<compile_context>
chip_gen: v7x
topology: tpu7x:2x2x1
jax: 0.10.0
libtpu: 0.0.40
codegen_flags: <defaults>
</compile_context>

<pallas_src>
import functools

import jax
import jax.numpy as jnp
from jax.experimental import pallas as pl
from jax.experimental.pallas import tpu as pltpu

HIDDEN = 200          # PyTorch hidden size
HIDDEN_PAD = 256      # lane-aligned padded hidden size
GATE_SCALE = (0.5, 0.5, 1.0, 0.5)   # i, f, g, o  (0.5 => sigmoid via tanh identity)


def _round_up(x, m):
    return ((x + m - 1) // m) * m


# --------------------------------------------------------------------------- #
# Fused kernel: in-block pre-gate GEMM + serial LSTM recurrence + ReLU/Linear
# --------------------------------------------------------------------------- #
def _lstm_fused_kernel(x_ref, wih_ref, b_ref, whh_ref, wlin_ref, blin_ref,
                       out_ref, pg_ref, hist_ref, h_ref, c_ref):
    tb = pl.program_id(0)

    @pl.when(tb == 0)
    def _():
        h_ref[...] = jnp.zeros_like(h_ref)
        c_ref[...] = jnp.zeros_like(c_ref)

    TT, Bp, Fp = x_ref.shape
    Hp = h_ref.shape[1]
    G = 4 * Hp

    # ---- fused input projection for the whole time block (one small GEMM,
    #      <5% of the block's MXU work; removes the HBM pre-gate round trip) ----
    x2d = x_ref[...].reshape(TT * Bp, Fp)
    pg = jnp.dot(x2d, wih_ref[...], preferred_element_type=jnp.float32) + b_ref[...]
    pg_ref[...] = pg.reshape(TT, Bp, G)

    # ---- loop-invariant hoists ----
    whh_hi = whh_ref[0]          # (Hp, G) bf16
    whh_lo = whh_ref[1]          # (Hp, G) bf16 residual

    def step(tt, carry):
        h, c = carry
        # bf16 operands -> 2 MXU passes (hi/lo W split keeps ~f32 weight accuracy),
        # f32 accumulation.
        h_bf = h.astype(jnp.bfloat16)
        rec = (jnp.dot(h_bf, whh_hi, preferred_element_type=jnp.float32)
               + jnp.dot(h_bf, whh_lo, preferred_element_type=jnp.float32))
        # i/f/o columns were pre-scaled by 0.5, so one tanh covers all four gates:
        #   sigmoid(z) = 0.5 * tanh(0.5 * z) + 0.5
        t_all = jnp.tanh(pg_ref[tt] + rec)               # (Bp, G) f32
        i_g = 0.5 * t_all[:, 0 * Hp:1 * Hp] + 0.5
        f_g = 0.5 * t_all[:, 1 * Hp:2 * Hp] + 0.5
        g_g = t_all[:, 2 * Hp:3 * Hp]
        o_g = 0.5 * t_all[:, 3 * Hp:4 * Hp] + 0.5
        c = f_g * c + i_g * g_g
        h = o_g * jnp.tanh(c)
        hist_ref[tt] = h                                  # contiguous tile-aligned store
        return (h, c)

    h_fin, c_fin = jax.lax.fori_loop(0, TT, step, (h_ref[...], c_ref[...]),
                                     unroll=8)
    h_ref[...] = h_fin
    c_ref[...] = c_fin

    # ---- bulk ReLU + Linear(H->1) epilogue: VPU mul + lane reduce, one
    #      lane-dense (Bp, TT) store per grid step (off the h/c critical path) ----
    y = jnp.sum(jnp.maximum(hist_ref[...], 0.0) * wlin_ref[...], axis=-1)   # (TT, Bp)
    out_ref[0] = y.T + blin_ref[...]                                        # (Bp, TT)


# --------------------------------------------------------------------------- #
# Parameter repacking helpers (lane-aligned gate blocks, pre-scaled for tanh-sigmoid)
# --------------------------------------------------------------------------- #
def _pack_gate_matrix(w_t, in_dim, in_pad, h, h_pad):
    """(in_dim, 4h) -> (in_pad, 4*h_pad); gate k at column k*h_pad, scaled."""
    out = jnp.zeros((in_pad, 4 * h_pad), jnp.float32)
    for k in range(4):
        out = out.at[:in_dim, k * h_pad:k * h_pad + h].set(
            GATE_SCALE[k] * w_t[:, k * h:(k + 1) * h])
    return out


def _pack_gate_bias(b, h, h_pad):
    out = jnp.zeros((1, 4 * h_pad), jnp.float32)
    for k in range(4):
        out = out.at[0, k * h_pad:k * h_pad + h].set(
            GATE_SCALE[k] * b[k * h:(k + 1) * h])
    return out


@functools.partial(jax.jit, static_argnames=("time_block",))
def lstm_model_forward(x, params, *, time_block=128):
    """x: (B, T, F) float32.  Returns (B, T, 1) float32 (matches LSTM_model.forward)."""
    B, T, F = x.shape
    H, Hp = HIDDEN, HIDDEN_PAD
    G = 4 * Hp

    Bp = _round_up(max(B, 8), 8)
    Fp = _round_up(max(F, 8), 8)
    TT = min(time_block, _round_up(T, 8))      # timesteps per grid step (x8 aligned)
    T_pad = _round_up(T, TT)
    NB = T_pad // TT

    # ---- repack / pad parameters ----
    b_gates = (params["b_ih"] + params["b_hh"]).astype(jnp.float32)          # (4H,)
    w_ih_p = _pack_gate_matrix(params["w_ih"].T.astype(jnp.float32), F, Fp, H, Hp)
    w_hh_p = _pack_gate_matrix(params["w_hh"].T.astype(jnp.float32), H, Hp, H, Hp)
    b_p = _pack_gate_bias(b_gates, H, Hp)
    # bf16 hi/lo split of W_hh for the 2-pass gate matmul.
    w_hh_hi = w_hh_p.astype(jnp.bfloat16)
    w_hh_lo = (w_hh_p - w_hh_hi.astype(jnp.float32)).astype(jnp.bfloat16)
    w_hh_hilo = jnp.stack([w_hh_hi, w_hh_lo], axis=0)                        # (2,Hp,G)

    w_lin = jnp.zeros((1, Hp), jnp.float32).at[0, :H].set(
        params["w_lin"].astype(jnp.float32)[0])
    b_lin = params["b_lin"].reshape(1, 1).astype(jnp.float32)

    # ---- time-major, padded input ----
    x_tm = jnp.transpose(x.astype(jnp.float32), (1, 0, 2))                   # (T, B, F)
    x_tm = jnp.pad(x_tm, ((0, T_pad - T), (0, Bp - B), (0, Fp - F)))

    out_blocks = pl.pallas_call(
        _lstm_fused_kernel,
        out_shape=jax.ShapeDtypeStruct((NB, Bp, TT), jnp.float32),
        grid_spec=pltpu.PrefetchScalarGridSpec(
            num_scalar_prefetch=0,
            grid=(NB,),
            in_specs=[
                pl.BlockSpec((TT, Bp, Fp), lambda tb: (tb, 0, 0)),   # x block
                pl.BlockSpec((Fp, G), lambda tb: (0, 0)),            # W_ih packed
                pl.BlockSpec((1, G), lambda tb: (0, 0)),             # gate bias
                pl.BlockSpec((2, Hp, G), lambda tb: (0, 0, 0)),      # W_hh hi/lo bf16
                pl.BlockSpec((1, Hp), lambda tb: (0, 0)),            # linear weight row
                pl.BlockSpec((1, 1), lambda tb: (0, 0)),             # linear bias
            ],
            out_specs=pl.BlockSpec((1, Bp, TT), lambda tb: (tb, 0, 0)),
            scratch_shapes=[
                pltpu.VMEM((TT, Bp, G), jnp.float32),    # block pre-gates
                pltpu.VMEM((TT, Bp, Hp), jnp.float32),   # h history (bulk epilogue)
                pltpu.VMEM((Bp, Hp), jnp.float32),       # h state
                pltpu.VMEM((Bp, Hp), jnp.float32),       # c state
            ],
        ),
        compiler_params=pltpu.CompilerParams(
            dimension_semantics=("arbitrary",)),          # sequential recurrence
    )(x_tm, w_ih_p, b_p, w_hh_hilo, w_lin, b_lin)

    # (NB, Bp, TT) -> (Bp, T_pad) -> (B, T, 1)
    y = jnp.transpose(out_blocks, (1, 0, 2)).reshape(Bp, T_pad)
    return y[:B, :T, None]


# --------------------------------------------------------------------------- #
# Init + pure-JAX reference
# --------------------------------------------------------------------------- #
def init_params(key, n_features):
    """Deterministic init matching PyTorch parameter shapes (uniform +-1/sqrt(H))."""
    H = HIDDEN
    bound = 1.0 / jnp.sqrt(jnp.float32(H))
    ks = jax.random.split(key, 6)
    u = lambda k, s: jax.random.uniform(k, s, jnp.float32, -bound, bound)
    return {
        "w_ih": u(ks[0], (4 * H, n_features)),   # lstm1.weight_ih_l0
        "w_hh": u(ks[1], (4 * H, H)),            # lstm1.weight_hh_l0
        "b_ih": u(ks[2], (4 * H,)),              # lstm1.bias_ih_l0
        "b_hh": u(ks[3], (4 * H,)),              # lstm1.bias_hh_l0
        "w_lin": u(ks[4], (1, H)),               # linear1.weight
        "b_lin": u(ks[5], (1,)),                 # linear1.bias
    }


def reference_forward(x, params):
    """Pure-JAX (f32) reference of the PyTorch module forward."""
    H = HIDDEN
    B, T, F = x.shape
    w_ih_t = params["w_ih"].T
    w_hh_t = params["w_hh"].T
    b = params["b_ih"] + params["b_hh"]

    def step(carry, x_t):
        h, c = carry
        gates = x_t @ w_ih_t + h @ w_hh_t + b
        i = jax.nn.sigmoid(gates[:, 0:H])
        f = jax.nn.sigmoid(gates[:, H:2 * H])
        g = jnp.tanh(gates[:, 2 * H:3 * H])
        o = jax.nn.sigmoid(gates[:, 3 * H:4 * H])
        c = f * c + i * g
        h = o * jnp.tanh(c)
        return (h, c), h

    h0 = jnp.zeros((B, H), jnp.float32)
    c0 = jnp.zeros((B, H), jnp.float32)
    _, hs = jax.lax.scan(step, (h0, c0), jnp.transpose(x, (1, 0, 2)))
    hs = jnp.transpose(hs, (1, 0, 2))               # (B, T, H)
    return jnp.maximum(hs, 0.0) @ params["w_lin"].T + params["b_lin"]


if __name__ == "__main__":
    B, T, F = 2, 8, 4
    key = jax.random.PRNGKey(0)
    k_x, k_p = jax.random.split(key)

    x = jax.random.normal(k_x, (B, T, F), jnp.float32)
    params = init_params(k_p, F)

    out = lstm_model_forward(x, params)
    out = jax.block_until_ready(out)
    assert out.shape == (B, T, 1), out.shape

    ref = jax.block_until_ready(reference_forward(x, params))
    # Tolerance accounts for the bf16-operand gate matmul (hi/lo W_hh split keeps
    # the error ~1e-4-level); everything else is f32.
    assert jnp.allclose(out, ref, atol=5e-4, rtol=5e-4), \
        float(jnp.max(jnp.abs(out - ref)))

    print("KERNEL_OK")
</pallas_src>

<mosaic_0001>
module attributes {stable_mosaic.version = 11 : i64} {
  func.func @_lstm_fused_kernel(%arg0: i32, %arg1: memref<8x8x8xf32, #tpu.memory_space<vmem>>, %arg2: memref<8x1024xf32, #tpu.memory_space<vmem>>, %arg3: memref<1x1024xf32, #tpu.memory_space<vmem>>, %arg4: memref<2x256x1024xbf16, #tpu.memory_space<vmem>>, %arg5: memref<1x256xf32, #tpu.memory_space<vmem>>, %arg6: memref<1x1xf32, #tpu.memory_space<vmem>>, %arg7: memref<1x8x8xf32, #tpu.memory_space<vmem>>, %arg8: memref<8x8x1024xf32, #tpu.memory_space<vmem>>, %arg9: memref<8x8x256xf32, #tpu.memory_space<vmem>>, %arg10: memref<8x256xf32, #tpu.memory_space<vmem>>, %arg11: memref<8x256xf32, #tpu.memory_space<vmem>>) attributes {dimension_semantics = [#tpu.dimension_semantics<arbitrary>], iteration_bounds = array<i64: 1>, scalar_prefetch = 0 : i64, scratch_operands = 4 : i64, tpu.core_type = #tpu.core_type<tc>, window_params = [{transform_indices = @transform_0, window_bounds = array<i64: 8, 8, 8>}, {pipeline_mode = #tpu.pipeline_mode<synchronous>, transform_indices = @transform_1, window_bounds = array<i64: 8, 1024>}, {pipeline_mode = #tpu.pipeline_mode<synchronous>, transform_indices = @transform_2, window_bounds = array<i64: 1, 1024>}, {pipeline_mode = #tpu.pipeline_mode<synchronous>, transform_indices = @transform_3, window_bounds = array<i64: 2, 256, 1024>}, {pipeline_mode = #tpu.pipeline_mode<synchronous>, transform_indices = @transform_4, window_bounds = array<i64: 1, 256>}, {pipeline_mode = #tpu.pipeline_mode<synchronous>, transform_indices = @transform_5, window_bounds = array<i64: 1, 1>}, {transform_indices = @transform_6, window_bounds = array<i64: 1, 8, 8>}]} {
    %c0_i32 = arith.constant 0 : i32
    %0 = arith.cmpi eq, %arg0, %c0_i32 : i32
    %1 = arith.extui %0 : i1 to i32
    %c0_i32_0 = arith.constant 0 : i32
    %2 = arith.cmpi ne, %1, %c0_i32_0 : i32
    scf.if %2 {
      %cst_132 = arith.constant 0.000000e+00 : f32
      %307 = vector.broadcast %cst_132 : f32 to vector<8x256xf32>
      %c0_133 = arith.constant 0 : index
      %c0_134 = arith.constant 0 : index
      %308 = vector.load %arg10[%c0_133, %c0_134] : memref<8x256xf32, #tpu.memory_space<vmem>>, vector<8x256xf32>
      tpu.vector_store %arg10[%c0_133, %c0_134], %307 {strides = array<i32>} : memref<8x256xf32, #tpu.memory_space<vmem>>, vector<8x256xf32>,
      %cst_135 = arith.constant 0.000000e+00 : f32
      %309 = vector.broadcast %cst_135 : f32 to vector<8x256xf32>
      %c0_136 = arith.constant 0 : index
      %c0_137 = arith.constant 0 : index
      %310 = vector.load %arg11[%c0_136, %c0_137] : memref<8x256xf32, #tpu.memory_space<vmem>>, vector<8x256xf32>
      tpu.vector_store %arg11[%c0_136, %c0_137], %309 {strides = array<i32>} : memref<8x256xf32, #tpu.memory_space<vmem>>, vector<8x256xf32>,
    } else {
    }
    %c0 = arith.constant 0 : index
    %c0_1 = arith.constant 0 : index
    %c0_2 = arith.constant 0 : index
    %3 = vector.load %arg1[%c0, %c0_1, %c0_2] : memref<8x8x8xf32, #tpu.memory_space<vmem>>, vector<8x8x8xf32>
    %4 = vector.shape_cast %3 : vector<8x8x8xf32> to vector<64x8xf32>
    %c0_3 = arith.constant 0 : index
    %c0_4 = arith.constant 0 : index
    %5 = vector.load %arg2[%c0_3, %c0_4] : memref<8x1024xf32, #tpu.memory_space<vmem>>, vector<8x1024xf32>
    %cst = arith.constant dense<0.000000e+00> : vector<64x1024xf32>
    %6 = tpu.matmul %4, %5, %cst {dimension_numbers = #tpu.dot_dimension_numbers<[1], [0], [0], [1], [0, 0, 1, 1], [], []>} : vector<64x8xf32>, vector<8x1024xf32>, vector<64x1024xf32> -> vector<64x1024xf32>
    %c0_5 = arith.constant 0 : index
    %c0_6 = arith.constant 0 : index
    %7 = vector.load %arg3[%c0_5, %c0_6] : memref<1x1024xf32, #tpu.memory_space<vmem>>, vector<1x1024xf32>
    %8 = vector.broadcast %7 : vector<1x1024xf32> to vector<64x1024xf32>
    %9 = arith.addf %6, %8 : vector<64x1024xf32>
    %10 = vector.shape_cast %9 : vector<64x1024xf32> to vector<8x8x1024xf32>
    %c0_7 = arith.constant 0 : index
    %c0_8 = arith.constant 0 : index
    %c0_9 = arith.constant 0 : index
    %11 = vector.load %arg8[%c0_7, %c0_8, %c0_9] : memref<8x8x1024xf32, #tpu.memory_space<vmem>>, vector<8x8x1024xf32>
    tpu.vector_store %arg8[%c0_7, %c0_8, %c0_9], %10 {strides = array<i32>} : memref<8x8x1024xf32, #tpu.memory_space<vmem>>, vector<8x8x1024xf32>,
    %c0_10 = arith.constant 0 : index
    %c0_11 = arith.constant 0 : index
    %c0_12 = arith.constant 0 : index
    %12 = vector.load %arg4[%c0_10, %c0_11, %c0_12] : memref<2x256x1024xbf16, #tpu.memory_space<vmem>>, vector<1x256x1024xbf16>
    %13 = vector.shape_cast %12 : vector<1x256x1024xbf16> to vector<256x1024xbf16>
    %c1 = arith.constant 1 : index
    %c0_13 = arith.constant 0 : index
    %c0_14 = arith.constant 0 : index
    %14 = vector.load %arg4[%c1, %c0_13, %c0_14] : memref<2x256x1024xbf16, #tpu.memory_space<vmem>>, vector<1x256x1024xbf16>
    %15 = vector.shape_cast %14 : vector<1x256x1024xbf16> to vector<256x1024xbf16>
    %c0_15 = arith.constant 0 : index
    %c0_16 = arith.constant 0 : index
    %16 = vector.load %arg10[%c0_15, %c0_16] : memref<8x256xf32, #tpu.memory_space<vmem>>, vector<8x256xf32>
    %c0_17 = arith.constant 0 : index
    %c0_18 = arith.constant 0 : index
    %17 = vector.load %arg11[%c0_17, %c0_18] : memref<8x256xf32, #tpu.memory_space<vmem>>, vector<8x256xf32>
    %c0_i32_19 = arith.constant 0 : i32
    %18 = arith.truncf %16 : vector<8x256xf32> to vector<8x256xbf16>
    %cst_20 = arith.constant dense<0.000000e+00> : vector<8x1024xf32>
    %19 = tpu.matmul %18, %13, %cst_20 {dimension_numbers = #tpu.dot_dimension_numbers<[1], [0], [0], [1], [0, 0, 1, 1], [], []>} : vector<8x256xbf16>, vector<256x1024xbf16>, vector<8x1024xf32> -> vector<8x1024xf32>
    %cst_21 = arith.constant dense<0.000000e+00> : vector<8x1024xf32>
    %20 = tpu.matmul %18, %15, %cst_21 {dimension_numbers = #tpu.dot_dimension_numbers<[1], [0], [0], [1], [0, 0, 1, 1], [], []>} : vector<8x256xbf16>, vector<256x1024xbf16>, vector<8x1024xf32> -> vector<8x1024xf32>
    %21 = arith.addf %19, %20 : vector<8x1024xf32>
    %22 = arith.index_cast %c0_i32_19 : i32 to index
    %c0_22 = arith.constant 0 : index
    %c0_23 = arith.constant 0 : index
    %23 = vector.load %arg8[%22, %c0_22, %c0_23] : memref<8x8x1024xf32, #tpu.memory_space<vmem>>, vector<1x8x1024xf32>
    %24 = vector.shape_cast %23 : vector<1x8x1024xf32> to vector<8x1024xf32>
    %25 = arith.addf %24, %21 : vector<8x1024xf32>
    %26 = math.tanh %25 : vector<8x1024xf32>
    %27 = vector.extract_strided_slice %26 {offsets = [0, 0], sizes = [8, 256], strides = [1, 1]} : vector<8x1024xf32> to vector<8x256xf32>
    %cst_24 = arith.constant 5.000000e-01 : f32
    %28 = vector.broadcast %cst_24 : f32 to vector<8x256xf32>
    %29 = arith.mulf %28, %27 : vector<8x256xf32>
    %cst_25 = arith.constant 5.000000e-01 : f32
    %30 = vector.broadcast %cst_25 : f32 to vector<8x256xf32>
    %31 = arith.addf %29, %30 : vector<8x256xf32>
    %32 = vector.extract_strided_slice %26 {offsets = [0, 256], sizes = [8, 256], strides = [1, 1]} : vector<8x1024xf32> to vector<8x256xf32>
    %cst_26 = arith.constant 5.000000e-01 : f32
    %33 = vector.broadcast %cst_26 : f32 to vector<8x256xf32>
    %34 = arith.mulf %33, %32 : vector<8x256xf32>
    %cst_27 = arith.constant 5.000000e-01 : f32
    %35 = vector.broadcast %cst_27 : f32 to vector<8x256xf32>
    %36 = arith.addf %34, %35 : vector<8x256xf32>
    %37 = vector.extract_strided_slice %26 {offsets = [0, 512], sizes = [8, 256], strides = [1, 1]} : vector<8x1024xf32> to vector<8x256xf32>
    %38 = vector.extract_strided_slice %26 {offsets = [0, 768], sizes = [8, 256], strides = [1, 1]} : vector<8x1024xf32> to vector<8x256xf32>
    %cst_28 = arith.constant 5.000000e-01 : f32
    %39 = vector.broadcast %cst_28 : f32 to vector<8x256xf32>
    %40 = arith.mulf %39, %38 : vector<8x256xf32>
    %cst_29 = arith.constant 5.000000e-01 : f32
    %41 = vector.broadcast %cst_29 : f32 to vector<8x256xf32>
    %42 = arith.addf %40, %41 : vector<8x256xf32>
    %43 = arith.mulf %36, %17 : vector<8x256xf32>
    %44 = arith.mulf %31, %37 : vector<8x256xf32>
    %45 = arith.addf %43, %44 : vector<8x256xf32>
    %46 = math.tanh %45 : vector<8x256xf32>
    %47 = arith.mulf %42, %46 : vector<8x256xf32>
    %48 = arith.index_cast %c0_i32_19 : i32 to index
    %c0_30 = arith.constant 0 : index
    %c0_31 = arith.constant 0 : index
    %49 = vector.load %arg9[%48, %c0_30, %c0_31] : memref<8x8x256xf32, #tpu.memory_space<vmem>>, vector<1x8x256xf32>
    %50 = vector.shape_cast %49 : vector<1x8x256xf32> to vector<8x256xf32>
    %51 = vector.shape_cast %47 : vector<8x256xf32> to vector<1x8x256xf32>
    tpu.vector_store %arg9[%48, %c0_30, %c0_31], %51 {strides = array<i32>} : memref<8x8x256xf32, #tpu.memory_space<vmem>>, vector<1x8x256xf32>,
    %c1_i32 = arith.constant 1 : i32
    %52 = arith.truncf %47 : vector<8x256xf32> to vector<8x256xbf16>
    %cst_32 = arith.constant dense<0.000000e+00> : vector<8x1024xf32>
    %53 = tpu.matmul %52, %13, %cst_32 {dimension_numbers = #tpu.dot_dimension_numbers<[1], [0], [0], [1], [0, 0, 1, 1], [], []>} : vector<8x256xbf16>, vector<256x1024xbf16>, vector<8x1024xf32> -> vector<8x1024xf32>
    %cst_33 = arith.constant dense<0.000000e+00> : vector<8x1024xf32>
    %54 = tpu.matmul %52, %15, %cst_33 {dimension_numbers = #tpu.dot_dimension_numbers<[1], [0], [0], [1], [0, 0, 1, 1], [], []>} : vector<8x256xbf16>, vector<256x1024xbf16>, vector<8x1024xf32> -> vector<8x1024xf32>
    %55 = arith.addf %53, %54 : vector<8x1024xf32>
    %56 = arith.index_cast %c1_i32 : i32 to index
    %c0_34 = arith.constant 0 : index
    %c0_35 = arith.constant 0 : index
    %57 = vector.load %arg8[%56, %c0_34, %c0_35] : memref<8x8x1024xf32, #tpu.memory_space<vmem>>, vector<1x8x1024xf32>
    %58 = vector.shape_cast %57 : vector<1x8x1024xf32> to vector<8x1024xf32>
    %59 = arith.addf %58, %55 : vector<8x1024xf32>
    %60 = math.tanh %59 : vector<8x1024xf32>
    %61 = vector.extract_strided_slice %60 {offsets = [0, 0], sizes = [8, 256], strides = [1, 1]} : vector<8x1024xf32> to vector<8x256xf32>
    %cst_36 = arith.constant 5.000000e-01 : f32
    %62 = vector.broadcast %cst_36 : f32 to vector<8x256xf32>
    %63 = arith.mulf %62, %61 : vector<8x256xf32>
    %cst_37 = arith.constant 5.000000e-01 : f32
    %64 = vector.broadcast %cst_37 : f32 to vector<8x256xf32>
    %65 = arith.addf %63, %64 : vector<8x256xf32>
    %66 = vector.extract_strided_slice %60 {offsets = [0, 256], sizes = [8, 256], strides = [1, 1]} : vector<8x1024xf32> to vector<8x256xf32>
    %cst_38 = arith.constant 5.000000e-01 : f32
    %67 = vector.broadcast %cst_38 : f32 to vector<8x256xf32>
    %68 = arith.mulf %67, %66 : vector<8x256xf32>
    %cst_39 = arith.constant 5.000000e-01 : f32
    %69 = vector.broadcast %cst_39 : f32 to vector<8x256xf32>
    %70 = arith.addf %68, %69 : vector<8x256xf32>
    %71 = vector.extract_strided_slice %60 {offsets = [0, 512], sizes = [8, 256], strides = [1, 1]} : vector<8x1024xf32> to vector<8x256xf32>
    %72 = vector.extract_strided_slice %60 {offsets = [0, 768], sizes = [8, 256], strides = [1, 1]} : vector<8x1024xf32> to vector<8x256xf32>
    %cst_40 = arith.constant 5.000000e-01 : f32
    %73 = vector.broadcast %cst_40 : f32 to vector<8x256xf32>
    %74 = arith.mulf %73, %72 : vector<8x256xf32>
    %cst_41 = arith.constant 5.000000e-01 : f32
    %75 = vector.broadcast %cst_41 : f32 to vector<8x256xf32>
    %76 = arith.addf %74, %75 : vector<8x256xf32>
    %77 = arith.mulf %70, %45 : vector<8x256xf32>
    %78 = arith.mulf %65, %71 : vector<8x256xf32>
    %79 = arith.addf %77, %78 : vector<8x256xf32>
    %80 = math.tanh %79 : vector<8x256xf32>
    %81 = arith.mulf %76, %80 : vector<8x256xf32>
    %82 = arith.index_cast %c1_i32 : i32 to index
    %c0_42 = arith.constant 0 : index
    %c0_43 = arith.constant 0 : index
    %83 = vector.load %arg9[%82, %c0_42, %c0_43] : memref<8x8x256xf32, #tpu.memory_space<vmem>>, vector<1x8x256xf32>
    %84 = vector.shape_cast %83 : vector<1x8x256xf32> to vector<8x256xf32>
    %85 = vector.shape_cast %81 : vector<8x256xf32> to vector<1x8x256xf32>
    tpu.vector_store %arg9[%82, %c0_42, %c0_43], %85 {strides = array<i32>} : memref<8x8x256xf32, #tpu.memory_space<vmem>>, vector<1x8x256xf32>,
    %c2_i32 = arith.constant 2 : i32
    %86 = arith.truncf %81 : vector<8x256xf32> to vector<8x256xbf16>
    %cst_44 = arith.constant dense<0.000000e+00> : vector<8x1024xf32>
    %87 = tpu.matmul %86, %13, %cst_44 {dimension_numbers = #tpu.dot_dimension_numbers<[1], [0], [0], [1], [0, 0, 1, 1], [], []>} : vector<8x256xbf16>, vector<256x1024xbf16>, vector<8x1024xf32> -> vector<8x1024xf32>
    %cst_45 = arith.constant dense<0.000000e+00> : vector<8x1024xf32>
    %88 = tpu.matmul %86, %15, %cst_45 {dimension_numbers = #tpu.dot_dimension_numbers<[1], [0], [0], [1], [0, 0, 1, 1], [], []>} : vector<8x256xbf16>, vector<256x1024xbf16>, vector<8x1024xf32> -> vector<8x1024xf32>
    %89 = arith.addf %87, %88 : vector<8x1024xf32>
    %90 = arith.index_cast %c2_i32 : i32 to index
    %c0_46 = arith.constant 0 : index
    %c0_47 = arith.constant 0 : index
    %91 = vector.load %arg8[%90, %c0_46, %c0_47] : memref<8x8x1024xf32, #tpu.memory_space<vmem>>, vector<1x8x1024xf32>
    %92 = vector.shape_cast %91 : vector<1x8x1024xf32> to vector<8x1024xf32>
    %93 = arith.addf %92, %89 : vector<8x1024xf32>
    %94 = math.tanh %93 : vector<8x1024xf32>
    %95 = vector.extract_strided_slice %94 {offsets = [0, 0], sizes = [8, 256], strides = [1, 1]} : vector<8x1024xf32> to vector<8x256xf32>
    %cst_48 = arith.constant 5.000000e-01 : f32
    %96 = vector.broadcast %cst_48 : f32 to vector<8x256xf32>
    %97 = arith.mulf %96, %95 : vector<8x256xf32>
    %cst_49 = arith.constant 5.000000e-01 : f32
    %98 = vector.broadcast %cst_49 : f32 to vector<8x256xf32>
    %99 = arith.addf %97, %98 : vector<8x256xf32>
    %100 = vector.extract_strided_slice %94 {offsets = [0, 256], sizes = [8, 256], strides = [1, 1]} : vector<8x1024xf32> to vector<8x256xf32>
    %cst_50 = arith.constant 5.000000e-01 : f32
    %101 = vector.broadcast %cst_50 : f32 to vector<8x256xf32>
    %102 = arith.mulf %101, %100 : vector<8x256xf32>
    %cst_51 = arith.constant 5.000000e-01 : f32
    %103 = vector.broadcast %cst_51 : f32 to vector<8x256xf32>
    %104 = arith.addf %102, %103 : vector<8x256xf32>
    %105 = vector.extract_strided_slice %94 {offsets = [0, 512], sizes = [8, 256], strides = [1, 1]} : vector<8x1024xf32> to vector<8x256xf32>
    %106 = vector.extract_strided_slice %94 {offsets = [0, 768], sizes = [8, 256], strides = [1, 1]} : vector<8x1024xf32> to vector<8x256xf32>
    %cst_52 = arith.constant 5.000000e-01 : f32
    %107 = vector.broadcast %cst_52 : f32 to vector<8x256xf32>
    %108 = arith.mulf %107, %106 : vector<8x256xf32>
    %cst_53 = arith.constant 5.000000e-01 : f32
    %109 = vector.broadcast %cst_53 : f32 to vector<8x256xf32>
    %110 = arith.addf %108, %109 : vector<8x256xf32>
    %111 = arith.mulf %104, %79 : vector<8x256xf32>
    %112 = arith.mulf %99, %105 : vector<8x256xf32>
    %113 = arith.addf %111, %112 : vector<8x256xf32>
    %114 = math.tanh %113 : vector<8x256xf32>
    %115 = arith.mulf %110, %114 : vector<8x256xf32>
    %116 = arith.index_cast %c2_i32 : i32 to index
    %c0_54 = arith.constant 0 : index
    %c0_55 = arith.constant 0 : index
    %117 = vector.load %arg9[%116, %c0_54, %c0_55] : memref<8x8x256xf32, #tpu.memory_space<vmem>>, vector<1x8x256xf32>
    %118 = vector.shape_cast %117 : vector<1x8x256xf32> to vector<8x256xf32>
    %119 = vector.shape_cast %115 : vector<8x256xf32> to vector<1x8x256xf32>
    tpu.vector_store %arg9[%116, %c0_54, %c0_55], %119 {strides = array<i32>} : memref<8x8x256xf32, #tpu.memory_space<vmem>>, vector<1x8x256xf32>,
    %c3_i32 = arith.constant 3 : i32
    %120 = arith.truncf %115 : vector<8x256xf32> to vector<8x256xbf16>
    %cst_56 = arith.constant dense<0.000000e+00> : vector<8x1024xf32>
    %121 = tpu.matmul %120, %13, %cst_56 {dimension_numbers = #tpu.dot_dimension_numbers<[1], [0], [0], [1], [0, 0, 1, 1], [], []>} : vector<8x256xbf16>, vector<256x1024xbf16>, vector<8x1024xf32> -> vector<8x1024xf32>
    %cst_57 = arith.constant dense<0.000000e+00> : vector<8x1024xf32>
    %122 = tpu.matmul %120, %15, %cst_57 {dimension_numbers = #tpu.dot_dimension_numbers<[1], [0], [0], [1], [0, 0, 1, 1], [], []>} : vector<8x256xbf16>, vector<256x1024xbf16>, vector<8x1024xf32> -> vector<8x1024xf32>
    %123 = arith.addf %121, %122 : vector<8x1024xf32>
    %124 = arith.index_cast %c3_i32 : i32 to index
    %c0_58 = arith.constant 0 : index
    %c0_59 = arith.constant 0 : index
    %125 = vector.load %arg8[%124, %c0_58, %c0_59] : memref<8x8x1024xf32, #tpu.memory_space<vmem>>, vector<1x8x1024xf32>
    %126 = vector.shape_cast %125 : vector<1x8x1024xf32> to vector<8x1024xf32>
    %127 = arith.addf %126, %123 : vector<8x1024xf32>
    %128 = math.tanh %127 : vector<8x1024xf32>
    %129 = vector.extract_strided_slice %128 {offsets = [0, 0], sizes = [8, 256], strides = [1, 1]} : vector<8x1024xf32> to vector<8x256xf32>
    %cst_60 = arith.constant 5.000000e-01 : f32
    %130 = vector.broadcast %cst_60 : f32 to vector<8x256xf32>
    %131 = arith.mulf %130, %129 : vector<8x256xf32>
    %cst_61 = arith.constant 5.000000e-01 : f32
    %132 = vector.broadcast %cst_61 : f32 to vector<8x256xf32>
    %133 = arith.addf %131, %132 : vector<8x256xf32>
    %134 = vector.extract_strided_slice %128 {offsets = [0, 256], sizes = [8, 256], strides = [1, 1]} : vector<8x1024xf32> to vector<8x256xf32>
    %cst_62 = arith.constant 5.000000e-01 : f32
    %135 = vector.broadcast %cst_62 : f32 to vector<8x256xf32>
    %136 = arith.mulf %135, %134 : vector<8x256xf32>
    %cst_63 = arith.constant 5.000000e-01 : f32
    %137 = vector.broadcast %cst_63 : f32 to vector<8x256xf32>
    %138 = arith.addf %136, %137 : vector<8x256xf32>
    %139 = vector.extract_strided_slice %128 {offsets = [0, 512], sizes = [8, 256], strides = [1, 1]} : vector<8x1024xf32> to vector<8x256xf32>
    %140 = vector.extract_strided_slice %128 {offsets = [0, 768], sizes = [8, 256], strides = [1, 1]} : vector<8x1024xf32> to vector<8x256xf32>
    %cst_64 = arith.constant 5.000000e-01 : f32
    %141 = vector.broadcast %cst_64 : f32 to vector<8x256xf32>
    %142 = arith.mulf %141, %140 : vector<8x256xf32>
    %cst_65 = arith.constant 5.000000e-01 : f32
    %143 = vector.broadcast %cst_65 : f32 to vector<8x256xf32>
    %144 = arith.addf %142, %143 : vector<8x256xf32>
    %145 = arith.mulf %138, %113 : vector<8x256xf32>
    %146 = arith.mulf %133, %139 : vector<8x256xf32>
    %147 = arith.addf %145, %146 : vector<8x256xf32>
    %148 = math.tanh %147 : vector<8x256xf32>
    %149 = arith.mulf %144, %148 : vector<8x256xf32>
    %150 = arith.index_cast %c3_i32 : i32 to index
    %c0_66 = arith.constant 0 : index
    %c0_67 = arith.constant 0 : index
    %151 = vector.load %arg9[%150, %c0_66, %c0_67] : memref<8x8x256xf32, #tpu.memory_space<vmem>>, vector<1x8x256xf32>
    %152 = vector.shape_cast %151 : vector<1x8x256xf32> to vector<8x256xf32>
    %153 = vector.shape_cast %149 : vector<8x256xf32> to vector<1x8x256xf32>
    tpu.vector_store %arg9[%150, %c0_66, %c0_67], %153 {strides = array<i32>} : memref<8x8x256xf32, #tpu.memory_space<vmem>>, vector<1x8x256xf32>,
    %c4_i32 = arith.constant 4 : i32
    %154 = arith.truncf %149 : vector<8x256xf32> to vector<8x256xbf16>
    %cst_68 = arith.constant dense<0.000000e+00> : vector<8x1024xf32>
    %155 = tpu.matmul %154, %13, %cst_68 {dimension_numbers = #tpu.dot_dimension_numbers<[1], [0], [0], [1], [0, 0, 1, 1], [], []>} : vector<8x256xbf16>, vector<256x1024xbf16>, vector<8x1024xf32> -> vector<8x1024xf32>
    %cst_69 = arith.constant dense<0.000000e+00> : vector<8x1024xf32>
    %156 = tpu.matmul %154, %15, %cst_69 {dimension_numbers = #tpu.dot_dimension_numbers<[1], [0], [0], [1], [0, 0, 1, 1], [], []>} : vector<8x256xbf16>, vector<256x1024xbf16>, vector<8x1024xf32> -> vector<8x1024xf32>
    %157 = arith.addf %155, %156 : vector<8x1024xf32>
    %158 = arith.index_cast %c4_i32 : i32 to index
    %c0_70 = arith.constant 0 : index
    %c0_71 = arith.constant 0 : index
    %159 = vector.load %arg8[%158, %c0_70, %c0_71] : memref<8x8x1024xf32, #tpu.memory_space<vmem>>, vector<1x8x1024xf32>
    %160 = vector.shape_cast %159 : vector<1x8x1024xf32> to vector<8x1024xf32>
    %161 = arith.addf %160, %157 : vector<8x1024xf32>
    %162 = math.tanh %161 : vector<8x1024xf32>
    %163 = vector.extract_strided_slice %162 {offsets = [0, 0], sizes = [8, 256], strides = [1, 1]} : vector<8x1024xf32> to vector<8x256xf32>
    %cst_72 = arith.constant 5.000000e-01 : f32
    %164 = vector.broadcast %cst_72 : f32 to vector<8x256xf32>
    %165 = arith.mulf %164, %163 : vector<8x256xf32>
    %cst_73 = arith.constant 5.000000e-01 : f32
    %166 = vector.broadcast %cst_73 : f32 to vector<8x256xf32>
    %167 = arith.addf %165, %166 : vector<8x256xf32>
    %168 = vector.extract_strided_slice %162 {offsets = [0, 256], sizes = [8, 256], strides = [1, 1]} : vector<8x1024xf32> to vector<8x256xf32>
    %cst_74 = arith.constant 5.000000e-01 : f32
    %169 = vector.broadcast %cst_74 : f32 to vector<8x256xf32>
    %170 = arith.mulf %169, %168 : vector<8x256xf32>
    %cst_75 = arith.constant 5.000000e-01 : f32
    %171 = vector.broadcast %cst_75 : f32 to vector<8x256xf32>
    %172 = arith.addf %170, %171 : vector<8x256xf32>
    %173 = vector.extract_strided_slice %162 {offsets = [0, 512], sizes = [8, 256], strides = [1, 1]} : vector<8x1024xf32> to vector<8x256xf32>
    %174 = vector.extract_strided_slice %162 {offsets = [0, 768], sizes = [8, 256], strides = [1, 1]} : vector<8x1024xf32> to vector<8x256xf32>
    %cst_76 = arith.constant 5.000000e-01 : f32
    %175 = vector.broadcast %cst_76 : f32 to vector<8x256xf32>
    %176 = arith.mulf %175, %174 : vector<8x256xf32>
    %cst_77 = arith.constant 5.000000e-01 : f32
    %177 = vector.broadcast %cst_77 : f32 to vector<8x256xf32>
    %178 = arith.addf %176, %177 : vector<8x256xf32>
    %179 = arith.mulf %172, %147 : vector<8x256xf32>
    %180 = arith.mulf %167, %173 : vector<8x256xf32>
    %181 = arith.addf %179, %180 : vector<8x256xf32>
    %182 = math.tanh %181 : vector<8x256xf32>
    %183 = arith.mulf %178, %182 : vector<8x256xf32>
    %184 = arith.index_cast %c4_i32 : i32 to index
    %c0_78 = arith.constant 0 : index
    %c0_79 = arith.constant 0 : index
    %185 = vector.load %arg9[%184, %c0_78, %c0_79] : memref<8x8x256xf32, #tpu.memory_space<vmem>>, vector<1x8x256xf32>
    %186 = vector.shape_cast %185 : vector<1x8x256xf32> to vector<8x256xf32>
    %187 = vector.shape_cast %183 : vector<8x256xf32> to vector<1x8x256xf32>
    tpu.vector_store %arg9[%184, %c0_78, %c0_79], %187 {strides = array<i32>} : memref<8x8x256xf32, #tpu.memory_space<vmem>>, vector<1x8x256xf32>,
    %c5_i32 = arith.constant 5 : i32
    %188 = arith.truncf %183 : vector<8x256xf32> to vector<8x256xbf16>
    %cst_80 = arith.constant dense<0.000000e+00> : vector<8x1024xf32>
    %189 = tpu.matmul %188, %13, %cst_80 {dimension_numbers = #tpu.dot_dimension_numbers<[1], [0], [0], [1], [0, 0, 1, 1], [], []>} : vector<8x256xbf16>, vector<256x1024xbf16>, vector<8x1024xf32> -> vector<8x1024xf32>
    %cst_81 = arith.constant dense<0.000000e+00> : vector<8x1024xf32>
    %190 = tpu.matmul %188, %15, %cst_81 {dimension_numbers = #tpu.dot_dimension_numbers<[1], [0], [0], [1], [0, 0, 1, 1], [], []>} : vector<8x256xbf16>, vector<256x1024xbf16>, vector<8x1024xf32> -> vector<8x1024xf32>
    %191 = arith.addf %189, %190 : vector<8x1024xf32>
    %192 = arith.index_cast %c5_i32 : i32 to index
    %c0_82 = arith.constant 0 : index
    %c0_83 = arith.constant 0 : index
    %193 = vector.load %arg8[%192, %c0_82, %c0_83] : memref<8x8x1024xf32, #tpu.memory_space<vmem>>, vector<1x8x1024xf32>
    %194 = vector.shape_cast %193 : vector<1x8x1024xf32> to vector<8x1024xf32>
    %195 = arith.addf %194, %191 : vector<8x1024xf32>
    %196 = math.tanh %195 : vector<8x1024xf32>
    %197 = vector.extract_strided_slice %196 {offsets = [0, 0], sizes = [8, 256], strides = [1, 1]} : vector<8x1024xf32> to vector<8x256xf32>
    %cst_84 = arith.constant 5.000000e-01 : f32
    %198 = vector.broadcast %cst_84 : f32 to vector<8x256xf32>
    %199 = arith.mulf %198, %197 : vector<8x256xf32>
    %cst_85 = arith.constant 5.000000e-01 : f32
    %200 = vector.broadcast %cst_85 : f32 to vector<8x256xf32>
    %201 = arith.addf %199, %200 : vector<8x256xf32>
    %202 = vector.extract_strided_slice %196 {offsets = [0, 256], sizes = [8, 256], strides = [1, 1]} : vector<8x1024xf32> to vector<8x256xf32>
    %cst_86 = arith.constant 5.000000e-01 : f32
    %203 = vector.broadcast %cst_86 : f32 to vector<8x256xf32>
    %204 = arith.mulf %203, %202 : vector<8x256xf32>
    %cst_87 = arith.constant 5.000000e-01 : f32
    %205 = vector.broadcast %cst_87 : f32 to vector<8x256xf32>
    %206 = arith.addf %204, %205 : vector<8x256xf32>
    %207 = vector.extract_strided_slice %196 {offsets = [0, 512], sizes = [8, 256], strides = [1, 1]} : vector<8x1024xf32> to vector<8x256xf32>
    %208 = vector.extract_strided_slice %196 {offsets = [0, 768], sizes = [8, 256], strides = [1, 1]} : vector<8x1024xf32> to vector<8x256xf32>
    %cst_88 = arith.constant 5.000000e-01 : f32
    %209 = vector.broadcast %cst_88 : f32 to vector<8x256xf32>
    %210 = arith.mulf %209, %208 : vector<8x256xf32>
    %cst_89 = arith.constant 5.000000e-01 : f32
    %211 = vector.broadcast %cst_89 : f32 to vector<8x256xf32>
    %212 = arith.addf %210, %211 : vector<8x256xf32>
    %213 = arith.mulf %206, %181 : vector<8x256xf32>
    %214 = arith.mulf %201, %207 : vector<8x256xf32>
    %215 = arith.addf %213, %214 : vector<8x256xf32>
    %216 = math.tanh %215 : vector<8x256xf32>
    %217 = arith.mulf %212, %216 : vector<8x256xf32>
    %218 = arith.index_cast %c5_i32 : i32 to index
    %c0_90 = arith.constant 0 : index
    %c0_91 = arith.constant 0 : index
    %219 = vector.load %arg9[%218, %c0_90, %c0_91] : memref<8x8x256xf32, #tpu.memory_space<vmem>>, vector<1x8x256xf32>
    %220 = vector.shape_cast %219 : vector<1x8x256xf32> to vector<8x256xf32>
    %221 = vector.shape_cast %217 : vector<8x256xf32> to vector<1x8x256xf32>
    tpu.vector_store %arg9[%218, %c0_90, %c0_91], %221 {strides = array<i32>} : memref<8x8x256xf32, #tpu.memory_space<vmem>>, vector<1x8x256xf32>,
    %c6_i32 = arith.constant 6 : i32
    %222 = arith.truncf %217 : vector<8x256xf32> to vector<8x256xbf16>
    %cst_92 = arith.constant dense<0.000000e+00> : vector<8x1024xf32>
    %223 = tpu.matmul %222, %13, %cst_92 {dimension_numbers = #tpu.dot_dimension_numbers<[1], [0], [0], [1], [0, 0, 1, 1], [], []>} : vector<8x256xbf16>, vector<256x1024xbf16>, vector<8x1024xf32> -> vector<8x1024xf32>
    %cst_93 = arith.constant dense<0.000000e+00> : vector<8x1024xf32>
    %224 = tpu.matmul %222, %15, %cst_93 {dimension_numbers = #tpu.dot_dimension_numbers<[1], [0], [0], [1], [0, 0, 1, 1], [], []>} : vector<8x256xbf16>, vector<256x1024xbf16>, vector<8x1024xf32> -> vector<8x1024xf32>
    %225 = arith.addf %223, %224 : vector<8x1024xf32>
    %226 = arith.index_cast %c6_i32 : i32 to index
    %c0_94 = arith.constant 0 : index
    %c0_95 = arith.constant 0 : index
    %227 = vector.load %arg8[%226, %c0_94, %c0_95] : memref<8x8x1024xf32, #tpu.memory_space<vmem>>, vector<1x8x1024xf32>
    %228 = vector.shape_cast %227 : vector<1x8x1024xf32> to vector<8x1024xf32>
    %229 = arith.addf %228, %225 : vector<8x1024xf32>
    %230 = math.tanh %229 : vector<8x1024xf32>
    %231 = vector.extract_strided_slice %230 {offsets = [0, 0], sizes = [8, 256], strides = [1, 1]} : vector<8x1024xf32> to vector<8x256xf32>
    %cst_96 = arith.constant 5.000000e-01 : f32
    %232 = vector.broadcast %cst_96 : f32 to vector<8x256xf32>
    %233 = arith.mulf %232, %231 : vector<8x256xf32>
    %cst_97 = arith.constant 5.000000e-01 : f32
    %234 = vector.broadcast %cst_97 : f32 to vector<8x256xf32>
    %235 = arith.addf %233, %234 : vector<8x256xf32>
    %236 = vector.extract_strided_slice %230 {offsets = [0, 256], sizes = [8, 256], strides = [1, 1]} : vector<8x1024xf32> to vector<8x256xf32>
    %cst_98 = arith.constant 5.000000e-01 : f32
    %237 = vector.broadcast %cst_98 : f32 to vector<8x256xf32>
    %238 = arith.mulf %237, %236 : vector<8x256xf32>
    %cst_99 = arith.constant 5.000000e-01 : f32
    %239 = vector.broadcast %cst_99 : f32 to vector<8x256xf32>
    %240 = arith.addf %238, %239 : vector<8x256xf32>
    %241 = vector.extract_strided_slice %230 {offsets = [0, 512], sizes = [8, 256], strides = [1, 1]} : vector<8x1024xf32> to vector<8x256xf32>
    %242 = vector.extract_strided_slice %230 {offsets = [0, 768], sizes = [8, 256], strides = [1, 1]} : vector<8x1024xf32> to vector<8x256xf32>
    %cst_100 = arith.constant 5.000000e-01 : f32
    %243 = vector.broadcast %cst_100 : f32 to vector<8x256xf32>
    %244 = arith.mulf %243, %242 : vector<8x256xf32>
    %cst_101 = arith.constant 5.000000e-01 : f32
    %245 = vector.broadcast %cst_101 : f32 to vector<8x256xf32>
    %246 = arith.addf %244, %245 : vector<8x256xf32>
    %247 = arith.mulf %240, %215 : vector<8x256xf32>
    %248 = arith.mulf %235, %241 : vector<8x256xf32>
    %249 = arith.addf %247, %248 : vector<8x256xf32>
    %250 = math.tanh %249 : vector<8x256xf32>
    %251 = arith.mulf %246, %250 : vector<8x256xf32>
    %252 = arith.index_cast %c6_i32 : i32 to index
    %c0_102 = arith.constant 0 : index
    %c0_103 = arith.constant 0 : index
    %253 = vector.load %arg9[%252, %c0_102, %c0_103] : memref<8x8x256xf32, #tpu.memory_space<vmem>>, vector<1x8x256xf32>
    %254 = vector.shape_cast %253 : vector<1x8x256xf32> to vector<8x256xf32>
    %255 = vector.shape_cast %251 : vector<8x256xf32> to vector<1x8x256xf32>
    tpu.vector_store %arg9[%252, %c0_102, %c0_103], %255 {strides = array<i32>} : memref<8x8x256xf32, #tpu.memory_space<vmem>>, vector<1x8x256xf32>,
    %c7_i32 = arith.constant 7 : i32
    %256 = arith.truncf %251 : vector<8x256xf32> to vector<8x256xbf16>
    %cst_104 = arith.constant dense<0.000000e+00> : vector<8x1024xf32>
    %257 = tpu.matmul %256, %13, %cst_104 {dimension_numbers = #tpu.dot_dimension_numbers<[1], [0], [0], [1], [0, 0, 1, 1], [], []>} : vector<8x256xbf16>, vector<256x1024xbf16>, vector<8x1024xf32> -> vector<8x1024xf32>
    %cst_105 = arith.constant dense<0.000000e+00> : vector<8x1024xf32>
    %258 = tpu.matmul %256, %15, %cst_105 {dimension_numbers = #tpu.dot_dimension_numbers<[1], [0], [0], [1], [0, 0, 1, 1], [], []>} : vector<8x256xbf16>, vector<256x1024xbf16>, vector<8x1024xf32> -> vector<8x1024xf32>
    %259 = arith.addf %257, %258 : vector<8x1024xf32>
    %260 = arith.index_cast %c7_i32 : i32 to index
    %c0_106 = arith.constant 0 : index
    %c0_107 = arith.constant 0 : index
    %261 = vector.load %arg8[%260, %c0_106, %c0_107] : memref<8x8x1024xf32, #tpu.memory_space<vmem>>, vector<1x8x1024xf32>
    %262 = vector.shape_cast %261 : vector<1x8x1024xf32> to vector<8x1024xf32>
    %263 = arith.addf %262, %259 : vector<8x1024xf32>
    %264 = math.tanh %263 : vector<8x1024xf32>
    %265 = vector.extract_strided_slice %264 {offsets = [0, 0], sizes = [8, 256], strides = [1, 1]} : vector<8x1024xf32> to vector<8x256xf32>
    %cst_108 = arith.constant 5.000000e-01 : f32
    %266 = vector.broadcast %cst_108 : f32 to vector<8x256xf32>
    %267 = arith.mulf %266, %265 : vector<8x256xf32>
    %cst_109 = arith.constant 5.000000e-01 : f32
    %268 = vector.broadcast %cst_109 : f32 to vector<8x256xf32>
    %269 = arith.addf %267, %268 : vector<8x256xf32>
    %270 = vector.extract_strided_slice %264 {offsets = [0, 256], sizes = [8, 256], strides = [1, 1]} : vector<8x1024xf32> to vector<8x256xf32>
    %cst_110 = arith.constant 5.000000e-01 : f32
    %271 = vector.broadcast %cst_110 : f32 to vector<8x256xf32>
    %272 = arith.mulf %271, %270 : vector<8x256xf32>
    %cst_111 = arith.constant 5.000000e-01 : f32
    %273 = vector.broadcast %cst_111 : f32 to vector<8x256xf32>
    %274 = arith.addf %272, %273 : vector<8x256xf32>
    %275 = vector.extract_strided_slice %264 {offsets = [0, 512], sizes = [8, 256], strides = [1, 1]} : vector<8x1024xf32> to vector<8x256xf32>
    %276 = vector.extract_strided_slice %264 {offsets = [0, 768], sizes = [8, 256], strides = [1, 1]} : vector<8x1024xf32> to vector<8x256xf32>
    %cst_112 = arith.constant 5.000000e-01 : f32
    %277 = vector.broadcast %cst_112 : f32 to vector<8x256xf32>
    %278 = arith.mulf %277, %276 : vector<8x256xf32>
    %cst_113 = arith.constant 5.000000e-01 : f32
    %279 = vector.broadcast %cst_113 : f32 to vector<8x256xf32>
    %280 = arith.addf %278, %279 : vector<8x256xf32>
    %281 = arith.mulf %274, %249 : vector<8x256xf32>
    %282 = arith.mulf %269, %275 : vector<8x256xf32>
    %283 = arith.addf %281, %282 : vector<8x256xf32>
    %284 = math.tanh %283 : vector<8x256xf32>
    %285 = arith.mulf %280, %284 : vector<8x256xf32>
    %286 = arith.index_cast %c7_i32 : i32 to index
    %c0_114 = arith.constant 0 : index
    %c0_115 = arith.constant 0 : index
    %287 = vector.load %arg9[%286, %c0_114, %c0_115] : memref<8x8x256xf32, #tpu.memory_space<vmem>>, vector<1x8x256xf32>
    %288 = vector.shape_cast %287 : vector<1x8x256xf32> to vector<8x256xf32>
    %289 = vector.shape_cast %285 : vector<8x256xf32> to vector<1x8x256xf32>
    tpu.vector_store %arg9[%286, %c0_114, %c0_115], %289 {strides = array<i32>} : memref<8x8x256xf32, #tpu.memory_space<vmem>>, vector<1x8x256xf32>,
    %c8_i32 = arith.constant 8 : i32
    %c0_116 = arith.constant 0 : index
    %c0_117 = arith.constant 0 : index
    %290 = vector.load %arg10[%c0_116, %c0_117] : memref<8x256xf32, #tpu.memory_space<vmem>>, vector<8x256xf32>
    tpu.vector_store %arg10[%c0_116, %c0_117], %285 {strides = array<i32>} : memref<8x256xf32, #tpu.memory_space<vmem>>, vector<8x256xf32>,
    %c0_118 = arith.constant 0 : index
    %c0_119 = arith.constant 0 : index
    %291 = vector.load %arg11[%c0_118, %c0_119] : memref<8x256xf32, #tpu.memory_space<vmem>>, vector<8x256xf32>
    tpu.vector_store %arg11[%c0_118, %c0_119], %283 {strides = array<i32>} : memref<8x256xf32, #tpu.memory_space<vmem>>, vector<8x256xf32>,
    %c0_120 = arith.constant 0 : index
    %c0_121 = arith.constant 0 : index
    %c0_122 = arith.constant 0 : index
    %292 = vector.load %arg9[%c0_120, %c0_121, %c0_122] : memref<8x8x256xf32, #tpu.memory_space<vmem>>, vector<8x8x256xf32>
    %cst_123 = arith.constant 0.000000e+00 : f32
    %293 = vector.broadcast %cst_123 : f32 to vector<8x8x256xf32>
    %294 = arith.maximumf %292, %293 : vector<8x8x256xf32>
    %c0_124 = arith.constant 0 : index
    %c0_125 = arith.constant 0 : index
    %295 = vector.load %arg5[%c0_124, %c0_125] : memref<1x256xf32, #tpu.memory_space<vmem>>, vector<1x256xf32>
    %296 = vector.shape_cast %295 : vector<1x256xf32> to vector<1x1x256xf32>
    %297 = vector.broadcast %296 : vector<1x1x256xf32> to vector<8x8x256xf32>
    %298 = arith.mulf %294, %297 : vector<8x8x256xf32>
    %cst_126 = arith.constant dense<0.000000e+00> : vector<8x8xf32>
    %299 = vector.multi_reduction <add>, %298, %cst_126 [2] : vector<8x8x256xf32> to vector<8x8xf32>
    %300 = tpu.transpose %299, [1, 0] : vector<8x8xf32> -> vector<8x8xf32>
    %c0_127 = arith.constant 0 : index
    %c0_128 = arith.constant 0 : index
    %301 = vector.load %arg6[%c0_127, %c0_128] : memref<1x1xf32, #tpu.memory_space<vmem>>, vector<1x1xf32>
    %302 = vector.broadcast %301 : vector<1x1xf32> to vector<8x8xf32>
    %303 = arith.addf %300, %302 : vector<8x8xf32>
    %c0_129 = arith.constant 0 : index
    %c0_130 = arith.constant 0 : index
    %c0_131 = arith.constant 0 : index
    %304 = vector.load %arg7[%c0_129, %c0_130, %c0_131] : memref<1x8x8xf32, #tpu.memory_space<vmem>>, vector<1x8x8xf32>
    %305 = vector.shape_cast %304 : vector<1x8x8xf32> to vector<8x8xf32>
    %306 = vector.shape_cast %303 : vector<8x8xf32> to vector<1x8x8xf32>
    tpu.vector_store %arg7[%c0_129, %c0_130, %c0_131], %306 {strides = array<i32>} : memref<1x8x8xf32, #tpu.memory_space<vmem>>, vector<1x8x8xf32>,
    return
  }
  func.func @transform_0(%arg0: i32) -> (i32, i32, i32) {
    %c0_i32 = arith.constant 0 : i32
    %c0_i32_0 = arith.constant 0 : i32
    %c0_i32_1 = arith.constant 0 : i32
    return %arg0, %c0_i32, %c0_i32_0 : i32, i32, i32
  }
  func.func @transform_1(%arg0: i32) -> (i32, i32) {
    %c0_i32 = arith.constant 0 : i32
    %c0_i32_0 = arith.constant 0 : i32
    %c0_i32_1 = arith.constant 0 : i32
    return %c0_i32, %c0_i32_0 : i32, i32
  }
  func.func @transform_2(%arg0: i32) -> (i32, i32) {
    %c0_i32 = arith.constant 0 : i32
    %c0_i32_0 = arith.constant 0 : i32
    %c0_i32_1 = arith.constant 0 : i32
    return %c0_i32, %c0_i32_0 : i32, i32
  }
  func.func @transform_3(%arg0: i32) -> (i32, i32, i32) {
    %c0_i32 = arith.constant 0 : i32
    %c0_i32_0 = arith.constant 0 : i32
    %c0_i32_1 = arith.constant 0 : i32
    %c0_i32_2 = arith.constant 0 : i32
    return %c0_i32, %c0_i32_0, %c0_i32_1 : i32, i32, i32
  }
  func.func @transform_4(%arg0: i32) -> (i32, i32) {
    %c0_i32 = arith.constant 0 : i32
    %c0_i32_0 = arith.constant 0 : i32
    %c0_i32_1 = arith.constant 0 : i32
    return %c0_i32, %c0_i32_0 : i32, i32
  }
  func.func @transform_5(%arg0: i32) -> (i32, i32) {
    %c0_i32 = arith.constant 0 : i32
    %c0_i32_0 = arith.constant 0 : i32
    %c0_i32_1 = arith.constant 0 : i32
    return %c0_i32, %c0_i32_0 : i32, i32
  }
  func.func @transform_6(%arg0: i32) -> (i32, i32, i32) {
    %c0_i32 = arith.constant 0 : i32
    %c0_i32_0 = arith.constant 0 : i32
    %c0_i32_1 = arith.constant 0 : i32
    return %arg0, %c0_i32, %c0_i32_0 : i32, i32, i32
  }
}

</mosaic_0001>

<bundles_post_ra>
// kernel: lstm_model_forward.1
= control target key start
LH: loop header
LB: loop body
LE: loop exit
PB: predicated region body
PF: predicated region fallthrough
CT: control target
= control target key end

     0   :  { %v6113_v3 = vmov 0.0   ;;  %vm91_vm0 = vcmask 64512   ;;  %vm5341_vm1 = vcmask 1041409   ;;  %vm5343_vm2 = vcmask 1042434   ;;  %s10187_s1 = inlined_call_operand.vmem [shape: f32[8,1024], index: 1, kind: input, shape index: {}]   ;;  %s10188_s0 = inlined_call_operand.vmem [shape: f32[8,8,8], index: 0, kind: input, shape index: {}]   ;;  %s10189_s3 = inlined_call_operand.vmem [shape: bf16[2,256,1024], index: 3, kind: input, shape index: {}]   ;;  %s10190_s2 = inlined_call_operand.vmem [shape: f32[1,1024], index: 2, kind: input, shape index: {}]   ;;  %s10191_s4 = inlined_call_operand.vmem [shape: f32[1,256], index: 4, kind: input, shape index: {}]   ;;  %s10192_s5 = inlined_call_operand.<no memory space> [shape: f32[1,1], index: 5, kind: input, shape index: {}]   ;;  %s10193_s6 = inlined_call_operand.vmem [shape: f32[1,8,8], index: 6, kind: output, shape index: {}]  }
   0x1   :  { %v42_v0 = vld [vmem:[%s10187_s1 + $0x8] sm:$0xff]  ;;  %v44_v1 = vld [vmem:[%s10187_s1 + $0x18] sm:$0xff]  ;;  %v41_v2 = vld [vmem:[%s10187_s1] sm:$0xff]  ;;  %180 = vmatprep.mubr.f32.mxu0 %v6113_v3  ;;  %293 = vmatprep.mubr.f32.mxu1 %v6113_v3  ;;  %vm5345_vm3 = vcmask 1043459   ;;  %vm5347_vm4 = vcmask 1044484   ;;  %vm5349_vm5 = vcmask 1045509  }
   0x2   :  { %116 = vmatprep.subr.mxu0 %v42_v0  ;;  %229 = vmatprep.subr.mxu1 %v44_v1  ;;  %v43_v4 = vld [vmem:[%s10187_s1 + $0x10] sm:$0xff]  ;;  %v6168_v5 = vld [vmem:[%s10188_s0] sm:$0xff]  ;;  %v46_v6 = vld [vmem:[%s10187_s1 + $0x28] sm:$0xff]  ;;  %vm5351_vm6 = vcmask 1046534   ;;  %vm5353_vm7 = vcmask 1047559  }
   0x3   :  { %117 = vmatpush1.msra.mxu0 %v41_v2  ;;  %230 = vmatpush1.msra.mxu1 %v43_v4  ;;  %v45_v7 = vld [vmem:[%s10187_s1 + $0x20] sm:$0xff]  ;;  %v48_v8 = vld [vmem:[%s10187_s1 + $0x38] sm:$0xff]  ;;  %v6187_v9 = vld [vmem:[%s10188_s0 + $0x8] sm:$0xff] }
   0x4   :  { %5404 = vmatmul.mubr.msk.f32.vlgmr.msra.gmra.mrb[0].mxu0 %vm91_vm0, %v6168_v5  ;;  %5412 = vmatmul.mubr.msk.f32.vlgmr.msra.gmra.mrb[0].mxu1 %vm91_vm0, %v6168_v5  ;;  %v5436_v10 = vld [vmem:[%s10189_s3 + $0x400] sm:$0xff]  ;;  %v47_v12 = vld [vmem:[%s10187_s1 + $0x30] sm:$0xff]  ;;  %v5437_v14 = vld [vmem:[%s10189_s3 + $0x408] sm:$0xff] }
   0x5   :  { %342 = vmatprep.subr.mxu0 %v46_v6  ;;  %186 = vmatprep.mubr.f32.mxu0 %v6113_v3  ;;  %v5440_v11 = vld [vmem:[%s10189_s3 + $0x420] sm:$0xff]  ;;  %v5441_v15 = vld [vmem:[%s10189_s3 + $0x428] sm:$0xff]  ;;  %v6218_v17 = vld [vmem:[%s10188_s0 + $0x10] sm:$0xff] }
   0x6   :  { %343 = vmatpush1.msra.mxu0 %v45_v7  ;;  %299 = vmatprep.mubr.f32.mxu1 %v6113_v3  ;;  %v6199_v13 = vcombine.high %v5436_v10, %v5440_v11  ;;  %v6211_v16 = vcombine.high %v5437_v14, %v5441_v15  ;;  %v6231_v18 = vld [vmem:[%s10188_s0 + $0x18] sm:$0xff]  ;;  %v6242_v19 = vld [vmem:[%s10188_s0 + $0x20] sm:$0xff]  ;;  %v6253_v20 = vld [vmem:[%s10188_s0 + $0x28] sm:$0xff]  ;;  %v6295_v27 = vcombine.low %v5436_v10, %v5440_v11 }
   0x7   :  { %455 = vmatprep.subr.mxu1 %v48_v8  ;;  %v6264_v21 = vld [vmem:[%s10188_s0 + $0x30] sm:$0xff]  ;;  %v6275_v22 = vld [vmem:[%s10188_s0 + $0x38] sm:$0xff]  ;;  %v5444_v23 = vld [vmem:[%s10189_s3 + $0x440] sm:$0xff]  ;;  %v6297_v28 = vcombine.low %v5437_v14, %v5441_v15 }
   0x8   :  { %10747 = vst [vmem:[#allocation7_spill] sm:$0xff] %v6199_v13  ;;  %5405 = vmatmul.mubr.msk.f32.gmra.mrb[2].mxu0 %vm91_vm0, %v6187_v9  ;;  %5413 = vmatmul.mubr.msk.f32.gmra.mrb[2].mxu1 %vm91_vm0, %v6187_v9  ;;  %10748 = vst [vmem:[#allocation8_spill] sm:$0xff] %v6211_v16  ;;  %v5448_v24 = vld [vmem:[%s10189_s3 + $0x460] sm:$0xff]  ;;  %v5445_v25 = vld [vmem:[%s10189_s3 + $0x448] sm:$0xff] }
   0x9   :  { %192 = vmatprep.mubr.f32.mxu0 %v6113_v3  ;;  %305 = vmatprep.mubr.f32.mxu1 %v6113_v3  ;;  %v5449_v26 = vld [vmem:[%s10189_s3 + $0x468] sm:$0xff]  ;;  %10749 = vst [vmem:[#allocation9_spill] sm:$0xff] %v6295_v27  ;;  %10750 = vst [vmem:[#allocation10_spill] sm:$0xff] %v6297_v28  ;;  %v6299_v29 = vcombine.high %v5444_v23, %v5448_v24  ;;  %v5452_v31 = vld [vmem:[%s10189_s3 + $0x480] sm:$0xff]  ;;  %v6321_v35 = vcombine.low %v5444_v23, %v5448_v24 }
   0xa   :  { %456 = vmatpush1.msra.mxu1 %v47_v12  ;;  %1535 = vmatprep.subr.bf16.mxu0 %v6199_v13  ;;  %v6301_v30 = vcombine.high %v5445_v25, %v5449_v26  ;;  %v5456_v32 = vld [vmem:[%s10189_s3 + $0x4a0] sm:$0xff]  ;;  %v5453_v33 = vld [vmem:[%s10189_s3 + $0x488] sm:$0xff]  ;;  %v6323_v36 = vcombine.low %v5445_v25, %v5449_v26 }
   0xb   :  { %1576 = vmatprep.subr.bf16.mxu1 %v6211_v16  ;;  %10751 = vst [vmem:[#allocation11_spill] sm:$0xff] %v6299_v29  ;;  %v5457_v34 = vld [vmem:[%s10189_s3 + $0x4a8] sm:$0xff]  ;;  %10753 = vst [vmem:[#allocation13_spill] sm:$0xff] %v6321_v35  ;;  %v6327_v37 = vcombine.high %v5452_v31, %v5456_v32  ;;  %v5460_v39 = vld [vmem:[%s10189_s3 + $0x4c0] sm:$0xff]  ;;  %v6351_v43 = vcombine.low %v5452_v31, %v5456_v32 }
   0xc   :  { %5406 = vmatmul.mubr.msk.f32.gmra.mrb[4].mxu0 %vm91_vm0, %v6218_v17  ;;  %5414 = vmatmul.mubr.msk.f32.gmra.mrb[4].mxu1 %vm91_vm0, %v6218_v17  ;;  %10752 = vst [vmem:[#allocation12_spill] sm:$0xff] %v6301_v30  ;;  %10754 = vst [vmem:[#allocation14_spill] sm:$0xff] %v6323_v36  ;;  %v6329_v38 = vcombine.high %v5453_v33, %v5457_v34  ;;  %v5464_v40 = vld [vmem:[%s10189_s3 + $0x4e0] sm:$0xff]  ;;  %v5461_v41 = vld [vmem:[%s10189_s3 + $0x4c8] sm:$0xff]  ;;  %v6353_v44 = vcombine.low %v5453_v33, %v5457_v34 }
   0xd   :  { %198 = vmatprep.mubr.f32.mxu0 %v6113_v3  ;;  %311 = vmatprep.mubr.f32.mxu1 %v6113_v3  ;;  %10755 = vst [vmem:[#allocation15_spill] sm:$0xff] %v6327_v37  ;;  %v5465_v42 = vld [vmem:[%s10189_s3 + $0x4e8] sm:$0xff]  ;;  %10757 = vst [vmem:[#allocation17_spill] sm:$0xff] %v6351_v43  ;;  %v6357_v45 = vcombine.high %v5460_v39, %v5464_v40  ;;  %v5468_v47 = vld [vmem:[%s10189_s3 + $0x500] sm:$0xff]  ;;  %v6381_v51 = vcombine.low %v5460_v39, %v5464_v40 }
   0xe   :  { %10756 = vst [vmem:[#allocation16_spill] sm:$0xff] %v6329_v38  ;;  %10758 = vst [vmem:[#allocation18_spill] sm:$0xff] %v6353_v44  ;;  %v6359_v46 = vcombine.high %v5461_v41, %v5465_v42  ;;  %v5472_v48 = vld [vmem:[%s10189_s3 + $0x520] sm:$0xff]  ;;  %v5469_v49 = vld [vmem:[%s10189_s3 + $0x508] sm:$0xff]  ;;  %v6383_v52 = vcombine.low %v5461_v41, %v5465_v42 }
   0xf   :  { %10759 = vst [vmem:[#allocation19_spill] sm:$0xff] %v6357_v45  ;;  %v5473_v50 = vld [vmem:[%s10189_s3 + $0x528] sm:$0xff]  ;;  %10761 = vst [vmem:[#allocation21_spill] sm:$0xff] %v6381_v51  ;;  %v6387_v53 = vcombine.high %v5468_v47, %v5472_v48  ;;  %v5476_v55 = vld [vmem:[%s10189_s3 + $0x540] sm:$0xff]  ;;  %v6411_v59 = vcombine.low %v5468_v47, %v5472_v48 }
  0x10   :  { %5407 = vmatmul.mubr.msk.f32.gmra.mrb[6].mxu0 %vm91_vm0, %v6231_v18  ;;  %5415 = vmatmul.mubr.msk.f32.gmra.mrb[6].mxu1 %vm91_vm0, %v6231_v18  ;;  %10760 = vst [vmem:[#allocation20_spill] sm:$0xff] %v6359_v46  ;;  %10762 = vst [vmem:[#allocation22_spill] sm:$0xff] %v6383_v52  ;;  %v6389_v54 = vcombine.high %v5469_v49, %v5473_v50  ;;  %v5480_v56 = vld [vmem:[%s10189_s3 + $0x560] sm:$0xff]  ;;  %v5477_v57 = vld [vmem:[%s10189_s3 + $0x548] sm:$0xff]  ;;  %v6413_v60 = vcombine.low %v5469_v49, %v5473_v50  ;;  %v10194_v49 = vmov 0.0|0.0  }
  0x11   :  { %204 = vmatprep.mubr.f32.mxu0 %v6113_v3  ;;  %317 = vmatprep.mubr.f32.mxu1 %v6113_v3  ;;  %10763 = vst [vmem:[#allocation23_spill] sm:$0xff] %v6387_v53  ;;  %v5481_v58 = vld [vmem:[%s10189_s3 + $0x568] sm:$0xff]  ;;  %10765 = vst [vmem:[#allocation25_spill] sm:$0xff] %v6411_v59  ;;  %v6417_v61 = vcombine.high %v5476_v55, %v5480_v56  ;;  %v5484_v63 = vld [vmem:[%s10189_s3 + $0x580] sm:$0xff]  ;;  %v6441_v4 = vcombine.low %v5476_v55, %v5480_v56 }
  0x12   :  { %10764 = vst [vmem:[#allocation24_spill] sm:$0xff] %v6389_v54  ;;  %10766 = vst [vmem:[#allocation26_spill] sm:$0xff] %v6413_v60  ;;  %v6419_v62 = vcombine.high %v5477_v57, %v5481_v58  ;;  %v5488_v0 = vld [vmem:[%s10189_s3 + $0x5a0] sm:$0xff]  ;;  %v5485_v1 = vld [vmem:[%s10189_s3 + $0x588] sm:$0xff] }
  0x13   :  { %10767 = vst [vmem:[#allocation27_spill] sm:$0xff] %v6417_v61  ;;  %v5489_v2 = vld [vmem:[%s10189_s3 + $0x5a8] sm:$0xff]  ;;  %10769 = vst [vmem:[#allocation29_spill] sm:$0xff] %v6441_v4  ;;  %v6447_v6 = vcombine.high %v5484_v63, %v5488_v0  ;;  %v5492_v8 = vld [vmem:[%s10189_s3 + $0x5c0] sm:$0xff]  ;;  %v6471_v12 = vcombine.low %v5484_v63, %v5488_v0 }
  0x14   :  { %5408 = vmatmul.mubr.msk.f32.gmra.mrb[8].mxu0 %vm91_vm0, %v6242_v19  ;;  %5416 = vmatmul.mubr.msk.f32.gmra.mrb[8].mxu1 %vm91_vm0, %v6242_v19  ;;  %10768 = vst [vmem:[#allocation28_spill] sm:$0xff] %v6419_v62  ;;  %v6449_v7 = vcombine.high %v5485_v1, %v5489_v2  ;;  %v5493_v10 = vld [vmem:[%s10189_s3 + $0x5c8] sm:$0xff]  ;;  %v6473_v14 = vcombine.low %v5485_v1, %v5489_v2  ;;  %v5512_v32 = vld [vmem:[%s10189_s3 + $0x660] sm:$0xff] }
  0x15   :  { %210 = vmatprep.mubr.f32.mxu0 %v6113_v3  ;;  %323 = vmatprep.mubr.f32.mxu1 %v6113_v3  ;;  %10771 = vst [vmem:[#allocation31_spill] sm:$0xff] %v6447_v6  ;;  %v5497_v11 = vld [vmem:[%s10189_s3 + $0x5e8] sm:$0xff]  ;;  %10773 = vst [vmem:[#allocation33_spill] sm:$0xff] %v6471_v12  ;;  %v5520_v42 = vld [vmem:[%s10189_s3 + $0x6a0] sm:$0xff] }
  0x16   :  { %10772 = vst [vmem:[#allocation32_spill] sm:$0xff] %v6449_v7  ;;  %10774 = vst [vmem:[#allocation34_spill] sm:$0xff] %v6473_v14  ;;  %v5505_v23 = vld [vmem:[%s10189_s3 + $0x628] sm:$0xff]  ;;  %v6503_v25 = vcombine.low %v5493_v10, %v5497_v11  ;;  %v5528_v63 = vld [vmem:[%s10189_s3 + $0x6e0] sm:$0xff] }
  0x17   :  { %v5509_v33 = vld [vmem:[%s10189_s3 + $0x648] sm:$0xff] }
  0x18   :  { %5409 = vmatmul.mubr.msk.f32.gmra.mrb[10].mxu0 %vm91_vm0, %v6253_v20  ;;  %5417 = vmatmul.mubr.msk.f32.gmra.mrb[10].mxu1 %vm91_vm0, %v6253_v20  ;;  %10778 = vst [vmem:[#allocation38_spill] sm:$0xff] %v6503_v25  ;;  %v5513_v34 = vld [vmem:[%s10189_s3 + $0x668] sm:$0xff] }
  0x19   :  { %216 = vmatprep.mubr.f32.mxu0 %v6113_v3  ;;  %329 = vmatprep.mubr.f32.mxu1 %v6113_v3  ;;  %v5517_v47 = vld [vmem:[%s10189_s3 + $0x688] sm:$0xff]  ;;  %v6559_v55 = vcombine.low %v5509_v33, %v5513_v34 }
  0x1a   :  { %v5521_v48 = vld [vmem:[%s10189_s3 + $0x6a8] sm:$0xff] }
  0x1b   :  { %10786 = vst [vmem:[#allocation46_spill] sm:$0xff] %v6559_v55  ;;  %v5525_v0 = vld [vmem:[%s10189_s3 + $0x6c8] sm:$0xff] }
  0x1c   :  { %5410 = vmatmul.mubr.msk.f32.gmra.mrb[12].mxu0 %vm91_vm0, %v6264_v21  ;;  %5418 = vmatmul.mubr.msk.f32.gmra.mrb[12].mxu1 %vm91_vm0, %v6264_v21  ;;  %v5529_v1 = vld [vmem:[%s10189_s3 + $0x6e8] sm:$0xff] }
  0x1d   :  { %222 = vmatprep.mubr.f32.mxu0 %v6113_v3  ;;  %335 = vmatprep.mubr.f32.mxu1 %v6113_v3 }
  0x20   :  { %5411 = vmatmul.mubr.msk.f32.gmra.mrb[14].mxu0 %vm91_vm0, %v6275_v22  ;;  %5419 = vmatmul.mubr.msk.f32.gmra.mrb[14].mxu1 %vm91_vm0, %v6275_v22 }
  0x21   :  { %406 = vmatprep.mubr.f32.mxu0 %v6113_v3  ;;  %519 = vmatprep.mubr.f32.mxu1 %v6113_v3 }
  0x24   :  { %5420 = vmatmul.mubr.msk.f32.vlgmr.msra.gmra.mrb[16].mxu0 %vm91_vm0, %v6168_v5  ;;  %5428 = vmatmul.mubr.msk.f32.vlgmr.msra.gmra.mrb[16].mxu1 %vm91_vm0, %v6168_v5  ;;  %v6443_v5 = vcombine.low %v5477_v57, %v5481_v58  ;;  %v6565_v57 = vcombine.high %v5517_v47, %v5521_v48  ;;  %v5524_v58 = vld [vmem:[%s10189_s3 + $0x6c0] sm:$0xff] }
  0x25   :  { %1536 = vmatpush1.bf16.msra.mxu0 %v6295_v27  ;;  %1577 = vmatpush1.bf16.msra.mxu1 %v6297_v28 }
  0x26   :  { %1537 = vmatprep.subr.bf16.mxu0 %v6299_v29  ;;  %1578 = vmatprep.subr.bf16.mxu1 %v6301_v30  ;;  %10770 = vst [vmem:[#allocation30_spill] sm:$0xff] %v6443_v5  ;;  %10788 = vst [vmem:[#allocation48_spill] sm:$0xff] %v6565_v57 }
  0x27   :  { %412 = vmatprep.mubr.f32.mxu0 %v6113_v3  ;;  %525 = vmatprep.mubr.f32.mxu1 %v6113_v3 }
  0x28   :  { %5421 = vmatmul.mubr.msk.f32.gmra.mrb[18].mxu0 %vm91_vm0, %v6187_v9  ;;  %5429 = vmatmul.mubr.msk.f32.gmra.mrb[18].mxu1 %vm91_vm0, %v6187_v9  ;;  %v5496_v9 = vld [vmem:[%s10189_s3 + $0x5e0] sm:$0xff] }
  0x29   :  { %1538 = vmatpush1.bf16.msra.mxu0 %v6321_v35  ;;  %1579 = vmatpush1.bf16.msra.mxu1 %v6323_v36  ;;  %v6477_v15 = vcombine.high %v5492_v8, %v5496_v9  ;;  %v6501_v24 = vcombine.low %v5492_v8, %v5496_v9  ;;  %v6583_v8 = vcombine.low %v5517_v47, %v5521_v48  ;;  %v5545_v47 = vld [vmem:[%s10189_s3 + $0x768] sm:$0xff] }
  0x2a   :  { %1539 = vmatprep.subr.bf16.mxu0 %v6327_v37  ;;  %1580 = vmatprep.subr.bf16.mxu1 %v6329_v38  ;;  %v6587_v9 = vcombine.high %v5524_v58, %v5528_v63 }
  0x2b   :  { %418 = vmatprep.mubr.f32.mxu0 %v6113_v3  ;;  %531 = vmatprep.mubr.f32.mxu1 %v6113_v3  ;;  %10775 = vst [vmem:[#allocation35_spill] sm:$0xff] %v6477_v15  ;;  %10777 = vst [vmem:[#allocation37_spill] sm:$0xff] %v6501_v24 }
  0x2c   :  { %5422 = vmatmul.mubr.msk.f32.gmra.mrb[20].mxu0 %vm91_vm0, %v6218_v17  ;;  %5430 = vmatmul.mubr.msk.f32.gmra.mrb[20].mxu1 %vm91_vm0, %v6218_v17  ;;  %v6479_v17 = vcombine.high %v5493_v10, %v5497_v11  ;;  %10790 = vst [vmem:[#allocation50_spill] sm:$0xff] %v6583_v8  ;;  %10791 = vst [vmem:[#allocation51_spill] sm:$0xff] %v6587_v9  ;;  %v6589_v10 = vcombine.high %v5525_v0, %v5529_v1  ;;  %v5532_v11 = vld [vmem:[%s10189_s3 + $0x700] sm:$0xff] }
  0x2d   :  { %1540 = vmatpush1.bf16.msra.mxu0 %v6351_v43  ;;  %1581 = vmatpush1.bf16.msra.mxu1 %v6353_v44 }
  0x2e   :  { %1541 = vmatprep.subr.bf16.mxu0 %v6357_v45  ;;  %1582 = vmatprep.subr.bf16.mxu1 %v6359_v46  ;;  %10776 = vst [vmem:[#allocation36_spill] sm:$0xff] %v6479_v17  ;;  %10792 = vst [vmem:[#allocation52_spill] sm:$0xff] %v6589_v10 }
  0x2f   :  { %424 = vmatprep.mubr.f32.mxu0 %v6113_v3  ;;  %537 = vmatprep.mubr.f32.mxu1 %v6113_v3 }
  0x30   :  { %5423 = vmatmul.mubr.msk.f32.gmra.mrb[22].mxu0 %vm91_vm0, %v6231_v18  ;;  %5431 = vmatmul.mubr.msk.f32.gmra.mrb[22].mxu1 %vm91_vm0, %v6231_v18  ;;  %v5500_v18 = vld [vmem:[%s10189_s3 + $0x600] sm:$0xff] }
  0x31   :  { %1542 = vmatpush1.bf16.msra.mxu0 %v6381_v51  ;;  %1583 = vmatpush1.bf16.msra.mxu1 %v6383_v52 }
  0x32   :  { %1543 = vmatprep.subr.bf16.mxu0 %v6387_v53  ;;  %1584 = vmatprep.subr.bf16.mxu1 %v6389_v54 }
  0x33   :  { %430 = vmatprep.mubr.f32.mxu0 %v6113_v3  ;;  %543 = vmatprep.mubr.f32.mxu1 %v6113_v3 }
  0x34   :  { %5424 = vmatmul.mubr.msk.f32.gmra.mrb[24].mxu0 %vm91_vm0, %v6242_v19  ;;  %5432 = vmatmul.mubr.msk.f32.gmra.mrb[24].mxu1 %vm91_vm0, %v6242_v19  ;;  %v5504_v19 = vld [vmem:[%s10189_s3 + $0x620] sm:$0xff] }
  0x35   :  { %1544 = vmatpush1.bf16.msra.mxu0 %v6411_v59  ;;  %1585 = vmatpush1.bf16.msra.mxu1 %v6413_v60  ;;  %v6507_v26 = vcombine.high %v5500_v18, %v5504_v19  ;;  %v6531_v39 = vcombine.low %v5500_v18, %v5504_v19  ;;  %v5536_v18 = vld [vmem:[%s10189_s3 + $0x720] sm:$0xff]  ;;  %v5533_v19 = vld [vmem:[%s10189_s3 + $0x708] sm:$0xff] }
  0x36   :  { %1545 = vmatprep.subr.bf16.mxu0 %v6417_v61  ;;  %1586 = vmatprep.subr.bf16.mxu1 %v6419_v62  ;;  %v6629_v48 = vcombine.low %v5532_v11, %v5536_v18 }
  0x37   :  { %436 = vmatprep.mubr.f32.mxu0 %v6113_v3  ;;  %549 = vmatprep.mubr.f32.mxu1 %v6113_v3  ;;  %10779 = vst [vmem:[#allocation39_spill] sm:$0xff] %v6507_v26  ;;  %10781 = vst [vmem:[#allocation41_spill] sm:$0xff] %v6531_v39 }
  0x38   :  { %5425 = vmatmul.mubr.msk.f32.gmra.mrb[26].mxu0 %vm91_vm0, %v6253_v20  ;;  %5433 = vmatmul.mubr.msk.f32.gmra.mrb[26].mxu1 %vm91_vm0, %v6253_v20  ;;  %v5501_v20 = vld [vmem:[%s10189_s3 + $0x608] sm:$0xff]  ;;  %10797 = vst [vmem:[#allocation57_spill] sm:$0xff] %v6629_v48 }
  0x39   :  { %1546 = vmatpush1.bf16.msra.mxu0 %v6441_v4  ;;  %1587 = vmatpush1.bf16.msra.mxu1 %v6443_v5  ;;  %v6509_v31 = vcombine.high %v5501_v20, %v5505_v23  ;;  %v6533_v40 = vcombine.low %v5501_v20, %v5505_v23  ;;  %v5537_v20 = vld [vmem:[%s10189_s3 + $0x728] sm:$0xff]  ;;  %v6605_v23 = vcombine.low %v5524_v58, %v5528_v63 }
  0x3a   :  { %1547 = vmatprep.subr.bf16.mxu0 %v6447_v6  ;;  %1588 = vmatprep.subr.bf16.mxu1 %v6449_v7  ;;  %v6631_v58 = vcombine.low %v5533_v19, %v5537_v20 }
  0x3b   :  { %442 = vmatprep.mubr.f32.mxu0 %v6113_v3  ;;  %555 = vmatprep.mubr.f32.mxu1 %v6113_v3  ;;  %10780 = vst [vmem:[#allocation40_spill] sm:$0xff] %v6509_v31  ;;  %10782 = vst [vmem:[#allocation42_spill] sm:$0xff] %v6533_v40 }
  0x3c   :  { %5426 = vmatmul.mubr.msk.f32.gmra.mrb[28].mxu0 %vm91_vm0, %v6264_v21  ;;  %5434 = vmatmul.mubr.msk.f32.gmra.mrb[28].mxu1 %vm91_vm0, %v6264_v21  ;;  %v5508_v21 = vld [vmem:[%s10189_s3 + $0x640] sm:$0xff]  ;;  %10793 = vst [vmem:[#allocation53_spill] sm:$0xff] %v6605_v23  ;;  %10798 = vst [vmem:[#allocation58_spill] sm:$0xff] %v6631_v58 }
  0x3d   :  { %1548 = vmatpush1.bf16.msra.mxu0 %v6471_v12  ;;  %1589 = vmatpush1.bf16.msra.mxu1 %v6473_v14  ;;  %v6537_v41 = vcombine.high %v5508_v21, %v5512_v32  ;;  %v6557_v50 = vcombine.low %v5508_v21, %v5512_v32  ;;  %v6607_v21 = vcombine.low %v5525_v0, %v5529_v1  ;;  %v5548_v1 = vld [vmem:[%s10189_s3 + $0x780] sm:$0xff] }
  0x3e   :  { %1549 = vmatprep.subr.bf16.mxu0 %v6477_v15  ;;  %1590 = vmatprep.subr.bf16.mxu1 %v6479_v17  ;;  %v6611_v32 = vcombine.high %v5532_v11, %v5536_v18  ;;  %v5549_v11 = vld [vmem:[%s10189_s3 + $0x788] sm:$0xff] }
  0x3f   :  { %448 = vmatprep.mubr.f32.mxu0 %v6113_v3  ;;  %561 = vmatprep.mubr.f32.mxu1 %v6113_v3  ;;  %10783 = vst [vmem:[#allocation43_spill] sm:$0xff] %v6537_v41  ;;  %v6539_v3 = vcombine.high %v5509_v33, %v5513_v34  ;;  %10785 = vst [vmem:[#allocation45_spill] sm:$0xff] %v6557_v50  ;;  %v6613_v33 = vcombine.high %v5533_v19, %v5537_v20  ;;  %v5540_v34 = vld [vmem:[%s10189_s3 + $0x740] sm:$0xff]  ;;  %v5553_v18 = vld [vmem:[%s10189_s3 + $0x7a8] sm:$0xff] }
  0x40   :  { %5427 = vmatmul.mubr.msk.f32.gmra.mrb[30].mxu0 %vm91_vm0, %v6275_v22  ;;  %5435 = vmatmul.mubr.msk.f32.gmra.mrb[30].mxu1 %vm91_vm0, %v6275_v22  ;;  %v5516_v22 = vld [vmem:[%s10189_s3 + $0x680] sm:$0xff]  ;;  %10794 = vst [vmem:[#allocation54_spill] sm:$0xff] %v6607_v21  ;;  %10795 = vst [vmem:[#allocation55_spill] sm:$0xff] %v6611_v32 }
  0x41   :  { %1550 = vmatpush1.bf16.msra.mxu0 %v6501_v24  ;;  %1591 = vmatpush1.bf16.msra.mxu1 %v6503_v25  ;;  %10784 = vst [vmem:[#allocation44_spill] sm:$0xff] %v6539_v3  ;;  %v6563_v56 = vcombine.high %v5516_v22, %v5520_v42  ;;  %v6581_v2 = vcombine.low %v5516_v22, %v5520_v42  ;;  %10796 = vst [vmem:[#allocation56_spill] sm:$0xff] %v6613_v33  ;;  %v5544_v22 = vld [vmem:[%s10189_s3 + $0x760] sm:$0xff]  ;;  %v5541_v42 = vld [vmem:[%s10189_s3 + $0x748] sm:$0xff] }
  0x42   :  { %1551 = vmatprep.subr.bf16.mxu0 %v6507_v26  ;;  %1592 = vmatprep.subr.bf16.mxu1 %v6509_v31  ;;  %v6635_v63 = vcombine.high %v5540_v34, %v5544_v22  ;;  %v6637_v0 = vcombine.high %v5541_v42, %v5545_v47  ;;  %v6653_v19 = vcombine.low %v5540_v34, %v5544_v22  ;;  %v5557_v34 = vld [vmem:[%s10189_s3 + $0x7c8] sm:$0xff] }
  0x43   :  { %1567 = vmatprep.mubr.bf16.mxu0 %v10194_v49  ;;  %1608 = vmatprep.mubr.bf16.mxu1 %v10194_v49  ;;  %10787 = vst [vmem:[#allocation47_spill] sm:$0xff] %v6563_v56  ;;  %10789 = vst [vmem:[#allocation49_spill] sm:$0xff] %v6581_v2  ;;  %v5552_v49 = vld [vmem:[%s10189_s3 + $0x7a0] sm:$0xff]  ;;  %v6655_v20 = vcombine.low %v5541_v42, %v5545_v47  ;;  %v5561_v22 = vld [vmem:[%s10189_s3 + $0x7e8] sm:$0xff]  ;;  %v6679_v47 = vcombine.low %v5549_v11, %v5553_v18 }
  0x44   :  { %10799 = vst [vmem:[#allocation59_spill] sm:$0xff] %v6635_v63  ;;  %10800 = vst [vmem:[#allocation60_spill] sm:$0xff] %v6637_v0  ;;  %v6677_v42 = vcombine.low %v5548_v1, %v5552_v49 }
  0x45   :  { %1552 = vmatpush1.bf16.msra.mxu0 %v6531_v39  ;;  %1593 = vmatpush1.bf16.msra.mxu1 %v6533_v40  ;;  %10801 = vst [vmem:[#allocation61_spill] sm:$0xff] %v6653_v19  ;;  %10802 = vst [vmem:[#allocation62_spill] sm:$0xff] %v6655_v20 }
  0x46   :  { %1553 = vmatprep.subr.bf16.mxu0 %v6537_v41  ;;  %1594 = vmatprep.subr.bf16.mxu1 %v6539_v3  ;;  %10805 = vst [vmem:[#allocation65_spill] sm:$0xff] %v6677_v42  ;;  %10806 = vst [vmem:[#allocation66_spill] sm:$0xff] %v6679_v47 }
  0x49   :  { %1554 = vmatpush1.bf16.msra.mxu0 %v6557_v50  ;;  %1595 = vmatpush1.bf16.msra.mxu1 %v6559_v55 }
  0x4a   :  { %1555 = vmatprep.subr.bf16.mxu0 %v6563_v56  ;;  %1596 = vmatprep.subr.bf16.mxu1 %v6565_v57 }
  0x4d   :  { %1556 = vmatpush1.bf16.msra.mxu0 %v6581_v2  ;;  %1597 = vmatpush1.bf16.msra.mxu1 %v6583_v8 }
  0x4e   :  { %1557 = vmatprep.subr.bf16.mxu0 %v6587_v9  ;;  %1598 = vmatprep.subr.bf16.mxu1 %v6589_v10  ;;  %v736_v10 = vld [vmem:[%s10189_s3 + $0x340] sm:$0xff] }
  0x51   :  { %1558 = vmatpush1.bf16.msra.mxu0 %v6605_v23  ;;  %1599 = vmatpush1.bf16.msra.mxu1 %v6607_v21  ;;  %v5556_v21 = vld [vmem:[%s10189_s3 + $0x7c0] sm:$0xff]  ;;  %v5462_v23 = vld [vmem:[%s10189_s3 + $0x4d0] sm:$0xff] }
  0x52   :  { %1559 = vmatprep.subr.bf16.mxu0 %v6611_v32  ;;  %1600 = vmatprep.subr.bf16.mxu1 %v6613_v33  ;;  %v6659_v33 = vcombine.high %v5548_v1, %v5552_v49  ;;  %v6661_v32 = vcombine.high %v5549_v11, %v5553_v18  ;;  %v5439_v49 = vld [vmem:[%s10189_s3 + $0x418] sm:$0xff]  ;;  %v6703_v18 = vcombine.low %v5557_v34, %v5561_v22 }
  0x53   :  { %v5443_v1 = vld [vmem:[%s10189_s3 + $0x438] sm:$0xff] }
  0x54   :  { %10803 = vst [vmem:[#allocation63_spill] sm:$0xff] %v6659_v33  ;;  %10804 = vst [vmem:[#allocation64_spill] sm:$0xff] %v6661_v32 }
  0x55   :  { %1560 = vmatpush1.bf16.msra.mxu0 %v6629_v48  ;;  %1601 = vmatpush1.bf16.msra.mxu1 %v6631_v58  ;;  %v5560_v58 = vld [vmem:[%s10189_s3 + $0x7e0] sm:$0xff]  ;;  %v5438_v48 = vld [vmem:[%s10189_s3 + $0x410] sm:$0xff]  ;;  %10810 = vst [vmem:[#allocation70_spill] sm:$0xff] %v6703_v18 }
  0x56   :  { %1561 = vmatprep.subr.bf16.mxu0 %v6635_v63  ;;  %1602 = vmatprep.subr.bf16.mxu1 %v6637_v0  ;;  %v6683_v0 = vcombine.high %v5556_v21, %v5560_v58  ;;  %v6685_v63 = vcombine.high %v5557_v34, %v5561_v22  ;;  %v6701_v11 = vcombine.low %v5556_v21, %v5560_v58  ;;  %v5447_v21 = vld [vmem:[%s10189_s3 + $0x458] sm:$0xff] }
  0x57   :  { %v5451_v58 = vld [vmem:[%s10189_s3 + $0x478] sm:$0xff]  ;;  %v6727_v22 = vcombine.low %v5439_v49, %v5443_v1 }
  0x58   :  { %10807 = vst [vmem:[#allocation67_spill] sm:$0xff] %v6683_v0  ;;  %10808 = vst [vmem:[#allocation68_spill] sm:$0xff] %v6685_v63 }
  0x59   :  { %1562 = vmatpush1.bf16.msra.mxu0 %v6653_v19  ;;  %1603 = vmatpush1.bf16.msra.mxu1 %v6655_v20  ;;  %v5442_v20 = vld [vmem:[%s10189_s3 + $0x430] sm:$0xff]  ;;  %10809 = vst [vmem:[#allocation69_spill] sm:$0xff] %v6701_v11  ;;  %10814 = vst [vmem:[#allocation74_spill] sm:$0xff] %v6727_v22 }
  0x5a   :  { %1563 = vmatprep.subr.bf16.mxu0 %v6659_v33  ;;  %1604 = vmatprep.subr.bf16.mxu1 %v6661_v32  ;;  %v6707_v32 = vcombine.high %v5438_v48, %v5442_v20  ;;  %v6709_v33 = vcombine.high %v5439_v49, %v5443_v1  ;;  %v5446_v19 = vld [vmem:[%s10189_s3 + $0x450] sm:$0xff]  ;;  %v6725_v34 = vcombine.low %v5438_v48, %v5442_v20  ;;  %v5455_v48 = vld [vmem:[%s10189_s3 + $0x498] sm:$0xff]  ;;  %v10817_v49 = vmov 0.0|0.0  }
  0x5b   :  { %v5459_v20 = vld [vmem:[%s10189_s3 + $0x4b8] sm:$0xff] }
  0x5c   :  { %10811 = vst [vmem:[#allocation71_spill] sm:$0xff] %v6707_v32  ;;  %10812 = vst [vmem:[#allocation72_spill] sm:$0xff] %v6709_v33 }
  0x5d   :  { %1564 = vmatpush1.bf16.msra.mxu0 %v6677_v42  ;;  %1605 = vmatpush1.bf16.msra.mxu1 %v6679_v47  ;;  %v5450_v47 = vld [vmem:[%s10189_s3 + $0x470] sm:$0xff]  ;;  %10813 = vst [vmem:[#allocation73_spill] sm:$0xff] %v6725_v34 }
  0x5e   :  { %1565 = vmatprep.subr.bf16.mxu0 %v6683_v0  ;;  %1606 = vmatprep.subr.bf16.mxu1 %v6685_v63  ;;  %v6731_v63 = vcombine.high %v5446_v19, %v5450_v47  ;;  %v6733_v0 = vcombine.high %v5447_v21, %v5451_v58  ;;  %v5454_v42 = vld [vmem:[%s10189_s3 + $0x490] sm:$0xff]  ;;  %v6751_v1 = vcombine.low %v5446_v19, %v5450_v47  ;;  %v5463_v19 = vld [vmem:[%s10189_s3 + $0x4d8] sm:$0xff] }
  0x5f   :  { %v5467_v47 = vld [vmem:[%s10189_s3 + $0x4f8] sm:$0xff] }
  0x60   :  { %10815 = vst [vmem:[#allocation75_spill] sm:$0xff] %v6731_v63  ;;  %10816 = vst [vmem:[#allocation76_spill] sm:$0xff] %v6733_v0 }
  0x61   :  { %1566 = vmatpush1.bf16.msra.mxu0 %v6701_v11  ;;  %1607 = vmatpush1.bf16.msra.mxu1 %v6703_v18  ;;  %v5458_v18 = vld [vmem:[%s10189_s3 + $0x4b0] sm:$0xff]  ;;  %10818 = vst [vmem:[#allocation77_spill] sm:$0xff] %v6751_v1  ;;  %v6759_v11 = vcombine.high %v5455_v48, %v5459_v20 }
  0x62   :  { %1617 = vmatprep.subr.bf16.mxu0 %v6707_v32  ;;  %1658 = vmatprep.subr.bf16.mxu1 %v6709_v33  ;;  %v6753_v33 = vcombine.low %v5447_v21, %v5451_v58  ;;  %v6757_v32 = vcombine.high %v5454_v42, %v5458_v18  ;;  %v6777_v21 = vcombine.low %v5454_v42, %v5458_v18  ;;  %v5471_v42 = vld [vmem:[%s10189_s3 + $0x518] sm:$0xff] }
  0x63   :  { %10821 = vst [vmem:[#allocation80_spill] sm:$0xff] %v6759_v11  ;;  %v6779_v58 = vcombine.low %v5455_v48, %v5459_v20  ;;  %v5475_v18 = vld [vmem:[%s10189_s3 + $0x538] sm:$0xff]  ;;  %v6803_v20 = vcombine.low %v5463_v19, %v5467_v47 }
  0x64   :  { %1568 = vmatmul.mubr.bf16.vlgmr.msra.gmra.mrb[32].mxu0 %v10817_v49  ;;  %1609 = vmatmul.mubr.bf16.vlgmr.msra.gmra.mrb[32].mxu1 %v10817_v49  ;;  %10819 = vst [vmem:[#allocation78_spill] sm:$0xff] %v6753_v33  ;;  %10820 = vst [vmem:[#allocation79_spill] sm:$0xff] %v6757_v32 }
  0x65   :  { %1618 = vmatpush1.bf16.msra.mxu0 %v6725_v34  ;;  %1659 = vmatpush1.bf16.msra.mxu1 %v6727_v22  ;;  %v5466_v22 = vld [vmem:[%s10189_s3 + $0x4f0] sm:$0xff]  ;;  %10822 = vst [vmem:[#allocation81_spill] sm:$0xff] %v6777_v21  ;;  %10823 = vst [vmem:[#allocation82_spill] sm:$0xff] %v6779_v58 }
  0x66   :  { %1619 = vmatprep.subr.bf16.mxu0 %v6731_v63  ;;  %1660 = vmatprep.subr.bf16.mxu1 %v6733_v0  ;;  %v6783_v0 = vcombine.high %v5462_v23, %v5466_v22  ;;  %v6785_v63 = vcombine.high %v5463_v19, %v5467_v47  ;;  %v5470_v34 = vld [vmem:[%s10189_s3 + $0x510] sm:$0xff]  ;;  %v6801_v48 = vcombine.low %v5462_v23, %v5466_v22  ;;  %v5479_v23 = vld [vmem:[%s10189_s3 + $0x558] sm:$0xff] }
  0x67   :  { %1649 = vmatprep.mubr.bf16.mxu0 %v10817_v49  ;;  %1690 = vmatprep.mubr.bf16.mxu1 %v10817_v49  ;;  %10827 = vst [vmem:[#allocation86_spill] sm:$0xff] %v6803_v20  ;;  %v5483_v22 = vld [vmem:[%s10189_s3 + $0x578] sm:$0xff]  ;;  %v6827_v47 = vcombine.low %v5471_v42, %v5475_v18 }
  0x68   :  { %10824 = vst [vmem:[#allocation83_spill] sm:$0xff] %v6783_v0  ;;  %10825 = vst [vmem:[#allocation84_spill] sm:$0xff] %v6785_v63 }
  0x69   :  { %1620 = vmatpush1.bf16.msra.mxu0 %v6751_v1  ;;  %1661 = vmatpush1.bf16.msra.mxu1 %v6753_v33  ;;  %v5474_v33 = vld [vmem:[%s10189_s3 + $0x530] sm:$0xff]  ;;  %10826 = vst [vmem:[#allocation85_spill] sm:$0xff] %v6801_v48  ;;  %10831 = vst [vmem:[#allocation90_spill] sm:$0xff] %v6827_v47 }
  0x6a   :  { %1621 = vmatprep.subr.bf16.mxu0 %v6757_v32  ;;  %1662 = vmatprep.subr.bf16.mxu1 %v6759_v11  ;;  %v6807_v11 = vcombine.high %v5470_v34, %v5474_v33  ;;  %v6809_v32 = vcombine.high %v5471_v42, %v5475_v18  ;;  %v5478_v1 = vld [vmem:[%s10189_s3 + $0x550] sm:$0xff]  ;;  %v6825_v19 = vcombine.low %v5470_v34, %v5474_v33  ;;  %v5487_v33 = vld [vmem:[%s10189_s3 + $0x598] sm:$0xff] }
  0x6b   :  { %v5491_v34 = vld [vmem:[%s10189_s3 + $0x5b8] sm:$0xff]  ;;  %v6851_v18 = vcombine.low %v5479_v23, %v5483_v22 }
  0x6c   :  { %10828 = vst [vmem:[#allocation87_spill] sm:$0xff] %v6807_v11  ;;  %10829 = vst [vmem:[#allocation88_spill] sm:$0xff] %v6809_v32 }
  0x6d   :  { %1622 = vmatpush1.bf16.msra.mxu0 %v6777_v21  ;;  %1663 = vmatpush1.bf16.msra.mxu1 %v6779_v58  ;;  %v5482_v58 = vld [vmem:[%s10189_s3 + $0x570] sm:$0xff]  ;;  %10830 = vst [vmem:[#allocation89_spill] sm:$0xff] %v6825_v19  ;;  %10835 = vst [vmem:[#allocation94_spill] sm:$0xff] %v6851_v18 }
  0x6e   :  { %1623 = vmatprep.subr.bf16.mxu0 %v6783_v0  ;;  %1664 = vmatprep.subr.bf16.mxu1 %v6785_v63  ;;  %v6831_v63 = vcombine.high %v5478_v1, %v5482_v58  ;;  %v6833_v0 = vcombine.high %v5479_v23, %v5483_v22  ;;  %v5486_v21 = vld [vmem:[%s10189_s3 + $0x590] sm:$0xff]  ;;  %v6849_v42 = vcombine.low %v5478_v1, %v5482_v58  ;;  %v5495_v1 = vld [vmem:[%s10189_s3 + $0x5d8] sm:$0xff] }
  0x6f   :  { %v5499_v58 = vld [vmem:[%s10189_s3 + $0x5f8] sm:$0xff]  ;;  %v6875_v22 = vcombine.low %v5487_v33, %v5491_v34 }
  0x70   :  { %10832 = vst [vmem:[#allocation91_spill] sm:$0xff] %v6831_v63  ;;  %10833 = vst [vmem:[#allocation92_spill] sm:$0xff] %v6833_v0 }
  0x71   :  { %1624 = vmatpush1.bf16.msra.mxu0 %v6801_v48  ;;  %1665 = vmatpush1.bf16.msra.mxu1 %v6803_v20  ;;  %v5490_v20 = vld [vmem:[%s10189_s3 + $0x5b0] sm:$0xff]  ;;  %10834 = vst [vmem:[#allocation93_spill] sm:$0xff] %v6849_v42  ;;  %10839 = vst [vmem:[#allocation98_spill] sm:$0xff] %v6875_v22 }
  0x72   :  { %1625 = vmatprep.subr.bf16.mxu0 %v6807_v11  ;;  %1666 = vmatprep.subr.bf16.mxu1 %v6809_v32  ;;  %v6855_v32 = vcombine.high %v5486_v21, %v5490_v20  ;;  %v6857_v11 = vcombine.high %v5487_v33, %v5491_v34  ;;  %v5494_v48 = vld [vmem:[%s10189_s3 + $0x5d0] sm:$0xff]  ;;  %v6873_v23 = vcombine.low %v5486_v21, %v5490_v20  ;;  %v5503_v21 = vld [vmem:[%s10189_s3 + $0x618] sm:$0xff] }
  0x73   :  { %v5507_v20 = vld [vmem:[%s10189_s3 + $0x638] sm:$0xff]  ;;  %v6899_v34 = vcombine.low %v5495_v1, %v5499_v58 }
  0x74   :  { %10836 = vst [vmem:[#allocation95_spill] sm:$0xff] %v6855_v32  ;;  %10837 = vst [vmem:[#allocation96_spill] sm:$0xff] %v6857_v11 }
  0x75   :  { %1626 = vmatpush1.bf16.msra.mxu0 %v6825_v19  ;;  %1667 = vmatpush1.bf16.msra.mxu1 %v6827_v47  ;;  %v5498_v47 = vld [vmem:[%s10189_s3 + $0x5f0] sm:$0xff]  ;;  %10838 = vst [vmem:[#allocation97_spill] sm:$0xff] %v6873_v23  ;;  %10843 = vst [vmem:[#allocation102_spill] sm:$0xff] %v6899_v34 }
  0x76   :  { %1627 = vmatprep.subr.bf16.mxu0 %v6831_v63  ;;  %1668 = vmatprep.subr.bf16.mxu1 %v6833_v0  ;;  %v6879_v0 = vcombine.high %v5494_v48, %v5498_v47  ;;  %v6881_v63 = vcombine.high %v5495_v1, %v5499_v58  ;;  %v5502_v19 = vld [vmem:[%s10189_s3 + $0x610] sm:$0xff]  ;;  %v6897_v33 = vcombine.low %v5494_v48, %v5498_v47  ;;  %v5511_v48 = vld [vmem:[%s10189_s3 + $0x658] sm:$0xff] }
  0x77   :  { %v5515_v47 = vld [vmem:[%s10189_s3 + $0x678] sm:$0xff]  ;;  %v6923_v58 = vcombine.low %v5503_v21, %v5507_v20 }
  0x78   :  { %10840 = vst [vmem:[#allocation99_spill] sm:$0xff] %v6879_v0  ;;  %10841 = vst [vmem:[#allocation100_spill] sm:$0xff] %v6881_v63 }
  0x79   :  { %1628 = vmatpush1.bf16.msra.mxu0 %v6849_v42  ;;  %1669 = vmatpush1.bf16.msra.mxu1 %v6851_v18  ;;  %v5506_v18 = vld [vmem:[%s10189_s3 + $0x630] sm:$0xff]  ;;  %10842 = vst [vmem:[#allocation101_spill] sm:$0xff] %v6897_v33  ;;  %10847 = vst [vmem:[#allocation106_spill] sm:$0xff] %v6923_v58 }
  0x7a   :  { %1629 = vmatprep.subr.bf16.mxu0 %v6855_v32  ;;  %1670 = vmatprep.subr.bf16.mxu1 %v6857_v11  ;;  %v6903_v11 = vcombine.high %v5502_v19, %v5506_v18  ;;  %v6905_v32 = vcombine.high %v5503_v21, %v5507_v20  ;;  %v5510_v42 = vld [vmem:[%s10189_s3 + $0x650] sm:$0xff]  ;;  %v6921_v1 = vcombine.low %v5502_v19, %v5506_v18  ;;  %v5519_v19 = vld [vmem:[%s10189_s3 + $0x698] sm:$0xff] }
  0x7b   :  { %v5523_v18 = vld [vmem:[%s10189_s3 + $0x6b8] sm:$0xff]  ;;  %v6947_v20 = vcombine.low %v5511_v48, %v5515_v47 }
  0x7c   :  { %10844 = vst [vmem:[#allocation103_spill] sm:$0xff] %v6903_v11  ;;  %10845 = vst [vmem:[#allocation104_spill] sm:$0xff] %v6905_v32 }
  0x7d   :  { %1630 = vmatpush1.bf16.msra.mxu0 %v6873_v23  ;;  %1671 = vmatpush1.bf16.msra.mxu1 %v6875_v22  ;;  %v5514_v22 = vld [vmem:[%s10189_s3 + $0x670] sm:$0xff]  ;;  %10846 = vst [vmem:[#allocation105_spill] sm:$0xff] %v6921_v1  ;;  %10851 = vst [vmem:[#allocation110_spill] sm:$0xff] %v6947_v20 }
  0x7e   :  { %1631 = vmatprep.subr.bf16.mxu0 %v6879_v0  ;;  %1672 = vmatprep.subr.bf16.mxu1 %v6881_v63  ;;  %v6927_v63 = vcombine.high %v5510_v42, %v5514_v22  ;;  %v6929_v0 = vcombine.high %v5511_v48, %v5515_v47  ;;  %v5518_v23 = vld [vmem:[%s10189_s3 + $0x690] sm:$0xff]  ;;  %v6945_v21 = vcombine.low %v5510_v42, %v5514_v22  ;;  %v5527_v42 = vld [vmem:[%s10189_s3 + $0x6d8] sm:$0xff] }
  0x7f   :  { %v5531_v22 = vld [vmem:[%s10189_s3 + $0x6f8] sm:$0xff]  ;;  %v6971_v47 = vcombine.low %v5519_v19, %v5523_v18 }
  0x80   :  { %10848 = vst [vmem:[#allocation107_spill] sm:$0xff] %v6927_v63  ;;  %10849 = vst [vmem:[#allocation108_spill] sm:$0xff] %v6929_v0 }
  0x81   :  { %1632 = vmatpush1.bf16.msra.mxu0 %v6897_v33  ;;  %1673 = vmatpush1.bf16.msra.mxu1 %v6899_v34  ;;  %v5522_v34 = vld [vmem:[%s10189_s3 + $0x6b0] sm:$0xff]  ;;  %10850 = vst [vmem:[#allocation109_spill] sm:$0xff] %v6945_v21  ;;  %10855 = vst [vmem:[#allocation114_spill] sm:$0xff] %v6971_v47 }
  0x82   :  { %1633 = vmatprep.subr.bf16.mxu0 %v6903_v11  ;;  %1674 = vmatprep.subr.bf16.mxu1 %v6905_v32  ;;  %v6951_v32 = vcombine.high %v5518_v23, %v5522_v34  ;;  %v6953_v11 = vcombine.high %v5519_v19, %v5523_v18  ;;  %v5526_v33 = vld [vmem:[%s10189_s3 + $0x6d0] sm:$0xff]  ;;  %v6969_v48 = vcombine.low %v5518_v23, %v5522_v34  ;;  %v5535_v23 = vld [vmem:[%s10189_s3 + $0x718] sm:$0xff] }
  0x83   :  { %v5539_v34 = vld [vmem:[%s10189_s3 + $0x738] sm:$0xff]  ;;  %v6995_v18 = vcombine.low %v5527_v42, %v5531_v22 }
  0x84   :  { %10852 = vst [vmem:[#allocation111_spill] sm:$0xff] %v6951_v32  ;;  %10853 = vst [vmem:[#allocation112_spill] sm:$0xff] %v6953_v11 }
  0x85   :  { %1634 = vmatpush1.bf16.msra.mxu0 %v6921_v1  ;;  %1675 = vmatpush1.bf16.msra.mxu1 %v6923_v58  ;;  %v5530_v58 = vld [vmem:[%s10189_s3 + $0x6f0] sm:$0xff]  ;;  %10854 = vst [vmem:[#allocation113_spill] sm:$0xff] %v6969_v48  ;;  %10859 = vst [vmem:[#allocation118_spill] sm:$0xff] %v6995_v18 }
  0x86   :  { %1635 = vmatprep.subr.bf16.mxu0 %v6927_v63  ;;  %1676 = vmatprep.subr.bf16.mxu1 %v6929_v0  ;;  %v6975_v0 = vcombine.high %v5526_v33, %v5530_v58  ;;  %v6977_v63 = vcombine.high %v5527_v42, %v5531_v22  ;;  %v5534_v1 = vld [vmem:[%s10189_s3 + $0x710] sm:$0xff]  ;;  %v6993_v19 = vcombine.low %v5526_v33, %v5530_v58  ;;  %v5543_v33 = vld [vmem:[%s10189_s3 + $0x758] sm:$0xff] }
  0x87   :  { %v5547_v58 = vld [vmem:[%s10189_s3 + $0x778] sm:$0xff]  ;;  %v7019_v22 = vcombine.low %v5535_v23, %v5539_v34 }
  0x88   :  { %10856 = vst [vmem:[#allocation115_spill] sm:$0xff] %v6975_v0  ;;  %10857 = vst [vmem:[#allocation116_spill] sm:$0xff] %v6977_v63 }
  0x89   :  { %1636 = vmatpush1.bf16.msra.mxu0 %v6945_v21  ;;  %1677 = vmatpush1.bf16.msra.mxu1 %v6947_v20  ;;  %v5538_v20 = vld [vmem:[%s10189_s3 + $0x730] sm:$0xff]  ;;  %10858 = vst [vmem:[#allocation117_spill] sm:$0xff] %v6993_v19  ;;  %10863 = vst [vmem:[#allocation122_spill] sm:$0xff] %v7019_v22 }
  0x8a   :  { %1637 = vmatprep.subr.bf16.mxu0 %v6951_v32  ;;  %1678 = vmatprep.subr.bf16.mxu1 %v6953_v11  ;;  %v6999_v11 = vcombine.high %v5534_v1, %v5538_v20  ;;  %v7001_v32 = vcombine.high %v5535_v23, %v5539_v34  ;;  %v5542_v21 = vld [vmem:[%s10189_s3 + $0x750] sm:$0xff]  ;;  %v7017_v42 = vcombine.low %v5534_v1, %v5538_v20  ;;  %v5551_v1 = vld [vmem:[%s10189_s3 + $0x798] sm:$0xff] }
  0x8b   :  { %v5555_v20 = vld [vmem:[%s10189_s3 + $0x7b8] sm:$0xff]  ;;  %v7043_v34 = vcombine.low %v5543_v33, %v5547_v58 }
  0x8c   :  { %10860 = vst [vmem:[#allocation119_spill] sm:$0xff] %v6999_v11  ;;  %10861 = vst [vmem:[#allocation120_spill] sm:$0xff] %v7001_v32 }
  0x8d   :  { %1638 = vmatpush1.bf16.msra.mxu0 %v6969_v48  ;;  %1679 = vmatpush1.bf16.msra.mxu1 %v6971_v47  ;;  %v5546_v47 = vld [vmem:[%s10189_s3 + $0x770] sm:$0xff]  ;;  %10862 = vst [vmem:[#allocation121_spill] sm:$0xff] %v7017_v42  ;;  %10867 = vst [vmem:[#allocation126_spill] sm:$0xff] %v7043_v34 }
  0x8e   :  { %1639 = vmatprep.subr.bf16.mxu0 %v6975_v0  ;;  %1680 = vmatprep.subr.bf16.mxu1 %v6977_v63  ;;  %v7023_v63 = vcombine.high %v5542_v21, %v5546_v47  ;;  %v7025_v0 = vcombine.high %v5543_v33, %v5547_v58  ;;  %v5550_v48 = vld [vmem:[%s10189_s3 + $0x790] sm:$0xff]  ;;  %v7041_v23 = vcombine.low %v5542_v21, %v5546_v47  ;;  %v5559_v21 = vld [vmem:[%s10189_s3 + $0x7d8] sm:$0xff] }
  0x8f   :  { %v5563_v47 = vld [vmem:[%s10189_s3 + $0x7f8] sm:$0xff]  ;;  %v7067_v58 = vcombine.low %v5551_v1, %v5555_v20 }
  0x90   :  { %10864 = vst [vmem:[#allocation123_spill] sm:$0xff] %v7023_v63  ;;  %10865 = vst [vmem:[#allocation124_spill] sm:$0xff] %v7025_v0 }
  0x91   :  { %1640 = vmatpush1.bf16.msra.mxu0 %v6993_v19  ;;  %1681 = vmatpush1.bf16.msra.mxu1 %v6995_v18  ;;  %v5554_v18 = vld [vmem:[%s10189_s3 + $0x7b0] sm:$0xff]  ;;  %10866 = vst [vmem:[#allocation125_spill] sm:$0xff] %v7041_v23  ;;  %10871 = vst [vmem:[#allocation130_spill] sm:$0xff] %v7067_v58 }
  0x92   :  { %1641 = vmatprep.subr.bf16.mxu0 %v6999_v11  ;;  %1682 = vmatprep.subr.bf16.mxu1 %v7001_v32  ;;  %v7047_v32 = vcombine.high %v5550_v48, %v5554_v18  ;;  %v7049_v11 = vcombine.high %v5551_v1, %v5555_v20  ;;  %v5558_v19 = vld [vmem:[%s10189_s3 + $0x7d0] sm:$0xff]  ;;  %v7065_v33 = vcombine.low %v5550_v48, %v5554_v18  ;;  %v633_v48 = vld [vmem:[%s10189_s3 + $0x8] sm:$0xff] }
  0x93   :  { %v637_v18 = vld [vmem:[%s10189_s3 + $0x28] sm:$0xff]  ;;  %v7091_v20 = vcombine.low %v5559_v21, %v5563_v47 }
  0x94   :  { %10868 = vst [vmem:[#allocation127_spill] sm:$0xff] %v7047_v32  ;;  %10869 = vst [vmem:[#allocation128_spill] sm:$0xff] %v7049_v11 }
  0x95   :  { %1642 = vmatpush1.bf16.msra.mxu0 %v7017_v42  ;;  %1683 = vmatpush1.bf16.msra.mxu1 %v7019_v22  ;;  %v5562_v22 = vld [vmem:[%s10189_s3 + $0x7f0] sm:$0xff]  ;;  %10870 = vst [vmem:[#allocation129_spill] sm:$0xff] %v7065_v33  ;;  %v632_v42 = vld [vmem:[%s10189_s3] sm:$0xff]  ;;  %10875 = vst [vmem:[#allocation134_spill] sm:$0xff] %v7091_v20 }
  0x96   :  { %1643 = vmatprep.subr.bf16.mxu0 %v7023_v63  ;;  %1684 = vmatprep.subr.bf16.mxu1 %v7025_v0  ;;  %v7071_v0 = vcombine.high %v5558_v19, %v5562_v22  ;;  %v7073_v63 = vcombine.high %v5559_v21, %v5563_v47  ;;  %v7089_v1 = vcombine.low %v5558_v19, %v5562_v22  ;;  %v641_v19 = vld [vmem:[%s10189_s3 + $0x48] sm:$0xff] }
  0x97   :  { %v645_v22 = vld [vmem:[%s10189_s3 + $0x68] sm:$0xff]  ;;  %v7115_v47 = vcombine.low %v633_v48, %v637_v18 }
  0x98   :  { %10872 = vst [vmem:[#allocation131_spill] sm:$0xff] %v7071_v0  ;;  %10873 = vst [vmem:[#allocation132_spill] sm:$0xff] %v7073_v63 }
  0x99   :  { %1644 = vmatpush1.bf16.msra.mxu0 %v7041_v23  ;;  %1685 = vmatpush1.bf16.msra.mxu1 %v7043_v34  ;;  %v636_v34 = vld [vmem:[%s10189_s3 + $0x20] sm:$0xff]  ;;  %10874 = vst [vmem:[#allocation133_spill] sm:$0xff] %v7089_v1  ;;  %10879 = vst [vmem:[#allocation138_spill] sm:$0xff] %v7115_v47 }
  0x9a   :  { %1645 = vmatprep.subr.bf16.mxu0 %v7047_v32  ;;  %1686 = vmatprep.subr.bf16.mxu1 %v7049_v11  ;;  %v7095_v11 = vcombine.high %v632_v42, %v636_v34  ;;  %v7097_v32 = vcombine.high %v633_v48, %v637_v18  ;;  %v640_v23 = vld [vmem:[%s10189_s3 + $0x40] sm:$0xff]  ;;  %v7113_v21 = vcombine.low %v632_v42, %v636_v34  ;;  %v649_v42 = vld [vmem:[%s10189_s3 + $0x88] sm:$0xff] }
  0x9b   :  { %v653_v34 = vld [vmem:[%s10189_s3 + $0xa8] sm:$0xff]  ;;  %v7141_v18 = vcombine.low %v641_v19, %v645_v22 }
  0x9c   :  { %10876 = vst [vmem:[#allocation135_spill] sm:$0xff] %v7095_v11  ;;  %10877 = vst [vmem:[#allocation136_spill] sm:$0xff] %v7097_v32 }
  0x9d   :  { %1646 = vmatpush1.bf16.msra.mxu0 %v7065_v33  ;;  %1687 = vmatpush1.bf16.msra.mxu1 %v7067_v58  ;;  %v644_v58 = vld [vmem:[%s10189_s3 + $0x60] sm:$0xff]  ;;  %10878 = vst [vmem:[#allocation137_spill] sm:$0xff] %v7113_v21  ;;  %10883 = vst [vmem:[#allocation142_spill] sm:$0xff] %v7141_v18 }
  0x9e   :  { %1647 = vmatprep.subr.bf16.mxu0 %v7071_v0  ;;  %1688 = vmatprep.subr.bf16.mxu1 %v7073_v63  ;;  %v7119_v63 = vcombine.high %v640_v23, %v644_v58  ;;  %v7121_v0 = vcombine.high %v641_v19, %v645_v22  ;;  %v648_v33 = vld [vmem:[%s10189_s3 + $0x80] sm:$0xff]  ;;  %v7139_v48 = vcombine.low %v640_v23, %v644_v58  ;;  %v657_v23 = vld [vmem:[%s10189_s3 + $0xc8] sm:$0xff] }
  0x9f   :  { %v661_v58 = vld [vmem:[%s10189_s3 + $0xe8] sm:$0xff]  ;;  %v7167_v22 = vcombine.low %v649_v42, %v653_v34 }
  0xa0   :  { %10880 = vst [vmem:[#allocation139_spill] sm:$0xff] %v7119_v63  ;;  %10881 = vst [vmem:[#allocation140_spill] sm:$0xff] %v7121_v0 }
  0xa1   :  { %1648 = vmatpush1.bf16.msra.mxu0 %v7089_v1  ;;  %1689 = vmatpush1.bf16.msra.mxu1 %v7091_v20  ;;  %v652_v20 = vld [vmem:[%s10189_s3 + $0xa0] sm:$0xff]  ;;  %10882 = vst [vmem:[#allocation141_spill] sm:$0xff] %v7139_v48  ;;  %10887 = vst [vmem:[#allocation146_spill] sm:$0xff] %v7167_v22 }
  0xa2   :  { %2339 = vmatprep.subr.bf16.mxu0 %v7095_v11  ;;  %2380 = vmatprep.subr.bf16.mxu1 %v7097_v32  ;;  %v7145_v32 = vcombine.high %v648_v33, %v652_v20  ;;  %v7147_v11 = vcombine.high %v649_v42, %v653_v34  ;;  %v656_v1 = vld [vmem:[%s10189_s3 + $0xc0] sm:$0xff]  ;;  %v7165_v19 = vcombine.low %v648_v33, %v652_v20  ;;  %v665_v33 = vld [vmem:[%s10189_s3 + $0x108] sm:$0xff] }
  0xa3   :  { %v669_v20 = vld [vmem:[%s10189_s3 + $0x128] sm:$0xff]  ;;  %v7191_v34 = vcombine.low %v657_v23, %v661_v58 }
  0xa4   :  { %1650 = vmatmul.mubr.bf16.vlgmr.msra.gmra.mrb[36].mxu0 %v10817_v49  ;;  %1691 = vmatmul.mubr.bf16.vlgmr.msra.gmra.mrb[36].mxu1 %v10817_v49  ;;  %10884 = vst [vmem:[#allocation143_spill] sm:$0xff] %v7145_v32  ;;  %10885 = vst [vmem:[#allocation144_spill] sm:$0xff] %v7147_v11 }
  0xa5   :  { %2340 = vmatpush1.bf16.msra.mxu0 %v7113_v21  ;;  %2381 = vmatpush1.bf16.msra.mxu1 %v7115_v47  ;;  %v660_v47 = vld [vmem:[%s10189_s3 + $0xe0] sm:$0xff]  ;;  %10886 = vst [vmem:[#allocation145_spill] sm:$0xff] %v7165_v19  ;;  %10891 = vst [vmem:[#allocation150_spill] sm:$0xff] %v7191_v34 }
  0xa6   :  { %2341 = vmatprep.subr.bf16.mxu0 %v7119_v63  ;;  %2382 = vmatprep.subr.bf16.mxu1 %v7121_v0  ;;  %v7171_v0 = vcombine.high %v656_v1, %v660_v47  ;;  %v7173_v63 = vcombine.high %v657_v23, %v661_v58  ;;  %v664_v21 = vld [vmem:[%s10189_s3 + $0x100] sm:$0xff]  ;;  %v7189_v42 = vcombine.low %v656_v1, %v660_v47  ;;  %v673_v1 = vld [vmem:[%s10189_s3 + $0x148] sm:$0xff] }
  0xa7   :  { %2371 = vmatprep.mubr.bf16.mxu0 %v10817_v49  ;;  %2412 = vmatprep.mubr.bf16.mxu1 %v10817_v49  ;;  %v677_v47 = vld [vmem:[%s10189_s3 + $0x168] sm:$0xff]  ;;  %v7215_v58 = vcombine.low %v665_v33, %v669_v20 }
  0xa8   :  { %10888 = vst [vmem:[#allocation147_spill] sm:$0xff] %v7171_v0  ;;  %10889 = vst [vmem:[#allocation148_spill] sm:$0xff] %v7173_v63 }
  0xa9   :  { %2342 = vmatpush1.bf16.msra.mxu0 %v7139_v48  ;;  %2383 = vmatpush1.bf16.msra.mxu1 %v7141_v18  ;;  %v668_v18 = vld [vmem:[%s10189_s3 + $0x120] sm:$0xff]  ;;  %10890 = vst [vmem:[#allocation149_spill] sm:$0xff] %v7189_v42  ;;  %10895 = vst [vmem:[#allocation154_spill] sm:$0xff] %v7215_v58 }
  0xaa   :  { %2343 = vmatprep.subr.bf16.mxu0 %v7145_v32  ;;  %2384 = vmatprep.subr.bf16.mxu1 %v7147_v11  ;;  %v7195_v11 = vcombine.high %v664_v21, %v668_v18  ;;  %v7197_v32 = vcombine.high %v665_v33, %v669_v20  ;;  %v672_v48 = vld [vmem:[%s10189_s3 + $0x140] sm:$0xff]  ;;  %v7213_v23 = vcombine.low %v664_v21, %v668_v18  ;;  %v681_v21 = vld [vmem:[%s10189_s3 + $0x188] sm:$0xff] }
  0xab   :  { %v685_v18 = vld [vmem:[%s10189_s3 + $0x1a8] sm:$0xff]  ;;  %v7239_v20 = vcombine.low %v673_v1, %v677_v47 }
  0xac   :  { %10892 = vst [vmem:[#allocation151_spill] sm:$0xff] %v7195_v11  ;;  %10893 = vst [vmem:[#allocation152_spill] sm:$0xff] %v7197_v32 }
  0xad   :  { %2344 = vmatpush1.bf16.msra.mxu0 %v7165_v19  ;;  %2385 = vmatpush1.bf16.msra.mxu1 %v7167_v22  ;;  %v676_v22 = vld [vmem:[%s10189_s3 + $0x160] sm:$0xff]  ;;  %10894 = vst [vmem:[#allocation153_spill] sm:$0xff] %v7213_v23  ;;  %10899 = vst [vmem:[#allocation158_spill] sm:$0xff] %v7239_v20 }
  0xae   :  { %2345 = vmatprep.subr.bf16.mxu0 %v7171_v0  ;;  %2386 = vmatprep.subr.bf16.mxu1 %v7173_v63  ;;  %v7219_v63 = vcombine.high %v672_v48, %v676_v22  ;;  %v7221_v0 = vcombine.high %v673_v1, %v677_v47  ;;  %v680_v19 = vld [vmem:[%s10189_s3 + $0x180] sm:$0xff]  ;;  %v7237_v33 = vcombine.low %v672_v48, %v676_v22  ;;  %v689_v48 = vld [vmem:[%s10189_s3 + $0x1c8] sm:$0xff] }
  0xaf   :  { %v693_v22 = vld [vmem:[%s10189_s3 + $0x1e8] sm:$0xff]  ;;  %v7263_v47 = vcombine.low %v681_v21, %v685_v18 }
  0xb0   :  { %10896 = vst [vmem:[#allocation155_spill] sm:$0xff] %v7219_v63  ;;  %10897 = vst [vmem:[#allocation156_spill] sm:$0xff] %v7221_v0 }
  0xb1   :  { %2346 = vmatpush1.bf16.msra.mxu0 %v7189_v42  ;;  %2387 = vmatpush1.bf16.msra.mxu1 %v7191_v34  ;;  %v684_v34 = vld [vmem:[%s10189_s3 + $0x1a0] sm:$0xff]  ;;  %10898 = vst [vmem:[#allocation157_spill] sm:$0xff] %v7237_v33  ;;  %10903 = vst [vmem:[#allocation162_spill] sm:$0xff] %v7263_v47 }
  0xb2   :  { %2347 = vmatprep.subr.bf16.mxu0 %v7195_v11  ;;  %2388 = vmatprep.subr.bf16.mxu1 %v7197_v32  ;;  %v7243_v32 = vcombine.high %v680_v19, %v684_v34  ;;  %v7245_v11 = vcombine.high %v681_v21, %v685_v18  ;;  %v688_v42 = vld [vmem:[%s10189_s3 + $0x1c0] sm:$0xff]  ;;  %v7261_v1 = vcombine.low %v680_v19, %v684_v34  ;;  %v697_v19 = vld [vmem:[%s10189_s3 + $0x208] sm:$0xff] }
  0xb3   :  { %v701_v34 = vld [vmem:[%s10189_s3 + $0x228] sm:$0xff]  ;;  %v7287_v18 = vcombine.low %v689_v48, %v693_v22 }
  0xb4   :  { %10900 = vst [vmem:[#allocation159_spill] sm:$0xff] %v7243_v32  ;;  %10901 = vst [vmem:[#allocation160_spill] sm:$0xff] %v7245_v11 }
  0xb5   :  { %2348 = vmatpush1.bf16.msra.mxu0 %v7213_v23  ;;  %2389 = vmatpush1.bf16.msra.mxu1 %v7215_v58  ;;  %v692_v58 = vld [vmem:[%s10189_s3 + $0x1e0] sm:$0xff]  ;;  %10902 = vst [vmem:[#allocation161_spill] sm:$0xff] %v7261_v1  ;;  %10907 = vst [vmem:[#allocation166_spill] sm:$0xff] %v7287_v18 }
  0xb6   :  { %2349 = vmatprep.subr.bf16.mxu0 %v7219_v63  ;;  %2390 = vmatprep.subr.bf16.mxu1 %v7221_v0  ;;  %v7267_v0 = vcombine.high %v688_v42, %v692_v58  ;;  %v7269_v63 = vcombine.high %v689_v48, %v693_v22  ;;  %v696_v23 = vld [vmem:[%s10189_s3 + $0x200] sm:$0xff]  ;;  %v7285_v21 = vcombine.low %v688_v42, %v692_v58  ;;  %v705_v42 = vld [vmem:[%s10189_s3 + $0x248] sm:$0xff] }
  0xb7   :  { %v709_v58 = vld [vmem:[%s10189_s3 + $0x268] sm:$0xff]  ;;  %v7311_v22 = vcombine.low %v697_v19, %v701_v34 }
  0xb8   :  { %10904 = vst [vmem:[#allocation163_spill] sm:$0xff] %v7267_v0  ;;  %10905 = vst [vmem:[#allocation164_spill] sm:$0xff] %v7269_v63 }
  0xb9   :  { %2350 = vmatpush1.bf16.msra.mxu0 %v7237_v33  ;;  %2391 = vmatpush1.bf16.msra.mxu1 %v7239_v20  ;;  %v700_v20 = vld [vmem:[%s10189_s3 + $0x220] sm:$0xff]  ;;  %10906 = vst [vmem:[#allocation165_spill] sm:$0xff] %v7285_v21  ;;  %10911 = vst [vmem:[#allocation170_spill] sm:$0xff] %v7311_v22 }
  0xba   :  { %2351 = vmatprep.subr.bf16.mxu0 %v7243_v32  ;;  %2392 = vmatprep.subr.bf16.mxu1 %v7245_v11  ;;  %v7291_v11 = vcombine.high %v696_v23, %v700_v20  ;;  %v7293_v32 = vcombine.high %v697_v19, %v701_v34  ;;  %v704_v33 = vld [vmem:[%s10189_s3 + $0x240] sm:$0xff]  ;;  %v7309_v48 = vcombine.low %v696_v23, %v700_v20  ;;  %v713_v23 = vld [vmem:[%s10189_s3 + $0x288] sm:$0xff] }
  0xbb   :  { %v717_v20 = vld [vmem:[%s10189_s3 + $0x2a8] sm:$0xff]  ;;  %v7335_v34 = vcombine.low %v705_v42, %v709_v58 }
  0xbc   :  { %10908 = vst [vmem:[#allocation167_spill] sm:$0xff] %v7291_v11  ;;  %10909 = vst [vmem:[#allocation168_spill] sm:$0xff] %v7293_v32 }
  0xbd   :  { %2352 = vmatpush1.bf16.msra.mxu0 %v7261_v1  ;;  %2393 = vmatpush1.bf16.msra.mxu1 %v7263_v47  ;;  %v708_v47 = vld [vmem:[%s10189_s3 + $0x260] sm:$0xff]  ;;  %10910 = vst [vmem:[#allocation169_spill] sm:$0xff] %v7309_v48  ;;  %10915 = vst [vmem:[#allocation174_spill] sm:$0xff] %v7335_v34 }
  0xbe   :  { %2353 = vmatprep.subr.bf16.mxu0 %v7267_v0  ;;  %2394 = vmatprep.subr.bf16.mxu1 %v7269_v63  ;;  %v7315_v63 = vcombine.high %v704_v33, %v708_v47  ;;  %v7317_v0 = vcombine.high %v705_v42, %v709_v58  ;;  %v712_v1 = vld [vmem:[%s10189_s3 + $0x280] sm:$0xff]  ;;  %v7333_v19 = vcombine.low %v704_v33, %v708_v47  ;;  %v721_v33 = vld [vmem:[%s10189_s3 + $0x2c8] sm:$0xff] }
  0xbf   :  { %v725_v47 = vld [vmem:[%s10189_s3 + $0x2e8] sm:$0xff]  ;;  %v7359_v58 = vcombine.low %v713_v23, %v717_v20 }
  0xc0   :  { %10912 = vst [vmem:[#allocation171_spill] sm:$0xff] %v7315_v63  ;;  %10913 = vst [vmem:[#allocation172_spill] sm:$0xff] %v7317_v0 }
  0xc1   :  { %2354 = vmatpush1.bf16.msra.mxu0 %v7285_v21  ;;  %2395 = vmatpush1.bf16.msra.mxu1 %v7287_v18  ;;  %v716_v18 = vld [vmem:[%s10189_s3 + $0x2a0] sm:$0xff]  ;;  %10914 = vst [vmem:[#allocation173_spill] sm:$0xff] %v7333_v19  ;;  %10919 = vst [vmem:[#allocation178_spill] sm:$0xff] %v7359_v58 }
  0xc2   :  { %2355 = vmatprep.subr.bf16.mxu0 %v7291_v11  ;;  %2396 = vmatprep.subr.bf16.mxu1 %v7293_v32  ;;  %v7339_v32 = vcombine.high %v712_v1, %v716_v18  ;;  %v7341_v11 = vcombine.high %v713_v23, %v717_v20  ;;  %v720_v21 = vld [vmem:[%s10189_s3 + $0x2c0] sm:$0xff]  ;;  %v7357_v42 = vcombine.low %v712_v1, %v716_v18  ;;  %v729_v1 = vld [vmem:[%s10189_s3 + $0x308] sm:$0xff] }
  0xc3   :  { %v733_v18 = vld [vmem:[%s10189_s3 + $0x328] sm:$0xff]  ;;  %v7383_v20 = vcombine.low %v721_v33, %v725_v47 }
  0xc4   :  { %10916 = vst [vmem:[#allocation175_spill] sm:$0xff] %v7339_v32  ;;  %10917 = vst [vmem:[#allocation176_spill] sm:$0xff] %v7341_v11 }
  0xc5   :  { %2356 = vmatpush1.bf16.msra.mxu0 %v7309_v48  ;;  %2397 = vmatpush1.bf16.msra.mxu1 %v7311_v22  ;;  %v724_v22 = vld [vmem:[%s10189_s3 + $0x2e0] sm:$0xff]  ;;  %10918 = vst [vmem:[#allocation177_spill] sm:$0xff] %v7357_v42  ;;  %10923 = vst [vmem:[#allocation182_spill] sm:$0xff] %v7383_v20 }
  0xc6   :  { %2357 = vmatprep.subr.bf16.mxu0 %v7315_v63  ;;  %2398 = vmatprep.subr.bf16.mxu1 %v7317_v0  ;;  %v7363_v0 = vcombine.high %v720_v21, %v724_v22  ;;  %v7365_v63 = vcombine.high %v721_v33, %v725_v47  ;;  %v728_v48 = vld [vmem:[%s10189_s3 + $0x300] sm:$0xff]  ;;  %v7381_v23 = vcombine.low %v720_v21, %v724_v22  ;;  %v737_v22 = vld [vmem:[%s10189_s3 + $0x348] sm:$0xff] }
  0xc7   :  { %v740_v21 = vld [vmem:[%s10189_s3 + $0x360] sm:$0xff]  ;;  %v741_v33 = vld [vmem:[%s10189_s3 + $0x368] sm:$0xff] }
  0xc8   :  { %10920 = vst [vmem:[#allocation179_spill] sm:$0xff] %v7363_v0  ;;  %10921 = vst [vmem:[#allocation180_spill] sm:$0xff] %v7365_v63 }
  0xc9   :  { %2358 = vmatpush1.bf16.msra.mxu0 %v7333_v19  ;;  %2399 = vmatpush1.bf16.msra.mxu1 %v7335_v34  ;;  %v732_v34 = vld [vmem:[%s10189_s3 + $0x320] sm:$0xff]  ;;  %10922 = vst [vmem:[#allocation181_spill] sm:$0xff] %v7381_v23  ;;  %v7389_v19 = vcombine.high %v729_v1, %v733_v18 }
  0xca   :  { %2359 = vmatprep.subr.bf16.mxu0 %v7339_v32  ;;  %2400 = vmatprep.subr.bf16.mxu1 %v7341_v11  ;;  %v7387_v32 = vcombine.high %v728_v48, %v732_v34  ;;  %v7405_v47 = vcombine.low %v728_v48, %v732_v34  ;;  %v7407_v11 = vcombine.low %v729_v1, %v733_v18  ;;  %v748_v48 = vld [vmem:[%s10189_s3 + $0x3a0] sm:$0xff]  ;;  %v745_v34 = vld [vmem:[%s10189_s3 + $0x388] sm:$0xff] }
  0xcb   :  { %10925 = vst [vmem:[#allocation184_spill] sm:$0xff] %v7389_v19  ;;  %v749_v1 = vld [vmem:[%s10189_s3 + $0x3a8] sm:$0xff] }
  0xcc   :  { %10924 = vst [vmem:[#allocation183_spill] sm:$0xff] %v7387_v32  ;;  %10926 = vst [vmem:[#allocation185_spill] sm:$0xff] %v7405_v47  ;;  %v757_v18 = vld [vmem:[%s10189_s3 + $0x3e8] sm:$0xff]  ;;  %v7480_v56 = vcombine.low %v745_v34, %v749_v1 }
  0xcd   :  { %2360 = vmatpush1.bf16.msra.mxu0 %v7357_v42  ;;  %2401 = vmatpush1.bf16.msra.mxu1 %v7359_v58  ;;  %10927 = vst [vmem:[#allocation186_spill] sm:$0xff] %v7407_v11  ;;  %v7414_v58 = vcombine.high %v736_v10, %v740_v21  ;;  %v7416_v42 = vcombine.high %v737_v22, %v741_v33 }
  0xce   :  { %2361 = vmatprep.subr.bf16.mxu0 %v7363_v0  ;;  %2402 = vmatprep.subr.bf16.mxu1 %v7365_v63  ;;  %v10928_v63 = vlaneseq  ;;  %10942 = vst [vmem:[#allocation199_spill] sm:$0xff] %v7480_v56 }
  0xcf   :  { %10930 = vst [vmem:[#allocation188_spill] sm:$0xff] %v7414_v58  ;;  %10931 = vst [vmem:[#allocation189_spill] sm:$0xff] %v7416_v42 }
  0xd0   :  { %v7410_v0 = vshrl.u32 %v10928_v63, 7  ;;  %v7433_v63 = vcombine.low %v736_v10, %v740_v21  ;;  %v752_v10 = vld [vmem:[%s10189_s3 + $0x3c0] sm:$0xff] }
  0xd1   :  { %2362 = vmatpush1.bf16.msra.mxu0 %v7381_v23  ;;  %2403 = vmatpush1.bf16.msra.mxu1 %v7383_v20  ;;  %v744_v23 = vld [vmem:[%s10189_s3 + $0x380] sm:$0xff]  ;;  %v753_v20 = vld [vmem:[%s10189_s3 + $0x3c8] sm:$0xff] }
  0xd2   :  { %10929 = vst [vmem:[#allocation187_spill] sm:$0xff] %v7410_v0  ;;  %2363 = vmatprep.subr.bf16.mxu0 %v7387_v32  ;;  %2404 = vmatprep.subr.bf16.mxu1 %v7389_v19  ;;  %10932 = vst [vmem:[#allocation190_spill] sm:$0xff] %v7433_v63  ;;  %v7435_v19 = vcombine.low %v737_v22, %v741_v33  ;;  %v7440_v32 = vld [vmem:[%s10190_s2] sm:$0xff]  ;;  %v61_v21 = vsub.s32 2, %v7410_v0  ;;  %v7478_v57 = vcombine.low %v744_v23, %v748_v48 }
  0xd3   :  { %v756_v33 = vld [vmem:[%s10189_s3 + $0x3e0] sm:$0xff]  ;;  %v7524_v41 = vcombine.low %v753_v20, %v757_v18 }
  0xd4   :  { %10933 = vst [vmem:[#allocation191_spill] sm:$0xff] %v7435_v19  ;;  %10941 = vst [vmem:[#allocation198_spill] sm:$0xff] %v7478_v57  ;;  %v7514_v55 = vcombine.low %v752_v10, %v756_v33 }
  0xd5   :  { %2364 = vmatpush1.bf16.msra.mxu0 %v7405_v47  ;;  %2405 = vmatpush1.bf16.msra.mxu1 %v7407_v11  ;;  %v7445_v47 = vcombine.high %v744_v23, %v748_v48  ;;  %v7447_v11 = vcombine.high %v745_v34, %v749_v1  ;;  %v10945_v23 = vsub.s32 1, %v7410_v0  ;;  %10951 = vst [vmem:[#allocation207_spill] sm:$0xff] %v7524_v41 }
  0xd6   :  { %2365 = vmatprep.subr.bf16.mxu0 %v7414_v58  ;;  %2406 = vmatprep.subr.bf16.mxu1 %v7416_v42  ;;  %v65_v58 = vsub.s32 3, %v7410_v0  ;;  %10948 = vst [vmem:[#allocation204_spill] sm:$0xff] %v7514_v55 }
  0xd7   :  { %10934 = vst [vmem:[#allocation192_spill] sm:$0xff] %v7445_v47  ;;  %10935 = vst [vmem:[#allocation193_spill] sm:$0xff] %v7447_v11  ;;  %v7453_v22 = vpop.f32.mrb[0].mxu0  ;;  %v7464_v42 = vpop.f32.mrb[0].mxu1  ;;  %v7497_v48 = vrot.slane %v7440_v32, %v10945_v23 }
  0xd8   :  { %10936 = vst [vmem:[#allocation194_spill] sm:$0xff] %v7453_v22  ;;  %10937 = vst [vmem:[#allocation195_spill] sm:$0xff] %v7464_v42  ;;  %v7467_v9 = vpop.f32.mrb[1].mxu0  ;;  %v7469_v8 = vpop.f32.mrb[1].mxu1  ;;  %v10940_v22 = vsub.s32 0, %v7410_v0  ;;  %v7489_v42 = vrot.slane %v7440_v32, %v61_v21  ;;  %v7500_v1 = vrot.slane %v7440_v32, %v65_v58  ;;  %v635_v21 = vld [vmem:[%s10189_s3 + $0x18] sm:$0xff] }
  0xd9   :  { %10938 = vst [vmem:[#allocation196_spill] sm:$0xff] %v7467_v9  ;;  %10939 = vst [vmem:[#allocation197_spill] sm:$0xff] %v7469_v8  ;;  %2366 = vmatpush1.bf16.msra.mxu0 %v7433_v63  ;;  %2407 = vmatpush1.bf16.msra.mxu1 %v7435_v19  ;;  %v7484_v9 = vcombine.high %v752_v10, %v756_v33  ;;  %v7486_v8 = vcombine.high %v753_v20, %v757_v18  ;;  %v646_v20 = vld [vmem:[%s10189_s3 + $0x70] sm:$0xff]  ;;  %v647_v18 = vld [vmem:[%s10189_s3 + $0x78] sm:$0xff] }
  0xda   :  { %v7474_v2 = vrot.slane %v7440_v32, %v10940_v22  ;;  %2367 = vmatprep.subr.bf16.mxu0 %v7445_v47  ;;  %2408 = vmatprep.subr.bf16.mxu1 %v7447_v11  ;;  %v634_v22 = vld [vmem:[%s10189_s3 + $0x10] sm:$0xff]  ;;  %10946 = vst [vmem:[#allocation202_spill] sm:$0xff] %v7500_v1  ;;  %v639_v47 = vld [vmem:[%s10189_s3 + $0x38] sm:$0xff] }
  0xdb   :  { %10943 = vst [vmem:[#allocation200_spill] sm:$0xff] %v7484_v9  ;;  %10944 = vst [vmem:[#allocation201_spill] sm:$0xff] %v7486_v8  ;;  %v188_v34 = vpop.f32.mrb[2].mxu0  ;;  %v638_v11 = vld [vmem:[%s10189_s3 + $0x30] sm:$0xff]  ;;  %v301_v19 = vpop.f32.mrb[2].mxu1 }
  0xdc   :  { %v7512_v23 = vadd.f32 %v188_v34, %v7474_v2  ;;  %v190_v63 = vpop.f32.mrb[3].mxu0  ;;  %v7517_v58 = vadd.f32 %v301_v19, %v7489_v42  ;;  %v303_v50 = vpop.f32.mrb[3].mxu1  ;;  %v7531_v10 = vcombine.high %v634_v22, %v638_v11  ;;  %v7533_v19 = vcombine.high %v635_v21, %v639_v47 }
  0xdd   :  { %v7520_v3 = vadd.f32 %v190_v63, %v7497_v48  ;;  %2368 = vmatpush1.bf16.msra.mxu0 %v7478_v57  ;;  %2409 = vmatpush1.bf16.msra.mxu1 %v7480_v56  ;;  %v7527_v40 = vadd.f32 %v303_v50, %v7500_v1  ;;  %v642_v63 = vld [vmem:[%s10189_s3 + $0x50] sm:$0xff]  ;;  %v643_v50 = vld [vmem:[%s10189_s3 + $0x58] sm:$0xff]  ;;  %v7560_v56 = vcombine.low %v635_v21, %v639_v47 }
  0xde   :  { %10947 = vst [vmem:[#allocation203_spill] sm:$0xff] %v7512_v23  ;;  %10949 = vst [vmem:[#allocation205_spill] sm:$0xff] %v7517_v58  ;;  %2369 = vmatprep.subr.bf16.mxu0 %v7484_v9  ;;  %2410 = vmatprep.subr.bf16.mxu1 %v7486_v8  ;;  %v7550_v58 = vcombine.low %v634_v22, %v638_v11  ;;  %v7567_v11 = vcombine.high %v642_v63, %v646_v20  ;;  %v654_v47 = vld [vmem:[%s10189_s3 + $0xb0] sm:$0xff]  ;;  %v655_v21 = vld [vmem:[%s10189_s3 + $0xb8] sm:$0xff] }
  0xdf   :  { %10950 = vst [vmem:[#allocation206_spill] sm:$0xff] %v7520_v3  ;;  %10952 = vst [vmem:[#allocation208_spill] sm:$0xff] %v7527_v40  ;;  %v194_v33 = vpop.f32.mrb[4].mxu0  ;;  %v307_v34 = vpop.f32.mrb[4].mxu1  ;;  %v7569_v22 = vcombine.high %v643_v50, %v647_v18 }
  0xe0   :  { %10953 = vst [vmem:[#allocation209_spill] sm:$0xff] %v7531_v10  ;;  %10954 = vst [vmem:[#allocation210_spill] sm:$0xff] %v7533_v19  ;;  %v7548_v40 = vadd.f32 %v194_v33, %v7474_v2  ;;  %v196_v3 = vpop.f32.mrb[5].mxu0  ;;  %v7553_v23 = vadd.f32 %v307_v34, %v7489_v42  ;;  %v309_v8 = vpop.f32.mrb[5].mxu1 }
  0xe1   :  { %10956 = vst [vmem:[#allocation212_spill] sm:$0xff] %v7550_v58  ;;  %v7556_v9 = vadd.f32 %v196_v3, %v7497_v48  ;;  %2370 = vmatpush1.bf16.msra.mxu0 %v7514_v55  ;;  %2411 = vmatpush1.bf16.msra.mxu1 %v7524_v41  ;;  %10959 = vst [vmem:[#allocation215_spill] sm:$0xff] %v7560_v56  ;;  %v7563_v57 = vadd.f32 %v309_v8, %v7500_v1  ;;  %v650_v3 = vld [vmem:[%s10189_s3 + $0x90] sm:$0xff]  ;;  %v651_v8 = vld [vmem:[%s10189_s3 + $0x98] sm:$0xff] }
  0xe2   :  { %10955 = vst [vmem:[#allocation211_spill] sm:$0xff] %v7548_v40  ;;  %10957 = vst [vmem:[#allocation213_spill] sm:$0xff] %v7553_v23  ;;  %2421 = vmatprep.subr.bf16.mxu0 %v7531_v10  ;;  %2462 = vmatprep.subr.bf16.mxu1 %v7533_v19  ;;  %v7588_v23 = vcombine.low %v642_v63, %v646_v20  ;;  %v7605_v63 = vcombine.high %v650_v3, %v654_v47 }
  0xe3   :  { %10958 = vst [vmem:[#allocation214_spill] sm:$0xff] %v7556_v9  ;;  %10960 = vst [vmem:[#allocation216_spill] sm:$0xff] %v7563_v57  ;;  %v200_v33 = vpop.f32.mrb[6].mxu0  ;;  %v313_v34 = vpop.f32.mrb[6].mxu1  ;;  %v7607_v20 = vcombine.high %v651_v8, %v655_v21  ;;  %v7636_v41 = vcombine.low %v651_v8, %v655_v21  ;;  %v670_v8 = vld [vmem:[%s10189_s3 + $0x130] sm:$0xff]  ;;  %v671_v21 = vld [vmem:[%s10189_s3 + $0x138] sm:$0xff] }
  0xe4   :  { %10961 = vst [vmem:[#allocation217_spill] sm:$0xff] %v7567_v11  ;;  %10962 = vst [vmem:[#allocation218_spill] sm:$0xff] %v7569_v22  ;;  %v7584_v57 = vadd.f32 %v200_v33, %v7474_v2  ;;  %2372 = vmatmul.mubr.bf16.vlgmr.msra.gmra.mrb[32].mxu0 %v10817_v49  ;;  %2413 = vmatmul.mubr.bf16.vlgmr.msra.gmra.mrb[32].mxu1 %v10817_v49  ;;  %v202_v9 = vpop.f32.mrb[7].mxu0  ;;  %v7591_v40 = vadd.f32 %v313_v34, %v7489_v42  ;;  %v315_v19 = vpop.f32.mrb[7].mxu1 }
  0xe5   :  { %10964 = vst [vmem:[#allocation220_spill] sm:$0xff] %v7588_v23  ;;  %v7594_v10 = vadd.f32 %v202_v9, %v7497_v48  ;;  %2422 = vmatpush1.bf16.msra.mxu0 %v7550_v58  ;;  %2463 = vmatpush1.bf16.msra.mxu1 %v7560_v56  ;;  %v7598_v33 = vcombine.low %v643_v50, %v647_v18  ;;  %10969 = vst [vmem:[#allocation225_spill] sm:$0xff] %v7605_v63  ;;  %v658_v9 = vld [vmem:[%s10189_s3 + $0xd0] sm:$0xff]  ;;  %v663_v18 = vld [vmem:[%s10189_s3 + $0xf8] sm:$0xff] }
  0xe6   :  { %10963 = vst [vmem:[#allocation219_spill] sm:$0xff] %v7584_v57  ;;  %10965 = vst [vmem:[#allocation221_spill] sm:$0xff] %v7591_v40  ;;  %v7601_v57 = vadd.f32 %v315_v19, %v7500_v1  ;;  %2423 = vmatprep.subr.bf16.mxu0 %v7567_v11  ;;  %2464 = vmatprep.subr.bf16.mxu1 %v7569_v22  ;;  %v662_v50 = vld [vmem:[%s10189_s3 + $0xf0] sm:$0xff]  ;;  %v659_v19 = vld [vmem:[%s10189_s3 + $0xd8] sm:$0xff]  ;;  %v7626_v22 = vcombine.low %v650_v3, %v654_v47 }
  0xe7   :  { %10966 = vst [vmem:[#allocation222_spill] sm:$0xff] %v7594_v10  ;;  %10967 = vst [vmem:[#allocation223_spill] sm:$0xff] %v7598_v33  ;;  %v206_v34 = vpop.f32.mrb[8].mxu0  ;;  %2453 = vmatprep.mubr.bf16.mxu0 %v10817_v49  ;;  %2494 = vmatprep.mubr.bf16.mxu1 %v10817_v49  ;;  %v7643_v3 = vcombine.high %v658_v9, %v662_v50 }
  0xe8   :  { %10968 = vst [vmem:[#allocation224_spill] sm:$0xff] %v7601_v57  ;;  %10970 = vst [vmem:[#allocation226_spill] sm:$0xff] %v7607_v20  ;;  %v319_v57 = vpop.f32.mrb[8].mxu1  ;;  %v7624_v10 = vadd.f32 %v206_v34, %v7474_v2  ;;  %v208_v40 = vpop.f32.mrb[9].mxu0 }
  0xe9   :  { %10972 = vst [vmem:[#allocation228_spill] sm:$0xff] %v7626_v22  ;;  %v7629_v11 = vadd.f32 %v319_v57, %v7489_v42  ;;  %v321_v56 = vpop.f32.mrb[9].mxu1  ;;  %v7632_v58 = vadd.f32 %v208_v40, %v7497_v48  ;;  %2424 = vmatpush1.bf16.msra.mxu0 %v7588_v23  ;;  %2465 = vmatpush1.bf16.msra.mxu1 %v7598_v33  ;;  %10975 = vst [vmem:[#allocation231_spill] sm:$0xff] %v7636_v41  ;;  %v666_v40 = vld [vmem:[%s10189_s3 + $0x110] sm:$0xff] }
  0xea   :  { %10971 = vst [vmem:[#allocation227_spill] sm:$0xff] %v7624_v10  ;;  %v7639_v55 = vadd.f32 %v321_v56, %v7500_v1  ;;  %2425 = vmatprep.subr.bf16.mxu0 %v7605_v63  ;;  %2466 = vmatprep.subr.bf16.mxu1 %v7607_v20  ;;  %10977 = vst [vmem:[#allocation233_spill] sm:$0xff] %v7643_v3  ;;  %v7645_v57 = vcombine.high %v659_v19, %v663_v18  ;;  %v667_v56 = vld [vmem:[%s10189_s3 + $0x118] sm:$0xff] }
  0xeb   :  { %10973 = vst [vmem:[#allocation229_spill] sm:$0xff] %v7629_v11  ;;  %10974 = vst [vmem:[#allocation230_spill] sm:$0xff] %v7632_v58  ;;  %v212_v47 = vpop.f32.mrb[10].mxu0  ;;  %v325_v34 = vpop.f32.mrb[10].mxu1  ;;  %v7662_v11 = vcombine.low %v658_v9, %v662_v50  ;;  %v7672_v33 = vcombine.low %v659_v19, %v663_v18  ;;  %v7679_v9 = vcombine.high %v666_v40, %v670_v8  ;;  %v678_v19 = vld [vmem:[%s10189_s3 + $0x170] sm:$0xff]  ;;  %v679_v18 = vld [vmem:[%s10189_s3 + $0x178] sm:$0xff] }
  0xec   :  { %10976 = vst [vmem:[#allocation232_spill] sm:$0xff] %v7639_v55  ;;  %10978 = vst [vmem:[#allocation234_spill] sm:$0xff] %v7645_v57  ;;  %v7660_v55 = vadd.f32 %v212_v47, %v7474_v2  ;;  %v214_v58 = vpop.f32.mrb[11].mxu0  ;;  %v7665_v10 = vadd.f32 %v325_v34, %v7489_v42  ;;  %v327_v20 = vpop.f32.mrb[11].mxu1  ;;  %v7681_v50 = vcombine.high %v667_v56, %v671_v21 }
  0xed   :  { %10980 = vst [vmem:[#allocation236_spill] sm:$0xff] %v7662_v11  ;;  %v7668_v63 = vadd.f32 %v214_v58, %v7497_v48  ;;  %2426 = vmatpush1.bf16.msra.mxu0 %v7626_v22  ;;  %2467 = vmatpush1.bf16.msra.mxu1 %v7636_v41  ;;  %10983 = vst [vmem:[#allocation239_spill] sm:$0xff] %v7672_v33  ;;  %v7675_v23 = vadd.f32 %v327_v20, %v7500_v1  ;;  %v674_v58 = vld [vmem:[%s10189_s3 + $0x150] sm:$0xff]  ;;  %v675_v20 = vld [vmem:[%s10189_s3 + $0x158] sm:$0xff] }
  0xee   :  { %10979 = vst [vmem:[#allocation235_spill] sm:$0xff] %v7660_v55  ;;  %10981 = vst [vmem:[#allocation237_spill] sm:$0xff] %v7665_v10  ;;  %2427 = vmatprep.subr.bf16.mxu0 %v7643_v3  ;;  %2468 = vmatprep.subr.bf16.mxu1 %v7645_v57  ;;  %v7698_v10 = vcombine.low %v666_v40, %v670_v8  ;;  %v7708_v41 = vcombine.low %v667_v56, %v671_v21  ;;  %v686_v56 = vld [vmem:[%s10189_s3 + $0x1b0] sm:$0xff]  ;;  %v687_v21 = vld [vmem:[%s10189_s3 + $0x1b8] sm:$0xff] }
  0xef   :  { %10982 = vst [vmem:[#allocation238_spill] sm:$0xff] %v7668_v63  ;;  %10984 = vst [vmem:[#allocation240_spill] sm:$0xff] %v7675_v23  ;;  %v218_v47 = vpop.f32.mrb[12].mxu0  ;;  %v331_v34 = vpop.f32.mrb[12].mxu1  ;;  %v7715_v40 = vcombine.high %v674_v58, %v678_v19  ;;  %v7717_v8 = vcombine.high %v675_v20, %v679_v18 }
  0xf0   :  { %10985 = vst [vmem:[#allocation241_spill] sm:$0xff] %v7679_v9  ;;  %10986 = vst [vmem:[#allocation242_spill] sm:$0xff] %v7681_v50  ;;  %v7696_v23 = vadd.f32 %v218_v47, %v7474_v2  ;;  %v220_v63 = vpop.f32.mrb[13].mxu0  ;;  %v7701_v55 = vadd.f32 %v331_v34, %v7489_v42  ;;  %v333_v57 = vpop.f32.mrb[13].mxu1 }
  0xf1   :  { %10988 = vst [vmem:[#allocation244_spill] sm:$0xff] %v7698_v10  ;;  %v7704_v3 = vadd.f32 %v220_v63, %v7497_v48  ;;  %2428 = vmatpush1.bf16.msra.mxu0 %v7662_v11  ;;  %2469 = vmatpush1.bf16.msra.mxu1 %v7672_v33  ;;  %10991 = vst [vmem:[#allocation247_spill] sm:$0xff] %v7708_v41  ;;  %v7711_v22 = vadd.f32 %v333_v57, %v7500_v1  ;;  %v682_v63 = vld [vmem:[%s10189_s3 + $0x190] sm:$0xff]  ;;  %v683_v57 = vld [vmem:[%s10189_s3 + $0x198] sm:$0xff]  ;;  %v69_v33 = vsub.s32 4, %v7410_v0 }
  0xf2   :  { %10987 = vst [vmem:[#allocation243_spill] sm:$0xff] %v7696_v23  ;;  %10989 = vst [vmem:[#allocation245_spill] sm:$0xff] %v7701_v55  ;;  %2429 = vmatprep.subr.bf16.mxu0 %v7679_v9  ;;  %2470 = vmatprep.subr.bf16.mxu1 %v7681_v50  ;;  %v7734_v55 = vcombine.low %v674_v58, %v678_v19  ;;  %v7745_v11 = vcombine.low %v675_v20, %v679_v18  ;;  %v73_v58 = vsub.s32 5, %v7410_v0 }
  0xf3   :  { %10990 = vst [vmem:[#allocation246_spill] sm:$0xff] %v7704_v3  ;;  %10992 = vst [vmem:[#allocation248_spill] sm:$0xff] %v7711_v22  ;;  %v224_v47 = vpop.f32.mrb[14].mxu0  ;;  %v337_v34 = vpop.f32.mrb[14].mxu1  ;;  %v7753_v19 = vcombine.high %v682_v63, %v686_v56  ;;  %v77_v20 = vsub.s32 6, %v7410_v0 }
  0xf4   :  { %10993 = vst [vmem:[#allocation249_spill] sm:$0xff] %v7715_v40  ;;  %10994 = vst [vmem:[#allocation250_spill] sm:$0xff] %v7717_v8  ;;  %v7732_v22 = vadd.f32 %v224_v47, %v7474_v2  ;;  %v226_v3 = vpop.f32.mrb[15].mxu0  ;;  %v7737_v23 = vadd.f32 %v337_v34, %v7489_v42  ;;  %v339_v50 = vpop.f32.mrb[15].mxu1  ;;  %v690_v34 = vld [vmem:[%s10189_s3 + $0x1d0] sm:$0xff] }
  0xf5   :  { %10996 = vst [vmem:[#allocation252_spill] sm:$0xff] %v7734_v55  ;;  %v7740_v9 = vadd.f32 %v226_v3, %v7497_v48  ;;  %2430 = vmatpush1.bf16.msra.mxu0 %v7698_v10  ;;  %2471 = vmatpush1.bf16.msra.mxu1 %v7708_v41  ;;  %10999 = vst [vmem:[#allocation255_spill] sm:$0xff] %v7745_v11  ;;  %v7748_v47 = vadd.f32 %v339_v50, %v7500_v1  ;;  %v694_v50 = vld [vmem:[%s10189_s3 + $0x1f0] sm:$0xff] }
  0xf6   :  { %10995 = vst [vmem:[#allocation251_spill] sm:$0xff] %v7732_v22  ;;  %10997 = vst [vmem:[#allocation253_spill] sm:$0xff] %v7737_v23  ;;  %2431 = vmatprep.subr.bf16.mxu0 %v7715_v40  ;;  %2472 = vmatprep.subr.bf16.mxu1 %v7717_v8  ;;  %v7755_v3 = vcombine.high %v683_v57, %v687_v21  ;;  %v81_v22 = vsub.s32 7, %v7410_v0  ;;  %v7780_v41 = vrot.slane %v7440_v32, %v69_v33  ;;  %v698_v33 = vld [vmem:[%s10189_s3 + $0x210] sm:$0xff] }
  0xf7   :  { %10998 = vst [vmem:[#allocation254_spill] sm:$0xff] %v7740_v9  ;;  %11000 = vst [vmem:[#allocation256_spill] sm:$0xff] %v7748_v47  ;;  %v7761_v18 = vpop.f32.mrb[16].mxu0  ;;  %v691_v47 = vld [vmem:[%s10189_s3 + $0x1d8] sm:$0xff]  ;;  %v7772_v23 = vpop.f32.mrb[16].mxu1  ;;  %v7784_v10 = vcombine.low %v682_v63, %v686_v56  ;;  %v7790_v0 = vcombine.high %v690_v34, %v694_v50  ;;  %v7801_v63 = vrot.slane %v7440_v32, %v73_v58 }
  0xf8   :  { %11001 = vst [vmem:[#allocation257_spill] sm:$0xff] %v7753_v19  ;;  %11002 = vst [vmem:[#allocation258_spill] sm:$0xff] %v7755_v3  ;;  %v695_v9 = vld [vmem:[%s10189_s3 + $0x1f8] sm:$0xff]  ;;  %v7775_v8 = vpop.f32.mrb[17].mxu0  ;;  %v7777_v40 = vpop.f32.mrb[17].mxu1  ;;  %v7804_v56 = vrot.slane %v7440_v32, %v81_v22 }
  0xf9   :  { %11003 = vst [vmem:[#allocation259_spill] sm:$0xff] %v7761_v18  ;;  %11004 = vst [vmem:[#allocation260_spill] sm:$0xff] %v7772_v23  ;;  %2432 = vmatpush1.bf16.msra.mxu0 %v7734_v55  ;;  %2473 = vmatpush1.bf16.msra.mxu1 %v7745_v11  ;;  %v7786_v18 = vcombine.low %v683_v57, %v687_v21  ;;  %v702_v57 = vld [vmem:[%s10189_s3 + $0x230] sm:$0xff]  ;;  %v699_v21 = vld [vmem:[%s10189_s3 + $0x218] sm:$0xff]  ;;  %v7815_v11 = vcombine.low %v690_v34, %v694_v50 }
  0xfa   :  { %11005 = vst [vmem:[#allocation261_spill] sm:$0xff] %v7775_v8  ;;  %11006 = vst [vmem:[#allocation262_spill] sm:$0xff] %v7777_v40  ;;  %2433 = vmatprep.subr.bf16.mxu0 %v7753_v19  ;;  %2474 = vmatprep.subr.bf16.mxu1 %v7755_v3  ;;  %v7792_v8 = vcombine.high %v691_v47, %v695_v9  ;;  %v7795_v40 = vrot.slane %v7440_v32, %v77_v20  ;;  %v703_v20 = vld [vmem:[%s10189_s3 + $0x238] sm:$0xff]  ;;  %v706_v50 = vld [vmem:[%s10189_s3 + $0x250] sm:$0xff] }
  0xfb   :  { %11007 = vst [vmem:[#allocation263_spill] sm:$0xff] %v7784_v10  ;;  %11008 = vst [vmem:[#allocation264_spill] sm:$0xff] %v7786_v18  ;;  %v414_v3 = vpop.f32.mrb[18].mxu0  ;;  %v527_v19 = vpop.f32.mrb[18].mxu1  ;;  %v7825_v23 = vcombine.low %v691_v47, %v695_v9  ;;  %v710_v9 = vld [vmem:[%s10189_s3 + $0x270] sm:$0xff]  ;;  %v711_v47 = vld [vmem:[%s10189_s3 + $0x278] sm:$0xff] }
  0xfc   :  { %11009 = vst [vmem:[#allocation265_spill] sm:$0xff] %v7790_v0  ;;  %11010 = vst [vmem:[#allocation266_spill] sm:$0xff] %v7792_v8  ;;  %v7818_v58 = vadd.f32 %v414_v3, %v7780_v41  ;;  %v416_v32 = vpop.f32.mrb[19].mxu0  ;;  %v7821_v22 = vadd.f32 %v527_v19, %v7795_v40  ;;  %v529_v55 = vpop.f32.mrb[19].mxu1  ;;  %v7835_v3 = vcombine.high %v698_v33, %v702_v57 }
  0xfd   :  { %11011 = vst [vmem:[#allocation267_spill] sm:$0xff] %v7815_v11  ;;  %2434 = vmatpush1.bf16.msra.mxu0 %v7784_v10  ;;  %2475 = vmatpush1.bf16.msra.mxu1 %v7786_v18  ;;  %11014 = vst [vmem:[#allocation270_spill] sm:$0xff] %v7825_v23  ;;  %v7828_v1 = vadd.f32 %v416_v32, %v7801_v63  ;;  %v7831_v34 = vadd.f32 %v529_v55, %v7804_v56  ;;  %v707_v55 = vld [vmem:[%s10189_s3 + $0x258] sm:$0xff] }
  0xfe   :  { %11012 = vst [vmem:[#allocation268_spill] sm:$0xff] %v7818_v58  ;;  %11013 = vst [vmem:[#allocation269_spill] sm:$0xff] %v7821_v22  ;;  %2435 = vmatprep.subr.bf16.mxu0 %v7790_v0  ;;  %2476 = vmatprep.subr.bf16.mxu1 %v7792_v8  ;;  %v7837_v19 = vcombine.high %v699_v21, %v703_v20  ;;  %v7861_v18 = vcombine.low %v699_v21, %v703_v20  ;;  %v718_v21 = vld [vmem:[%s10189_s3 + $0x2b0] sm:$0xff]  ;;  %v719_v20 = vld [vmem:[%s10189_s3 + $0x2b8] sm:$0xff] }
  0xff   :  { %11015 = vst [vmem:[#allocation271_spill] sm:$0xff] %v7828_v1  ;;  %11016 = vst [vmem:[#allocation272_spill] sm:$0xff] %v7831_v34  ;;  %v420_v32 = vpop.f32.mrb[20].mxu0  ;;  %v533_v34 = vpop.f32.mrb[20].mxu1  ;;  %v7851_v1 = vcombine.low %v698_v33, %v702_v57  ;;  %v7871_v57 = vcombine.high %v706_v50, %v710_v9 }
 0x100   :  { %11017 = vst [vmem:[#allocation273_spill] sm:$0xff] %v7835_v3  ;;  %11018 = vst [vmem:[#allocation274_spill] sm:$0xff] %v7837_v19  ;;  %v7854_v22 = vadd.f32 %v420_v32, %v7780_v41  ;;  %v422_v58 = vpop.f32.mrb[21].mxu0  ;;  %v7857_v8 = vadd.f32 %v533_v34, %v7795_v40  ;;  %v535_v0 = vpop.f32.mrb[21].mxu1  ;;  %v7873_v34 = vcombine.high %v707_v55, %v711_v47  ;;  %v714_v32 = vld [vmem:[%s10189_s3 + $0x290] sm:$0xff] }
 0x101   :  { %11019 = vst [vmem:[#allocation275_spill] sm:$0xff] %v7851_v1  ;;  %2436 = vmatpush1.bf16.msra.mxu0 %v7815_v11  ;;  %2477 = vmatpush1.bf16.msra.mxu1 %v7825_v23  ;;  %11022 = vst [vmem:[#allocation278_spill] sm:$0xff] %v7861_v18  ;;  %v7864_v10 = vadd.f32 %v422_v58, %v7801_v63  ;;  %v7867_v33 = vadd.f32 %v535_v0, %v7804_v56  ;;  %v715_v0 = vld [vmem:[%s10189_s3 + $0x298] sm:$0xff] }
 0x102   :  { %11020 = vst [vmem:[#allocation276_spill] sm:$0xff] %v7854_v22  ;;  %11021 = vst [vmem:[#allocation277_spill] sm:$0xff] %v7857_v8  ;;  %2437 = vmatprep.subr.bf16.mxu0 %v7835_v3  ;;  %2478 = vmatprep.subr.bf16.mxu1 %v7837_v19  ;;  %v7897_v23 = vcombine.low %v707_v55, %v711_v47  ;;  %v727_v55 = vld [vmem:[%s10189_s3 + $0x2f8] sm:$0xff] }
 0x103   :  { %11023 = vst [vmem:[#allocation279_spill] sm:$0xff] %v7864_v10  ;;  %11024 = vst [vmem:[#allocation280_spill] sm:$0xff] %v7867_v33  ;;  %v426_v58 = vpop.f32.mrb[22].mxu0  ;;  %v539_v33 = vpop.f32.mrb[22].mxu1  ;;  %v7887_v10 = vcombine.low %v706_v50, %v710_v9  ;;  %v7907_v9 = vcombine.high %v714_v32, %v718_v21 }
 0x104   :  { %11025 = vst [vmem:[#allocation281_spill] sm:$0xff] %v7871_v57  ;;  %11026 = vst [vmem:[#allocation282_spill] sm:$0xff] %v7873_v34  ;;  %v7890_v8 = vadd.f32 %v426_v58, %v7780_v41  ;;  %v428_v22 = vpop.f32.mrb[23].mxu0  ;;  %v7893_v19 = vadd.f32 %v539_v33, %v7795_v40  ;;  %v541_v3 = vpop.f32.mrb[23].mxu1  ;;  %v7909_v33 = vcombine.high %v715_v0, %v719_v20  ;;  %v722_v58 = vld [vmem:[%s10189_s3 + $0x2d0] sm:$0xff] }
 0x105   :  { %11027 = vst [vmem:[#allocation283_spill] sm:$0xff] %v7887_v10  ;;  %2438 = vmatpush1.bf16.msra.mxu0 %v7851_v1  ;;  %2479 = vmatpush1.bf16.msra.mxu1 %v7861_v18  ;;  %11030 = vst [vmem:[#allocation286_spill] sm:$0xff] %v7897_v23  ;;  %v7900_v11 = vadd.f32 %v428_v22, %v7801_v63  ;;  %v7903_v50 = vadd.f32 %v541_v3, %v7804_v56  ;;  %v726_v22 = vld [vmem:[%s10189_s3 + $0x2f0] sm:$0xff]  ;;  %v723_v3 = vld [vmem:[%s10189_s3 + $0x2d8] sm:$0xff] }
 0x106   :  { %11028 = vst [vmem:[#allocation284_spill] sm:$0xff] %v7890_v8  ;;  %11029 = vst [vmem:[#allocation285_spill] sm:$0xff] %v7893_v19  ;;  %2439 = vmatprep.subr.bf16.mxu0 %v7871_v57  ;;  %2480 = vmatprep.subr.bf16.mxu1 %v7873_v34  ;;  %v7933_v18 = vcombine.low %v715_v0, %v719_v20  ;;  %v735_v0 = vld [vmem:[%s10189_s3 + $0x338] sm:$0xff] }
 0x107   :  { %11031 = vst [vmem:[#allocation287_spill] sm:$0xff] %v7900_v11  ;;  %11032 = vst [vmem:[#allocation288_spill] sm:$0xff] %v7903_v50  ;;  %v432_v47 = vpop.f32.mrb[24].mxu0  ;;  %v545_v50 = vpop.f32.mrb[24].mxu1  ;;  %v7923_v11 = vcombine.low %v714_v32, %v718_v21  ;;  %v7943_v21 = vcombine.high %v722_v58, %v726_v22 }
 0x108   :  { %11033 = vst [vmem:[#allocation289_spill] sm:$0xff] %v7907_v9  ;;  %11034 = vst [vmem:[#allocation290_spill] sm:$0xff] %v7909_v33  ;;  %v7926_v19 = vadd.f32 %v432_v47, %v7780_v41  ;;  %v434_v8 = vpop.f32.mrb[25].mxu0  ;;  %v7929_v34 = vadd.f32 %v545_v50, %v7795_v40  ;;  %v547_v57 = vpop.f32.mrb[25].mxu1  ;;  %v7945_v50 = vcombine.high %v723_v3, %v727_v55  ;;  %v730_v47 = vld [vmem:[%s10189_s3 + $0x310] sm:$0xff] }
 0x109   :  { %11035 = vst [vmem:[#allocation291_spill] sm:$0xff] %v7923_v11  ;;  %2440 = vmatpush1.bf16.msra.mxu0 %v7887_v10  ;;  %2481 = vmatpush1.bf16.msra.mxu1 %v7897_v23  ;;  %11038 = vst [vmem:[#allocation294_spill] sm:$0xff] %v7933_v18  ;;  %v7936_v1 = vadd.f32 %v434_v8, %v7801_v63  ;;  %v7939_v32 = vadd.f32 %v547_v57, %v7804_v56  ;;  %v734_v8 = vld [vmem:[%s10189_s3 + $0x330] sm:$0xff]  ;;  %v731_v57 = vld [vmem:[%s10189_s3 + $0x318] sm:$0xff] }
 0x10a   :  { %11036 = vst [vmem:[#allocation292_spill] sm:$0xff] %v7926_v19  ;;  %11037 = vst [vmem:[#allocation293_spill] sm:$0xff] %v7929_v34  ;;  %2441 = vmatprep.subr.bf16.mxu0 %v7907_v9  ;;  %2482 = vmatprep.subr.bf16.mxu1 %v7909_v33  ;;  %v7969_v23 = vcombine.low %v723_v3, %v727_v55  ;;  %v743_v3 = vld [vmem:[%s10189_s3 + $0x378] sm:$0xff] }
 0x10b   :  { %11039 = vst [vmem:[#allocation295_spill] sm:$0xff] %v7936_v1  ;;  %11040 = vst [vmem:[#allocation296_spill] sm:$0xff] %v7939_v32  ;;  %v438_v20 = vpop.f32.mrb[26].mxu0  ;;  %v551_v32 = vpop.f32.mrb[26].mxu1  ;;  %v7959_v1 = vcombine.low %v722_v58, %v726_v22  ;;  %v7979_v22 = vcombine.high %v730_v47, %v734_v8 }
 0x10c   :  { %11041 = vst [vmem:[#allocation297_spill] sm:$0xff] %v7943_v21  ;;  %11042 = vst [vmem:[#allocation298_spill] sm:$0xff] %v7945_v50  ;;  %v7962_v34 = vadd.f32 %v438_v20, %v7780_v41  ;;  %v440_v19 = vpop.f32.mrb[27].mxu0  ;;  %v7965_v33 = vadd.f32 %v551_v32, %v7795_v40  ;;  %v553_v9 = vpop.f32.mrb[27].mxu1  ;;  %v7981_v32 = vcombine.high %v731_v57, %v735_v0  ;;  %v738_v20 = vld [vmem:[%s10189_s3 + $0x350] sm:$0xff] }
 0x10d   :  { %11043 = vst [vmem:[#allocation299_spill] sm:$0xff] %v7959_v1  ;;  %2442 = vmatpush1.bf16.msra.mxu0 %v7923_v11  ;;  %2483 = vmatpush1.bf16.msra.mxu1 %v7933_v18  ;;  %11046 = vst [vmem:[#allocation302_spill] sm:$0xff] %v7969_v23  ;;  %v7972_v10 = vadd.f32 %v440_v19, %v7801_v63  ;;  %v7975_v58 = vadd.f32 %v553_v9, %v7804_v56  ;;  %v742_v19 = vld [vmem:[%s10189_s3 + $0x370] sm:$0xff]  ;;  %v739_v9 = vld [vmem:[%s10189_s3 + $0x358] sm:$0xff] }
 0x10e   :  { %11044 = vst [vmem:[#allocation300_spill] sm:$0xff] %v7962_v34  ;;  %11045 = vst [vmem:[#allocation301_spill] sm:$0xff] %v7965_v33  ;;  %2443 = vmatprep.subr.bf16.mxu0 %v7943_v21  ;;  %2484 = vmatprep.subr.bf16.mxu1 %v7945_v50  ;;  %v8005_v18 = vcombine.low %v731_v57, %v735_v0  ;;  %v751_v57 = vld [vmem:[%s10189_s3 + $0x3b8] sm:$0xff] }
 0x10f   :  { %11047 = vst [vmem:[#allocation303_spill] sm:$0xff] %v7972_v10  ;;  %11048 = vst [vmem:[#allocation304_spill] sm:$0xff] %v7975_v58  ;;  %v444_v55 = vpop.f32.mrb[28].mxu0  ;;  %v557_v58 = vpop.f32.mrb[28].mxu1  ;;  %v7995_v10 = vcombine.low %v730_v47, %v734_v8  ;;  %v8015_v8 = vcombine.high %v738_v20, %v742_v19 }
 0x110   :  { %11049 = vst [vmem:[#allocation305_spill] sm:$0xff] %v7979_v22  ;;  %11050 = vst [vmem:[#allocation306_spill] sm:$0xff] %v7981_v32  ;;  %v7998_v33 = vadd.f32 %v444_v55, %v7780_v41  ;;  %v446_v34 = vpop.f32.mrb[29].mxu0  ;;  %v8001_v50 = vadd.f32 %v557_v58, %v7795_v40  ;;  %v559_v21 = vpop.f32.mrb[29].mxu1  ;;  %v8017_v58 = vcombine.high %v739_v9, %v743_v3  ;;  %v746_v55 = vld [vmem:[%s10189_s3 + $0x390] sm:$0xff] }
 0x111   :  { %11051 = vst [vmem:[#allocation307_spill] sm:$0xff] %v7995_v10  ;;  %2444 = vmatpush1.bf16.msra.mxu0 %v7959_v1  ;;  %2485 = vmatpush1.bf16.msra.mxu1 %v7969_v23  ;;  %11054 = vst [vmem:[#allocation310_spill] sm:$0xff] %v8005_v18  ;;  %v8008_v11 = vadd.f32 %v446_v34, %v7801_v63  ;;  %v8011_v47 = vadd.f32 %v559_v21, %v7804_v56  ;;  %v750_v34 = vld [vmem:[%s10189_s3 + $0x3b0] sm:$0xff]  ;;  %v747_v21 = vld [vmem:[%s10189_s3 + $0x398] sm:$0xff] }
 0x112   :  { %11052 = vst [vmem:[#allocation308_spill] sm:$0xff] %v7998_v33  ;;  %11053 = vst [vmem:[#allocation309_spill] sm:$0xff] %v8001_v50  ;;  %2445 = vmatprep.subr.bf16.mxu0 %v7979_v22  ;;  %2486 = vmatprep.subr.bf16.mxu1 %v7981_v32  ;;  %v8041_v23 = vcombine.low %v739_v9, %v743_v3  ;;  %v759_v9 = vld [vmem:[%s10189_s3 + $0x3f8] sm:$0xff]  ;;  %v8069_v3 = vcombine.low %v746_v55, %v750_v34 }
 0x113   :  { %11055 = vst [vmem:[#allocation311_spill] sm:$0xff] %v8008_v11  ;;  %11056 = vst [vmem:[#allocation312_spill] sm:$0xff] %v8011_v47  ;;  %v450_v0 = vpop.f32.mrb[30].mxu0  ;;  %v563_v47 = vpop.f32.mrb[30].mxu1  ;;  %v8031_v11 = vcombine.low %v738_v20, %v742_v19  ;;  %v8051_v19 = vcombine.high %v746_v55, %v750_v34  ;;  %v11074_v55 = vld [vmem:[#allocation43_spill] sm:$0xff]  ;;  %v11075_v34 = vld [vmem:[#allocation44_spill] sm:$0xff] }
 0x114   :  { %11057 = vst [vmem:[#allocation313_spill] sm:$0xff] %v8015_v8  ;;  %11058 = vst [vmem:[#allocation314_spill] sm:$0xff] %v8017_v58  ;;  %v8034_v50 = vadd.f32 %v450_v0, %v7780_v41  ;;  %v452_v33 = vpop.f32.mrb[31].mxu0  ;;  %v8037_v32 = vadd.f32 %v563_v47, %v7795_v40  ;;  %v565_v22 = vpop.f32.mrb[31].mxu1  ;;  %v8053_v47 = vcombine.high %v747_v21, %v751_v57  ;;  %v754_v0 = vld [vmem:[%s10189_s3 + $0x3d0] sm:$0xff] }
 0x115   :  { %11059 = vst [vmem:[#allocation315_spill] sm:$0xff] %v8031_v11  ;;  %2446 = vmatpush1.bf16.msra.mxu0 %v7995_v10  ;;  %2487 = vmatpush1.bf16.msra.mxu1 %v8005_v18  ;;  %11062 = vst [vmem:[#allocation318_spill] sm:$0xff] %v8041_v23  ;;  %v8044_v1 = vadd.f32 %v452_v33, %v7801_v63  ;;  %v8047_v20 = vadd.f32 %v565_v22, %v7804_v56  ;;  %v758_v33 = vld [vmem:[%s10189_s3 + $0x3f0] sm:$0xff]  ;;  %v755_v22 = vld [vmem:[%s10189_s3 + $0x3d8] sm:$0xff] }
 0x116   :  { %11060 = vst [vmem:[#allocation316_spill] sm:$0xff] %v8034_v50  ;;  %11061 = vst [vmem:[#allocation317_spill] sm:$0xff] %v8037_v32  ;;  %2447 = vmatprep.subr.bf16.mxu0 %v8015_v8  ;;  %2488 = vmatprep.subr.bf16.mxu1 %v8017_v58  ;;  %v8077_v32 = vcombine.high %v755_v22, %v759_v9  ;;  %v8081_v50 = vcombine.low %v754_v0, %v758_v33 }
 0x117   :  { %11063 = vst [vmem:[#allocation319_spill] sm:$0xff] %v8044_v1  ;;  %11064 = vst [vmem:[#allocation320_spill] sm:$0xff] %v8047_v20  ;;  %v8071_v20 = vcombine.low %v747_v21, %v751_v57  ;;  %v8075_v1 = vcombine.high %v754_v0, %v758_v33  ;;  %v11076_v21 = vld [vmem:[#allocation45_spill] sm:$0xff]  ;;  %v11077_v57 = vld [vmem:[#allocation46_spill] sm:$0xff] }
 0x118   :  { %11065 = vst [vmem:[#allocation321_spill] sm:$0xff] %v8051_v19  ;;  %11066 = vst [vmem:[#allocation322_spill] sm:$0xff] %v8053_v47  ;;  %v11078_v0 = vld [vmem:[#allocation47_spill] sm:$0xff]  ;;  %v11079_v33 = vld [vmem:[#allocation48_spill] sm:$0xff] }
 0x119   :  { %2448 = vmatpush1.bf16.msra.mxu0 %v8031_v11  ;;  %2489 = vmatpush1.bf16.msra.mxu1 %v8041_v23  ;;  %11067 = vst [vmem:[#allocation323_spill] sm:$0xff] %v8069_v3  ;;  %11068 = vst [vmem:[#allocation324_spill] sm:$0xff] %v8071_v20  ;;  %v8083_v11 = vcombine.low %v755_v22, %v759_v9  ;;  %v11080_v22 = vld [vmem:[#allocation49_spill] sm:$0xff]  ;;  %v11081_v9 = vld [vmem:[#allocation50_spill] sm:$0xff] }
 0x11a   :  { %2449 = vmatprep.subr.bf16.mxu0 %v8051_v19  ;;  %2490 = vmatprep.subr.bf16.mxu1 %v8053_v47  ;;  %11069 = vst [vmem:[#allocation325_spill] sm:$0xff] %v8075_v1  ;;  %11070 = vst [vmem:[#allocation326_spill] sm:$0xff] %v8077_v32 }
 0x11b   :  { %11071 = vst [vmem:[#allocation327_spill] sm:$0xff] %v8081_v50  ;;  %11072 = vst [vmem:[#allocation328_spill] sm:$0xff] %v8083_v11 }
 0x11d   :  { %2450 = vmatpush1.bf16.msra.mxu0 %v8069_v3  ;;  %2491 = vmatpush1.bf16.msra.mxu1 %v8071_v20 }
 0x11e   :  { %2451 = vmatprep.subr.bf16.mxu0 %v8075_v1  ;;  %2492 = vmatprep.subr.bf16.mxu1 %v8077_v32 }
 0x121   :  { %2452 = vmatpush1.bf16.msra.mxu0 %v8081_v50  ;;  %2493 = vmatpush1.bf16.msra.mxu1 %v8083_v11 }
 0x122   :  { %2553 = vmatprep.subr.bf16.mxu0 %v6199_v13  ;;  %2594 = vmatprep.subr.bf16.mxu1 %v6211_v16 }
 0x124   :  { %2454 = vmatmul.mubr.bf16.vlgmr.msra.gmra.mrb[36].mxu0 %v10817_v49  ;;  %2495 = vmatmul.mubr.bf16.vlgmr.msra.gmra.mrb[36].mxu1 %v10817_v49  ;;  %v11073_v49 = vld [vmem:[#allocation42_spill] sm:$0xff] }
 0x125   :  { %2554 = vmatpush1.bf16.msra.mxu0 %v6295_v27  ;;  %2595 = vmatpush1.bf16.msra.mxu1 %v6297_v28 }
 0x126   :  { %2555 = vmatprep.subr.bf16.mxu0 %v6299_v29  ;;  %2596 = vmatprep.subr.bf16.mxu1 %v6301_v30 }
 0x129   :  { %2556 = vmatpush1.bf16.msra.mxu0 %v6321_v35  ;;  %2597 = vmatpush1.bf16.msra.mxu1 %v6323_v36 }
 0x12a   :  { %2557 = vmatprep.subr.bf16.mxu0 %v6327_v37  ;;  %2598 = vmatprep.subr.bf16.mxu1 %v6329_v38 }
 0x12d   :  { %2558 = vmatpush1.bf16.msra.mxu0 %v6351_v43  ;;  %2599 = vmatpush1.bf16.msra.mxu1 %v6353_v44 }
 0x12e   :  { %2559 = vmatprep.subr.bf16.mxu0 %v6357_v45  ;;  %2600 = vmatprep.subr.bf16.mxu1 %v6359_v46 }
 0x131   :  { %2560 = vmatpush1.bf16.msra.mxu0 %v6381_v51  ;;  %2601 = vmatpush1.bf16.msra.mxu1 %v6383_v52 }
 0x132   :  { %2561 = vmatprep.subr.bf16.mxu0 %v6387_v53  ;;  %2602 = vmatprep.subr.bf16.mxu1 %v6389_v54 }
 0x135   :  { %2562 = vmatpush1.bf16.msra.mxu0 %v6411_v59  ;;  %2603 = vmatpush1.bf16.msra.mxu1 %v6413_v60 }
 0x136   :  { %2563 = vmatprep.subr.bf16.mxu0 %v6417_v61  ;;  %2604 = vmatprep.subr.bf16.mxu1 %v6419_v62 }
 0x139   :  { %2564 = vmatpush1.bf16.msra.mxu0 %v6441_v4  ;;  %2605 = vmatpush1.bf16.msra.mxu1 %v6443_v5 }
 0x13a   :  { %2565 = vmatprep.subr.bf16.mxu0 %v6447_v6  ;;  %2606 = vmatprep.subr.bf16.mxu1 %v6449_v7 }
 0x13d   :  { %2566 = vmatpush1.bf16.msra.mxu0 %v6471_v12  ;;  %2607 = vmatpush1.bf16.msra.mxu1 %v6473_v14 }
 0x13e   :  { %2567 = vmatprep.subr.bf16.mxu0 %v6477_v15  ;;  %2608 = vmatprep.subr.bf16.mxu1 %v6479_v17 }
 0x141   :  { %2568 = vmatpush1.bf16.msra.mxu0 %v6501_v24  ;;  %2609 = vmatpush1.bf16.msra.mxu1 %v6503_v25  ;;  %v11108_v25 = vld [vmem:[#allocation197_spill] sm:$0xff] }
 0x142   :  { %2569 = vmatprep.subr.bf16.mxu0 %v6507_v26  ;;  %2610 = vmatprep.subr.bf16.mxu1 %v6509_v31  ;;  %v11082_v31 = vld [vmem:[#allocation51_spill] sm:$0xff] }
 0x145   :  { %2570 = vmatpush1.bf16.msra.mxu0 %v6531_v39  ;;  %2611 = vmatpush1.bf16.msra.mxu1 %v11073_v49  ;;  %v11083_v39 = vld [vmem:[#allocation52_spill] sm:$0xff]  ;;  %v11084_v49 = vld [vmem:[#allocation53_spill] sm:$0xff] }
 0x146   :  { %2571 = vmatprep.subr.bf16.mxu0 %v11074_v55  ;;  %2612 = vmatprep.subr.bf16.mxu1 %v11075_v34  ;;  %v11085_v55 = vld [vmem:[#allocation54_spill] sm:$0xff]  ;;  %v11086_v34 = vld [vmem:[#allocation55_spill] sm:$0xff] }
 0x149   :  { %2572 = vmatpush1.bf16.msra.mxu0 %v11076_v21  ;;  %2613 = vmatpush1.bf16.msra.mxu1 %v11077_v57  ;;  %v11087_v21 = vld [vmem:[#allocation56_spill] sm:$0xff]  ;;  %v11088_v57 = vld [vmem:[#allocation57_spill] sm:$0xff] }
 0x14a   :  { %2573 = vmatprep.subr.bf16.mxu0 %v11078_v0  ;;  %2614 = vmatprep.subr.bf16.mxu1 %v11079_v33  ;;  %v11089_v0 = vld [vmem:[#allocation58_spill] sm:$0xff]  ;;  %v11090_v33 = vld [vmem:[#allocation59_spill] sm:$0xff] }
 0x14d   :  { %2574 = vmatpush1.bf16.msra.mxu0 %v11080_v22  ;;  %2615 = vmatpush1.bf16.msra.mxu1 %v11081_v9  ;;  %v11091_v22 = vld [vmem:[#allocation60_spill] sm:$0xff]  ;;  %v11092_v9 = vld [vmem:[#allocation61_spill] sm:$0xff] }
 0x14e   :  { %2575 = vmatprep.subr.bf16.mxu0 %v11082_v31  ;;  %2616 = vmatprep.subr.bf16.mxu1 %v11083_v39  ;;  %v11093_v31 = vld [vmem:[#allocation62_spill] sm:$0xff]  ;;  %v11094_v39 = vld [vmem:[#allocation63_spill] sm:$0xff] }
 0x151   :  { %2576 = vmatpush1.bf16.msra.mxu0 %v11084_v49  ;;  %2617 = vmatpush1.bf16.msra.mxu1 %v11085_v55  ;;  %v11095_v49 = vld [vmem:[#allocation64_spill] sm:$0xff]  ;;  %v11096_v55 = vld [vmem:[#allocation65_spill] sm:$0xff] }
 0x152   :  { %2577 = vmatprep.subr.bf16.mxu0 %v11086_v34  ;;  %2618 = vmatprep.subr.bf16.mxu1 %v11087_v21  ;;  %v11097_v34 = vld [vmem:[#allocation66_spill] sm:$0xff]  ;;  %v11098_v21 = vld [vmem:[#allocation67_spill] sm:$0xff] }
 0x155   :  { %2578 = vmatpush1.bf16.msra.mxu0 %v11088_v57  ;;  %2619 = vmatpush1.bf16.msra.mxu1 %v11089_v0  ;;  %v11099_v57 = vld [vmem:[#allocation68_spill] sm:$0xff]  ;;  %v11100_v0 = vld [vmem:[#allocation69_spill] sm:$0xff] }
 0x156   :  { %2579 = vmatprep.subr.bf16.mxu0 %v11090_v33  ;;  %2620 = vmatprep.subr.bf16.mxu1 %v11091_v22  ;;  %v11101_v33 = vld [vmem:[#allocation70_spill] sm:$0xff]  ;;  %v11102_v22 = vld [vmem:[#allocation71_spill] sm:$0xff] }
 0x159   :  { %2580 = vmatpush1.bf16.msra.mxu0 %v11092_v9  ;;  %2621 = vmatpush1.bf16.msra.mxu1 %v11093_v31  ;;  %v11103_v9 = vld [vmem:[#allocation72_spill] sm:$0xff] }
 0x15a   :  { %2581 = vmatprep.subr.bf16.mxu0 %v11094_v39  ;;  %2622 = vmatprep.subr.bf16.mxu1 %v11095_v49  ;;  %v11104_v39 = vld [vmem:[#allocation194_spill] sm:$0xff]  ;;  %v11105_v49 = vld [vmem:[#allocation195_spill] sm:$0xff] }
 0x15b   :  { %v183_v31 = vadd.f32 %v11104_v39, %v7474_v2 }
 0x15d   :  { %2582 = vmatpush1.bf16.msra.mxu0 %v11096_v55  ;;  %2623 = vmatpush1.bf16.msra.mxu1 %v11097_v34  ;;  %v296_v55 = vadd.f32 %v11105_v49, %v7489_v42  ;;  %v11106_v34 = vld [vmem:[#allocation196_spill] sm:$0xff]  ;;  %v11109_v42 = vld [vmem:[#allocation259_spill] sm:$0xff] }
 0x15e   :  { %2583 = vmatprep.subr.bf16.mxu0 %v11098_v21  ;;  %2624 = vmatprep.subr.bf16.mxu1 %v11099_v57  ;;  %v185_v26 = vadd.f32 %v11106_v34, %v7497_v48  ;;  %v11107_v21 = vld [vmem:[#allocation202_spill] sm:$0xff]  ;;  %v409_v48 = vadd.f32 %v11109_v42, %v7780_v41 }
 0x15f   :  { %v298_v57 = vadd.f32 %v11108_v25, %v11107_v21  ;;  %v11110_v25 = vld [vmem:[#allocation260_spill] sm:$0xff] }
 0x160   :  { %v522_v49 = vadd.f32 %v11110_v25, %v7795_v40 }
 0x161   :  { %2584 = vmatpush1.bf16.msra.mxu0 %v11100_v0  ;;  %2625 = vmatpush1.bf16.msra.mxu1 %v11101_v33 }
 0x162   :  { %2635 = vmatprep.subr.bf16.mxu0 %v11102_v22  ;;  %2676 = vmatprep.subr.bf16.mxu1 %v11103_v9 }
 0x1b7   :  { %v2373_v24 = vpop.f32.mrb[32].mxu0  ;;  %v2414_v0 = vpop.f32.mrb[32].mxu1 }
 0x1b8   :  { %v2511_v17 = vadd.f32 %v2373_v24, %v183_v31  ;;  %v2513_v33 = vadd.f32 %v2414_v0, %v296_v55  ;;  %v2375_v15 = vpop.f32.mrb[33].mxu0  ;;  %v2416_v22 = vpop.f32.mrb[33].mxu1  ;;  %v11111_v24 = vld [vmem:[#allocation261_spill] sm:$0xff] }
 0x1b9   :  { %v2512_v14 = vadd.f32 %v2375_v15, %v185_v26  ;;  %v2514_v9 = vadd.f32 %v2416_v22, %v298_v57  ;;  %v2377_v12 = vpop.f32.mrb[34].mxu0  ;;  %v2418_v7 = vpop.f32.mrb[34].mxu1  ;;  %v411_v31 = vadd.f32 %v11111_v24, %v7801_v63  ;;  %v11112_v15 = vld [vmem:[#allocation262_spill] sm:$0xff] }
 0x1ba   :  { %v2378_v39 = vpop.f32.mrb[35].mxu0  ;;  %v2419_v2 = vpop.f32.mrb[35].mxu1  ;;  %5953 = vtanh.f32 %v2513_v33  ;;  %v524_v26 = vadd.f32 %v11112_v15, %v7804_v56 }
 0x1bb   :  { %5955 = vtanh.f32 %v2511_v17 }
 0x1bc   :  { %5957 = vtanh.f32 %v2514_v9 }
 0x1bd   :  { %5959 = vtanh.f32 %v2512_v14 }
 0x1c4   :  { %v5954_v41 = vpop.eup %5953 }
 0x1c5   :  { %v5956_v9 = vpop.eup %5955  ;;  %v2531_v63 = vmul.f32 0.5, %v5954_v41 }
 0x1c6   :  { %v5958_v39 = vpop.eup %5957  ;;  %v2527_v56 = vmul.f32 0.5, %v5956_v9 }
 0x1c7   :  { %v5960_v2 = vpop.eup %5959  ;;  %v2532_v42 = vmul.f32 0.5, %v5958_v39  ;;  %v2533_v25 = vadd.f32 0.5, %v2531_v63  ;;  %v11113_v63 = vld [vmem:[#allocation187_spill] sm:$0xff] }
 0x1c9   :  { %v2534_v24 = vadd.f32 0.5, %v2532_v42  ;;  %v2539_v15 = vmul.f32 0.0, %v2533_v25 }
 0x1f7   :  { %v2455_v12 = vpop.f32.mrb[36].mxu0  ;;  %v2496_v7 = vpop.f32.mrb[36].mxu1 }
 0x1f8   :  { %v2515_v55 = vadd.f32 %v2455_v12, %v409_v48  ;;  %v2517_v34 = vadd.f32 %v2496_v7, %v522_v49  ;;  %v2457_v21 = vpop.f32.mrb[37].mxu0  ;;  %v2498_v17 = vpop.f32.mrb[37].mxu1  ;;  %v2528_v48 = vmul.f32 0.5, %v5960_v2  ;;  %v2529_v49 = vadd.f32 0.5, %v2527_v56 }
 0x1f9   :  { %v2516_v57 = vadd.f32 %v2457_v21, %v411_v31  ;;  %v2518_v14 = vadd.f32 %v2498_v17, %v524_v26  ;;  %v2459_v0 = vpop.f32.mrb[38].mxu0  ;;  %v2500_v33 = vpop.f32.mrb[38].mxu1  ;;  %v11114_v2 = vsub.s32 0, %v11113_v63 }
 0x1fa   :  { %5961 = vtanh.f32 %v2515_v55  ;;  %v2460_v22 = vpop.f32.mrb[39].mxu0  ;;  %v2501_v40 = vpop.f32.mrb[39].mxu1  ;;  %v2530_v26 = vadd.f32 0.5, %v2528_v48  ;;  %v2540_v55 = vmul.f32 0.0, %v2534_v24 }
 0x1fb   :  { %5963 = vtanh.f32 %v2516_v57 }
 0x1fc   :  { %5965 = vtanh.f32 %v2517_v34 }
 0x1fd   :  { %5967 = vtanh.f32 %v2518_v14  ;;  %v5247_v14 = vld [vmem:[%s10191_s4] sm:$0x3] }
 0x1fe   :  { %v8184_v56 = vrot.slane %v5247_v14, %v11114_v2  ;;  %v11126_v2 = vld [vmem:[#allocation83_spill] sm:$0xff] }
 0x204   :  { %v5962_v31 = vpop.eup %5961 }
 0x205   :  { %v2541_v12 = vmul.f32 %v5962_v31, %v2529_v49  ;;  %v5964_v7 = vpop.eup %5963  ;;  %v11115_v49 = vsub.s32 1, %v11113_v63  ;;  %v11135_v63 = vld [vmem:[#allocation92_spill] sm:$0xff] }
 0x206   :  { %v2542_v17 = vmul.f32 %v5964_v7, %v2530_v26  ;;  %v5966_v0 = vpop.eup %5965 }
 0x207   :  { %v8173_v21 = vadd.f32 %v2541_v12, %v2539_v15  ;;  %v5968_v34 = vpop.eup %5967  ;;  %v2535_v33 = vmul.f32 0.5, %v5966_v0  ;;  %v8188_v24 = vrot.slane %v5247_v14, %v11115_v49  ;;  %v11121_v14 = vld [vmem:[#allocation78_spill] sm:$0xff]  ;;  %v11130_v49 = vld [vmem:[#allocation87_spill] sm:$0xff] }
 0x208   :  { %v8176_v57 = vadd.f32 %v2542_v17, %v2540_v55  ;;  %v2536_v41 = vmul.f32 0.5, %v5968_v34  ;;  %v11116_v55 = vld [vmem:[#allocation73_spill] sm:$0xff]  ;;  %v11117_v17 = vld [vmem:[#allocation74_spill] sm:$0xff]  ;;  %v11118_v34 = vld [vmem:[#allocation75_spill] sm:$0xff] }
 0x209   :  { %5969 = vtanh.f32 %v8173_v21  ;;  %v2537_v22 = vadd.f32 0.5, %v2535_v33  ;;  %v11119_v33 = vld [vmem:[#allocation76_spill] sm:$0xff] }
 0x20a   :  { %5971 = vtanh.f32 %v8176_v57  ;;  %v2538_v39 = vadd.f32 0.5, %v2536_v41  ;;  %v11120_v41 = vld [vmem:[#allocation77_spill] sm:$0xff] }
 0x213   :  { %v5970_v40 = vpop.eup %5969 }
 0x214   :  { %v2547_v9 = vmul.f32 %v5970_v40, %v2537_v22  ;;  %v5972_v42 = vpop.eup %5971  ;;  %v11122_v22 = vld [vmem:[#allocation79_spill] sm:$0xff]  ;;  %v11123_v40 = vld [vmem:[#allocation80_spill] sm:$0xff] }
 0x215   :  { %v2548_v25 = vmul.f32 %v5972_v42, %v2538_v39  ;;  %v11125_v39 = vld [vmem:[#allocation82_spill] sm:$0xff]  ;;  %v11127_v42 = vld [vmem:[#allocation84_spill] sm:$0xff] }
 0x216   :  { %v5231_v48 = vmax.f32 %v2547_v9, 0.0  ;;  %v8193_v12 = vpack.c.bf16 %v2547_v9, %v2547_v9  ;;  %v11124_v9 = vld [vmem:[#allocation81_spill] sm:$0xff] }
 0x217   :  { %v8190_v31 = vpack.c.bf16 %v2548_v25, %v2548_v25  ;;  %v5232_v15 = vmax.f32 %v2548_v25, 0.0  ;;  %v11128_v25 = vld [vmem:[#allocation85_spill] sm:$0xff] }
 0x218   :  { %v5259_v26 = vmul.f32 %v8184_v56, %v5231_v48  ;;  %v11129_v48 = vld [vmem:[#allocation86_spill] sm:$0xff] }
 0x219   :  { %2585 = vmatprep.mubr.bf16.mxu0 %v8190_v31  ;;  %2626 = vmatprep.mubr.bf16.mxu1 %v8190_v31  ;;  %v5260_v7 = vmul.f32 %v8188_v24, %v5232_v15  ;;  %v11131_v15 = vld [vmem:[#allocation88_spill] sm:$0xff] }
 0x21a   :  { %2586 = vmatmul.mubr.bf16.vlgmr.msra.gmra.mrb[40].mxu0 %v8193_v12  ;;  %2627 = vmatmul.mubr.bf16.vlgmr.msra.gmra.mrb[40].mxu1 %v8193_v12 }
 0x21b   :  { %2636 = vmatpush1.bf16.msra.mxu0 %v11116_v55  ;;  %2677 = vmatpush1.bf16.msra.mxu1 %v11117_v17  ;;  %v5275_v0 = vadd.f32 %v5260_v7, %v5259_v26  ;;  %v11132_v26 = vld [vmem:[#allocation89_spill] sm:$0xff]  ;;  %v11133_v7 = vld [vmem:[#allocation90_spill] sm:$0xff] }
 0x21c   :  { %2667 = vmatprep.mubr.bf16.mxu0 %v8190_v31  ;;  %2708 = vmatprep.mubr.bf16.mxu1 %v8190_v31 }
 0x21d   :  { %5276 = vadd.xlane.f32.xlu0 %v5275_v0  ;;  %2637 = vmatprep.subr.bf16.mxu0 %v11118_v34  ;;  %v11134_v0 = vld [vmem:[#allocation91_spill] sm:$0xff] }
 0x21e   :  { %2678 = vmatprep.subr.bf16.mxu1 %v11119_v33 }
 0x21f   :  { %2638 = vmatpush1.bf16.msra.mxu0 %v11120_v41  ;;  %2679 = vmatpush1.bf16.msra.mxu1 %v11121_v14 }
 0x220   :  { %2639 = vmatprep.subr.bf16.mxu0 %v11122_v22  ;;  %2680 = vmatprep.subr.bf16.mxu1 %v11123_v40 }
 0x223   :  { %2640 = vmatpush1.bf16.msra.mxu0 %v11124_v9  ;;  %2681 = vmatpush1.bf16.msra.mxu1 %v11125_v39  ;;  %v11136_v39 = vld [vmem:[#allocation93_spill] sm:$0xff] }
 0x224   :  { %2641 = vmatprep.subr.bf16.mxu0 %v11126_v2  ;;  %2682 = vmatprep.subr.bf16.mxu1 %v11127_v42  ;;  %v11137_v2 = vld [vmem:[#allocation94_spill] sm:$0xff]  ;;  %v11138_v42 = vld [vmem:[#allocation95_spill] sm:$0xff] }
 0x227   :  { %2642 = vmatpush1.bf16.msra.mxu0 %v11128_v25  ;;  %2683 = vmatpush1.bf16.msra.mxu1 %v11129_v48  ;;  %v11139_v25 = vld [vmem:[#allocation96_spill] sm:$0xff]  ;;  %v11140_v48 = vld [vmem:[#allocation97_spill] sm:$0xff] }
 0x228   :  { %2643 = vmatprep.subr.bf16.mxu0 %v11130_v49  ;;  %2684 = vmatprep.subr.bf16.mxu1 %v11131_v15  ;;  %v11141_v49 = vld [vmem:[#allocation98_spill] sm:$0xff]  ;;  %v11142_v15 = vld [vmem:[#allocation99_spill] sm:$0xff] }
 0x22b   :  { %2644 = vmatpush1.bf16.msra.mxu0 %v11132_v26  ;;  %2685 = vmatpush1.bf16.msra.mxu1 %v11133_v7  ;;  %v11143_v26 = vld [vmem:[#allocation100_spill] sm:$0xff]  ;;  %v11144_v7 = vld [vmem:[#allocation101_spill] sm:$0xff] }
 0x22c   :  { %2645 = vmatprep.subr.bf16.mxu0 %v11134_v0  ;;  %2686 = vmatprep.subr.bf16.mxu1 %v11135_v63  ;;  %v11145_v0 = vld [vmem:[#allocation102_spill] sm:$0xff]  ;;  %v11146_v63 = vld [vmem:[#allocation103_spill] sm:$0xff] }
 0x22f   :  { %2646 = vmatpush1.bf16.msra.mxu0 %v11136_v39  ;;  %2687 = vmatpush1.bf16.msra.mxu1 %v11137_v2  ;;  %v11147_v39 = vld [vmem:[#allocation104_spill] sm:$0xff]  ;;  %v11148_v2 = vld [vmem:[#allocation105_spill] sm:$0xff] }
 0x230   :  { %2647 = vmatprep.subr.bf16.mxu0 %v11138_v42  ;;  %2688 = vmatprep.subr.bf16.mxu1 %v11139_v25  ;;  %v11149_v42 = vld [vmem:[#allocation106_spill] sm:$0xff]  ;;  %v11150_v25 = vld [vmem:[#allocation107_spill] sm:$0xff] }
 0x233   :  { %2648 = vmatpush1.bf16.msra.mxu0 %v11140_v48  ;;  %2689 = vmatpush1.bf16.msra.mxu1 %v11141_v49  ;;  %v11151_v48 = vld [vmem:[#allocation108_spill] sm:$0xff]  ;;  %v11152_v49 = vld [vmem:[#allocation109_spill] sm:$0xff] }
 0x234   :  { %2649 = vmatprep.subr.bf16.mxu0 %v11142_v15  ;;  %2690 = vmatprep.subr.bf16.mxu1 %v11143_v26  ;;  %v11153_v15 = vld [vmem:[#allocation110_spill] sm:$0xff]  ;;  %v11154_v26 = vld [vmem:[#allocation111_spill] sm:$0xff] }
 0x237   :  { %2650 = vmatpush1.bf16.msra.mxu0 %v11144_v7  ;;  %2691 = vmatpush1.bf16.msra.mxu1 %v11145_v0  ;;  %v11155_v7 = vld [vmem:[#allocation112_spill] sm:$0xff]  ;;  %v11156_v0 = vld [vmem:[#allocation113_spill] sm:$0xff] }
 0x238   :  { %2651 = vmatprep.subr.bf16.mxu0 %v11146_v63  ;;  %2692 = vmatprep.subr.bf16.mxu1 %v11147_v39  ;;  %v11157_v63 = vld [vmem:[#allocation114_spill] sm:$0xff]  ;;  %v11158_v39 = vld [vmem:[#allocation115_spill] sm:$0xff] }
 0x23b   :  { %2652 = vmatpush1.bf16.msra.mxu0 %v11148_v2  ;;  %2693 = vmatpush1.bf16.msra.mxu1 %v11149_v42  ;;  %v11159_v2 = vld [vmem:[#allocation116_spill] sm:$0xff]  ;;  %v11160_v42 = vld [vmem:[#allocation117_spill] sm:$0xff] }
 0x23c   :  { %2653 = vmatprep.subr.bf16.mxu0 %v11150_v25  ;;  %2694 = vmatprep.subr.bf16.mxu1 %v11151_v48  ;;  %v11161_v25 = vld [vmem:[#allocation118_spill] sm:$0xff]  ;;  %v11162_v48 = vld [vmem:[#allocation119_spill] sm:$0xff] }
 0x23f   :  { %2654 = vmatpush1.bf16.msra.mxu0 %v11152_v49  ;;  %2695 = vmatpush1.bf16.msra.mxu1 %v11153_v15  ;;  %v11163_v49 = vld [vmem:[#allocation120_spill] sm:$0xff]  ;;  %v11164_v15 = vld [vmem:[#allocation121_spill] sm:$0xff] }
 0x240   :  { %2655 = vmatprep.subr.bf16.mxu0 %v11154_v26  ;;  %2696 = vmatprep.subr.bf16.mxu1 %v11155_v7  ;;  %v11165_v26 = vld [vmem:[#allocation122_spill] sm:$0xff]  ;;  %v11166_v7 = vld [vmem:[#allocation123_spill] sm:$0xff] }
 0x243   :  { %2656 = vmatpush1.bf16.msra.mxu0 %v11156_v0  ;;  %2697 = vmatpush1.bf16.msra.mxu1 %v11157_v63  ;;  %v11167_v0 = vld [vmem:[#allocation124_spill] sm:$0xff]  ;;  %v11168_v63 = vld [vmem:[#allocation125_spill] sm:$0xff] }
 0x244   :  { %2657 = vmatprep.subr.bf16.mxu0 %v11158_v39  ;;  %2698 = vmatprep.subr.bf16.mxu1 %v11159_v2  ;;  %v11169_v39 = vld [vmem:[#allocation126_spill] sm:$0xff]  ;;  %v11170_v2 = vld [vmem:[#allocation127_spill] sm:$0xff] }
 0x247   :  { %2658 = vmatpush1.bf16.msra.mxu0 %v11160_v42  ;;  %2699 = vmatpush1.bf16.msra.mxu1 %v11161_v25  ;;  %v11171_v42 = vld [vmem:[#allocation128_spill] sm:$0xff]  ;;  %v11172_v25 = vld [vmem:[#allocation129_spill] sm:$0xff] }
 0x248   :  { %2659 = vmatprep.subr.bf16.mxu0 %v11162_v48  ;;  %2700 = vmatprep.subr.bf16.mxu1 %v11163_v49  ;;  %v11173_v48 = vld [vmem:[#allocation130_spill] sm:$0xff]  ;;  %v11174_v49 = vld [vmem:[#allocation131_spill] sm:$0xff] }
 0x24b   :  { %2660 = vmatpush1.bf16.msra.mxu0 %v11164_v15  ;;  %2701 = vmatpush1.bf16.msra.mxu1 %v11165_v26  ;;  %v11175_v15 = vld [vmem:[#allocation132_spill] sm:$0xff]  ;;  %v11176_v26 = vld [vmem:[#allocation133_spill] sm:$0xff] }
 0x24c   :  { %2661 = vmatprep.subr.bf16.mxu0 %v11166_v7  ;;  %2702 = vmatprep.subr.bf16.mxu1 %v11167_v0  ;;  %v11177_v7 = vld [vmem:[#allocation134_spill] sm:$0xff]  ;;  %v11178_v0 = vld [vmem:[#allocation135_spill] sm:$0xff] }
 0x24f   :  { %2662 = vmatpush1.bf16.msra.mxu0 %v11168_v63  ;;  %2703 = vmatpush1.bf16.msra.mxu1 %v11169_v39  ;;  %v11179_v63 = vld [vmem:[#allocation136_spill] sm:$0xff]  ;;  %v11192_v39 = vld [vmem:[#allocation149_spill] sm:$0xff] }
 0x250   :  { %2663 = vmatprep.subr.bf16.mxu0 %v11170_v2  ;;  %2704 = vmatprep.subr.bf16.mxu1 %v11171_v42  ;;  %v11180_v42 = vld [vmem:[#allocation137_spill] sm:$0xff]  ;;  %v11190_v2 = vld [vmem:[#allocation147_spill] sm:$0xff] }
 0x253   :  { %2664 = vmatpush1.bf16.msra.mxu0 %v11172_v25  ;;  %2705 = vmatpush1.bf16.msra.mxu1 %v11173_v48  ;;  %v11181_v48 = vld [vmem:[#allocation138_spill] sm:$0xff]  ;;  %v11188_v25 = vld [vmem:[#allocation145_spill] sm:$0xff] }
 0x254   :  { %2665 = vmatprep.subr.bf16.mxu0 %v11174_v49  ;;  %2706 = vmatprep.subr.bf16.mxu1 %v11175_v15  ;;  %v11182_v15 = vld [vmem:[#allocation139_spill] sm:$0xff]  ;;  %v11187_v49 = vld [vmem:[#allocation144_spill] sm:$0xff] }
 0x257   :  { %2666 = vmatpush1.bf16.msra.mxu0 %v11176_v26  ;;  %2707 = vmatpush1.bf16.msra.mxu1 %v11177_v7  ;;  %v11183_v26 = vld [vmem:[#allocation140_spill] sm:$0xff]  ;;  %v11184_v7 = vld [vmem:[#allocation141_spill] sm:$0xff] }
 0x258   :  { %2717 = vmatprep.subr.bf16.mxu0 %v11178_v0  ;;  %2758 = vmatprep.subr.bf16.mxu1 %v11179_v63  ;;  %v11185_v0 = vld [vmem:[#allocation142_spill] sm:$0xff]  ;;  %v11186_v63 = vld [vmem:[#allocation143_spill] sm:$0xff] }
 0x25a   :  { %2668 = vmatmul.mubr.bf16.vlgmr.msra.gmra.mrb[44].mxu0 %v8193_v12  ;;  %2709 = vmatmul.mubr.bf16.vlgmr.msra.gmra.mrb[44].mxu1 %v8193_v12 }
 0x25b   :  { %2718 = vmatpush1.bf16.msra.mxu0 %v11180_v42  ;;  %2749 = vmatprep.mubr.bf16.mxu0 %v8190_v31  ;;  %v11189_v42 = vld [vmem:[#allocation146_spill] sm:$0xff] }
 0x25c   :  { %2759 = vmatpush1.bf16.msra.mxu1 %v11181_v48  ;;  %2790 = vmatprep.mubr.bf16.mxu1 %v8190_v31  ;;  %v11191_v48 = vld [vmem:[#allocation148_spill] sm:$0xff] }
 0x25d   :  { %2719 = vmatprep.subr.bf16.mxu0 %v11182_v15  ;;  %2760 = vmatprep.subr.bf16.mxu1 %v11183_v26  ;;  %v11193_v15 = vld [vmem:[#allocation150_spill] sm:$0xff]  ;;  %v11194_v26 = vld [vmem:[#allocation151_spill] sm:$0xff] }
 0x25f   :  { %2720 = vmatpush1.bf16.msra.mxu0 %v11184_v7  ;;  %v11195_v7 = vld [vmem:[#allocation152_spill] sm:$0xff] }
 0x260   :  { %2761 = vmatpush1.bf16.msra.mxu1 %v11185_v0  ;;  %2721 = vmatprep.subr.bf16.mxu0 %v11186_v63  ;;  %v11196_v0 = vld [vmem:[#allocation153_spill] sm:$0xff]  ;;  %v11197_v63 = vld [vmem:[#allocation154_spill] sm:$0xff] }
 0x261   :  { %2762 = vmatprep.subr.bf16.mxu1 %v11187_v49  ;;  %v11198_v49 = vld [vmem:[#allocation155_spill] sm:$0xff] }
 0x263   :  { %2722 = vmatpush1.bf16.msra.mxu0 %v11188_v25  ;;  %v11199_v25 = vld [vmem:[#allocation156_spill] sm:$0xff] }
 0x264   :  { %2763 = vmatpush1.bf16.msra.mxu1 %v11189_v42  ;;  %2723 = vmatprep.subr.bf16.mxu0 %v11190_v2  ;;  %v11200_v42 = vld [vmem:[#allocation157_spill] sm:$0xff]  ;;  %v11201_v2 = vld [vmem:[#allocation158_spill] sm:$0xff] }
 0x265   :  { %2764 = vmatprep.subr.bf16.mxu1 %v11191_v48  ;;  %v11202_v48 = vld [vmem:[#allocation159_spill] sm:$0xff] }
 0x267   :  { %2724 = vmatpush1.bf16.msra.mxu0 %v11192_v39  ;;  %v11203_v39 = vld [vmem:[#allocation160_spill] sm:$0xff] }
 0x268   :  { %2765 = vmatpush1.bf16.msra.mxu1 %v11193_v15  ;;  %2725 = vmatprep.subr.bf16.mxu0 %v11194_v26  ;;  %v11204_v15 = vld [vmem:[#allocation161_spill] sm:$0xff]  ;;  %v11205_v26 = vld [vmem:[#allocation162_spill] sm:$0xff] }
 0x269   :  { %2766 = vmatprep.subr.bf16.mxu1 %v11195_v7  ;;  %v11206_v7 = vld [vmem:[#allocation163_spill] sm:$0xff] }
 0x26b   :  { %2726 = vmatpush1.bf16.msra.mxu0 %v11196_v0  ;;  %v11207_v0 = vld [vmem:[#allocation164_spill] sm:$0xff] }
 0x26c   :  { %2767 = vmatpush1.bf16.msra.mxu1 %v11197_v63  ;;  %2727 = vmatprep.subr.bf16.mxu0 %v11198_v49  ;;  %v11208_v63 = vld [vmem:[#allocation165_spill] sm:$0xff]  ;;  %v11209_v49 = vld [vmem:[#allocation166_spill] sm:$0xff] }
 0x26d   :  { %2768 = vmatprep.subr.bf16.mxu1 %v11199_v25  ;;  %v11210_v25 = vld [vmem:[#allocation167_spill] sm:$0xff] }
 0x26f   :  { %2728 = vmatpush1.bf16.msra.mxu0 %v11200_v42  ;;  %v11211_v42 = vld [vmem:[#allocation168_spill] sm:$0xff] }
 0x270   :  { %2769 = vmatpush1.bf16.msra.mxu1 %v11201_v2  ;;  %2729 = vmatprep.subr.bf16.mxu0 %v11202_v48  ;;  %v11212_v2 = vld [vmem:[#allocation169_spill] sm:$0xff]  ;;  %v11213_v48 = vld [vmem:[#allocation170_spill] sm:$0xff] }
 0x271   :  { %2770 = vmatprep.subr.bf16.mxu1 %v11203_v39  ;;  %v11214_v39 = vld [vmem:[#allocation171_spill] sm:$0xff] }
 0x273   :  { %2730 = vmatpush1.bf16.msra.mxu0 %v11204_v15  ;;  %v11215_v15 = vld [vmem:[#allocation172_spill] sm:$0xff] }
 0x274   :  { %2771 = vmatpush1.bf16.msra.mxu1 %v11205_v26  ;;  %2731 = vmatprep.subr.bf16.mxu0 %v11206_v7  ;;  %v11216_v26 = vld [vmem:[#allocation173_spill] sm:$0xff]  ;;  %v11217_v7 = vld [vmem:[#allocation174_spill] sm:$0xff] }
 0x275   :  { %2772 = vmatprep.subr.bf16.mxu1 %v11207_v0  ;;  %v11218_v0 = vld [vmem:[#allocation175_spill] sm:$0xff] }
 0x277   :  { %2732 = vmatpush1.bf16.msra.mxu0 %v11208_v63  ;;  %v11219_v63 = vld [vmem:[#allocation176_spill] sm:$0xff] }
 0x278   :  { %2773 = vmatpush1.bf16.msra.mxu1 %v11209_v49  ;;  %2733 = vmatprep.subr.bf16.mxu0 %v11210_v25  ;;  %v11220_v49 = vld [vmem:[#allocation177_spill] sm:$0xff]  ;;  %v11221_v25 = vld [vmem:[#allocation178_spill] sm:$0xff] }
 0x279   :  { %2774 = vmatprep.subr.bf16.mxu1 %v11211_v42  ;;  %v11222_v42 = vld [vmem:[#allocation179_spill] sm:$0xff] }
 0x27b   :  { %2734 = vmatpush1.bf16.msra.mxu0 %v11212_v2  ;;  %v11223_v2 = vld [vmem:[#allocation180_spill] sm:$0xff] }
 0x27c   :  { %2775 = vmatpush1.bf16.msra.mxu1 %v11213_v48  ;;  %2735 = vmatprep.subr.bf16.mxu0 %v11214_v39  ;;  %v11224_v48 = vld [vmem:[#allocation181_spill] sm:$0xff]  ;;  %v11225_v39 = vld [vmem:[#allocation182_spill] sm:$0xff] }
 0x27d   :  { %2776 = vmatprep.subr.bf16.mxu1 %v11215_v15  ;;  %v11226_v15 = vld [vmem:[#allocation183_spill] sm:$0xff] }
 0x27f   :  { %2736 = vmatpush1.bf16.msra.mxu0 %v11216_v26  ;;  %v11227_v26 = vld [vmem:[#allocation184_spill] sm:$0xff] }
 0x280   :  { %2777 = vmatpush1.bf16.msra.mxu1 %v11217_v7  ;;  %2737 = vmatprep.subr.bf16.mxu0 %v11218_v0  ;;  %v11228_v7 = vld [vmem:[#allocation185_spill] sm:$0xff]  ;;  %v11229_v0 = vld [vmem:[#allocation186_spill] sm:$0xff] }
 0x281   :  { %2778 = vmatprep.subr.bf16.mxu1 %v11219_v63  ;;  %v11230_v63 = vld [vmem:[#allocation188_spill] sm:$0xff] }
 0x283   :  { %2738 = vmatpush1.bf16.msra.mxu0 %v11220_v49  ;;  %v11231_v49 = vld [vmem:[#allocation189_spill] sm:$0xff] }
 0x284   :  { %2779 = vmatpush1.bf16.msra.mxu1 %v11221_v25  ;;  %2739 = vmatprep.subr.bf16.mxu0 %v11222_v42  ;;  %v11232_v25 = vld [vmem:[#allocation190_spill] sm:$0xff]  ;;  %v11233_v42 = vld [vmem:[#allocation191_spill] sm:$0xff] }
 0x285   :  { %2780 = vmatprep.subr.bf16.mxu1 %v11223_v2  ;;  %v11234_v2 = vld [vmem:[#allocation192_spill] sm:$0xff] }
 0x287   :  { %2740 = vmatpush1.bf16.msra.mxu0 %v11224_v48  ;;  %v11235_v48 = vld [vmem:[#allocation193_spill] sm:$0xff] }
 0x288   :  { %2781 = vmatpush1.bf16.msra.mxu1 %v11225_v39  ;;  %2741 = vmatprep.subr.bf16.mxu0 %v11226_v15  ;;  %v11236_v39 = vld [vmem:[#allocation198_spill] sm:$0xff]  ;;  %v11237_v15 = vld [vmem:[#allocation199_spill] sm:$0xff] }
 0x289   :  { %2782 = vmatprep.subr.bf16.mxu1 %v11227_v26  ;;  %v11238_v26 = vld [vmem:[#allocation200_spill] sm:$0xff] }
 0x28b   :  { %2742 = vmatpush1.bf16.msra.mxu0 %v11228_v7  ;;  %v11239_v7 = vld [vmem:[#allocation201_spill] sm:$0xff] }
 0x28c   :  { %2783 = vmatpush1.bf16.msra.mxu1 %v11229_v0  ;;  %2743 = vmatprep.subr.bf16.mxu0 %v11230_v63  ;;  %v11240_v0 = vld [vmem:[#allocation204_spill] sm:$0xff]  ;;  %v11241_v63 = vld [vmem:[#allocation207_spill] sm:$0xff] }
 0x28d   :  { %2784 = vmatprep.subr.bf16.mxu1 %v11231_v49  ;;  %v11242_v49 = vld [vmem:[#allocation209_spill] sm:$0xff] }
 0x28f   :  { %2744 = vmatpush1.bf16.msra.mxu0 %v11232_v25  ;;  %v11243_v25 = vld [vmem:[#allocation210_spill] sm:$0xff] }
 0x290   :  { %2785 = vmatpush1.bf16.msra.mxu1 %v11233_v42  ;;  %2745 = vmatprep.subr.bf16.mxu0 %v11234_v2  ;;  %v11254_v2 = vld [vmem:[#allocation233_spill] sm:$0xff] }
 0x291   :  { %2786 = vmatprep.subr.bf16.mxu1 %v11235_v48  ;;  %v11244_v48 = vld [vmem:[#allocation212_spill] sm:$0xff] }
 0x293   :  { %2746 = vmatpush1.bf16.msra.mxu0 %v11236_v39  ;;  %v11252_v39 = vld [vmem:[#allocation228_spill] sm:$0xff] }
 0x294   :  { %2787 = vmatpush1.bf16.msra.mxu1 %v11237_v15  ;;  %2747 = vmatprep.subr.bf16.mxu0 %v11238_v26  ;;  %v11245_v15 = vld [vmem:[#allocation215_spill] sm:$0xff]  ;;  %v11251_v26 = vld [vmem:[#allocation226_spill] sm:$0xff] }
 0x295   :  { %2788 = vmatprep.subr.bf16.mxu1 %v11239_v7  ;;  %v11246_v7 = vld [vmem:[#allocation217_spill] sm:$0xff] }
 0x297   :  { %2748 = vmatpush1.bf16.msra.mxu0 %v11240_v0  ;;  %v11247_v0 = vld [vmem:[#allocation218_spill] sm:$0xff] }
 0x298   :  { %2789 = vmatpush1.bf16.msra.mxu1 %v11241_v63  ;;  %2799 = vmatprep.subr.bf16.mxu0 %v11242_v49  ;;  %v11248_v63 = vld [vmem:[#allocation220_spill] sm:$0xff]  ;;  %v11249_v49 = vld [vmem:[#allocation223_spill] sm:$0xff] }
 0x299   :  { %2840 = vmatprep.subr.bf16.mxu1 %v11243_v25  ;;  %v11250_v25 = vld [vmem:[#allocation225_spill] sm:$0xff] }
 0x29a   :  { %2750 = vmatmul.mubr.bf16.vlgmr.msra.gmra.mrb[40].mxu0 %v8193_v12 }
 0x29b   :  { %2791 = vmatmul.mubr.bf16.vlgmr.msra.gmra.mrb[40].mxu1 %v8193_v12  ;;  %2800 = vmatpush1.bf16.msra.mxu0 %v11244_v48  ;;  %v11253_v48 = vld [vmem:[#allocation231_spill] sm:$0xff] }
 0x29c   :  { %2831 = vmatprep.mubr.bf16.mxu0 %v8190_v31  ;;  %2841 = vmatpush1.bf16.msra.mxu1 %v11245_v15  ;;  %v11255_v15 = vld [vmem:[#allocation234_spill] sm:$0xff] }
 0x29d   :  { %2872 = vmatprep.mubr.bf16.mxu1 %v8190_v31  ;;  %2801 = vmatprep.subr.bf16.mxu0 %v11246_v7  ;;  %v11256_v31 = vld [vmem:[#allocation236_spill] sm:$0xff]  ;;  %v11257_v7 = vld [vmem:[#allocation239_spill] sm:$0xff] }
 0x29e   :  { %2842 = vmatprep.subr.bf16.mxu1 %v11247_v0  ;;  %v11258_v0 = vld [vmem:[#allocation241_spill] sm:$0xff] }
 0x29f   :  { %2802 = vmatpush1.bf16.msra.mxu0 %v11248_v63  ;;  %v11259_v63 = vld [vmem:[#allocation242_spill] sm:$0xff] }
 0x2a0   :  { %2843 = vmatpush1.bf16.msra.mxu1 %v11249_v49  ;;  %2803 = vmatprep.subr.bf16.mxu0 %v11250_v25  ;;  %v11260_v49 = vld [vmem:[#allocation244_spill] sm:$0xff]  ;;  %v11261_v25 = vld [vmem:[#allocation247_spill] sm:$0xff] }
 0x2a1   :  { %2844 = vmatprep.subr.bf16.mxu1 %v11251_v26  ;;  %v11262_v26 = vld [vmem:[#allocation249_spill] sm:$0xff] }
 0x2a3   :  { %2804 = vmatpush1.bf16.msra.mxu0 %v11252_v39  ;;  %v11263_v39 = vld [vmem:[#allocation250_spill] sm:$0xff] }
 0x2a4   :  { %2845 = vmatpush1.bf16.msra.mxu1 %v11253_v48  ;;  %2805 = vmatprep.subr.bf16.mxu0 %v11254_v2  ;;  %v11264_v48 = vld [vmem:[#allocation252_spill] sm:$0xff]  ;;  %v11265_v2 = vld [vmem:[#allocation255_spill] sm:$0xff] }
 0x2a5   :  { %2846 = vmatprep.subr.bf16.mxu1 %v11255_v15  ;;  %v11266_v15 = vld [vmem:[#allocation257_spill] sm:$0xff] }
 0x2a7   :  { %2806 = vmatpush1.bf16.msra.mxu0 %v11256_v31  ;;  %v11267_v31 = vld [vmem:[#allocation258_spill] sm:$0xff] }
 0x2a8   :  { %2847 = vmatpush1.bf16.msra.mxu1 %v11257_v7  ;;  %2807 = vmatprep.subr.bf16.mxu0 %v11258_v0  ;;  %v11268_v7 = vld [vmem:[#allocation263_spill] sm:$0xff]  ;;  %v11269_v0 = vld [vmem:[#allocation264_spill] sm:$0xff] }
 0x2a9   :  { %2848 = vmatprep.subr.bf16.mxu1 %v11259_v63  ;;  %v11270_v63 = vld [vmem:[#allocation265_spill] sm:$0xff] }
 0x2ab   :  { %2808 = vmatpush1.bf16.msra.mxu0 %v11260_v49  ;;  %v11271_v49 = vld [vmem:[#allocation266_spill] sm:$0xff] }
 0x2ac   :  { %2849 = vmatpush1.bf16.msra.mxu1 %v11261_v25  ;;  %2809 = vmatprep.subr.bf16.mxu0 %v11262_v26  ;;  %v11272_v25 = vld [vmem:[#allocation267_spill] sm:$0xff]  ;;  %v11273_v26 = vld [vmem:[#allocation270_spill] sm:$0xff] }
 0x2ad   :  { %2850 = vmatprep.subr.bf16.mxu1 %v11263_v39  ;;  %v11274_v39 = vld [vmem:[#allocation273_spill] sm:$0xff] }
 0x2af   :  { %2810 = vmatpush1.bf16.msra.mxu0 %v11264_v48  ;;  %v11275_v48 = vld [vmem:[#allocation274_spill] sm:$0xff] }
 0x2b0   :  { %2851 = vmatpush1.bf16.msra.mxu1 %v11265_v2  ;;  %2811 = vmatprep.subr.bf16.mxu0 %v11266_v15  ;;  %v11276_v2 = vld [vmem:[#allocation275_spill] sm:$0xff]  ;;  %v11277_v15 = vld [vmem:[#allocation278_spill] sm:$0xff] }
 0x2b1   :  { %2852 = vmatprep.subr.bf16.mxu1 %v11267_v31  ;;  %v11278_v31 = vld [vmem:[#allocation281_spill] sm:$0xff] }
 0x2b3   :  { %2812 = vmatpush1.bf16.msra.mxu0 %v11268_v7  ;;  %v11279_v7 = vld [vmem:[#allocation282_spill] sm:$0xff] }
 0x2b4   :  { %2853 = vmatpush1.bf16.msra.mxu1 %v11269_v0  ;;  %2813 = vmatprep.subr.bf16.mxu0 %v11270_v63  ;;  %v11280_v0 = vld [vmem:[#allocation283_spill] sm:$0xff]  ;;  %v11281_v63 = vld [vmem:[#allocation286_spill] sm:$0xff] }
 0x2b5   :  { %2854 = vmatprep.subr.bf16.mxu1 %v11271_v49  ;;  %v11282_v49 = vld [vmem:[#allocation289_spill] sm:$0xff] }
 0x2b7   :  { %2814 = vmatpush1.bf16.msra.mxu0 %v11272_v25  ;;  %v11283_v25 = vld [vmem:[#allocation290_spill] sm:$0xff] }
 0x2b8   :  { %2855 = vmatpush1.bf16.msra.mxu1 %v11273_v26  ;;  %2815 = vmatprep.subr.bf16.mxu0 %v11274_v39  ;;  %v11284_v26 = vld [vmem:[#allocation291_spill] sm:$0xff]  ;;  %v11285_v39 = vld [vmem:[#allocation294_spill] sm:$0xff] }
 0x2b9   :  { %2856 = vmatprep.subr.bf16.mxu1 %v11275_v48  ;;  %v11286_v48 = vld [vmem:[#allocation297_spill] sm:$0xff] }
 0x2bb   :  { %2816 = vmatpush1.bf16.msra.mxu0 %v11276_v2  ;;  %v11287_v2 = vld [vmem:[#allocation298_spill] sm:$0xff] }
 0x2bc   :  { %2857 = vmatpush1.bf16.msra.mxu1 %v11277_v15  ;;  %2817 = vmatprep.subr.bf16.mxu0 %v11278_v31  ;;  %v11288_v15 = vld [vmem:[#allocation299_spill] sm:$0xff]  ;;  %v11289_v31 = vld [vmem:[#allocation302_spill] sm:$0xff] }
 0x2bd   :  { %2858 = vmatprep.subr.bf16.mxu1 %v11279_v7  ;;  %v11290_v7 = vld [vmem:[#allocation305_spill] sm:$0xff] }
 0x2bf   :  { %2818 = vmatpush1.bf16.msra.mxu0 %v11280_v0  ;;  %v11291_v0 = vld [vmem:[#allocation306_spill] sm:$0xff] }
 0x2c0   :  { %2859 = vmatpush1.bf16.msra.mxu1 %v11281_v63  ;;  %2819 = vmatprep.subr.bf16.mxu0 %v11282_v49 }
 0x2c1   :  { %2860 = vmatprep.subr.bf16.mxu1 %v11283_v25 }
 0x2c3   :  { %2820 = vmatpush1.bf16.msra.mxu0 %v11284_v26 }
 0x2c4   :  { %2861 = vmatpush1.bf16.msra.mxu1 %v11285_v39  ;;  %2821 = vmatprep.subr.bf16.mxu0 %v11286_v48  ;;  %v11292_v39 = vld [vmem:[#allocation315_spill] sm:$0xff] }
 0x2c5   :  { %2862 = vmatprep.subr.bf16.mxu1 %v11287_v2 }
 0x2c7   :  { %2822 = vmatpush1.bf16.msra.mxu0 %v11288_v15 }
 0x2c8   :  { %2863 = vmatpush1.bf16.msra.mxu1 %v11289_v31  ;;  %2823 = vmatprep.subr.bf16.mxu0 %v11290_v7 }
 0x2c9   :  { %2864 = vmatprep.subr.bf16.mxu1 %v11291_v0 }
 0x2cb   :  { %2824 = vmatpush1.bf16.msra.mxu0 %v7995_v10 }
 0x2cc   :  { %2865 = vmatpush1.bf16.msra.mxu1 %v8005_v18  ;;  %2825 = vmatprep.subr.bf16.mxu0 %v8015_v8 }
 0x2cd   :  { %2866 = vmatprep.subr.bf16.mxu1 %v8017_v58 }
 0x2cf   :  { %2826 = vmatpush1.bf16.msra.mxu0 %v11292_v39 }
 0x2d0   :  { %2867 = vmatpush1.bf16.msra.mxu1 %v8041_v23  ;;  %2827 = vmatprep.subr.bf16.mxu0 %v8051_v19 }
 0x2d1   :  { %2868 = vmatprep.subr.bf16.mxu1 %v8053_v47 }
 0x2d3   :  { %2828 = vmatpush1.bf16.msra.mxu0 %v8069_v3 }
 0x2d4   :  { %2869 = vmatpush1.bf16.msra.mxu1 %v8071_v20  ;;  %2829 = vmatprep.subr.bf16.mxu0 %v8075_v1 }
 0x2d5   :  { %2870 = vmatprep.subr.bf16.mxu1 %v8077_v32 }
 0x2d7   :  { %2830 = vmatpush1.bf16.msra.mxu0 %v8081_v50 }
 0x2d8   :  { %2871 = vmatpush1.bf16.msra.mxu1 %v8083_v11  ;;  %2933 = vmatprep.subr.bf16.mxu0 %v6199_v13 }
 0x2d9   :  { %2974 = vmatprep.subr.bf16.mxu1 %v6211_v16 }
 0x2da   :  { %2832 = vmatmul.mubr.bf16.vlgmr.msra.gmra.mrb[44].mxu0 %v8193_v12 }
 0x2db   :  { %2873 = vmatmul.mubr.bf16.vlgmr.msra.gmra.mrb[44].mxu1 %v8193_v12  ;;  %2934 = vmatpush1.bf16.msra.mxu0 %v6295_v27  ;;  %v11293_v12 = vld [vmem:[#allocation32_spill] sm:$0xff] }
 0x2dc   :  { %2975 = vmatpush1.bf16.msra.mxu1 %v6297_v28  ;;  %2935 = vmatprep.subr.bf16.mxu0 %v6299_v29 }
 0x2dd   :  { %2976 = vmatprep.subr.bf16.mxu1 %v6301_v30 }
 0x2df   :  { %2936 = vmatpush1.bf16.msra.mxu0 %v6321_v35  ;;  %v11339_v35 = vld [vmem:[#allocation269_spill] sm:$0xff] }
 0x2e0   :  { %2977 = vmatpush1.bf16.msra.mxu1 %v6323_v36  ;;  %2937 = vmatprep.subr.bf16.mxu0 %v6327_v37 }
 0x2e1   :  { %2978 = vmatprep.subr.bf16.mxu1 %v6329_v38 }
 0x2e3   :  { %2938 = vmatpush1.bf16.msra.mxu0 %v6351_v43 }
 0x2e4   :  { %2979 = vmatpush1.bf16.msra.mxu1 %v6353_v44  ;;  %2939 = vmatprep.subr.bf16.mxu0 %v6357_v45 }
 0x2e5   :  { %2980 = vmatprep.subr.bf16.mxu1 %v6359_v46 }
 0x2e7   :  { %2940 = vmatpush1.bf16.msra.mxu0 %v6381_v51 }
 0x2e8   :  { %2981 = vmatpush1.bf16.msra.mxu1 %v6383_v52  ;;  %2941 = vmatprep.subr.bf16.mxu0 %v6387_v53  ;;  %v11294_v52 = vld [vmem:[#allocation33_spill] sm:$0xff]  ;;  %v11295_v53 = vld [vmem:[#allocation34_spill] sm:$0xff] }
 0x2e9   :  { %2982 = vmatprep.subr.bf16.mxu1 %v6389_v54  ;;  %v11296_v54 = vld [vmem:[#allocation35_spill] sm:$0xff] }
 0x2eb   :  { %2942 = vmatpush1.bf16.msra.mxu0 %v6411_v59  ;;  %v11297_v59 = vld [vmem:[#allocation36_spill] sm:$0xff] }
 0x2ec   :  { %2983 = vmatpush1.bf16.msra.mxu1 %v6413_v60  ;;  %2943 = vmatprep.subr.bf16.mxu0 %v6417_v61  ;;  %v11298_v60 = vld [vmem:[#allocation37_spill] sm:$0xff]  ;;  %v11299_v61 = vld [vmem:[#allocation38_spill] sm:$0xff] }
 0x2ed   :  { %2984 = vmatprep.subr.bf16.mxu1 %v6419_v62  ;;  %v11300_v62 = vld [vmem:[#allocation39_spill] sm:$0xff] }
 0x2ef   :  { %2944 = vmatpush1.bf16.msra.mxu0 %v6441_v4  ;;  %v11301_v4 = vld [vmem:[#allocation40_spill] sm:$0xff] }
 0x2f0   :  { %2985 = vmatpush1.bf16.msra.mxu1 %v6443_v5  ;;  %2945 = vmatprep.subr.bf16.mxu0 %v6447_v6  ;;  %v11302_v5 = vld [vmem:[#allocation41_spill] sm:$0xff]  ;;  %v11303_v6 = vld [vmem:[#allocation42_spill] sm:$0xff] }
 0x2f1   :  { %2986 = vmatprep.subr.bf16.mxu1 %v11293_v12  ;;  %v11304_v12 = vld [vmem:[#allocation43_spill] sm:$0xff] }
 0x2f3   :  { %2946 = vmatpush1.bf16.msra.mxu0 %v11294_v52  ;;  %v11305_v52 = vld [vmem:[#allocation44_spill] sm:$0xff] }
 0x2f4   :  { %2987 = vmatpush1.bf16.msra.mxu1 %v11295_v53  ;;  %2947 = vmatprep.subr.bf16.mxu0 %v11296_v54  ;;  %v11306_v53 = vld [vmem:[#allocation45_spill] sm:$0xff]  ;;  %v11307_v54 = vld [vmem:[#allocation46_spill] sm:$0xff] }
 0x2f5   :  { %2988 = vmatprep.subr.bf16.mxu1 %v11297_v59  ;;  %v11308_v59 = vld [vmem:[#allocation47_spill] sm:$0xff] }
 0x2f7   :  { %2948 = vmatpush1.bf16.msra.mxu0 %v11298_v60  ;;  %v11309_v60 = vld [vmem:[#allocation48_spill] sm:$0xff] }
 0x2f8   :  { %2989 = vmatpush1.bf16.msra.mxu1 %v11299_v61  ;;  %2949 = vmatprep.subr.bf16.mxu0 %v11300_v62  ;;  %v11310_v61 = vld [vmem:[#allocation49_spill] sm:$0xff]  ;;  %v11311_v62 = vld [vmem:[#allocation50_spill] sm:$0xff] }
 0x2f9   :  { %2990 = vmatprep.subr.bf16.mxu1 %v11301_v4  ;;  %v11312_v4 = vld [vmem:[#allocation51_spill] sm:$0xff] }
 0x2fb   :  { %2950 = vmatpush1.bf16.msra.mxu0 %v11302_v5  ;;  %v11313_v5 = vld [vmem:[#allocation52_spill] sm:$0xff] }
 0x2fc   :  { %2991 = vmatpush1.bf16.msra.mxu1 %v11303_v6  ;;  %2951 = vmatprep.subr.bf16.mxu0 %v11304_v12  ;;  %v11314_v6 = vld [vmem:[#allocation53_spill] sm:$0xff]  ;;  %v11315_v12 = vld [vmem:[#allocation54_spill] sm:$0xff] }
 0x2fd   :  { %2992 = vmatprep.subr.bf16.mxu1 %v11305_v52  ;;  %v11316_v52 = vld [vmem:[#allocation55_spill] sm:$0xff] }
 0x2ff   :  { %2952 = vmatpush1.bf16.msra.mxu0 %v11306_v53  ;;  %v11317_v53 = vld [vmem:[#allocation56_spill] sm:$0xff] }
 0x300   :  { %2993 = vmatpush1.bf16.msra.mxu1 %v11307_v54  ;;  %2953 = vmatprep.subr.bf16.mxu0 %v11308_v59  ;;  %v11318_v54 = vld [vmem:[#allocation57_spill] sm:$0xff]  ;;  %v11319_v59 = vld [vmem:[#allocation58_spill] sm:$0xff] }
 0x301   :  { %2994 = vmatprep.subr.bf16.mxu1 %v11309_v60  ;;  %v11320_v60 = vld [vmem:[#allocation59_spill] sm:$0xff] }
 0x303   :  { %2954 = vmatpush1.bf16.msra.mxu0 %v11310_v61  ;;  %v11321_v61 = vld [vmem:[#allocation60_spill] sm:$0xff] }
 0x304   :  { %2995 = vmatpush1.bf16.msra.mxu1 %v11311_v62  ;;  %2955 = vmatprep.subr.bf16.mxu0 %v11312_v4  ;;  %v11322_v62 = vld [vmem:[#allocation61_spill] sm:$0xff]  ;;  %v11323_v4 = vld [vmem:[#allocation62_spill] sm:$0xff] }
 0x305   :  { %2996 = vmatprep.subr.bf16.mxu1 %v11313_v5  ;;  %v11324_v5 = vld [vmem:[#allocation63_spill] sm:$0xff] }
 0x307   :  { %2956 = vmatpush1.bf16.msra.mxu0 %v11314_v6  ;;  %v11325_v6 = vld [vmem:[#allocation64_spill] sm:$0xff] }
 0x308   :  { %2997 = vmatpush1.bf16.msra.mxu1 %v11315_v12  ;;  %2957 = vmatprep.subr.bf16.mxu0 %v11316_v52  ;;  %v11326_v12 = vld [vmem:[#allocation65_spill] sm:$0xff]  ;;  %v11327_v52 = vld [vmem:[#allocation66_spill] sm:$0xff] }
 0x309   :  { %2998 = vmatprep.subr.bf16.mxu1 %v11317_v53  ;;  %v11328_v53 = vld [vmem:[#allocation67_spill] sm:$0xff] }
 0x30b   :  { %2958 = vmatpush1.bf16.msra.mxu0 %v11318_v54  ;;  %v11329_v54 = vld [vmem:[#allocation68_spill] sm:$0xff] }
 0x30c   :  { %2999 = vmatpush1.bf16.msra.mxu1 %v11319_v59  ;;  %2959 = vmatprep.subr.bf16.mxu0 %v11320_v60  ;;  %v11330_v59 = vld [vmem:[#allocation69_spill] sm:$0xff]  ;;  %v11331_v60 = vld [vmem:[#allocation70_spill] sm:$0xff] }
 0x30d   :  { %3000 = vmatprep.subr.bf16.mxu1 %v11321_v61  ;;  %v11332_v61 = vld [vmem:[#allocation71_spill] sm:$0xff] }
 0x30f   :  { %2960 = vmatpush1.bf16.msra.mxu0 %v11322_v62  ;;  %v11333_v62 = vld [vmem:[#allocation72_spill] sm:$0xff] }
 0x310   :  { %3001 = vmatpush1.bf16.msra.mxu1 %v11323_v4  ;;  %2961 = vmatprep.subr.bf16.mxu0 %v11324_v5  ;;  %v11334_v5 = vld [vmem:[#allocation203_spill] sm:$0xff] }
 0x311   :  { %3002 = vmatprep.subr.bf16.mxu1 %v11325_v6 }
 0x313   :  { %2962 = vmatpush1.bf16.msra.mxu0 %v11326_v12  ;;  %v11335_v12 = vld [vmem:[#allocation205_spill] sm:$0xff] }
 0x314   :  { %3003 = vmatpush1.bf16.msra.mxu1 %v11327_v52  ;;  %2963 = vmatprep.subr.bf16.mxu0 %v11328_v53  ;;  %v11336_v52 = vld [vmem:[#allocation206_spill] sm:$0xff] }
 0x315   :  { %3004 = vmatprep.subr.bf16.mxu1 %v11329_v54  ;;  %v11337_v54 = vld [vmem:[#allocation208_spill] sm:$0xff] }
 0x317   :  { %2964 = vmatpush1.bf16.msra.mxu0 %v11330_v59 }
 0x318   :  { %3005 = vmatpush1.bf16.msra.mxu1 %v11331_v60  ;;  %3015 = vmatprep.subr.bf16.mxu0 %v11332_v61  ;;  %v11338_v61 = vld [vmem:[#allocation268_spill] sm:$0xff] }
 0x319   :  { %3056 = vmatprep.subr.bf16.mxu1 %v11333_v62 }
 0x36d   :  { %v2751_v4 = vpop.f32.mrb[40].mxu0 }
 0x36e   :  { %v2890_v51 = vadd.f32 %v2751_v4, %v11334_v5  ;;  %v2792_v6 = vpop.f32.mrb[40].mxu1  ;;  %v2753_v46 = vpop.f32.mrb[41].mxu0 }
 0x36f   :  { %v2892_v45 = vadd.f32 %v2792_v6, %v11335_v12  ;;  %v2891_v44 = vadd.f32 %v2753_v46, %v11336_v52  ;;  %v2794_v53 = vpop.f32.mrb[41].mxu1  ;;  %v2755_v43 = vpop.f32.mrb[42].mxu0  ;;  %v11340_v12 = vld [vmem:[#allocation271_spill] sm:$0xff] }
 0x370   :  { %v2893_v38 = vadd.f32 %v2794_v53, %v11337_v54  ;;  %v2796_v59 = vpop.f32.mrb[42].mxu1  ;;  %v2756_v37 = vpop.f32.mrb[43].mxu0  ;;  %v11341_v53 = vld [vmem:[#allocation272_spill] sm:$0xff] }
 0x371   :  { %v2797_v60 = vpop.f32.mrb[43].mxu1  ;;  %5973 = vtanh.f32 %v2892_v45 }
 0x372   :  { %5975 = vtanh.f32 %v2890_v51 }
 0x373   :  { %5977 = vtanh.f32 %v2893_v38 }
 0x374   :  { %5979 = vtanh.f32 %v2891_v44 }
 0x37b   :  { %v5974_v30 = vpop.eup %5973 }
 0x37c   :  { %v5976_v51 = vpop.eup %5975  ;;  %v2910_v59 = vmul.f32 0.5, %v5974_v30 }
 0x37d   :  { %v5978_v44 = vpop.eup %5977 }
 0x37e   :  { %v5980_v60 = vpop.eup %5979  ;;  %v2912_v29 = vadd.f32 0.5, %v2910_v59 }
 0x3ad   :  { %v2833_v62 = vpop.f32.mrb[44].mxu0 }
 0x3ae   :  { %v2894_v4 = vadd.f32 %v2833_v62, %v11338_v61  ;;  %v2874_v5 = vpop.f32.mrb[44].mxu1  ;;  %v2835_v36 = vpop.f32.mrb[45].mxu0  ;;  %v2906_v61 = vmul.f32 0.5, %v5976_v51  ;;  %v2911_v62 = vmul.f32 0.5, %v5978_v44 }
 0x3af   :  { %v2896_v6 = vadd.f32 %v2874_v5, %v11339_v35  ;;  %v2895_v46 = vadd.f32 %v2835_v36, %v11340_v12  ;;  %v2876_v52 = vpop.f32.mrb[45].mxu1  ;;  %v2837_v43 = vpop.f32.mrb[46].mxu0  ;;  %v2907_v35 = vmul.f32 0.5, %v5980_v60 }
 0x3b0   :  { %5981 = vtanh.f32 %v2894_v4  ;;  %v2897_v37 = vadd.f32 %v2876_v52, %v11341_v53  ;;  %v2878_v54 = vpop.f32.mrb[46].mxu1  ;;  %v2838_v45 = vpop.f32.mrb[47].mxu0  ;;  %v2908_v36 = vadd.f32 0.5, %v2906_v61  ;;  %v2913_v5 = vadd.f32 0.5, %v2911_v62 }
 0x3b1   :  { %v2879_v38 = vpop.f32.mrb[47].mxu1  ;;  %5983 = vtanh.f32 %v2895_v46  ;;  %v2918_v4 = vmul.f32 %v2912_v29, %v8173_v21  ;;  %v2909_v52 = vadd.f32 0.5, %v2907_v35 }
 0x3b2   :  { %5985 = vtanh.f32 %v2896_v6  ;;  %v2919_v54 = vmul.f32 %v2913_v5, %v8176_v57 }
 0x3b3   :  { %5987 = vtanh.f32 %v2897_v37 }
 0x3ba   :  { %v5982_v12 = vpop.eup %5981 }
 0x3bb   :  { %v2920_v43 = vmul.f32 %v5982_v12, %v2908_v36  ;;  %v5984_v53 = vpop.eup %5983 }
 0x3bc   :  { %v2921_v30 = vmul.f32 %v5984_v53, %v2909_v52  ;;  %v5986_v51 = vpop.eup %5985  ;;  %v11342_v52 = vld [vmem:[#allocation82_spill] sm:$0xff]  ;;  %v11344_v53 = vld [vmem:[#allocation84_spill] sm:$0xff] }
 0x3bd   :  { %v8478_v45 = vadd.f32 %v2920_v43, %v2918_v4  ;;  %v5988_v6 = vpop.eup %5987  ;;  %v2914_v37 = vmul.f32 0.5, %v5986_v51  ;;  %v11343_v43 = vld [vmem:[#allocation83_spill] sm:$0xff] }
 0x3be   :  { %v8481_v46 = vadd.f32 %v2921_v30, %v2919_v54  ;;  %v2915_v38 = vmul.f32 0.5, %v5988_v6  ;;  %v11345_v54 = vld [vmem:[#allocation85_spill] sm:$0xff]  ;;  %v11346_v30 = vld [vmem:[#allocation86_spill] sm:$0xff]  ;;  %v11347_v51 = vld [vmem:[#allocation87_spill] sm:$0xff] }
 0x3bf   :  { %5989 = vtanh.f32 %v8478_v45  ;;  %v2916_v44 = vadd.f32 0.5, %v2914_v37  ;;  %v11348_v6 = vld [vmem:[#allocation88_spill] sm:$0xff]  ;;  %v11349_v37 = vld [vmem:[#allocation89_spill] sm:$0xff] }
 0x3c0   :  { %5991 = vtanh.f32 %v8481_v46  ;;  %v2917_v59 = vadd.f32 0.5, %v2915_v38  ;;  %v11350_v38 = vld [vmem:[#allocation90_spill] sm:$0xff] }
 0x3c9   :  { %v5990_v29 = vpop.eup %5989 }
 0x3ca   :  { %v2926_v21 = vmul.f32 %v5990_v29, %v2916_v44  ;;  %v5992_v60 = vpop.eup %5991  ;;  %v11351_v44 = vld [vmem:[#allocation91_spill] sm:$0xff]  ;;  %v11352_v29 = vld [vmem:[#allocation92_spill] sm:$0xff] }
 0x3cb   :  { %v2927_v61 = vmul.f32 %v5992_v60, %v2917_v59  ;;  %v11354_v59 = vld [vmem:[#allocation94_spill] sm:$0xff]  ;;  %v11355_v60 = vld [vmem:[#allocation95_spill] sm:$0xff] }
 0x3cc   :  { %v5233_v57 = vmax.f32 %v2926_v21, 0.0  ;;  %v8487_v5 = vpack.c.bf16 %v2926_v21, %v2926_v21  ;;  %v11353_v21 = vld [vmem:[#allocation93_spill] sm:$0xff] }
 0x3cd   :  { %v8484_v62 = vpack.c.bf16 %v2927_v61, %v2927_v61  ;;  %v5234_v35 = vmax.f32 %v2927_v61, 0.0  ;;  %v11356_v61 = vld [vmem:[#allocation96_spill] sm:$0xff] }
 0x3ce   :  { %v5261_v36 = vmul.f32 %v8184_v56, %v5233_v57  ;;  %v11357_v57 = vld [vmem:[#allocation97_spill] sm:$0xff] }
 0x3cf   :  { %2965 = vmatprep.mubr.bf16.mxu0 %v8484_v62  ;;  %3006 = vmatprep.mubr.bf16.mxu1 %v8484_v62  ;;  %v5262_v12 = vmul.f32 %v8188_v24, %v5234_v35  ;;  %v11358_v35 = vld [vmem:[#allocation98_spill] sm:$0xff] }
 0x3d0   :  { %2966 = vmatmul.mubr.bf16.vlgmr.msra.gmra.mrb[48].mxu0 %v8487_v5  ;;  %3007 = vmatmul.mubr.bf16.vlgmr.msra.gmra.mrb[48].mxu1 %v8487_v5 }
 0x3d1   :  { %3016 = vmatpush1.bf16.msra.mxu0 %v11116_v55  ;;  %3057 = vmatpush1.bf16.msra.mxu1 %v11117_v17  ;;  %v5278_v4 = vadd.f32 %v5262_v12, %v5261_v36  ;;  %v11359_v36 = vld [vmem:[#allocation99_spill] sm:$0xff]  ;;  %v11360_v12 = vld [vmem:[#allocation100_spill] sm:$0xff] }
 0x3d2   :  { %3047 = vmatprep.mubr.bf16.mxu0 %v8484_v62  ;;  %3088 = vmatprep.mubr.bf16.mxu1 %v8484_v62 }
 0x3d3   :  { %5279 = vadd.xlane.f32.xlu0 %v5278_v4  ;;  %3017 = vmatprep.subr.bf16.mxu0 %v11118_v34  ;;  %v11361_v4 = vld [vmem:[#allocation101_spill] sm:$0xff] }
 0x3d4   :  { %3058 = vmatprep.subr.bf16.mxu1 %v11119_v33 }
 0x3d5   :  { %3018 = vmatpush1.bf16.msra.mxu0 %v11120_v41  ;;  %3059 = vmatpush1.bf16.msra.mxu1 %v11121_v14 }
 0x3d6   :  { %3019 = vmatprep.subr.bf16.mxu0 %v11122_v22  ;;  %3060 = vmatprep.subr.bf16.mxu1 %v11123_v40 }
 0x3d9   :  { %3020 = vmatpush1.bf16.msra.mxu0 %v11124_v9  ;;  %3061 = vmatpush1.bf16.msra.mxu1 %v11342_v52 }
 0x3da   :  { %3021 = vmatprep.subr.bf16.mxu0 %v11343_v43  ;;  %3062 = vmatprep.subr.bf16.mxu1 %v11344_v53 }
 0x3dd   :  { %3022 = vmatpush1.bf16.msra.mxu0 %v11345_v54  ;;  %3063 = vmatpush1.bf16.msra.mxu1 %v11346_v30 }
 0x3de   :  { %3023 = vmatprep.subr.bf16.mxu0 %v11347_v51  ;;  %3064 = vmatprep.subr.bf16.mxu1 %v11348_v6 }
 0x3e1   :  { %3024 = vmatpush1.bf16.msra.mxu0 %v11349_v37  ;;  %3065 = vmatpush1.bf16.msra.mxu1 %v11350_v38 }
 0x3e2   :  { %3025 = vmatprep.subr.bf16.mxu0 %v11351_v44  ;;  %3066 = vmatprep.subr.bf16.mxu1 %v11352_v29  ;;  %v11362_v44 = vld [vmem:[#allocation102_spill] sm:$0xff]  ;;  %v11363_v29 = vld [vmem:[#allocation103_spill] sm:$0xff] }
 0x3e5   :  { %3026 = vmatpush1.bf16.msra.mxu0 %v11353_v21  ;;  %3067 = vmatpush1.bf16.msra.mxu1 %v11354_v59  ;;  %v11364_v21 = vld [vmem:[#allocation104_spill] sm:$0xff]  ;;  %v11365_v59 = vld [vmem:[#allocation105_spill] sm:$0xff] }
 0x3e6   :  { %3027 = vmatprep.subr.bf16.mxu0 %v11355_v60  ;;  %3068 = vmatprep.subr.bf16.mxu1 %v11356_v61  ;;  %v11366_v60 = vld [vmem:[#allocation106_spill] sm:$0xff]  ;;  %v11367_v61 = vld [vmem:[#allocation107_spill] sm:$0xff] }
 0x3e9   :  { %3028 = vmatpush1.bf16.msra.mxu0 %v11357_v57  ;;  %3069 = vmatpush1.bf16.msra.mxu1 %v11358_v35  ;;  %v11368_v57 = vld [vmem:[#allocation108_spill] sm:$0xff]  ;;  %v11369_v35 = vld [vmem:[#allocation109_spill] sm:$0xff] }
 0x3ea   :  { %3029 = vmatprep.subr.bf16.mxu0 %v11359_v36  ;;  %3070 = vmatprep.subr.bf16.mxu1 %v11360_v12  ;;  %v11370_v36 = vld [vmem:[#allocation110_spill] sm:$0xff]  ;;  %v11371_v12 = vld [vmem:[#allocation111_spill] sm:$0xff] }
 0x3ed   :  { %3030 = vmatpush1.bf16.msra.mxu0 %v11361_v4  ;;  %3071 = vmatpush1.bf16.msra.mxu1 %v11362_v44  ;;  %v11372_v4 = vld [vmem:[#allocation112_spill] sm:$0xff]  ;;  %v11373_v44 = vld [vmem:[#allocation113_spill] sm:$0xff] }
 0x3ee   :  { %3031 = vmatprep.subr.bf16.mxu0 %v11363_v29  ;;  %3072 = vmatprep.subr.bf16.mxu1 %v11364_v21  ;;  %v11374_v29 = vld [vmem:[#allocation114_spill] sm:$0xff]  ;;  %v11375_v21 = vld [vmem:[#allocation115_spill] sm:$0xff] }
 0x3f1   :  { %3032 = vmatpush1.bf16.msra.mxu0 %v11365_v59  ;;  %3073 = vmatpush1.bf16.msra.mxu1 %v11366_v60  ;;  %v11376_v59 = vld [vmem:[#allocation116_spill] sm:$0xff]  ;;  %v11377_v60 = vld [vmem:[#allocation117_spill] sm:$0xff] }
 0x3f2   :  { %3033 = vmatprep.subr.bf16.mxu0 %v11367_v61  ;;  %3074 = vmatprep.subr.bf16.mxu1 %v11368_v57  ;;  %v11378_v61 = vld [vmem:[#allocation118_spill] sm:$0xff]  ;;  %v11379_v57 = vld [vmem:[#allocation119_spill] sm:$0xff] }
 0x3f5   :  { %3034 = vmatpush1.bf16.msra.mxu0 %v11369_v35  ;;  %3075 = vmatpush1.bf16.msra.mxu1 %v11370_v36  ;;  %v11380_v35 = vld [vmem:[#allocation120_spill] sm:$0xff]  ;;  %v11381_v36 = vld [vmem:[#allocation121_spill] sm:$0xff] }
 0x3f6   :  { %3035 = vmatprep.subr.bf16.mxu0 %v11371_v12  ;;  %3076 = vmatprep.subr.bf16.mxu1 %v11372_v4  ;;  %v11382_v12 = vld [vmem:[#allocation122_spill] sm:$0xff]  ;;  %v11383_v4 = vld [vmem:[#allocation123_spill] sm:$0xff] }
 0x3f9   :  { %3036 = vmatpush1.bf16.msra.mxu0 %v11373_v44  ;;  %3077 = vmatpush1.bf16.msra.mxu1 %v11374_v29  ;;  %v11384_v44 = vld [vmem:[#allocation124_spill] sm:$0xff]  ;;  %v11385_v29 = vld [vmem:[#allocation125_spill] sm:$0xff] }
 0x3fa   :  { %3037 = vmatprep.subr.bf16.mxu0 %v11375_v21  ;;  %3078 = vmatprep.subr.bf16.mxu1 %v11376_v59  ;;  %v11386_v21 = vld [vmem:[#allocation126_spill] sm:$0xff]  ;;  %v11387_v59 = vld [vmem:[#allocation127_spill] sm:$0xff] }
 0x3fd   :  { %3038 = vmatpush1.bf16.msra.mxu0 %v11377_v60  ;;  %3079 = vmatpush1.bf16.msra.mxu1 %v11378_v61  ;;  %v11388_v60 = vld [vmem:[#allocation128_spill] sm:$0xff]  ;;  %v11389_v61 = vld [vmem:[#allocation129_spill] sm:$0xff] }
 0x3fe   :  { %3039 = vmatprep.subr.bf16.mxu0 %v11379_v57  ;;  %3080 = vmatprep.subr.bf16.mxu1 %v11380_v35  ;;  %v11390_v57 = vld [vmem:[#allocation130_spill] sm:$0xff]  ;;  %v11391_v35 = vld [vmem:[#allocation131_spill] sm:$0xff] }
 0x401   :  { %3040 = vmatpush1.bf16.msra.mxu0 %v11381_v36  ;;  %3081 = vmatpush1.bf16.msra.mxu1 %v11382_v12  ;;  %v11392_v36 = vld [vmem:[#allocation132_spill] sm:$0xff]  ;;  %v11393_v12 = vld [vmem:[#allocation133_spill] sm:$0xff] }
 0x402   :  { %3041 = vmatprep.subr.bf16.mxu0 %v11383_v4  ;;  %3082 = vmatprep.subr.bf16.mxu1 %v11384_v44  ;;  %v11394_v4 = vld [vmem:[#allocation134_spill] sm:$0xff]  ;;  %v11395_v44 = vld [vmem:[#allocation135_spill] sm:$0xff] }
 0x405   :  { %3042 = vmatpush1.bf16.msra.mxu0 %v11385_v29  ;;  %3083 = vmatpush1.bf16.msra.mxu1 %v11386_v21  ;;  %v11396_v29 = vld [vmem:[#allocation136_spill] sm:$0xff]  ;;  %v11409_v21 = vld [vmem:[#allocation149_spill] sm:$0xff] }
 0x406   :  { %3043 = vmatprep.subr.bf16.mxu0 %v11387_v59  ;;  %3084 = vmatprep.subr.bf16.mxu1 %v11388_v60  ;;  %v11397_v60 = vld [vmem:[#allocation137_spill] sm:$0xff]  ;;  %v11407_v59 = vld [vmem:[#allocation147_spill] sm:$0xff] }
 0x409   :  { %3044 = vmatpush1.bf16.msra.mxu0 %v11389_v61  ;;  %3085 = vmatpush1.bf16.msra.mxu1 %v11390_v57  ;;  %v11398_v57 = vld [vmem:[#allocation138_spill] sm:$0xff]  ;;  %v11405_v61 = vld [vmem:[#allocation145_spill] sm:$0xff] }
 0x40a   :  { %3045 = vmatprep.subr.bf16.mxu0 %v11391_v35  ;;  %3086 = vmatprep.subr.bf16.mxu1 %v11392_v36  ;;  %v11399_v36 = vld [vmem:[#allocation139_spill] sm:$0xff]  ;;  %v11404_v35 = vld [vmem:[#allocation144_spill] sm:$0xff] }
 0x40d   :  { %3046 = vmatpush1.bf16.msra.mxu0 %v11393_v12  ;;  %3087 = vmatpush1.bf16.msra.mxu1 %v11394_v4  ;;  %v11400_v12 = vld [vmem:[#allocation140_spill] sm:$0xff]  ;;  %v11401_v4 = vld [vmem:[#allocation141_spill] sm:$0xff] }
 0x40e   :  { %3097 = vmatprep.subr.bf16.mxu0 %v11395_v44  ;;  %3138 = vmatprep.subr.bf16.mxu1 %v11396_v29  ;;  %v11402_v44 = vld [vmem:[#allocation142_spill] sm:$0xff]  ;;  %v11403_v29 = vld [vmem:[#allocation143_spill] sm:$0xff] }
 0x410   :  { %3048 = vmatmul.mubr.bf16.vlgmr.msra.gmra.mrb[52].mxu0 %v8487_v5  ;;  %3089 = vmatmul.mubr.bf16.vlgmr.msra.gmra.mrb[52].mxu1 %v8487_v5 }
 0x411   :  { %3098 = vmatpush1.bf16.msra.mxu0 %v11397_v60  ;;  %3129 = vmatprep.mubr.bf16.mxu0 %v8484_v62  ;;  %v11406_v60 = vld [vmem:[#allocation146_spill] sm:$0xff] }
 0x412   :  { %3139 = vmatpush1.bf16.msra.mxu1 %v11398_v57  ;;  %3170 = vmatprep.mubr.bf16.mxu1 %v8484_v62  ;;  %v11408_v57 = vld [vmem:[#allocation148_spill] sm:$0xff] }
 0x413   :  { %3099 = vmatprep.subr.bf16.mxu0 %v11399_v36  ;;  %3140 = vmatprep.subr.bf16.mxu1 %v11400_v12  ;;  %v11410_v36 = vld [vmem:[#allocation150_spill] sm:$0xff]  ;;  %v11411_v12 = vld [vmem:[#allocation151_spill] sm:$0xff] }
 0x415   :  { %3100 = vmatpush1.bf16.msra.mxu0 %v11401_v4  ;;  %v11412_v4 = vld [vmem:[#allocation152_spill] sm:$0xff] }
 0x416   :  { %3141 = vmatpush1.bf16.msra.mxu1 %v11402_v44  ;;  %3101 = vmatprep.subr.bf16.mxu0 %v11403_v29  ;;  %v11413_v44 = vld [vmem:[#allocation153_spill] sm:$0xff]  ;;  %v11414_v29 = vld [vmem:[#allocation154_spill] sm:$0xff] }
 0x417   :  { %3142 = vmatprep.subr.bf16.mxu1 %v11404_v35  ;;  %v11415_v35 = vld [vmem:[#allocation155_spill] sm:$0xff] }
 0x419   :  { %3102 = vmatpush1.bf16.msra.mxu0 %v11405_v61  ;;  %v11416_v61 = vld [vmem:[#allocation156_spill] sm:$0xff] }
 0x41a   :  { %3143 = vmatpush1.bf16.msra.mxu1 %v11406_v60  ;;  %3103 = vmatprep.subr.bf16.mxu0 %v11407_v59  ;;  %v11417_v60 = vld [vmem:[#allocation157_spill] sm:$0xff]  ;;  %v11418_v59 = vld [vmem:[#allocation158_spill] sm:$0xff] }
 0x41b   :  { %3144 = vmatprep.subr.bf16.mxu1 %v11408_v57  ;;  %v11419_v57 = vld [vmem:[#allocation159_spill] sm:$0xff] }
 0x41d   :  { %3104 = vmatpush1.bf16.msra.mxu0 %v11409_v21  ;;  %v11420_v21 = vld [vmem:[#allocation160_spill] sm:$0xff] }
 0x41e   :  { %3145 = vmatpush1.bf16.msra.mxu1 %v11410_v36  ;;  %3105 = vmatprep.subr.bf16.mxu0 %v11411_v12  ;;  %v11421_v36 = vld [vmem:[#allocation161_spill] sm:$0xff]  ;;  %v11422_v12 = vld [vmem:[#allocation162_spill] sm:$0xff] }
 0x41f   :  { %3146 = vmatprep.subr.bf16.mxu1 %v11412_v4  ;;  %v11423_v4 = vld [vmem:[#allocation163_spill] sm:$0xff] }
 0x421   :  { %3106 = vmatpush1.bf16.msra.mxu0 %v11413_v44  ;;  %v11424_v44 = vld [vmem:[#allocation164_spill] sm:$0xff] }
 0x422   :  { %3147 = vmatpush1.bf16.msra.mxu1 %v11414_v29  ;;  %3107 = vmatprep.subr.bf16.mxu0 %v11415_v35  ;;  %v11425_v29 = vld [vmem:[#allocation165_spill] sm:$0xff]  ;;  %v11426_v35 = vld [vmem:[#allocation166_spill] sm:$0xff] }
 0x423   :  { %3148 = vmatprep.subr.bf16.mxu1 %v11416_v61  ;;  %v11427_v61 = vld [vmem:[#allocation167_spill] sm:$0xff] }
 0x425   :  { %3108 = vmatpush1.bf16.msra.mxu0 %v11417_v60  ;;  %v11428_v60 = vld [vmem:[#allocation168_spill] sm:$0xff] }
 0x426   :  { %3149 = vmatpush1.bf16.msra.mxu1 %v11418_v59  ;;  %3109 = vmatprep.subr.bf16.mxu0 %v11419_v57  ;;  %v11429_v59 = vld [vmem:[#allocation169_spill] sm:$0xff]  ;;  %v11430_v57 = vld [vmem:[#allocation170_spill] sm:$0xff] }
 0x427   :  { %3150 = vmatprep.subr.bf16.mxu1 %v11420_v21  ;;  %v11431_v21 = vld [vmem:[#allocation171_spill] sm:$0xff] }
 0x429   :  { %3110 = vmatpush1.bf16.msra.mxu0 %v11421_v36  ;;  %v11432_v36 = vld [vmem:[#allocation172_spill] sm:$0xff] }
 0x42a   :  { %3151 = vmatpush1.bf16.msra.mxu1 %v11422_v12  ;;  %3111 = vmatprep.subr.bf16.mxu0 %v11423_v4  ;;  %v11433_v12 = vld [vmem:[#allocation173_spill] sm:$0xff]  ;;  %v11434_v4 = vld [vmem:[#allocation174_spill] sm:$0xff] }
 0x42b   :  { %3152 = vmatprep.subr.bf16.mxu1 %v11424_v44  ;;  %v11435_v44 = vld [vmem:[#allocation175_spill] sm:$0xff] }
 0x42d   :  { %3112 = vmatpush1.bf16.msra.mxu0 %v11425_v29  ;;  %v11436_v29 = vld [vmem:[#allocation176_spill] sm:$0xff] }
 0x42e   :  { %3153 = vmatpush1.bf16.msra.mxu1 %v11426_v35  ;;  %3113 = vmatprep.subr.bf16.mxu0 %v11427_v61  ;;  %v11437_v35 = vld [vmem:[#allocation177_spill] sm:$0xff]  ;;  %v11438_v61 = vld [vmem:[#allocation178_spill] sm:$0xff] }
 0x42f   :  { %3154 = vmatprep.subr.bf16.mxu1 %v11428_v60  ;;  %v11439_v60 = vld [vmem:[#allocation179_spill] sm:$0xff] }
 0x431   :  { %3114 = vmatpush1.bf16.msra.mxu0 %v11429_v59  ;;  %v11440_v59 = vld [vmem:[#allocation180_spill] sm:$0xff] }
 0x432   :  { %3155 = vmatpush1.bf16.msra.mxu1 %v11430_v57  ;;  %3115 = vmatprep.subr.bf16.mxu0 %v11431_v21  ;;  %v11441_v57 = vld [vmem:[#allocation181_spill] sm:$0xff]  ;;  %v11442_v21 = vld [vmem:[#allocation182_spill] sm:$0xff] }
 0x433   :  { %3156 = vmatprep.subr.bf16.mxu1 %v11432_v36  ;;  %v11443_v36 = vld [vmem:[#allocation183_spill] sm:$0xff] }
 0x435   :  { %3116 = vmatpush1.bf16.msra.mxu0 %v11433_v12  ;;  %v11444_v12 = vld [vmem:[#allocation184_spill] sm:$0xff] }
 0x436   :  { %3157 = vmatpush1.bf16.msra.mxu1 %v11434_v4  ;;  %3117 = vmatprep.subr.bf16.mxu0 %v11435_v44  ;;  %v11445_v4 = vld [vmem:[#allocation185_spill] sm:$0xff]  ;;  %v11446_v44 = vld [vmem:[#allocation186_spill] sm:$0xff] }
 0x437   :  { %3158 = vmatprep.subr.bf16.mxu1 %v11436_v29  ;;  %v11447_v29 = vld [vmem:[#allocation188_spill] sm:$0xff] }
 0x439   :  { %3118 = vmatpush1.bf16.msra.mxu0 %v11437_v35  ;;  %v11448_v35 = vld [vmem:[#allocation189_spill] sm:$0xff] }
 0x43a   :  { %3159 = vmatpush1.bf16.msra.mxu1 %v11438_v61  ;;  %3119 = vmatprep.subr.bf16.mxu0 %v11439_v60  ;;  %v11449_v61 = vld [vmem:[#allocation190_spill] sm:$0xff] }
 0x43b   :  { %3160 = vmatprep.subr.bf16.mxu1 %v11440_v59  ;;  %v11450_v59 = vld [vmem:[#allocation192_spill] sm:$0xff] }
 0x43d   :  { %3120 = vmatpush1.bf16.msra.mxu0 %v11441_v57  ;;  %v11451_v57 = vld [vmem:[#allocation193_spill] sm:$0xff] }
 0x43e   :  { %3161 = vmatpush1.bf16.msra.mxu1 %v11442_v21  ;;  %3121 = vmatprep.subr.bf16.mxu0 %v11443_v36  ;;  %v11452_v21 = vld [vmem:[#allocation198_spill] sm:$0xff]  ;;  %v11453_v36 = vld [vmem:[#allocation199_spill] sm:$0xff] }
 0x43f   :  { %3162 = vmatprep.subr.bf16.mxu1 %v11444_v12  ;;  %v11454_v12 = vld [vmem:[#allocation200_spill] sm:$0xff] }
 0x441   :  { %3122 = vmatpush1.bf16.msra.mxu0 %v11445_v4  ;;  %v11455_v4 = vld [vmem:[#allocation201_spill] sm:$0xff] }
 0x442   :  { %3163 = vmatpush1.bf16.msra.mxu1 %v11446_v44  ;;  %3123 = vmatprep.subr.bf16.mxu0 %v11447_v29  ;;  %v11456_v44 = vld [vmem:[#allocation204_spill] sm:$0xff]  ;;  %v11457_v29 = vld [vmem:[#allocation207_spill] sm:$0xff] }
 0x443   :  { %3164 = vmatprep.subr.bf16.mxu1 %v11448_v35  ;;  %v11458_v35 = vld [vmem:[#allocation209_spill] sm:$0xff] }
 0x445   :  { %3124 = vmatpush1.bf16.msra.mxu0 %v11449_v61  ;;  %v11459_v61 = vld [vmem:[#allocation210_spill] sm:$0xff] }
 0x446   :  { %3165 = vmatpush1.bf16.msra.mxu1 %v11233_v42  ;;  %3125 = vmatprep.subr.bf16.mxu0 %v11450_v59  ;;  %v11470_v59 = vld [vmem:[#allocation233_spill] sm:$0xff] }
 0x447   :  { %3166 = vmatprep.subr.bf16.mxu1 %v11451_v57  ;;  %v11460_v57 = vld [vmem:[#allocation212_spill] sm:$0xff] }
 0x449   :  { %3126 = vmatpush1.bf16.msra.mxu0 %v11452_v21  ;;  %v11468_v21 = vld [vmem:[#allocation228_spill] sm:$0xff] }
 0x44a   :  { %3167 = vmatpush1.bf16.msra.mxu1 %v11453_v36  ;;  %3127 = vmatprep.subr.bf16.mxu0 %v11454_v12  ;;  %v11461_v36 = vld [vmem:[#allocation215_spill] sm:$0xff]  ;;  %v11467_v12 = vld [vmem:[#allocation226_spill] sm:$0xff] }
 0x44b   :  { %3168 = vmatprep.subr.bf16.mxu1 %v11455_v4  ;;  %v11462_v4 = vld [vmem:[#allocation217_spill] sm:$0xff] }
 0x44d   :  { %3128 = vmatpush1.bf16.msra.mxu0 %v11456_v44  ;;  %v11463_v44 = vld [vmem:[#allocation218_spill] sm:$0xff] }
 0x44e   :  { %3169 = vmatpush1.bf16.msra.mxu1 %v11457_v29  ;;  %3179 = vmatprep.subr.bf16.mxu0 %v11458_v35  ;;  %v11464_v29 = vld [vmem:[#allocation220_spill] sm:$0xff]  ;;  %v11465_v35 = vld [vmem:[#allocation223_spill] sm:$0xff] }
 0x44f   :  { %3220 = vmatprep.subr.bf16.mxu1 %v11459_v61  ;;  %v11466_v61 = vld [vmem:[#allocation225_spill] sm:$0xff] }
 0x450   :  { %3130 = vmatmul.mubr.bf16.vlgmr.msra.gmra.mrb[48].mxu0 %v8487_v5 }
 0x451   :  { %3171 = vmatmul.mubr.bf16.vlgmr.msra.gmra.mrb[48].mxu1 %v8487_v5  ;;  %3180 = vmatpush1.bf16.msra.mxu0 %v11460_v57  ;;  %v11469_v57 = vld [vmem:[#allocation231_spill] sm:$0xff] }
 0x452   :  { %3211 = vmatprep.mubr.bf16.mxu0 %v8484_v62  ;;  %3221 = vmatpush1.bf16.msra.mxu1 %v11461_v36  ;;  %v11471_v36 = vld [vmem:[#allocation234_spill] sm:$0xff] }
 0x453   :  { %3252 = vmatprep.mubr.bf16.mxu1 %v8484_v62  ;;  %3181 = vmatprep.subr.bf16.mxu0 %v11462_v4  ;;  %v11472_v62 = vld [vmem:[#allocation236_spill] sm:$0xff]  ;;  %v11473_v4 = vld [vmem:[#allocation239_spill] sm:$0xff] }
 0x454   :  { %3222 = vmatprep.subr.bf16.mxu1 %v11463_v44  ;;  %v11474_v44 = vld [vmem:[#allocation241_spill] sm:$0xff] }
 0x455   :  { %3182 = vmatpush1.bf16.msra.mxu0 %v11464_v29  ;;  %v11475_v29 = vld [vmem:[#allocation242_spill] sm:$0xff] }
 0x456   :  { %3223 = vmatpush1.bf16.msra.mxu1 %v11465_v35  ;;  %3183 = vmatprep.subr.bf16.mxu0 %v11466_v61  ;;  %v11476_v35 = vld [vmem:[#allocation244_spill] sm:$0xff]  ;;  %v11477_v61 = vld [vmem:[#allocation247_spill] sm:$0xff] }
 0x457   :  { %3224 = vmatprep.subr.bf16.mxu1 %v11467_v12  ;;  %v11478_v12 = vld [vmem:[#allocation249_spill] sm:$0xff] }
 0x459   :  { %3184 = vmatpush1.bf16.msra.mxu0 %v11468_v21  ;;  %v11479_v21 = vld [vmem:[#allocation250_spill] sm:$0xff] }
 0x45a   :  { %3225 = vmatpush1.bf16.msra.mxu1 %v11469_v57  ;;  %3185 = vmatprep.subr.bf16.mxu0 %v11470_v59  ;;  %v11480_v57 = vld [vmem:[#allocation252_spill] sm:$0xff]  ;;  %v11481_v59 = vld [vmem:[#allocation255_spill] sm:$0xff] }
 0x45b   :  { %3226 = vmatprep.subr.bf16.mxu1 %v11471_v36  ;;  %v11482_v36 = vld [vmem:[#allocation257_spill] sm:$0xff] }
 0x45d   :  { %3186 = vmatpush1.bf16.msra.mxu0 %v11472_v62  ;;  %v11483_v62 = vld [vmem:[#allocation258_spill] sm:$0xff] }
 0x45e   :  { %3227 = vmatpush1.bf16.msra.mxu1 %v11473_v4  ;;  %3187 = vmatprep.subr.bf16.mxu0 %v11474_v44  ;;  %v11484_v4 = vld [vmem:[#allocation263_spill] sm:$0xff]  ;;  %v11485_v44 = vld [vmem:[#allocation264_spill] sm:$0xff] }
 0x45f   :  { %3228 = vmatprep.subr.bf16.mxu1 %v11475_v29  ;;  %v11486_v29 = vld [vmem:[#allocation265_spill] sm:$0xff] }
 0x461   :  { %3188 = vmatpush1.bf16.msra.mxu0 %v11476_v35  ;;  %v11487_v35 = vld [vmem:[#allocation266_spill] sm:$0xff] }
 0x462   :  { %3229 = vmatpush1.bf16.msra.mxu1 %v11477_v61  ;;  %3189 = vmatprep.subr.bf16.mxu0 %v11478_v12  ;;  %v11488_v61 = vld [vmem:[#allocation267_spill] sm:$0xff]  ;;  %v11489_v12 = vld [vmem:[#allocation270_spill] sm:$0xff] }
 0x463   :  { %3230 = vmatprep.subr.bf16.mxu1 %v11479_v21  ;;  %v11490_v21 = vld [vmem:[#allocation273_spill] sm:$0xff] }
 0x465   :  { %3190 = vmatpush1.bf16.msra.mxu0 %v11480_v57  ;;  %v11491_v57 = vld [vmem:[#allocation274_spill] sm:$0xff] }
 0x466   :  { %3231 = vmatpush1.bf16.msra.mxu1 %v11481_v59  ;;  %3191 = vmatprep.subr.bf16.mxu0 %v11482_v36  ;;  %v11492_v59 = vld [vmem:[#allocation275_spill] sm:$0xff]  ;;  %v11493_v36 = vld [vmem:[#allocation278_spill] sm:$0xff] }
 0x467   :  { %3232 = vmatprep.subr.bf16.mxu1 %v11483_v62  ;;  %v11494_v62 = vld [vmem:[#allocation281_spill] sm:$0xff] }
 0x469   :  { %3192 = vmatpush1.bf16.msra.mxu0 %v11484_v4  ;;  %v11495_v4 = vld [vmem:[#allocation282_spill] sm:$0xff] }
 0x46a   :  { %3233 = vmatpush1.bf16.msra.mxu1 %v11485_v44  ;;  %3193 = vmatprep.subr.bf16.mxu0 %v11486_v29  ;;  %v11496_v44 = vld [vmem:[#allocation283_spill] sm:$0xff] }
 0x46b   :  { %3234 = vmatprep.subr.bf16.mxu1 %v11487_v35 }
 0x46d   :  { %3194 = vmatpush1.bf16.msra.mxu0 %v11488_v61 }
 0x46e   :  { %3235 = vmatpush1.bf16.msra.mxu1 %v11489_v12  ;;  %3195 = vmatprep.subr.bf16.mxu0 %v11490_v21  ;;  %v11497_v21 = vld [vmem:[#allocation294_spill] sm:$0xff] }
 0x46f   :  { %3236 = vmatprep.subr.bf16.mxu1 %v11491_v57 }
 0x471   :  { %3196 = vmatpush1.bf16.msra.mxu0 %v11492_v59 }
 0x472   :  { %3237 = vmatpush1.bf16.msra.mxu1 %v11493_v36  ;;  %3197 = vmatprep.subr.bf16.mxu0 %v11494_v62 }
 0x473   :  { %3238 = vmatprep.subr.bf16.mxu1 %v11495_v4 }
 0x475   :  { %3198 = vmatpush1.bf16.msra.mxu0 %v11496_v44 }
 0x476   :  { %3239 = vmatpush1.bf16.msra.mxu1 %v11281_v63  ;;  %3199 = vmatprep.subr.bf16.mxu0 %v11282_v49 }
 0x477   :  { %3240 = vmatprep.subr.bf16.mxu1 %v11283_v25 }
 0x479   :  { %3200 = vmatpush1.bf16.msra.mxu0 %v11284_v26 }
 0x47a   :  { %3241 = vmatpush1.bf16.msra.mxu1 %v11497_v21  ;;  %3201 = vmatprep.subr.bf16.mxu0 %v11286_v48 }
 0x47b   :  { %3242 = vmatprep.subr.bf16.mxu1 %v11287_v2 }
 0x47d   :  { %3202 = vmatpush1.bf16.msra.mxu0 %v11288_v15 }
 0x47e   :  { %3243 = vmatpush1.bf16.msra.mxu1 %v11289_v31  ;;  %3203 = vmatprep.subr.bf16.mxu0 %v11290_v7 }
 0x47f   :  { %3244 = vmatprep.subr.bf16.mxu1 %v11291_v0  ;;  %v11565_v0 = vld [vmem:[#allocation277_spill] sm:$0xff] }
 0x481   :  { %3204 = vmatpush1.bf16.msra.mxu0 %v7995_v10 }
 0x482   :  { %3245 = vmatpush1.bf16.msra.mxu1 %v8005_v18  ;;  %3205 = vmatprep.subr.bf16.mxu0 %v8015_v8 }
 0x483   :  { %3246 = vmatprep.subr.bf16.mxu1 %v8017_v58 }
 0x485   :  { %3206 = vmatpush1.bf16.msra.mxu0 %v11292_v39 }
 0x486   :  { %3247 = vmatpush1.bf16.msra.mxu1 %v8041_v23  ;;  %3207 = vmatprep.subr.bf16.mxu0 %v8051_v19 }
 0x487   :  { %3248 = vmatprep.subr.bf16.mxu1 %v8053_v47 }
 0x489   :  { %3208 = vmatpush1.bf16.msra.mxu0 %v8069_v3  ;;  %v11505_v3 = vld [vmem:[#allocation18_spill] sm:$0xff] }
 0x48a   :  { %3249 = vmatpush1.bf16.msra.mxu1 %v8071_v20  ;;  %3209 = vmatprep.subr.bf16.mxu0 %v8075_v1  ;;  %v11498_v20 = vld [vmem:[#allocation11_spill] sm:$0xff]  ;;  %v11499_v1 = vld [vmem:[#allocation12_spill] sm:$0xff] }
 0x48b   :  { %3250 = vmatprep.subr.bf16.mxu1 %v8077_v32  ;;  %v11500_v32 = vld [vmem:[#allocation13_spill] sm:$0xff] }
 0x48d   :  { %3210 = vmatpush1.bf16.msra.mxu0 %v8081_v50  ;;  %v11501_v50 = vld [vmem:[#allocation14_spill] sm:$0xff] }
 0x48e   :  { %3251 = vmatpush1.bf16.msra.mxu1 %v8083_v11  ;;  %3313 = vmatprep.subr.bf16.mxu0 %v6199_v13  ;;  %v11502_v11 = vld [vmem:[#allocation15_spill] sm:$0xff]  ;;  %v11503_v13 = vld [vmem:[#allocation16_spill] sm:$0xff] }
 0x48f   :  { %3354 = vmatprep.subr.bf16.mxu1 %v6211_v16  ;;  %v11504_v16 = vld [vmem:[#allocation17_spill] sm:$0xff] }
 0x490   :  { %3212 = vmatmul.mubr.bf16.vlgmr.msra.gmra.mrb[52].mxu0 %v8487_v5 }
 0x491   :  { %3253 = vmatmul.mubr.bf16.vlgmr.msra.gmra.mrb[52].mxu1 %v8487_v5  ;;  %3314 = vmatpush1.bf16.msra.mxu0 %v6295_v27  ;;  %v11506_v5 = vld [vmem:[#allocation19_spill] sm:$0xff]  ;;  %v11507_v27 = vld [vmem:[#allocation20_spill] sm:$0xff] }
 0x492   :  { %3355 = vmatpush1.bf16.msra.mxu1 %v6297_v28  ;;  %3315 = vmatprep.subr.bf16.mxu0 %v11498_v20  ;;  %v11508_v28 = vld [vmem:[#allocation21_spill] sm:$0xff]  ;;  %v11509_v20 = vld [vmem:[#allocation22_spill] sm:$0xff] }
 0x493   :  { %3356 = vmatprep.subr.bf16.mxu1 %v11499_v1  ;;  %v11510_v1 = vld [vmem:[#allocation23_spill] sm:$0xff] }
 0x495   :  { %3316 = vmatpush1.bf16.msra.mxu0 %v11500_v32  ;;  %v11511_v32 = vld [vmem:[#allocation24_spill] sm:$0xff] }
 0x496   :  { %3357 = vmatpush1.bf16.msra.mxu1 %v11501_v50  ;;  %3317 = vmatprep.subr.bf16.mxu0 %v11502_v11  ;;  %v11512_v50 = vld [vmem:[#allocation25_spill] sm:$0xff]  ;;  %v11513_v11 = vld [vmem:[#allocation26_spill] sm:$0xff] }
 0x497   :  { %3358 = vmatprep.subr.bf16.mxu1 %v11503_v13  ;;  %v11514_v13 = vld [vmem:[#allocation27_spill] sm:$0xff] }
 0x499   :  { %3318 = vmatpush1.bf16.msra.mxu0 %v11504_v16  ;;  %v11515_v16 = vld [vmem:[#allocation28_spill] sm:$0xff] }
 0x49a   :  { %3359 = vmatpush1.bf16.msra.mxu1 %v11505_v3  ;;  %3319 = vmatprep.subr.bf16.mxu0 %v11506_v5  ;;  %v11516_v3 = vld [vmem:[#allocation29_spill] sm:$0xff]  ;;  %v11517_v5 = vld [vmem:[#allocation30_spill] sm:$0xff] }
 0x49b   :  { %3360 = vmatprep.subr.bf16.mxu1 %v11507_v27  ;;  %v11518_v27 = vld [vmem:[#allocation31_spill] sm:$0xff] }
 0x49d   :  { %3320 = vmatpush1.bf16.msra.mxu0 %v11508_v28  ;;  %v11519_v28 = vld [vmem:[#allocation32_spill] sm:$0xff] }
 0x49e   :  { %3361 = vmatpush1.bf16.msra.mxu1 %v11509_v20  ;;  %3321 = vmatprep.subr.bf16.mxu0 %v11510_v1  ;;  %v11520_v20 = vld [vmem:[#allocation33_spill] sm:$0xff]  ;;  %v11521_v1 = vld [vmem:[#allocation34_spill] sm:$0xff] }
 0x49f   :  { %3362 = vmatprep.subr.bf16.mxu1 %v11511_v32  ;;  %v11522_v32 = vld [vmem:[#allocation35_spill] sm:$0xff] }
 0x4a1   :  { %3322 = vmatpush1.bf16.msra.mxu0 %v11512_v50  ;;  %v11523_v50 = vld [vmem:[#allocation36_spill] sm:$0xff] }
 0x4a2   :  { %3363 = vmatpush1.bf16.msra.mxu1 %v11513_v11  ;;  %3323 = vmatprep.subr.bf16.mxu0 %v11514_v13  ;;  %v11524_v11 = vld [vmem:[#allocation37_spill] sm:$0xff]  ;;  %v11525_v13 = vld [vmem:[#allocation38_spill] sm:$0xff] }
 0x4a3   :  { %3364 = vmatprep.subr.bf16.mxu1 %v11515_v16  ;;  %v11526_v16 = vld [vmem:[#allocation39_spill] sm:$0xff] }
 0x4a5   :  { %3324 = vmatpush1.bf16.msra.mxu0 %v11516_v3  ;;  %v11527_v3 = vld [vmem:[#allocation40_spill] sm:$0xff] }
 0x4a6   :  { %3365 = vmatpush1.bf16.msra.mxu1 %v11517_v5  ;;  %3325 = vmatprep.subr.bf16.mxu0 %v11518_v27  ;;  %v11528_v5 = vld [vmem:[#allocation41_spill] sm:$0xff]  ;;  %v11529_v27 = vld [vmem:[#allocation42_spill] sm:$0xff] }
 0x4a7   :  { %3366 = vmatprep.subr.bf16.mxu1 %v11519_v28  ;;  %v11530_v28 = vld [vmem:[#allocation43_spill] sm:$0xff] }
 0x4a9   :  { %3326 = vmatpush1.bf16.msra.mxu0 %v11520_v20  ;;  %v11531_v20 = vld [vmem:[#allocation44_spill] sm:$0xff] }
 0x4aa   :  { %3367 = vmatpush1.bf16.msra.mxu1 %v11521_v1  ;;  %3327 = vmatprep.subr.bf16.mxu0 %v11522_v32  ;;  %v11532_v1 = vld [vmem:[#allocation45_spill] sm:$0xff]  ;;  %v11533_v32 = vld [vmem:[#allocation46_spill] sm:$0xff] }
 0x4ab   :  { %3368 = vmatprep.subr.bf16.mxu1 %v11523_v50  ;;  %v11534_v50 = vld [vmem:[#allocation47_spill] sm:$0xff] }
 0x4ad   :  { %3328 = vmatpush1.bf16.msra.mxu0 %v11524_v11  ;;  %v11535_v11 = vld [vmem:[#allocation48_spill] sm:$0xff] }
 0x4ae   :  { %3369 = vmatpush1.bf16.msra.mxu1 %v11525_v13  ;;  %3329 = vmatprep.subr.bf16.mxu0 %v11526_v16  ;;  %v11536_v13 = vld [vmem:[#allocation49_spill] sm:$0xff]  ;;  %v11537_v16 = vld [vmem:[#allocation50_spill] sm:$0xff] }
 0x4af   :  { %3370 = vmatprep.subr.bf16.mxu1 %v11527_v3  ;;  %v11538_v3 = vld [vmem:[#allocation51_spill] sm:$0xff] }
 0x4b1   :  { %3330 = vmatpush1.bf16.msra.mxu0 %v11528_v5  ;;  %v11539_v5 = vld [vmem:[#allocation52_spill] sm:$0xff] }
 0x4b2   :  { %3371 = vmatpush1.bf16.msra.mxu1 %v11529_v27  ;;  %3331 = vmatprep.subr.bf16.mxu0 %v11530_v28  ;;  %v11540_v27 = vld [vmem:[#allocation53_spill] sm:$0xff]  ;;  %v11541_v28 = vld [vmem:[#allocation54_spill] sm:$0xff] }
 0x4b3   :  { %3372 = vmatprep.subr.bf16.mxu1 %v11531_v20  ;;  %v11542_v20 = vld [vmem:[#allocation55_spill] sm:$0xff] }
 0x4b5   :  { %3332 = vmatpush1.bf16.msra.mxu0 %v11532_v1  ;;  %v11543_v1 = vld [vmem:[#allocation56_spill] sm:$0xff] }
 0x4b6   :  { %3373 = vmatpush1.bf16.msra.mxu1 %v11533_v32  ;;  %3333 = vmatprep.subr.bf16.mxu0 %v11534_v50  ;;  %v11544_v32 = vld [vmem:[#allocation57_spill] sm:$0xff]  ;;  %v11545_v50 = vld [vmem:[#allocation58_spill] sm:$0xff] }
 0x4b7   :  { %3374 = vmatprep.subr.bf16.mxu1 %v11535_v11  ;;  %v11546_v11 = vld [vmem:[#allocation59_spill] sm:$0xff] }
 0x4b9   :  { %3334 = vmatpush1.bf16.msra.mxu0 %v11536_v13  ;;  %v11547_v13 = vld [vmem:[#allocation60_spill] sm:$0xff] }
 0x4ba   :  { %3375 = vmatpush1.bf16.msra.mxu1 %v11537_v16  ;;  %3335 = vmatprep.subr.bf16.mxu0 %v11538_v3  ;;  %v11548_v16 = vld [vmem:[#allocation61_spill] sm:$0xff]  ;;  %v11549_v3 = vld [vmem:[#allocation62_spill] sm:$0xff] }
 0x4bb   :  { %3376 = vmatprep.subr.bf16.mxu1 %v11539_v5  ;;  %v11550_v5 = vld [vmem:[#allocation63_spill] sm:$0xff] }
 0x4bd   :  { %3336 = vmatpush1.bf16.msra.mxu0 %v11540_v27  ;;  %v11551_v27 = vld [vmem:[#allocation64_spill] sm:$0xff] }
 0x4be   :  { %3377 = vmatpush1.bf16.msra.mxu1 %v11541_v28  ;;  %3337 = vmatprep.subr.bf16.mxu0 %v11542_v20  ;;  %v11552_v28 = vld [vmem:[#allocation65_spill] sm:$0xff]  ;;  %v11553_v20 = vld [vmem:[#allocation66_spill] sm:$0xff] }
 0x4bf   :  { %3378 = vmatprep.subr.bf16.mxu1 %v11543_v1  ;;  %v11554_v1 = vld [vmem:[#allocation67_spill] sm:$0xff] }
 0x4c1   :  { %3338 = vmatpush1.bf16.msra.mxu0 %v11544_v32  ;;  %v11555_v32 = vld [vmem:[#allocation68_spill] sm:$0xff] }
 0x4c2   :  { %3379 = vmatpush1.bf16.msra.mxu1 %v11545_v50  ;;  %3339 = vmatprep.subr.bf16.mxu0 %v11546_v11  ;;  %v11556_v50 = vld [vmem:[#allocation69_spill] sm:$0xff]  ;;  %v11557_v11 = vld [vmem:[#allocation70_spill] sm:$0xff] }
 0x4c3   :  { %3380 = vmatprep.subr.bf16.mxu1 %v11547_v13  ;;  %v11558_v13 = vld [vmem:[#allocation71_spill] sm:$0xff] }
 0x4c5   :  { %3340 = vmatpush1.bf16.msra.mxu0 %v11548_v16  ;;  %v11559_v16 = vld [vmem:[#allocation72_spill] sm:$0xff] }
 0x4c6   :  { %3381 = vmatpush1.bf16.msra.mxu1 %v11549_v3  ;;  %3341 = vmatprep.subr.bf16.mxu0 %v11550_v5  ;;  %v11560_v5 = vld [vmem:[#allocation211_spill] sm:$0xff] }
 0x4c7   :  { %3382 = vmatprep.subr.bf16.mxu1 %v11551_v27 }
 0x4c9   :  { %3342 = vmatpush1.bf16.msra.mxu0 %v11552_v28  ;;  %v11561_v28 = vld [vmem:[#allocation213_spill] sm:$0xff] }
 0x4ca   :  { %3383 = vmatpush1.bf16.msra.mxu1 %v11553_v20  ;;  %3343 = vmatprep.subr.bf16.mxu0 %v11554_v1  ;;  %v11562_v20 = vld [vmem:[#allocation214_spill] sm:$0xff] }
 0x4cb   :  { %3384 = vmatprep.subr.bf16.mxu1 %v11555_v32  ;;  %v11563_v32 = vld [vmem:[#allocation216_spill] sm:$0xff] }
 0x4cd   :  { %3344 = vmatpush1.bf16.msra.mxu0 %v11556_v50 }
 0x4ce   :  { %3385 = vmatpush1.bf16.msra.mxu1 %v11557_v11  ;;  %3395 = vmatprep.subr.bf16.mxu0 %v11558_v13  ;;  %v11564_v13 = vld [vmem:[#allocation276_spill] sm:$0xff] }
 0x4cf   :  { %3436 = vmatprep.subr.bf16.mxu1 %v11559_v16 }
 0x523   :  { %v3131_v3 = vpop.f32.mrb[48].mxu0 }
 0x524   :  { %v3270_v47 = vadd.f32 %v3131_v3, %v11560_v5  ;;  %v3172_v27 = vpop.f32.mrb[48].mxu1  ;;  %v3133_v19 = vpop.f32.mrb[49].mxu0 }
 0x525   :  { %v3272_v23 = vadd.f32 %v3172_v27, %v11561_v28  ;;  %v3271_v39 = vadd.f32 %v3133_v19, %v11562_v20  ;;  %v3174_v1 = vpop.f32.mrb[49].mxu1  ;;  %v3135_v58 = vpop.f32.mrb[50].mxu0  ;;  %v11566_v28 = vld [vmem:[#allocation279_spill] sm:$0xff] }
 0x526   :  { %v3273_v8 = vadd.f32 %v3174_v1, %v11563_v32  ;;  %v3176_v50 = vpop.f32.mrb[50].mxu1  ;;  %v3136_v18 = vpop.f32.mrb[51].mxu0  ;;  %v11567_v1 = vld [vmem:[#allocation280_spill] sm:$0xff] }
 0x527   :  { %v3177_v11 = vpop.f32.mrb[51].mxu1  ;;  %5993 = vtanh.f32 %v3272_v23 }
 0x528   :  { %5995 = vtanh.f32 %v3270_v47 }
 0x529   :  { %5997 = vtanh.f32 %v3273_v8 }
 0x52a   :  { %5999 = vtanh.f32 %v3271_v39 }
 0x531   :  { %v5994_v7 = vpop.eup %5993 }
 0x532   :  { %v5996_v50 = vpop.eup %5995  ;;  %v3290_v47 = vmul.f32 0.5, %v5994_v7 }
 0x533   :  { %v5998_v8 = vpop.eup %5997 }
 0x534   :  { %v3291_v39 = vmul.f32 0.5, %v5998_v8  ;;  %v3292_v31 = vadd.f32 0.5, %v3290_v47 }
 0x563   :  { %v3213_v16 = vpop.f32.mrb[52].mxu0 }
 0x564   :  { %v3274_v3 = vadd.f32 %v3213_v16, %v11564_v13  ;;  %v3254_v5 = vpop.f32.mrb[52].mxu1  ;;  %v3215_v10 = vpop.f32.mrb[53].mxu0  ;;  %v3286_v16 = vmul.f32 0.5, %v5996_v50 }
 0x565   :  { %v3276_v27 = vadd.f32 %v3254_v5, %v11565_v0  ;;  %v3275_v20 = vadd.f32 %v3215_v10, %v11566_v28  ;;  %v3256_v19 = vpop.f32.mrb[53].mxu1  ;;  %v3217_v58 = vpop.f32.mrb[54].mxu0  ;;  %v3293_v5 = vadd.f32 0.5, %v3291_v39 }
 0x566   :  { %6001 = vtanh.f32 %v3274_v3  ;;  %v3277_v18 = vadd.f32 %v3256_v19, %v11567_v1  ;;  %v3258_v11 = vpop.f32.mrb[54].mxu1  ;;  %v3218_v23 = vpop.f32.mrb[55].mxu0  ;;  %v3288_v10 = vadd.f32 0.5, %v3286_v16  ;;  %v3298_v3 = vmul.f32 %v3292_v31, %v8478_v45 }
 0x567   :  { %v3259_v32 = vpop.f32.mrb[55].mxu1  ;;  %6003 = vtanh.f32 %v3275_v20  ;;  %v6000_v13 = vpop.eup %5999  ;;  %v3299_v11 = vmul.f32 %v3293_v5, %v8481_v46 }
 0x568   :  { %v3287_v0 = vmul.f32 0.5, %v6000_v13  ;;  %6005 = vtanh.f32 %v3276_v27 }
 0x569   :  { %6007 = vtanh.f32 %v3277_v18 }
 0x56a   :  { %v3289_v19 = vadd.f32 0.5, %v3287_v0 }
 0x570   :  { %v6002_v28 = vpop.eup %6001 }
 0x571   :  { %v3300_v58 = vmul.f32 %v6002_v28, %v3288_v10  ;;  %v6004_v1 = vpop.eup %6003 }
 0x572   :  { %v3301_v7 = vmul.f32 %v6004_v1, %v3289_v19  ;;  %v6006_v50 = vpop.eup %6005  ;;  %v11568_v19 = vld [vmem:[#allocation91_spill] sm:$0xff]  ;;  %v11570_v1 = vld [vmem:[#allocation93_spill] sm:$0xff] }
 0x573   :  { %v8772_v23 = vadd.f32 %v3300_v58, %v3298_v3  ;;  %v6008_v27 = vpop.eup %6007  ;;  %v3294_v18 = vmul.f32 0.5, %v6006_v50  ;;  %v11569_v58 = vld [vmem:[#allocation92_spill] sm:$0xff] }
 0x574   :  { %v8775_v20 = vadd.f32 %v3301_v7, %v3299_v11  ;;  %v3295_v32 = vmul.f32 0.5, %v6008_v27  ;;  %v11571_v11 = vld [vmem:[#allocation94_spill] sm:$0xff]  ;;  %v11572_v7 = vld [vmem:[#allocation95_spill] sm:$0xff]  ;;  %v11573_v50 = vld [vmem:[#allocation96_spill] sm:$0xff] }
 0x575   :  { %6009 = vtanh.f32 %v8772_v23  ;;  %v3296_v8 = vadd.f32 0.5, %v3294_v18  ;;  %v11574_v27 = vld [vmem:[#allocation97_spill] sm:$0xff]  ;;  %v11575_v18 = vld [vmem:[#allocation98_spill] sm:$0xff] }
 0x576   :  { %6011 = vtanh.f32 %v8775_v20  ;;  %v3297_v47 = vadd.f32 0.5, %v3295_v32  ;;  %v11576_v32 = vld [vmem:[#allocation99_spill] sm:$0xff] }
 0x57f   :  { %v6010_v31 = vpop.eup %6009 }
 0x580   :  { %v3306_v45 = vmul.f32 %v6010_v31, %v3296_v8  ;;  %v6012_v13 = vpop.eup %6011  ;;  %v11577_v8 = vld [vmem:[#allocation100_spill] sm:$0xff]  ;;  %v11578_v31 = vld [vmem:[#allocation101_spill] sm:$0xff] }
 0x581   :  { %v3307_v16 = vmul.f32 %v6012_v13, %v3297_v47  ;;  %v11580_v47 = vld [vmem:[#allocation103_spill] sm:$0xff]  ;;  %v11581_v13 = vld [vmem:[#allocation104_spill] sm:$0xff] }
 0x582   :  { %v5235_v46 = vmax.f32 %v3306_v45, 0.0  ;;  %v8781_v5 = vpack.c.bf16 %v3306_v45, %v3306_v45  ;;  %v11579_v45 = vld [vmem:[#allocation102_spill] sm:$0xff] }
 0x583   :  { %v8778_v39 = vpack.c.bf16 %v3307_v16, %v3307_v16  ;;  %v5236_v0 = vmax.f32 %v3307_v16, 0.0  ;;  %v11582_v16 = vld [vmem:[#allocation105_spill] sm:$0xff] }
 0x584   :  { %v5263_v10 = vmul.f32 %v8184_v56, %v5235_v46  ;;  %v11583_v46 = vld [vmem:[#allocation106_spill] sm:$0xff] }
 0x585   :  { %3345 = vmatprep.mubr.bf16.mxu0 %v8778_v39  ;;  %3386 = vmatprep.mubr.bf16.mxu1 %v8778_v39  ;;  %v5264_v28 = vmul.f32 %v8188_v24, %v5236_v0  ;;  %v11584_v0 = vld [vmem:[#allocation107_spill] sm:$0xff] }
 0x586   :  { %3346 = vmatmul.mubr.bf16.vlgmr.msra.gmra.mrb[56].mxu0 %v8781_v5  ;;  %3387 = vmatmul.mubr.bf16.vlgmr.msra.gmra.mrb[56].mxu1 %v8781_v5 }
 0x587   :  { %3396 = vmatpush1.bf16.msra.mxu0 %v11116_v55  ;;  %3437 = vmatpush1.bf16.msra.mxu1 %v11117_v17  ;;  %v5281_v3 = vadd.f32 %v5264_v28, %v5263_v10  ;;  %v11585_v10 = vld [vmem:[#allocation108_spill] sm:$0xff]  ;;  %v11586_v28 = vld [vmem:[#allocation109_spill] sm:$0xff] }
 0x588   :  { %3427 = vmatprep.mubr.bf16.mxu0 %v8778_v39  ;;  %3468 = vmatprep.mubr.bf16.mxu1 %v8778_v39 }
 0x589   :  { %5282 = vadd.xlane.f32.xlu1 %v5281_v3  ;;  %3397 = vmatprep.subr.bf16.mxu0 %v11118_v34  ;;  %v11587_v3 = vld [vmem:[#allocation110_spill] sm:$0xff] }
 0x58a   :  { %3438 = vmatprep.subr.bf16.mxu1 %v11119_v33 }
 0x58b   :  { %3398 = vmatpush1.bf16.msra.mxu0 %v11120_v41  ;;  %3439 = vmatpush1.bf16.msra.mxu1 %v11121_v14 }
 0x58c   :  { %3399 = vmatprep.subr.bf16.mxu0 %v11122_v22  ;;  %3440 = vmatprep.subr.bf16.mxu1 %v11123_v40 }
 0x58f   :  { %3400 = vmatpush1.bf16.msra.mxu0 %v11124_v9  ;;  %3441 = vmatpush1.bf16.msra.mxu1 %v11342_v52 }
 0x590   :  { %3401 = vmatprep.subr.bf16.mxu0 %v11343_v43  ;;  %3442 = vmatprep.subr.bf16.mxu1 %v11344_v53 }
 0x593   :  { %3402 = vmatpush1.bf16.msra.mxu0 %v11345_v54  ;;  %3443 = vmatpush1.bf16.msra.mxu1 %v11346_v30 }
 0x594   :  { %3403 = vmatprep.subr.bf16.mxu0 %v11347_v51  ;;  %3444 = vmatprep.subr.bf16.mxu1 %v11348_v6 }
 0x597   :  { %3404 = vmatpush1.bf16.msra.mxu0 %v11349_v37  ;;  %3445 = vmatpush1.bf16.msra.mxu1 %v11350_v38 }
 0x598   :  { %3405 = vmatprep.subr.bf16.mxu0 %v11568_v19  ;;  %3446 = vmatprep.subr.bf16.mxu1 %v11569_v58 }
 0x59b   :  { %3406 = vmatpush1.bf16.msra.mxu0 %v11570_v1  ;;  %3447 = vmatpush1.bf16.msra.mxu1 %v11571_v11 }
 0x59c   :  { %3407 = vmatprep.subr.bf16.mxu0 %v11572_v7  ;;  %3448 = vmatprep.subr.bf16.mxu1 %v11573_v50 }
 0x59f   :  { %3408 = vmatpush1.bf16.msra.mxu0 %v11574_v27  ;;  %3449 = vmatpush1.bf16.msra.mxu1 %v11575_v18 }
 0x5a0   :  { %3409 = vmatprep.subr.bf16.mxu0 %v11576_v32  ;;  %3450 = vmatprep.subr.bf16.mxu1 %v11577_v8  ;;  %v11588_v8 = vld [vmem:[#allocation111_spill] sm:$0xff] }
 0x5a3   :  { %3410 = vmatpush1.bf16.msra.mxu0 %v11578_v31  ;;  %3451 = vmatpush1.bf16.msra.mxu1 %v11579_v45  ;;  %v11589_v31 = vld [vmem:[#allocation112_spill] sm:$0xff]  ;;  %v11590_v45 = vld [vmem:[#allocation113_spill] sm:$0xff] }
 0x5a4   :  { %3411 = vmatprep.subr.bf16.mxu0 %v11580_v47  ;;  %3452 = vmatprep.subr.bf16.mxu1 %v11581_v13  ;;  %v11591_v47 = vld [vmem:[#allocation114_spill] sm:$0xff]  ;;  %v11592_v13 = vld [vmem:[#allocation115_spill] sm:$0xff] }
 0x5a7   :  { %3412 = vmatpush1.bf16.msra.mxu0 %v11582_v16  ;;  %3453 = vmatpush1.bf16.msra.mxu1 %v11583_v46  ;;  %v11593_v16 = vld [vmem:[#allocation116_spill] sm:$0xff]  ;;  %v11594_v46 = vld [vmem:[#allocation117_spill] sm:$0xff] }
 0x5a8   :  { %3413 = vmatprep.subr.bf16.mxu0 %v11584_v0  ;;  %3454 = vmatprep.subr.bf16.mxu1 %v11585_v10  ;;  %v11595_v0 = vld [vmem:[#allocation118_spill] sm:$0xff]  ;;  %v11596_v10 = vld [vmem:[#allocation119_spill] sm:$0xff] }
 0x5ab   :  { %3414 = vmatpush1.bf16.msra.mxu0 %v11586_v28  ;;  %3455 = vmatpush1.bf16.msra.mxu1 %v11587_v3  ;;  %v11597_v28 = vld [vmem:[#allocation120_spill] sm:$0xff]  ;;  %v11598_v3 = vld [vmem:[#allocation121_spill] sm:$0xff] }
 0x5ac   :  { %3415 = vmatprep.subr.bf16.mxu0 %v11588_v8  ;;  %3456 = vmatprep.subr.bf16.mxu1 %v11589_v31  ;;  %v11599_v8 = vld [vmem:[#allocation122_spill] sm:$0xff]  ;;  %v11600_v31 = vld [vmem:[#allocation123_spill] sm:$0xff] }
 0x5af   :  { %3416 = vmatpush1.bf16.msra.mxu0 %v11590_v45  ;;  %3457 = vmatpush1.bf16.msra.mxu1 %v11591_v47  ;;  %v11601_v45 = vld [vmem:[#allocation124_spill] sm:$0xff]  ;;  %v11602_v47 = vld [vmem:[#allocation125_spill] sm:$0xff] }
 0x5b0   :  { %3417 = vmatprep.subr.bf16.mxu0 %v11592_v13  ;;  %3458 = vmatprep.subr.bf16.mxu1 %v11593_v16  ;;  %v11603_v13 = vld [vmem:[#allocation126_spill] sm:$0xff]  ;;  %v11604_v16 = vld [vmem:[#allocation127_spill] sm:$0xff] }
 0x5b3   :  { %3418 = vmatpush1.bf16.msra.mxu0 %v11594_v46  ;;  %3459 = vmatpush1.bf16.msra.mxu1 %v11595_v0  ;;  %v11605_v46 = vld [vmem:[#allocation128_spill] sm:$0xff]  ;;  %v11606_v0 = vld [vmem:[#allocation129_spill] sm:$0xff] }
 0x5b4   :  { %3419 = vmatprep.subr.bf16.mxu0 %v11596_v10  ;;  %3460 = vmatprep.subr.bf16.mxu1 %v11597_v28  ;;  %v11607_v10 = vld [vmem:[#allocation130_spill] sm:$0xff]  ;;  %v11608_v28 = vld [vmem:[#allocation131_spill] sm:$0xff] }
 0x5b7   :  { %3420 = vmatpush1.bf16.msra.mxu0 %v11598_v3  ;;  %3461 = vmatpush1.bf16.msra.mxu1 %v11599_v8  ;;  %v11609_v3 = vld [vmem:[#allocation132_spill] sm:$0xff]  ;;  %v11610_v8 = vld [vmem:[#allocation133_spill] sm:$0xff] }
 0x5b8   :  { %3421 = vmatprep.subr.bf16.mxu0 %v11600_v31  ;;  %3462 = vmatprep.subr.bf16.mxu1 %v11601_v45  ;;  %v11611_v31 = vld [vmem:[#allocation134_spill] sm:$0xff]  ;;  %v11612_v45 = vld [vmem:[#allocation135_spill] sm:$0xff] }
 0x5bb   :  { %3422 = vmatpush1.bf16.msra.mxu0 %v11602_v47  ;;  %3463 = vmatpush1.bf16.msra.mxu1 %v11603_v13  ;;  %v11613_v47 = vld [vmem:[#allocation136_spill] sm:$0xff]  ;;  %v11626_v13 = vld [vmem:[#allocation149_spill] sm:$0xff] }
 0x5bc   :  { %3423 = vmatprep.subr.bf16.mxu0 %v11604_v16  ;;  %3464 = vmatprep.subr.bf16.mxu1 %v11605_v46  ;;  %v11614_v46 = vld [vmem:[#allocation137_spill] sm:$0xff]  ;;  %v11624_v16 = vld [vmem:[#allocation147_spill] sm:$0xff] }
 0x5bf   :  { %3424 = vmatpush1.bf16.msra.mxu0 %v11606_v0  ;;  %3465 = vmatpush1.bf16.msra.mxu1 %v11607_v10  ;;  %v11615_v10 = vld [vmem:[#allocation138_spill] sm:$0xff]  ;;  %v11622_v0 = vld [vmem:[#allocation145_spill] sm:$0xff] }
 0x5c0   :  { %3425 = vmatprep.subr.bf16.mxu0 %v11608_v28  ;;  %3466 = vmatprep.subr.bf16.mxu1 %v11609_v3  ;;  %v11616_v3 = vld [vmem:[#allocation139_spill] sm:$0xff]  ;;  %v11621_v28 = vld [vmem:[#allocation144_spill] sm:$0xff] }
 0x5c3   :  { %3426 = vmatpush1.bf16.msra.mxu0 %v11610_v8  ;;  %3467 = vmatpush1.bf16.msra.mxu1 %v11611_v31  ;;  %v11617_v8 = vld [vmem:[#allocation140_spill] sm:$0xff]  ;;  %v11618_v31 = vld [vmem:[#allocation141_spill] sm:$0xff] }
 0x5c4   :  { %3477 = vmatprep.subr.bf16.mxu0 %v11612_v45  ;;  %3518 = vmatprep.subr.bf16.mxu1 %v11613_v47  ;;  %v11619_v45 = vld [vmem:[#allocation142_spill] sm:$0xff]  ;;  %v11620_v47 = vld [vmem:[#allocation143_spill] sm:$0xff] }
 0x5c6   :  { %3428 = vmatmul.mubr.bf16.vlgmr.msra.gmra.mrb[60].mxu0 %v8781_v5  ;;  %3469 = vmatmul.mubr.bf16.vlgmr.msra.gmra.mrb[60].mxu1 %v8781_v5 }
 0x5c7   :  { %3478 = vmatpush1.bf16.msra.mxu0 %v11614_v46  ;;  %3509 = vmatprep.mubr.bf16.mxu0 %v8778_v39  ;;  %v11623_v46 = vld [vmem:[#allocation146_spill] sm:$0xff] }
 0x5c8   :  { %3519 = vmatpush1.bf16.msra.mxu1 %v11615_v10  ;;  %3550 = vmatprep.mubr.bf16.mxu1 %v8778_v39  ;;  %v11625_v10 = vld [vmem:[#allocation148_spill] sm:$0xff] }
 0x5c9   :  { %3479 = vmatprep.subr.bf16.mxu0 %v11616_v3  ;;  %3520 = vmatprep.subr.bf16.mxu1 %v11617_v8  ;;  %v11627_v3 = vld [vmem:[#allocation150_spill] sm:$0xff]  ;;  %v11628_v8 = vld [vmem:[#allocation151_spill] sm:$0xff] }
 0x5cb   :  { %3480 = vmatpush1.bf16.msra.mxu0 %v11618_v31  ;;  %v11629_v31 = vld [vmem:[#allocation152_spill] sm:$0xff] }
 0x5cc   :  { %3521 = vmatpush1.bf16.msra.mxu1 %v11619_v45  ;;  %3481 = vmatprep.subr.bf16.mxu0 %v11620_v47  ;;  %v11630_v45 = vld [vmem:[#allocation153_spill] sm:$0xff]  ;;  %v11631_v47 = vld [vmem:[#allocation154_spill] sm:$0xff] }
 0x5cd   :  { %3522 = vmatprep.subr.bf16.mxu1 %v11621_v28  ;;  %v11632_v28 = vld [vmem:[#allocation155_spill] sm:$0xff] }
 0x5cf   :  { %3482 = vmatpush1.bf16.msra.mxu0 %v11622_v0  ;;  %v11633_v0 = vld [vmem:[#allocation156_spill] sm:$0xff] }
 0x5d0   :  { %3523 = vmatpush1.bf16.msra.mxu1 %v11623_v46  ;;  %3483 = vmatprep.subr.bf16.mxu0 %v11624_v16  ;;  %v11634_v46 = vld [vmem:[#allocation157_spill] sm:$0xff]  ;;  %v11635_v16 = vld [vmem:[#allocation158_spill] sm:$0xff] }
 0x5d1   :  { %3524 = vmatprep.subr.bf16.mxu1 %v11625_v10  ;;  %v11636_v10 = vld [vmem:[#allocation159_spill] sm:$0xff] }
 0x5d3   :  { %3484 = vmatpush1.bf16.msra.mxu0 %v11626_v13  ;;  %v11637_v13 = vld [vmem:[#allocation160_spill] sm:$0xff] }
 0x5d4   :  { %3525 = vmatpush1.bf16.msra.mxu1 %v11627_v3  ;;  %3485 = vmatprep.subr.bf16.mxu0 %v11628_v8  ;;  %v11638_v3 = vld [vmem:[#allocation161_spill] sm:$0xff]  ;;  %v11639_v8 = vld [vmem:[#allocation162_spill] sm:$0xff] }
 0x5d5   :  { %3526 = vmatprep.subr.bf16.mxu1 %v11629_v31  ;;  %v11640_v31 = vld [vmem:[#allocation163_spill] sm:$0xff] }
 0x5d7   :  { %3486 = vmatpush1.bf16.msra.mxu0 %v11630_v45  ;;  %v11641_v45 = vld [vmem:[#allocation164_spill] sm:$0xff] }
 0x5d8   :  { %3527 = vmatpush1.bf16.msra.mxu1 %v11631_v47  ;;  %3487 = vmatprep.subr.bf16.mxu0 %v11632_v28  ;;  %v11642_v47 = vld [vmem:[#allocation165_spill] sm:$0xff]  ;;  %v11643_v28 = vld [vmem:[#allocation166_spill] sm:$0xff] }
 0x5d9   :  { %3528 = vmatprep.subr.bf16.mxu1 %v11633_v0  ;;  %v11644_v0 = vld [vmem:[#allocation167_spill] sm:$0xff] }
 0x5db   :  { %3488 = vmatpush1.bf16.msra.mxu0 %v11634_v46  ;;  %v11645_v46 = vld [vmem:[#allocation168_spill] sm:$0xff] }
 0x5dc   :  { %3529 = vmatpush1.bf16.msra.mxu1 %v11635_v16  ;;  %3489 = vmatprep.subr.bf16.mxu0 %v11636_v10  ;;  %v11646_v16 = vld [vmem:[#allocation169_spill] sm:$0xff]  ;;  %v11647_v10 = vld [vmem:[#allocation170_spill] sm:$0xff] }
 0x5dd   :  { %3530 = vmatprep.subr.bf16.mxu1 %v11637_v13  ;;  %v11648_v13 = vld [vmem:[#allocation171_spill] sm:$0xff] }
 0x5df   :  { %3490 = vmatpush1.bf16.msra.mxu0 %v11638_v3  ;;  %v11649_v3 = vld [vmem:[#allocation172_spill] sm:$0xff] }
 0x5e0   :  { %3531 = vmatpush1.bf16.msra.mxu1 %v11639_v8  ;;  %3491 = vmatprep.subr.bf16.mxu0 %v11640_v31  ;;  %v11650_v8 = vld [vmem:[#allocation173_spill] sm:$0xff]  ;;  %v11651_v31 = vld [vmem:[#allocation174_spill] sm:$0xff] }
 0x5e1   :  { %3532 = vmatprep.subr.bf16.mxu1 %v11641_v45  ;;  %v11652_v45 = vld [vmem:[#allocation175_spill] sm:$0xff] }
 0x5e3   :  { %3492 = vmatpush1.bf16.msra.mxu0 %v11642_v47  ;;  %v11653_v47 = vld [vmem:[#allocation176_spill] sm:$0xff] }
 0x5e4   :  { %3533 = vmatpush1.bf16.msra.mxu1 %v11643_v28  ;;  %3493 = vmatprep.subr.bf16.mxu0 %v11644_v0  ;;  %v11654_v28 = vld [vmem:[#allocation177_spill] sm:$0xff]  ;;  %v11655_v0 = vld [vmem:[#allocation178_spill] sm:$0xff] }
 0x5e5   :  { %3534 = vmatprep.subr.bf16.mxu1 %v11645_v46 }
 0x5e7   :  { %3494 = vmatpush1.bf16.msra.mxu0 %v11646_v16  ;;  %v11656_v16 = vld [vmem:[#allocation180_spill] sm:$0xff] }
 0x5e8   :  { %3535 = vmatpush1.bf16.msra.mxu1 %v11647_v10  ;;  %3495 = vmatprep.subr.bf16.mxu0 %v11648_v13  ;;  %v11657_v10 = vld [vmem:[#allocation181_spill] sm:$0xff]  ;;  %v11658_v13 = vld [vmem:[#allocation182_spill] sm:$0xff] }
 0x5e9   :  { %3536 = vmatprep.subr.bf16.mxu1 %v11649_v3  ;;  %v11659_v3 = vld [vmem:[#allocation183_spill] sm:$0xff] }
 0x5eb   :  { %3496 = vmatpush1.bf16.msra.mxu0 %v11650_v8  ;;  %v11660_v8 = vld [vmem:[#allocation184_spill] sm:$0xff] }
 0x5ec   :  { %3537 = vmatpush1.bf16.msra.mxu1 %v11651_v31  ;;  %3497 = vmatprep.subr.bf16.mxu0 %v11652_v45  ;;  %v11661_v31 = vld [vmem:[#allocation185_spill] sm:$0xff]  ;;  %v11662_v45 = vld [vmem:[#allocation186_spill] sm:$0xff] }
 0x5ed   :  { %3538 = vmatprep.subr.bf16.mxu1 %v11653_v47  ;;  %v11663_v47 = vld [vmem:[#allocation188_spill] sm:$0xff] }
 0x5ef   :  { %3498 = vmatpush1.bf16.msra.mxu0 %v11654_v28  ;;  %v11664_v28 = vld [vmem:[#allocation189_spill] sm:$0xff] }
 0x5f0   :  { %3539 = vmatpush1.bf16.msra.mxu1 %v11655_v0  ;;  %3499 = vmatprep.subr.bf16.mxu0 %v11439_v60  ;;  %v11665_v0 = vld [vmem:[#allocation190_spill] sm:$0xff] }
 0x5f1   :  { %3540 = vmatprep.subr.bf16.mxu1 %v11656_v16  ;;  %v11666_v16 = vld [vmem:[#allocation192_spill] sm:$0xff] }
 0x5f3   :  { %3500 = vmatpush1.bf16.msra.mxu0 %v11657_v10  ;;  %v11667_v10 = vld [vmem:[#allocation193_spill] sm:$0xff] }
 0x5f4   :  { %3541 = vmatpush1.bf16.msra.mxu1 %v11658_v13  ;;  %3501 = vmatprep.subr.bf16.mxu0 %v11659_v3  ;;  %v11668_v13 = vld [vmem:[#allocation198_spill] sm:$0xff]  ;;  %v11669_v3 = vld [vmem:[#allocation199_spill] sm:$0xff] }
 0x5f5   :  { %3542 = vmatprep.subr.bf16.mxu1 %v11660_v8  ;;  %v11670_v8 = vld [vmem:[#allocation200_spill] sm:$0xff] }
 0x5f7   :  { %3502 = vmatpush1.bf16.msra.mxu0 %v11661_v31  ;;  %v11671_v31 = vld [vmem:[#allocation201_spill] sm:$0xff] }
 0x5f8   :  { %3543 = vmatpush1.bf16.msra.mxu1 %v11662_v45  ;;  %3503 = vmatprep.subr.bf16.mxu0 %v11663_v47  ;;  %v11672_v45 = vld [vmem:[#allocation204_spill] sm:$0xff]  ;;  %v11673_v47 = vld [vmem:[#allocation207_spill] sm:$0xff] }
 0x5f9   :  { %3544 = vmatprep.subr.bf16.mxu1 %v11664_v28  ;;  %v11674_v28 = vld [vmem:[#allocation209_spill] sm:$0xff] }
 0x5fb   :  { %3504 = vmatpush1.bf16.msra.mxu0 %v11665_v0  ;;  %v11675_v0 = vld [vmem:[#allocation210_spill] sm:$0xff] }
 0x5fc   :  { %3545 = vmatpush1.bf16.msra.mxu1 %v11233_v42  ;;  %3505 = vmatprep.subr.bf16.mxu0 %v11666_v16  ;;  %v11686_v16 = vld [vmem:[#allocation233_spill] sm:$0xff] }
 0x5fd   :  { %3546 = vmatprep.subr.bf16.mxu1 %v11667_v10  ;;  %v11676_v10 = vld [vmem:[#allocation212_spill] sm:$0xff] }
 0x5ff   :  { %3506 = vmatpush1.bf16.msra.mxu0 %v11668_v13  ;;  %v11684_v13 = vld [vmem:[#allocation228_spill] sm:$0xff] }
 0x600   :  { %3547 = vmatpush1.bf16.msra.mxu1 %v11669_v3  ;;  %3507 = vmatprep.subr.bf16.mxu0 %v11670_v8  ;;  %v11677_v3 = vld [vmem:[#allocation215_spill] sm:$0xff]  ;;  %v11683_v8 = vld [vmem:[#allocation226_spill] sm:$0xff] }
 0x601   :  { %3548 = vmatprep.subr.bf16.mxu1 %v11671_v31  ;;  %v11678_v31 = vld [vmem:[#allocation217_spill] sm:$0xff] }
 0x603   :  { %3508 = vmatpush1.bf16.msra.mxu0 %v11672_v45  ;;  %v11679_v45 = vld [vmem:[#allocation218_spill] sm:$0xff] }
 0x604   :  { %3549 = vmatpush1.bf16.msra.mxu1 %v11673_v47  ;;  %3559 = vmatprep.subr.bf16.mxu0 %v11674_v28  ;;  %v11680_v47 = vld [vmem:[#allocation220_spill] sm:$0xff]  ;;  %v11681_v28 = vld [vmem:[#allocation223_spill] sm:$0xff] }
 0x605   :  { %3600 = vmatprep.subr.bf16.mxu1 %v11675_v0  ;;  %v11682_v0 = vld [vmem:[#allocation225_spill] sm:$0xff] }
 0x606   :  { %3510 = vmatmul.mubr.bf16.vlgmr.msra.gmra.mrb[56].mxu0 %v8781_v5 }
 0x607   :  { %3551 = vmatmul.mubr.bf16.vlgmr.msra.gmra.mrb[56].mxu1 %v8781_v5  ;;  %3560 = vmatpush1.bf16.msra.mxu0 %v11676_v10  ;;  %v11685_v10 = vld [vmem:[#allocation231_spill] sm:$0xff] }
 0x608   :  { %3591 = vmatprep.mubr.bf16.mxu0 %v8778_v39  ;;  %3601 = vmatpush1.bf16.msra.mxu1 %v11677_v3  ;;  %v11687_v3 = vld [vmem:[#allocation234_spill] sm:$0xff] }
 0x609   :  { %3632 = vmatprep.mubr.bf16.mxu1 %v8778_v39  ;;  %3561 = vmatprep.subr.bf16.mxu0 %v11678_v31  ;;  %v11688_v39 = vld [vmem:[#allocation236_spill] sm:$0xff]  ;;  %v11689_v31 = vld [vmem:[#allocation239_spill] sm:$0xff] }
 0x60a   :  { %3602 = vmatprep.subr.bf16.mxu1 %v11679_v45  ;;  %v11690_v45 = vld [vmem:[#allocation241_spill] sm:$0xff] }
 0x60b   :  { %3562 = vmatpush1.bf16.msra.mxu0 %v11680_v47  ;;  %v11691_v47 = vld [vmem:[#allocation242_spill] sm:$0xff] }
 0x60c   :  { %3603 = vmatpush1.bf16.msra.mxu1 %v11681_v28  ;;  %3563 = vmatprep.subr.bf16.mxu0 %v11682_v0  ;;  %v11692_v28 = vld [vmem:[#allocation244_spill] sm:$0xff]  ;;  %v11693_v0 = vld [vmem:[#allocation247_spill] sm:$0xff] }
 0x60d   :  { %3604 = vmatprep.subr.bf16.mxu1 %v11683_v8  ;;  %v11694_v8 = vld [vmem:[#allocation249_spill] sm:$0xff] }
 0x60f   :  { %3564 = vmatpush1.bf16.msra.mxu0 %v11684_v13  ;;  %v11695_v13 = vld [vmem:[#allocation250_spill] sm:$0xff] }
 0x610   :  { %3605 = vmatpush1.bf16.msra.mxu1 %v11685_v10  ;;  %3565 = vmatprep.subr.bf16.mxu0 %v11686_v16  ;;  %v11696_v10 = vld [vmem:[#allocation252_spill] sm:$0xff]  ;;  %v11697_v16 = vld [vmem:[#allocation255_spill] sm:$0xff] }
 0x611   :  { %3606 = vmatprep.subr.bf16.mxu1 %v11687_v3  ;;  %v11698_v3 = vld [vmem:[#allocation257_spill] sm:$0xff] }
 0x613   :  { %3566 = vmatpush1.bf16.msra.mxu0 %v11688_v39  ;;  %v11699_v39 = vld [vmem:[#allocation258_spill] sm:$0xff] }
 0x614   :  { %3607 = vmatpush1.bf16.msra.mxu1 %v11689_v31  ;;  %3567 = vmatprep.subr.bf16.mxu0 %v11690_v45  ;;  %v11700_v31 = vld [vmem:[#allocation263_spill] sm:$0xff]  ;;  %v11701_v45 = vld [vmem:[#allocation264_spill] sm:$0xff] }
 0x615   :  { %3608 = vmatprep.subr.bf16.mxu1 %v11691_v47 }
 0x617   :  { %3568 = vmatpush1.bf16.msra.mxu0 %v11692_v28 }
 0x618   :  { %3609 = vmatpush1.bf16.msra.mxu1 %v11693_v0  ;;  %3569 = vmatprep.subr.bf16.mxu0 %v11694_v8 }
 0x619   :  { %3610 = vmatprep.subr.bf16.mxu1 %v11695_v13  ;;  %v11702_v13 = vld [vmem:[#allocation273_spill] sm:$0xff] }
 0x61b   :  { %3570 = vmatpush1.bf16.msra.mxu0 %v11696_v10 }
 0x61c   :  { %3611 = vmatpush1.bf16.msra.mxu1 %v11697_v16  ;;  %3571 = vmatprep.subr.bf16.mxu0 %v11698_v3 }
 0x61d   :  { %3612 = vmatprep.subr.bf16.mxu1 %v11699_v39 }
 0x61f   :  { %3572 = vmatpush1.bf16.msra.mxu0 %v11700_v31 }
 0x620   :  { %3613 = vmatpush1.bf16.msra.mxu1 %v11701_v45  ;;  %3573 = vmatprep.subr.bf16.mxu0 %v11486_v29  ;;  %v11791_v29 = vld [vmem:[#allocation285_spill] sm:$0xff] }
 0x621   :  { %3614 = vmatprep.subr.bf16.mxu1 %v11487_v35 }
 0x623   :  { %3574 = vmatpush1.bf16.msra.mxu0 %v11488_v61 }
 0x624   :  { %3615 = vmatpush1.bf16.msra.mxu1 %v11489_v12  ;;  %3575 = vmatprep.subr.bf16.mxu0 %v11702_v13 }
 0x625   :  { %3616 = vmatprep.subr.bf16.mxu1 %v11491_v57 }
 0x627   :  { %3576 = vmatpush1.bf16.msra.mxu0 %v11492_v59 }
 0x628   :  { %3617 = vmatpush1.bf16.msra.mxu1 %v11493_v36  ;;  %3577 = vmatprep.subr.bf16.mxu0 %v11494_v62  ;;  %v11703_v62 = vld [vmem:[#allocation302_spill] sm:$0xff] }
 0x629   :  { %3618 = vmatprep.subr.bf16.mxu1 %v11495_v4  ;;  %v11704_v4 = vld [vmem:[#allocation305_spill] sm:$0xff] }
 0x62b   :  { %3578 = vmatpush1.bf16.msra.mxu0 %v11496_v44  ;;  %v11705_v44 = vld [vmem:[#allocation306_spill] sm:$0xff] }
 0x62c   :  { %3619 = vmatpush1.bf16.msra.mxu1 %v11281_v63  ;;  %3579 = vmatprep.subr.bf16.mxu0 %v11282_v49  ;;  %v11706_v63 = vld [vmem:[#allocation307_spill] sm:$0xff]  ;;  %v11707_v49 = vld [vmem:[#allocation310_spill] sm:$0xff] }
 0x62d   :  { %3620 = vmatprep.subr.bf16.mxu1 %v11283_v25  ;;  %v11708_v25 = vld [vmem:[#allocation313_spill] sm:$0xff] }
 0x62f   :  { %3580 = vmatpush1.bf16.msra.mxu0 %v11284_v26  ;;  %v11709_v26 = vld [vmem:[#allocation314_spill] sm:$0xff] }
 0x630   :  { %3621 = vmatpush1.bf16.msra.mxu1 %v11497_v21  ;;  %3581 = vmatprep.subr.bf16.mxu0 %v11286_v48  ;;  %v11710_v21 = vld [vmem:[#allocation315_spill] sm:$0xff]  ;;  %v11711_v48 = vld [vmem:[#allocation318_spill] sm:$0xff] }
 0x631   :  { %3622 = vmatprep.subr.bf16.mxu1 %v11287_v2  ;;  %v11712_v2 = vld [vmem:[#allocation321_spill] sm:$0xff] }
 0x633   :  { %3582 = vmatpush1.bf16.msra.mxu0 %v11288_v15  ;;  %v11713_v15 = vld [vmem:[#allocation322_spill] sm:$0xff] }
 0x634   :  { %3623 = vmatpush1.bf16.msra.mxu1 %v11703_v62  ;;  %3583 = vmatprep.subr.bf16.mxu0 %v11704_v4  ;;  %v11714_v62 = vld [vmem:[#allocation323_spill] sm:$0xff]  ;;  %v11715_v4 = vld [vmem:[#allocation324_spill] sm:$0xff] }
 0x635   :  { %3624 = vmatprep.subr.bf16.mxu1 %v11705_v44  ;;  %v11716_v44 = vld [vmem:[#allocation325_spill] sm:$0xff] }
 0x637   :  { %3584 = vmatpush1.bf16.msra.mxu0 %v11706_v63  ;;  %v11717_v63 = vld [vmem:[#allocation326_spill] sm:$0xff] }
 0x638   :  { %3625 = vmatpush1.bf16.msra.mxu1 %v11707_v49  ;;  %3585 = vmatprep.subr.bf16.mxu0 %v11708_v25  ;;  %v11718_v49 = vld [vmem:[#allocation327_spill] sm:$0xff]  ;;  %v11719_v25 = vld [vmem:[#allocation328_spill] sm:$0xff] }
 0x639   :  { %3626 = vmatprep.subr.bf16.mxu1 %v11709_v26  ;;  %v11720_v26 = vld [vmem:[#allocation7_spill] sm:$0xff] }
 0x63b   :  { %3586 = vmatpush1.bf16.msra.mxu0 %v11710_v21  ;;  %v11721_v21 = vld [vmem:[#allocation8_spill] sm:$0xff] }
 0x63c   :  { %3627 = vmatpush1.bf16.msra.mxu1 %v11711_v48  ;;  %3587 = vmatprep.subr.bf16.mxu0 %v11712_v2  ;;  %v11731_v2 = vld [vmem:[#allocation18_spill] sm:$0xff] }
 0x63d   :  { %3628 = vmatprep.subr.bf16.mxu1 %v11713_v15  ;;  %v11722_v15 = vld [vmem:[#allocation9_spill] sm:$0xff] }
 0x63f   :  { %3588 = vmatpush1.bf16.msra.mxu0 %v11714_v62  ;;  %v11723_v62 = vld [vmem:[#allocation10_spill] sm:$0xff] }
 0x640   :  { %3629 = vmatpush1.bf16.msra.mxu1 %v11715_v4  ;;  %3589 = vmatprep.subr.bf16.mxu0 %v11716_v44  ;;  %v11724_v4 = vld [vmem:[#allocation11_spill] sm:$0xff]  ;;  %v11725_v44 = vld [vmem:[#allocation12_spill] sm:$0xff] }
 0x641   :  { %3630 = vmatprep.subr.bf16.mxu1 %v11717_v63  ;;  %v11726_v63 = vld [vmem:[#allocation13_spill] sm:$0xff] }
 0x643   :  { %3590 = vmatpush1.bf16.msra.mxu0 %v11718_v49  ;;  %v11727_v49 = vld [vmem:[#allocation14_spill] sm:$0xff] }
 0x644   :  { %3631 = vmatpush1.bf16.msra.mxu1 %v11719_v25  ;;  %3693 = vmatprep.subr.bf16.mxu0 %v11720_v26  ;;  %v11728_v25 = vld [vmem:[#allocation15_spill] sm:$0xff]  ;;  %v11729_v26 = vld [vmem:[#allocation16_spill] sm:$0xff] }
 0x645   :  { %3734 = vmatprep.subr.bf16.mxu1 %v11721_v21  ;;  %v11730_v21 = vld [vmem:[#allocation17_spill] sm:$0xff] }
 0x646   :  { %3592 = vmatmul.mubr.bf16.vlgmr.msra.gmra.mrb[60].mxu0 %v8781_v5 }
 0x647   :  { %3633 = vmatmul.mubr.bf16.vlgmr.msra.gmra.mrb[60].mxu1 %v8781_v5  ;;  %3694 = vmatpush1.bf16.msra.mxu0 %v11722_v15  ;;  %v11732_v5 = vld [vmem:[#allocation19_spill] sm:$0xff]  ;;  %v11733_v15 = vld [vmem:[#allocation20_spill] sm:$0xff] }
 0x648   :  { %3735 = vmatpush1.bf16.msra.mxu1 %v11723_v62  ;;  %3695 = vmatprep.subr.bf16.mxu0 %v11724_v4  ;;  %v11734_v62 = vld [vmem:[#allocation21_spill] sm:$0xff]  ;;  %v11735_v4 = vld [vmem:[#allocation22_spill] sm:$0xff] }
 0x649   :  { %3736 = vmatprep.subr.bf16.mxu1 %v11725_v44  ;;  %v11736_v44 = vld [vmem:[#allocation23_spill] sm:$0xff] }
 0x64b   :  { %3696 = vmatpush1.bf16.msra.mxu0 %v11726_v63  ;;  %v11737_v63 = vld [vmem:[#allocation24_spill] sm:$0xff] }
 0x64c   :  { %3737 = vmatpush1.bf16.msra.mxu1 %v11727_v49  ;;  %3697 = vmatprep.subr.bf16.mxu0 %v11728_v25  ;;  %v11738_v49 = vld [vmem:[#allocation25_spill] sm:$0xff]  ;;  %v11739_v25 = vld [vmem:[#allocation26_spill] sm:$0xff] }
 0x64d   :  { %3738 = vmatprep.subr.bf16.mxu1 %v11729_v26  ;;  %v11740_v26 = vld [vmem:[#allocation27_spill] sm:$0xff] }
 0x64f   :  { %3698 = vmatpush1.bf16.msra.mxu0 %v11730_v21  ;;  %v11741_v21 = vld [vmem:[#allocation28_spill] sm:$0xff] }
 0x650   :  { %3739 = vmatpush1.bf16.msra.mxu1 %v11731_v2  ;;  %3699 = vmatprep.subr.bf16.mxu0 %v11732_v5  ;;  %v11742_v2 = vld [vmem:[#allocation29_spill] sm:$0xff]  ;;  %v11743_v5 = vld [vmem:[#allocation30_spill] sm:$0xff] }
 0x651   :  { %3740 = vmatprep.subr.bf16.mxu1 %v11733_v15  ;;  %v11744_v15 = vld [vmem:[#allocation31_spill] sm:$0xff] }
 0x653   :  { %3700 = vmatpush1.bf16.msra.mxu0 %v11734_v62  ;;  %v11745_v62 = vld [vmem:[#allocation32_spill] sm:$0xff] }
 0x654   :  { %3741 = vmatpush1.bf16.msra.mxu1 %v11735_v4  ;;  %3701 = vmatprep.subr.bf16.mxu0 %v11736_v44  ;;  %v11746_v4 = vld [vmem:[#allocation33_spill] sm:$0xff]  ;;  %v11747_v44 = vld [vmem:[#allocation34_spill] sm:$0xff] }
 0x655   :  { %3742 = vmatprep.subr.bf16.mxu1 %v11737_v63  ;;  %v11748_v63 = vld [vmem:[#allocation35_spill] sm:$0xff] }
 0x657   :  { %3702 = vmatpush1.bf16.msra.mxu0 %v11738_v49  ;;  %v11749_v49 = vld [vmem:[#allocation36_spill] sm:$0xff] }
 0x658   :  { %3743 = vmatpush1.bf16.msra.mxu1 %v11739_v25  ;;  %3703 = vmatprep.subr.bf16.mxu0 %v11740_v26  ;;  %v11750_v25 = vld [vmem:[#allocation37_spill] sm:$0xff]  ;;  %v11751_v26 = vld [vmem:[#allocation38_spill] sm:$0xff] }
 0x659   :  { %3744 = vmatprep.subr.bf16.mxu1 %v11741_v21  ;;  %v11752_v21 = vld [vmem:[#allocation39_spill] sm:$0xff] }
 0x65b   :  { %3704 = vmatpush1.bf16.msra.mxu0 %v11742_v2  ;;  %v11753_v2 = vld [vmem:[#allocation40_spill] sm:$0xff] }
 0x65c   :  { %3745 = vmatpush1.bf16.msra.mxu1 %v11743_v5  ;;  %3705 = vmatprep.subr.bf16.mxu0 %v11744_v15  ;;  %v11754_v5 = vld [vmem:[#allocation41_spill] sm:$0xff]  ;;  %v11755_v15 = vld [vmem:[#allocation42_spill] sm:$0xff] }
 0x65d   :  { %3746 = vmatprep.subr.bf16.mxu1 %v11745_v62  ;;  %v11756_v62 = vld [vmem:[#allocation43_spill] sm:$0xff] }
 0x65f   :  { %3706 = vmatpush1.bf16.msra.mxu0 %v11746_v4  ;;  %v11757_v4 = vld [vmem:[#allocation44_spill] sm:$0xff] }
 0x660   :  { %3747 = vmatpush1.bf16.msra.mxu1 %v11747_v44  ;;  %3707 = vmatprep.subr.bf16.mxu0 %v11748_v63  ;;  %v11758_v44 = vld [vmem:[#allocation45_spill] sm:$0xff]  ;;  %v11759_v63 = vld [vmem:[#allocation46_spill] sm:$0xff] }
 0x661   :  { %3748 = vmatprep.subr.bf16.mxu1 %v11749_v49  ;;  %v11760_v49 = vld [vmem:[#allocation47_spill] sm:$0xff] }
 0x663   :  { %3708 = vmatpush1.bf16.msra.mxu0 %v11750_v25  ;;  %v11761_v25 = vld [vmem:[#allocation48_spill] sm:$0xff] }
 0x664   :  { %3749 = vmatpush1.bf16.msra.mxu1 %v11751_v26  ;;  %3709 = vmatprep.subr.bf16.mxu0 %v11752_v21  ;;  %v11762_v26 = vld [vmem:[#allocation49_spill] sm:$0xff]  ;;  %v11763_v21 = vld [vmem:[#allocation50_spill] sm:$0xff] }
 0x665   :  { %3750 = vmatprep.subr.bf16.mxu1 %v11753_v2  ;;  %v11764_v2 = vld [vmem:[#allocation51_spill] sm:$0xff] }
 0x667   :  { %3710 = vmatpush1.bf16.msra.mxu0 %v11754_v5  ;;  %v11765_v5 = vld [vmem:[#allocation52_spill] sm:$0xff] }
 0x668   :  { %3751 = vmatpush1.bf16.msra.mxu1 %v11755_v15  ;;  %3711 = vmatprep.subr.bf16.mxu0 %v11756_v62  ;;  %v11766_v15 = vld [vmem:[#allocation53_spill] sm:$0xff]  ;;  %v11767_v62 = vld [vmem:[#allocation54_spill] sm:$0xff] }
 0x669   :  { %3752 = vmatprep.subr.bf16.mxu1 %v11757_v4  ;;  %v11768_v4 = vld [vmem:[#allocation55_spill] sm:$0xff] }
 0x66b   :  { %3712 = vmatpush1.bf16.msra.mxu0 %v11758_v44  ;;  %v11769_v44 = vld [vmem:[#allocation56_spill] sm:$0xff] }
 0x66c   :  { %3753 = vmatpush1.bf16.msra.mxu1 %v11759_v63  ;;  %3713 = vmatprep.subr.bf16.mxu0 %v11760_v49  ;;  %v11770_v63 = vld [vmem:[#allocation57_spill] sm:$0xff]  ;;  %v11771_v49 = vld [vmem:[#allocation58_spill] sm:$0xff] }
 0x66d   :  { %3754 = vmatprep.subr.bf16.mxu1 %v11761_v25  ;;  %v11772_v25 = vld [vmem:[#allocation59_spill] sm:$0xff] }
 0x66f   :  { %3714 = vmatpush1.bf16.msra.mxu0 %v11762_v26  ;;  %v11773_v26 = vld [vmem:[#allocation60_spill] sm:$0xff] }
 0x670   :  { %3755 = vmatpush1.bf16.msra.mxu1 %v11763_v21  ;;  %3715 = vmatprep.subr.bf16.mxu0 %v11764_v2  ;;  %v11774_v21 = vld [vmem:[#allocation61_spill] sm:$0xff]  ;;  %v11775_v2 = vld [vmem:[#allocation62_spill] sm:$0xff] }
 0x671   :  { %3756 = vmatprep.subr.bf16.mxu1 %v11765_v5  ;;  %v11776_v5 = vld [vmem:[#allocation63_spill] sm:$0xff] }
 0x673   :  { %3716 = vmatpush1.bf16.msra.mxu0 %v11766_v15  ;;  %v11777_v15 = vld [vmem:[#allocation64_spill] sm:$0xff] }
 0x674   :  { %3757 = vmatpush1.bf16.msra.mxu1 %v11767_v62  ;;  %3717 = vmatprep.subr.bf16.mxu0 %v11768_v4  ;;  %v11778_v62 = vld [vmem:[#allocation65_spill] sm:$0xff]  ;;  %v11779_v4 = vld [vmem:[#allocation66_spill] sm:$0xff] }
 0x675   :  { %3758 = vmatprep.subr.bf16.mxu1 %v11769_v44  ;;  %v11780_v44 = vld [vmem:[#allocation67_spill] sm:$0xff] }
 0x677   :  { %3718 = vmatpush1.bf16.msra.mxu0 %v11770_v63  ;;  %v11781_v63 = vld [vmem:[#allocation68_spill] sm:$0xff] }
 0x678   :  { %3759 = vmatpush1.bf16.msra.mxu1 %v11771_v49  ;;  %3719 = vmatprep.subr.bf16.mxu0 %v11772_v25  ;;  %v11782_v49 = vld [vmem:[#allocation69_spill] sm:$0xff]  ;;  %v11783_v25 = vld [vmem:[#allocation70_spill] sm:$0xff] }
 0x679   :  { %3760 = vmatprep.subr.bf16.mxu1 %v11773_v26  ;;  %v11784_v26 = vld [vmem:[#allocation71_spill] sm:$0xff] }
 0x67b   :  { %3720 = vmatpush1.bf16.msra.mxu0 %v11774_v21  ;;  %v11785_v21 = vld [vmem:[#allocation72_spill] sm:$0xff] }
 0x67c   :  { %3761 = vmatpush1.bf16.msra.mxu1 %v11775_v2  ;;  %3721 = vmatprep.subr.bf16.mxu0 %v11776_v5  ;;  %v11786_v5 = vld [vmem:[#allocation219_spill] sm:$0xff] }
 0x67d   :  { %3762 = vmatprep.subr.bf16.mxu1 %v11777_v15 }
 0x67f   :  { %3722 = vmatpush1.bf16.msra.mxu0 %v11778_v62  ;;  %v11787_v62 = vld [vmem:[#allocation221_spill] sm:$0xff] }
 0x680   :  { %3763 = vmatpush1.bf16.msra.mxu1 %v11779_v4  ;;  %3723 = vmatprep.subr.bf16.mxu0 %v11780_v44  ;;  %v11788_v4 = vld [vmem:[#allocation222_spill] sm:$0xff] }
 0x681   :  { %3764 = vmatprep.subr.bf16.mxu1 %v11781_v63  ;;  %v11789_v63 = vld [vmem:[#allocation224_spill] sm:$0xff] }
 0x683   :  { %3724 = vmatpush1.bf16.msra.mxu0 %v11782_v49 }
 0x684   :  { %3765 = vmatpush1.bf16.msra.mxu1 %v11783_v25  ;;  %3775 = vmatprep.subr.bf16.mxu0 %v11784_v26  ;;  %v11790_v26 = vld [vmem:[#allocation284_spill] sm:$0xff] }
 0x685   :  { %3816 = vmatprep.subr.bf16.mxu1 %v11785_v21 }
 0x6d9   :  { %v3511_v2 = vpop.f32.mrb[56].mxu0 }
 0x6da   :  { %v3650_v48 = vadd.f32 %v3511_v2, %v11786_v5  ;;  %v3552_v15 = vpop.f32.mrb[56].mxu1  ;;  %v3513_v36 = vpop.f32.mrb[57].mxu0 }
 0x6db   :  { %v3652_v59 = vadd.f32 %v3552_v15, %v11787_v62  ;;  %v3651_v57 = vadd.f32 %v3513_v36, %v11788_v4  ;;  %v3554_v44 = vpop.f32.mrb[57].mxu1  ;;  %v3515_v13 = vpop.f32.mrb[58].mxu0  ;;  %v11792_v62 = vld [vmem:[#allocation287_spill] sm:$0xff] }
 0x6dc   :  { %v3653_v12 = vadd.f32 %v3554_v44, %v11789_v63  ;;  %v3556_v49 = vpop.f32.mrb[58].mxu1  ;;  %v3516_v61 = vpop.f32.mrb[59].mxu0  ;;  %v11793_v63 = vld [vmem:[#allocation288_spill] sm:$0xff] }
 0x6dd   :  { %v3557_v25 = vpop.f32.mrb[59].mxu1  ;;  %6013 = vtanh.f32 %v3652_v59 }
 0x6de   :  { %6015 = vtanh.f32 %v3650_v48 }
 0x6df   :  { %6017 = vtanh.f32 %v3653_v12 }
 0x6e0   :  { %6019 = vtanh.f32 %v3651_v57 }
 0x6e7   :  { %v6014_v45 = vpop.eup %6013 }
 0x6e8   :  { %v6016_v48 = vpop.eup %6015  ;;  %v3670_v57 = vmul.f32 0.5, %v6014_v45 }
 0x6e9   :  { %v6018_v61 = vpop.eup %6017 }
 0x6ea   :  { %v3671_v12 = vmul.f32 0.5, %v6018_v61  ;;  %v3672_v31 = vadd.f32 0.5, %v3670_v57 }
 0x719   :  { %v3593_v21 = vpop.f32.mrb[60].mxu0 }
 0x71a   :  { %v3654_v2 = vadd.f32 %v3593_v21, %v11790_v26  ;;  %v3634_v5 = vpop.f32.mrb[60].mxu1  ;;  %v3595_v35 = vpop.f32.mrb[61].mxu0  ;;  %v3666_v21 = vmul.f32 0.5, %v6016_v48 }
 0x71b   :  { %v3656_v15 = vadd.f32 %v3634_v5, %v11791_v29  ;;  %v3655_v36 = vadd.f32 %v3595_v35, %v11792_v62  ;;  %v3636_v4 = vpop.f32.mrb[61].mxu1  ;;  %v3597_v13 = vpop.f32.mrb[62].mxu0  ;;  %v3673_v5 = vadd.f32 0.5, %v3671_v12 }
 0x71c   :  { %6021 = vtanh.f32 %v3654_v2  ;;  %v3657_v49 = vadd.f32 %v3636_v4, %v11793_v63  ;;  %v3638_v25 = vpop.f32.mrb[62].mxu1  ;;  %v3598_v44 = vpop.f32.mrb[63].mxu0  ;;  %v3668_v35 = vadd.f32 0.5, %v3666_v21  ;;  %v3678_v2 = vmul.f32 %v3672_v31, %v8772_v23 }
 0x71d   :  { %v3639_v59 = vpop.f32.mrb[63].mxu1  ;;  %6023 = vtanh.f32 %v3655_v36  ;;  %v6020_v26 = vpop.eup %6019  ;;  %v3679_v25 = vmul.f32 %v3673_v5, %v8775_v20 }
 0x71e   :  { %v3667_v29 = vmul.f32 0.5, %v6020_v26  ;;  %6025 = vtanh.f32 %v3656_v15 }
 0x71f   :  { %6027 = vtanh.f32 %v3657_v49 }
 0x720   :  { %v3669_v4 = vadd.f32 0.5, %v3667_v29 }
 0x726   :  { %v6022_v62 = vpop.eup %6021 }
 0x727   :  { %v3680_v13 = vmul.f32 %v6022_v62, %v3668_v35  ;;  %v6024_v63 = vpop.eup %6023 }
 0x728   :  { %v3681_v45 = vmul.f32 %v6024_v63, %v3669_v4  ;;  %v6026_v48 = vpop.eup %6025  ;;  %v11794_v4 = vld [vmem:[#allocation100_spill] sm:$0xff]  ;;  %v11796_v63 = vld [vmem:[#allocation102_spill] sm:$0xff] }
 0x729   :  { %v9066_v44 = vadd.f32 %v3680_v13, %v3678_v2  ;;  %v6028_v15 = vpop.eup %6027  ;;  %v3674_v49 = vmul.f32 0.5, %v6026_v48  ;;  %v11795_v13 = vld [vmem:[#allocation101_spill] sm:$0xff] }
 0x72a   :  { %v9069_v36 = vadd.f32 %v3681_v45, %v3679_v25  ;;  %v3675_v59 = vmul.f32 0.5, %v6028_v15  ;;  %v11797_v25 = vld [vmem:[#allocation103_spill] sm:$0xff]  ;;  %v11798_v45 = vld [vmem:[#allocation104_spill] sm:$0xff]  ;;  %v11799_v48 = vld [vmem:[#allocation105_spill] sm:$0xff] }
 0x72b   :  { %6029 = vtanh.f32 %v9066_v44  ;;  %v3676_v61 = vadd.f32 0.5, %v3674_v49  ;;  %v11800_v15 = vld [vmem:[#allocation106_spill] sm:$0xff]  ;;  %v11801_v49 = vld [vmem:[#allocation107_spill] sm:$0xff] }
 0x72c   :  { %6031 = vtanh.f32 %v9069_v36  ;;  %v3677_v57 = vadd.f32 0.5, %v3675_v59  ;;  %v11802_v59 = vld [vmem:[#allocation108_spill] sm:$0xff] }
 0x735   :  { %v6030_v23 = vpop.eup %6029 }
 0x736   :  { %v3686_v31 = vmul.f32 %v6030_v23, %v3676_v61  ;;  %v6032_v26 = vpop.eup %6031  ;;  %v11803_v61 = vld [vmem:[#allocation109_spill] sm:$0xff]  ;;  %v11804_v23 = vld [vmem:[#allocation110_spill] sm:$0xff] }
 0x737   :  { %v3687_v21 = vmul.f32 %v6032_v26, %v3677_v57  ;;  %v11806_v57 = vld [vmem:[#allocation112_spill] sm:$0xff]  ;;  %v11807_v26 = vld [vmem:[#allocation113_spill] sm:$0xff] }
 0x738   :  { %v5237_v20 = vmax.f32 %v3686_v31, 0.0  ;;  %v9075_v5 = vpack.c.bf16 %v3686_v31, %v3686_v31  ;;  %v11805_v31 = vld [vmem:[#allocation111_spill] sm:$0xff] }
 0x739   :  { %v9072_v12 = vpack.c.bf16 %v3687_v21, %v3687_v21  ;;  %v5238_v29 = vmax.f32 %v3687_v21, 0.0  ;;  %v11808_v21 = vld [vmem:[#allocation114_spill] sm:$0xff] }
 0x73a   :  { %v5265_v35 = vmul.f32 %v8184_v56, %v5237_v20  ;;  %v11809_v20 = vld [vmem:[#allocation115_spill] sm:$0xff] }
 0x73b   :  { %3725 = vmatprep.mubr.bf16.mxu0 %v9072_v12  ;;  %3766 = vmatprep.mubr.bf16.mxu1 %v9072_v12  ;;  %v5266_v62 = vmul.f32 %v8188_v24, %v5238_v29  ;;  %v11810_v29 = vld [vmem:[#allocation116_spill] sm:$0xff] }
 0x73c   :  { %3726 = vmatmul.mubr.bf16.vlgmr.msra.gmra.mrb[64].mxu0 %v9075_v5  ;;  %3767 = vmatmul.mubr.bf16.vlgmr.msra.gmra.mrb[64].mxu1 %v9075_v5 }
 0x73d   :  { %3776 = vmatpush1.bf16.msra.mxu0 %v11116_v55  ;;  %3817 = vmatpush1.bf16.msra.mxu1 %v11117_v17  ;;  %v5284_v2 = vadd.f32 %v5266_v62, %v5265_v35  ;;  %v11811_v35 = vld [vmem:[#allocation117_spill] sm:$0xff]  ;;  %v11812_v62 = vld [vmem:[#allocation118_spill] sm:$0xff] }
 0x73e   :  { %3807 = vmatprep.mubr.bf16.mxu0 %v9072_v12  ;;  %3848 = vmatprep.mubr.bf16.mxu1 %v9072_v12 }
 0x73f   :  { %5285 = vadd.xlane.f32.xlu1 %v5284_v2  ;;  %3777 = vmatprep.subr.bf16.mxu0 %v11118_v34  ;;  %v11813_v2 = vld [vmem:[#allocation119_spill] sm:$0xff] }
 0x740   :  { %3818 = vmatprep.subr.bf16.mxu1 %v11119_v33 }
 0x741   :  { %3778 = vmatpush1.bf16.msra.mxu0 %v11120_v41  ;;  %3819 = vmatpush1.bf16.msra.mxu1 %v11121_v14 }
 0x742   :  { %3779 = vmatprep.subr.bf16.mxu0 %v11122_v22  ;;  %3820 = vmatprep.subr.bf16.mxu1 %v11123_v40 }
 0x745   :  { %3780 = vmatpush1.bf16.msra.mxu0 %v11124_v9  ;;  %3821 = vmatpush1.bf16.msra.mxu1 %v11342_v52 }
 0x746   :  { %3781 = vmatprep.subr.bf16.mxu0 %v11343_v43  ;;  %3822 = vmatprep.subr.bf16.mxu1 %v11344_v53 }
 0x749   :  { %3782 = vmatpush1.bf16.msra.mxu0 %v11345_v54  ;;  %3823 = vmatpush1.bf16.msra.mxu1 %v11346_v30 }
 0x74a   :  { %3783 = vmatprep.subr.bf16.mxu0 %v11347_v51  ;;  %3824 = vmatprep.subr.bf16.mxu1 %v11348_v6 }
 0x74d   :  { %3784 = vmatpush1.bf16.msra.mxu0 %v11349_v37  ;;  %3825 = vmatpush1.bf16.msra.mxu1 %v11350_v38 }
 0x74e   :  { %3785 = vmatprep.subr.bf16.mxu0 %v11568_v19  ;;  %3826 = vmatprep.subr.bf16.mxu1 %v11569_v58 }
 0x751   :  { %3786 = vmatpush1.bf16.msra.mxu0 %v11570_v1  ;;  %3827 = vmatpush1.bf16.msra.mxu1 %v11571_v11 }
 0x752   :  { %3787 = vmatprep.subr.bf16.mxu0 %v11572_v7  ;;  %3828 = vmatprep.subr.bf16.mxu1 %v11573_v50 }
 0x755   :  { %3788 = vmatpush1.bf16.msra.mxu0 %v11574_v27  ;;  %3829 = vmatpush1.bf16.msra.mxu1 %v11575_v18 }
 0x756   :  { %3789 = vmatprep.subr.bf16.mxu0 %v11576_v32  ;;  %3830 = vmatprep.subr.bf16.mxu1 %v11794_v4 }
 0x759   :  { %3790 = vmatpush1.bf16.msra.mxu0 %v11795_v13  ;;  %3831 = vmatpush1.bf16.msra.mxu1 %v11796_v63 }
 0x75a   :  { %3791 = vmatprep.subr.bf16.mxu0 %v11797_v25  ;;  %3832 = vmatprep.subr.bf16.mxu1 %v11798_v45 }
 0x75d   :  { %3792 = vmatpush1.bf16.msra.mxu0 %v11799_v48  ;;  %3833 = vmatpush1.bf16.msra.mxu1 %v11800_v15 }
 0x75e   :  { %3793 = vmatprep.subr.bf16.mxu0 %v11801_v49  ;;  %3834 = vmatprep.subr.bf16.mxu1 %v11802_v59 }
 0x761   :  { %3794 = vmatpush1.bf16.msra.mxu0 %v11803_v61  ;;  %3835 = vmatpush1.bf16.msra.mxu1 %v11804_v23  ;;  %v11814_v61 = vld [vmem:[#allocation120_spill] sm:$0xff]  ;;  %v11815_v23 = vld [vmem:[#allocation121_spill] sm:$0xff] }
 0x762   :  { %3795 = vmatprep.subr.bf16.mxu0 %v11805_v31  ;;  %3836 = vmatprep.subr.bf16.mxu1 %v11806_v57  ;;  %v11816_v31 = vld [vmem:[#allocation122_spill] sm:$0xff]  ;;  %v11817_v57 = vld [vmem:[#allocation123_spill] sm:$0xff] }
 0x765   :  { %3796 = vmatpush1.bf16.msra.mxu0 %v11807_v26  ;;  %3837 = vmatpush1.bf16.msra.mxu1 %v11808_v21  ;;  %v11818_v26 = vld [vmem:[#allocation124_spill] sm:$0xff]  ;;  %v11819_v21 = vld [vmem:[#allocation125_spill] sm:$0xff] }
 0x766   :  { %3797 = vmatprep.subr.bf16.mxu0 %v11809_v20  ;;  %3838 = vmatprep.subr.bf16.mxu1 %v11810_v29  ;;  %v11820_v20 = vld [vmem:[#allocation126_spill] sm:$0xff]  ;;  %v11821_v29 = vld [vmem:[#allocation127_spill] sm:$0xff] }
 0x769   :  { %3798 = vmatpush1.bf16.msra.mxu0 %v11811_v35  ;;  %3839 = vmatpush1.bf16.msra.mxu1 %v11812_v62  ;;  %v11822_v35 = vld [vmem:[#allocation128_spill] sm:$0xff]  ;;  %v11823_v62 = vld [vmem:[#allocation129_spill] sm:$0xff] }
 0x76a   :  { %3799 = vmatprep.subr.bf16.mxu0 %v11813_v2  ;;  %3840 = vmatprep.subr.bf16.mxu1 %v11814_v61  ;;  %v11824_v2 = vld [vmem:[#allocation130_spill] sm:$0xff]  ;;  %v11825_v61 = vld [vmem:[#allocation131_spill] sm:$0xff] }
 0x76d   :  { %3800 = vmatpush1.bf16.msra.mxu0 %v11815_v23  ;;  %3841 = vmatpush1.bf16.msra.mxu1 %v11816_v31  ;;  %v11826_v23 = vld [vmem:[#allocation132_spill] sm:$0xff]  ;;  %v11827_v31 = vld [vmem:[#allocation133_spill] sm:$0xff] }
 0x76e   :  { %3801 = vmatprep.subr.bf16.mxu0 %v11817_v57  ;;  %3842 = vmatprep.subr.bf16.mxu1 %v11818_v26  ;;  %v11828_v57 = vld [vmem:[#allocation134_spill] sm:$0xff]  ;;  %v11829_v26 = vld [vmem:[#allocation135_spill] sm:$0xff] }
 0x771   :  { %3802 = vmatpush1.bf16.msra.mxu0 %v11819_v21  ;;  %3843 = vmatpush1.bf16.msra.mxu1 %v11820_v20  ;;  %v11830_v21 = vld [vmem:[#allocation136_spill] sm:$0xff]  ;;  %v11843_v20 = vld [vmem:[#allocation149_spill] sm:$0xff] }
 0x772   :  { %3803 = vmatprep.subr.bf16.mxu0 %v11821_v29  ;;  %3844 = vmatprep.subr.bf16.mxu1 %v11822_v35  ;;  %v11831_v35 = vld [vmem:[#allocation137_spill] sm:$0xff]  ;;  %v11841_v29 = vld [vmem:[#allocation147_spill] sm:$0xff] }
 0x775   :  { %3804 = vmatpush1.bf16.msra.mxu0 %v11823_v62  ;;  %3845 = vmatpush1.bf16.msra.mxu1 %v11824_v2  ;;  %v11832_v2 = vld [vmem:[#allocation138_spill] sm:$0xff]  ;;  %v11839_v62 = vld [vmem:[#allocation145_spill] sm:$0xff] }
 0x776   :  { %3805 = vmatprep.subr.bf16.mxu0 %v11825_v61  ;;  %3846 = vmatprep.subr.bf16.mxu1 %v11826_v23  ;;  %v11833_v23 = vld [vmem:[#allocation139_spill] sm:$0xff]  ;;  %v11838_v61 = vld [vmem:[#allocation144_spill] sm:$0xff] }
 0x779   :  { %3806 = vmatpush1.bf16.msra.mxu0 %v11827_v31  ;;  %3847 = vmatpush1.bf16.msra.mxu1 %v11828_v57  ;;  %v11834_v31 = vld [vmem:[#allocation140_spill] sm:$0xff]  ;;  %v11835_v57 = vld [vmem:[#allocation141_spill] sm:$0xff] }
 0x77a   :  { %3857 = vmatprep.subr.bf16.mxu0 %v11829_v26  ;;  %3898 = vmatprep.subr.bf16.mxu1 %v11830_v21  ;;  %v11836_v26 = vld [vmem:[#allocation142_spill] sm:$0xff]  ;;  %v11837_v21 = vld [vmem:[#allocation143_spill] sm:$0xff] }
 0x77c   :  { %3808 = vmatmul.mubr.bf16.vlgmr.msra.gmra.mrb[68].mxu0 %v9075_v5  ;;  %3849 = vmatmul.mubr.bf16.vlgmr.msra.gmra.mrb[68].mxu1 %v9075_v5 }
 0x77d   :  { %3858 = vmatpush1.bf16.msra.mxu0 %v11831_v35  ;;  %3889 = vmatprep.mubr.bf16.mxu0 %v9072_v12  ;;  %v11840_v35 = vld [vmem:[#allocation146_spill] sm:$0xff] }
 0x77e   :  { %3899 = vmatpush1.bf16.msra.mxu1 %v11832_v2  ;;  %3930 = vmatprep.mubr.bf16.mxu1 %v9072_v12  ;;  %v11842_v2 = vld [vmem:[#allocation148_spill] sm:$0xff] }
 0x77f   :  { %3859 = vmatprep.subr.bf16.mxu0 %v11833_v23  ;;  %3900 = vmatprep.subr.bf16.mxu1 %v11834_v31  ;;  %v11844_v23 = vld [vmem:[#allocation150_spill] sm:$0xff]  ;;  %v11845_v31 = vld [vmem:[#allocation151_spill] sm:$0xff] }
 0x781   :  { %3860 = vmatpush1.bf16.msra.mxu0 %v11835_v57  ;;  %v11846_v57 = vld [vmem:[#allocation152_spill] sm:$0xff] }
 0x782   :  { %3901 = vmatpush1.bf16.msra.mxu1 %v11836_v26  ;;  %3861 = vmatprep.subr.bf16.mxu0 %v11837_v21  ;;  %v11847_v26 = vld [vmem:[#allocation153_spill] sm:$0xff]  ;;  %v11848_v21 = vld [vmem:[#allocation154_spill] sm:$0xff] }
 0x783   :  { %3902 = vmatprep.subr.bf16.mxu1 %v11838_v61  ;;  %v11849_v61 = vld [vmem:[#allocation155_spill] sm:$0xff] }
 0x785   :  { %3862 = vmatpush1.bf16.msra.mxu0 %v11839_v62  ;;  %v11850_v62 = vld [vmem:[#allocation156_spill] sm:$0xff] }
 0x786   :  { %3903 = vmatpush1.bf16.msra.mxu1 %v11840_v35  ;;  %3863 = vmatprep.subr.bf16.mxu0 %v11841_v29  ;;  %v11851_v35 = vld [vmem:[#allocation157_spill] sm:$0xff]  ;;  %v11852_v29 = vld [vmem:[#allocation158_spill] sm:$0xff] }
 0x787   :  { %3904 = vmatprep.subr.bf16.mxu1 %v11842_v2  ;;  %v11853_v2 = vld [vmem:[#allocation159_spill] sm:$0xff] }
 0x789   :  { %3864 = vmatpush1.bf16.msra.mxu0 %v11843_v20  ;;  %v11854_v20 = vld [vmem:[#allocation160_spill] sm:$0xff] }
 0x78a   :  { %3905 = vmatpush1.bf16.msra.mxu1 %v11844_v23  ;;  %3865 = vmatprep.subr.bf16.mxu0 %v11845_v31  ;;  %v11855_v23 = vld [vmem:[#allocation161_spill] sm:$0xff]  ;;  %v11856_v31 = vld [vmem:[#allocation162_spill] sm:$0xff] }
 0x78b   :  { %3906 = vmatprep.subr.bf16.mxu1 %v11846_v57  ;;  %v11857_v57 = vld [vmem:[#allocation163_spill] sm:$0xff] }
 0x78d   :  { %3866 = vmatpush1.bf16.msra.mxu0 %v11847_v26  ;;  %v11858_v26 = vld [vmem:[#allocation164_spill] sm:$0xff] }
 0x78e   :  { %3907 = vmatpush1.bf16.msra.mxu1 %v11848_v21  ;;  %3867 = vmatprep.subr.bf16.mxu0 %v11849_v61  ;;  %v11859_v21 = vld [vmem:[#allocation165_spill] sm:$0xff]  ;;  %v11860_v61 = vld [vmem:[#allocation166_spill] sm:$0xff] }
 0x78f   :  { %3908 = vmatprep.subr.bf16.mxu1 %v11850_v62  ;;  %v11861_v62 = vld [vmem:[#allocation167_spill] sm:$0xff] }
 0x791   :  { %3868 = vmatpush1.bf16.msra.mxu0 %v11851_v35 }
 0x792   :  { %3909 = vmatpush1.bf16.msra.mxu1 %v11852_v29  ;;  %3869 = vmatprep.subr.bf16.mxu0 %v11853_v2  ;;  %v11862_v29 = vld [vmem:[#allocation169_spill] sm:$0xff]  ;;  %v11863_v2 = vld [vmem:[#allocation170_spill] sm:$0xff] }
 0x793   :  { %3910 = vmatprep.subr.bf16.mxu1 %v11854_v20  ;;  %v11864_v20 = vld [vmem:[#allocation171_spill] sm:$0xff] }
 0x795   :  { %3870 = vmatpush1.bf16.msra.mxu0 %v11855_v23  ;;  %v11865_v23 = vld [vmem:[#allocation172_spill] sm:$0xff] }
 0x796   :  { %3911 = vmatpush1.bf16.msra.mxu1 %v11856_v31  ;;  %3871 = vmatprep.subr.bf16.mxu0 %v11857_v57  ;;  %v11866_v31 = vld [vmem:[#allocation173_spill] sm:$0xff]  ;;  %v11867_v57 = vld [vmem:[#allocation174_spill] sm:$0xff] }
 0x797   :  { %3912 = vmatprep.subr.bf16.mxu1 %v11858_v26  ;;  %v11868_v26 = vld [vmem:[#allocation175_spill] sm:$0xff] }
 0x799   :  { %3872 = vmatpush1.bf16.msra.mxu0 %v11859_v21  ;;  %v11869_v21 = vld [vmem:[#allocation176_spill] sm:$0xff] }
 0x79a   :  { %3913 = vmatpush1.bf16.msra.mxu1 %v11860_v61  ;;  %3873 = vmatprep.subr.bf16.mxu0 %v11861_v62  ;;  %v11870_v61 = vld [vmem:[#allocation177_spill] sm:$0xff]  ;;  %v11871_v62 = vld [vmem:[#allocation178_spill] sm:$0xff] }
 0x79b   :  { %3914 = vmatprep.subr.bf16.mxu1 %v11645_v46 }
 0x79d   :  { %3874 = vmatpush1.bf16.msra.mxu0 %v11862_v29  ;;  %v11872_v29 = vld [vmem:[#allocation180_spill] sm:$0xff] }
 0x79e   :  { %3915 = vmatpush1.bf16.msra.mxu1 %v11863_v2  ;;  %3875 = vmatprep.subr.bf16.mxu0 %v11864_v20  ;;  %v11873_v2 = vld [vmem:[#allocation181_spill] sm:$0xff]  ;;  %v11874_v20 = vld [vmem:[#allocation182_spill] sm:$0xff] }
 0x79f   :  { %3916 = vmatprep.subr.bf16.mxu1 %v11865_v23  ;;  %v11875_v23 = vld [vmem:[#allocation183_spill] sm:$0xff] }
 0x7a1   :  { %3876 = vmatpush1.bf16.msra.mxu0 %v11866_v31  ;;  %v11876_v31 = vld [vmem:[#allocation184_spill] sm:$0xff] }
 0x7a2   :  { %3917 = vmatpush1.bf16.msra.mxu1 %v11867_v57  ;;  %3877 = vmatprep.subr.bf16.mxu0 %v11868_v26  ;;  %v11877_v57 = vld [vmem:[#allocation185_spill] sm:$0xff]  ;;  %v11878_v26 = vld [vmem:[#allocation186_spill] sm:$0xff] }
 0x7a3   :  { %3918 = vmatprep.subr.bf16.mxu1 %v11869_v21  ;;  %v11879_v21 = vld [vmem:[#allocation188_spill] sm:$0xff] }
 0x7a5   :  { %3878 = vmatpush1.bf16.msra.mxu0 %v11870_v61  ;;  %v11880_v61 = vld [vmem:[#allocation189_spill] sm:$0xff] }
 0x7a6   :  { %3919 = vmatpush1.bf16.msra.mxu1 %v11871_v62  ;;  %3879 = vmatprep.subr.bf16.mxu0 %v11439_v60  ;;  %v11881_v62 = vld [vmem:[#allocation190_spill] sm:$0xff] }
 0x7a7   :  { %3920 = vmatprep.subr.bf16.mxu1 %v11872_v29  ;;  %v11882_v29 = vld [vmem:[#allocation192_spill] sm:$0xff] }
 0x7a9   :  { %3880 = vmatpush1.bf16.msra.mxu0 %v11873_v2  ;;  %v11883_v2 = vld [vmem:[#allocation193_spill] sm:$0xff] }
 0x7aa   :  { %3921 = vmatpush1.bf16.msra.mxu1 %v11874_v20  ;;  %3881 = vmatprep.subr.bf16.mxu0 %v11875_v23  ;;  %v11884_v20 = vld [vmem:[#allocation198_spill] sm:$0xff]  ;;  %v11885_v23 = vld [vmem:[#allocation199_spill] sm:$0xff] }
 0x7ab   :  { %3922 = vmatprep.subr.bf16.mxu1 %v11876_v31  ;;  %v11886_v31 = vld [vmem:[#allocation200_spill] sm:$0xff] }
 0x7ad   :  { %3882 = vmatpush1.bf16.msra.mxu0 %v11877_v57  ;;  %v11887_v57 = vld [vmem:[#allocation201_spill] sm:$0xff] }
 0x7ae   :  { %3923 = vmatpush1.bf16.msra.mxu1 %v11878_v26  ;;  %3883 = vmatprep.subr.bf16.mxu0 %v11879_v21  ;;  %v11888_v26 = vld [vmem:[#allocation204_spill] sm:$0xff]  ;;  %v11889_v21 = vld [vmem:[#allocation207_spill] sm:$0xff] }
 0x7af   :  { %3924 = vmatprep.subr.bf16.mxu1 %v11880_v61  ;;  %v11890_v61 = vld [vmem:[#allocation209_spill] sm:$0xff] }
 0x7b1   :  { %3884 = vmatpush1.bf16.msra.mxu0 %v11881_v62  ;;  %v11891_v62 = vld [vmem:[#allocation210_spill] sm:$0xff] }
 0x7b2   :  { %3925 = vmatpush1.bf16.msra.mxu1 %v11233_v42  ;;  %3885 = vmatprep.subr.bf16.mxu0 %v11882_v29  ;;  %v11902_v29 = vld [vmem:[#allocation233_spill] sm:$0xff] }
 0x7b3   :  { %3926 = vmatprep.subr.bf16.mxu1 %v11883_v2  ;;  %v11892_v2 = vld [vmem:[#allocation212_spill] sm:$0xff] }
 0x7b5   :  { %3886 = vmatpush1.bf16.msra.mxu0 %v11884_v20  ;;  %v11900_v20 = vld [vmem:[#allocation228_spill] sm:$0xff] }
 0x7b6   :  { %3927 = vmatpush1.bf16.msra.mxu1 %v11885_v23  ;;  %3887 = vmatprep.subr.bf16.mxu0 %v11886_v31  ;;  %v11893_v23 = vld [vmem:[#allocation215_spill] sm:$0xff]  ;;  %v11899_v31 = vld [vmem:[#allocation226_spill] sm:$0xff] }
 0x7b7   :  { %3928 = vmatprep.subr.bf16.mxu1 %v11887_v57  ;;  %v11894_v57 = vld [vmem:[#allocation217_spill] sm:$0xff] }
 0x7b9   :  { %3888 = vmatpush1.bf16.msra.mxu0 %v11888_v26  ;;  %v11895_v26 = vld [vmem:[#allocation218_spill] sm:$0xff] }
 0x7ba   :  { %3929 = vmatpush1.bf16.msra.mxu1 %v11889_v21  ;;  %3939 = vmatprep.subr.bf16.mxu0 %v11890_v61  ;;  %v11896_v21 = vld [vmem:[#allocation220_spill] sm:$0xff]  ;;  %v11897_v61 = vld [vmem:[#allocation223_spill] sm:$0xff] }
 0x7bb   :  { %3980 = vmatprep.subr.bf16.mxu1 %v11891_v62  ;;  %v11898_v62 = vld [vmem:[#allocation225_spill] sm:$0xff] }
 0x7bc   :  { %3890 = vmatmul.mubr.bf16.vlgmr.msra.gmra.mrb[64].mxu0 %v9075_v5 }
 0x7bd   :  { %3931 = vmatmul.mubr.bf16.vlgmr.msra.gmra.mrb[64].mxu1 %v9075_v5  ;;  %3940 = vmatpush1.bf16.msra.mxu0 %v11892_v2  ;;  %v11901_v2 = vld [vmem:[#allocation231_spill] sm:$0xff] }
 0x7be   :  { %3971 = vmatprep.mubr.bf16.mxu0 %v9072_v12  ;;  %3981 = vmatpush1.bf16.msra.mxu1 %v11893_v23  ;;  %v11903_v23 = vld [vmem:[#allocation234_spill] sm:$0xff] }
 0x7bf   :  { %4012 = vmatprep.mubr.bf16.mxu1 %v9072_v12  ;;  %3941 = vmatprep.subr.bf16.mxu0 %v11894_v57  ;;  %v11904_v12 = vld [vmem:[#allocation236_spill] sm:$0xff]  ;;  %v11905_v57 = vld [vmem:[#allocation239_spill] sm:$0xff] }
 0x7c0   :  { %3982 = vmatprep.subr.bf16.mxu1 %v11895_v26  ;;  %v11906_v26 = vld [vmem:[#allocation241_spill] sm:$0xff] }
 0x7c1   :  { %3942 = vmatpush1.bf16.msra.mxu0 %v11896_v21  ;;  %v12017_v21 = vld [vmem:[#allocation293_spill] sm:$0xff] }
 0x7c2   :  { %3983 = vmatpush1.bf16.msra.mxu1 %v11897_v61  ;;  %3943 = vmatprep.subr.bf16.mxu0 %v11898_v62 }
 0x7c3   :  { %3984 = vmatprep.subr.bf16.mxu1 %v11899_v31 }
 0x7c5   :  { %3944 = vmatpush1.bf16.msra.mxu0 %v11900_v20  ;;  %v11907_v20 = vld [vmem:[#allocation250_spill] sm:$0xff] }
 0x7c6   :  { %3985 = vmatpush1.bf16.msra.mxu1 %v11901_v2  ;;  %3945 = vmatprep.subr.bf16.mxu0 %v11902_v29 }
 0x7c7   :  { %3986 = vmatprep.subr.bf16.mxu1 %v11903_v23 }
 0x7c9   :  { %3946 = vmatpush1.bf16.msra.mxu0 %v11904_v12 }
 0x7ca   :  { %3987 = vmatpush1.bf16.msra.mxu1 %v11905_v57  ;;  %3947 = vmatprep.subr.bf16.mxu0 %v11906_v26  ;;  %v11908_v57 = vld [vmem:[#allocation263_spill] sm:$0xff]  ;;  %v11909_v26 = vld [vmem:[#allocation264_spill] sm:$0xff] }
 0x7cb   :  { %3988 = vmatprep.subr.bf16.mxu1 %v11691_v47  ;;  %v11910_v47 = vld [vmem:[#allocation265_spill] sm:$0xff] }
 0x7cd   :  { %3948 = vmatpush1.bf16.msra.mxu0 %v11692_v28  ;;  %v11911_v28 = vld [vmem:[#allocation266_spill] sm:$0xff] }
 0x7ce   :  { %3989 = vmatpush1.bf16.msra.mxu1 %v11693_v0  ;;  %3949 = vmatprep.subr.bf16.mxu0 %v11694_v8  ;;  %v11912_v0 = vld [vmem:[#allocation267_spill] sm:$0xff]  ;;  %v11913_v8 = vld [vmem:[#allocation270_spill] sm:$0xff] }
 0x7cf   :  { %3990 = vmatprep.subr.bf16.mxu1 %v11907_v20  ;;  %v11914_v20 = vld [vmem:[#allocation273_spill] sm:$0xff] }
 0x7d1   :  { %3950 = vmatpush1.bf16.msra.mxu0 %v11696_v10  ;;  %v11915_v10 = vld [vmem:[#allocation274_spill] sm:$0xff] }
 0x7d2   :  { %3991 = vmatpush1.bf16.msra.mxu1 %v11697_v16  ;;  %3951 = vmatprep.subr.bf16.mxu0 %v11698_v3  ;;  %v11916_v16 = vld [vmem:[#allocation275_spill] sm:$0xff]  ;;  %v11917_v3 = vld [vmem:[#allocation278_spill] sm:$0xff] }
 0x7d3   :  { %3992 = vmatprep.subr.bf16.mxu1 %v11699_v39  ;;  %v11918_v39 = vld [vmem:[#allocation281_spill] sm:$0xff] }
 0x7d5   :  { %3952 = vmatpush1.bf16.msra.mxu0 %v11908_v57  ;;  %v11919_v57 = vld [vmem:[#allocation282_spill] sm:$0xff] }
 0x7d6   :  { %3993 = vmatpush1.bf16.msra.mxu1 %v11909_v26  ;;  %3953 = vmatprep.subr.bf16.mxu0 %v11910_v47  ;;  %v11920_v26 = vld [vmem:[#allocation283_spill] sm:$0xff]  ;;  %v11921_v47 = vld [vmem:[#allocation286_spill] sm:$0xff] }
 0x7d7   :  { %3994 = vmatprep.subr.bf16.mxu1 %v11911_v28  ;;  %v11922_v28 = vld [vmem:[#allocation289_spill] sm:$0xff] }
 0x7d9   :  { %3954 = vmatpush1.bf16.msra.mxu0 %v11912_v0  ;;  %v11923_v0 = vld [vmem:[#allocation290_spill] sm:$0xff] }
 0x7da   :  { %3995 = vmatpush1.bf16.msra.mxu1 %v11913_v8  ;;  %3955 = vmatprep.subr.bf16.mxu0 %v11914_v20  ;;  %v11924_v8 = vld [vmem:[#allocation291_spill] sm:$0xff]  ;;  %v11925_v20 = vld [vmem:[#allocation294_spill] sm:$0xff] }
 0x7db   :  { %3996 = vmatprep.subr.bf16.mxu1 %v11915_v10  ;;  %v11926_v10 = vld [vmem:[#allocation297_spill] sm:$0xff] }
 0x7dd   :  { %3956 = vmatpush1.bf16.msra.mxu0 %v11916_v16  ;;  %v11927_v16 = vld [vmem:[#allocation298_spill] sm:$0xff] }
 0x7de   :  { %3997 = vmatpush1.bf16.msra.mxu1 %v11917_v3  ;;  %3957 = vmatprep.subr.bf16.mxu0 %v11918_v39  ;;  %v11928_v3 = vld [vmem:[#allocation299_spill] sm:$0xff]  ;;  %v11929_v39 = vld [vmem:[#allocation302_spill] sm:$0xff] }
 0x7df   :  { %3998 = vmatprep.subr.bf16.mxu1 %v11919_v57  ;;  %v11930_v57 = vld [vmem:[#allocation305_spill] sm:$0xff] }
 0x7e1   :  { %3958 = vmatpush1.bf16.msra.mxu0 %v11920_v26  ;;  %v11931_v26 = vld [vmem:[#allocation306_spill] sm:$0xff] }
 0x7e2   :  { %3999 = vmatpush1.bf16.msra.mxu1 %v11921_v47  ;;  %3959 = vmatprep.subr.bf16.mxu0 %v11922_v28  ;;  %v11932_v47 = vld [vmem:[#allocation307_spill] sm:$0xff]  ;;  %v11933_v28 = vld [vmem:[#allocation310_spill] sm:$0xff] }
 0x7e3   :  { %4000 = vmatprep.subr.bf16.mxu1 %v11923_v0  ;;  %v11934_v0 = vld [vmem:[#allocation313_spill] sm:$0xff] }
 0x7e5   :  { %3960 = vmatpush1.bf16.msra.mxu0 %v11924_v8  ;;  %v11935_v8 = vld [vmem:[#allocation314_spill] sm:$0xff] }
 0x7e6   :  { %4001 = vmatpush1.bf16.msra.mxu1 %v11925_v20  ;;  %3961 = vmatprep.subr.bf16.mxu0 %v11926_v10  ;;  %v11936_v20 = vld [vmem:[#allocation315_spill] sm:$0xff]  ;;  %v11937_v10 = vld [vmem:[#allocation318_spill] sm:$0xff] }
 0x7e7   :  { %4002 = vmatprep.subr.bf16.mxu1 %v11927_v16  ;;  %v11938_v16 = vld [vmem:[#allocation321_spill] sm:$0xff] }
 0x7e9   :  { %3962 = vmatpush1.bf16.msra.mxu0 %v11928_v3  ;;  %v11939_v3 = vld [vmem:[#allocation322_spill] sm:$0xff] }
 0x7ea   :  { %4003 = vmatpush1.bf16.msra.mxu1 %v11929_v39  ;;  %3963 = vmatprep.subr.bf16.mxu0 %v11930_v57  ;;  %v11940_v39 = vld [vmem:[#allocation323_spill] sm:$0xff]  ;;  %v11941_v57 = vld [vmem:[#allocation324_spill] sm:$0xff] }
 0x7eb   :  { %4004 = vmatprep.subr.bf16.mxu1 %v11931_v26  ;;  %v11942_v26 = vld [vmem:[#allocation325_spill] sm:$0xff] }
 0x7ed   :  { %3964 = vmatpush1.bf16.msra.mxu0 %v11932_v47  ;;  %v11943_v47 = vld [vmem:[#allocation326_spill] sm:$0xff] }
 0x7ee   :  { %4005 = vmatpush1.bf16.msra.mxu1 %v11933_v28  ;;  %3965 = vmatprep.subr.bf16.mxu0 %v11934_v0  ;;  %v11944_v28 = vld [vmem:[#allocation327_spill] sm:$0xff]  ;;  %v11945_v0 = vld [vmem:[#allocation328_spill] sm:$0xff] }
 0x7ef   :  { %4006 = vmatprep.subr.bf16.mxu1 %v11935_v8  ;;  %v11946_v8 = vld [vmem:[#allocation7_spill] sm:$0xff] }
 0x7f1   :  { %3966 = vmatpush1.bf16.msra.mxu0 %v11936_v20  ;;  %v11947_v20 = vld [vmem:[#allocation8_spill] sm:$0xff] }
 0x7f2   :  { %4007 = vmatpush1.bf16.msra.mxu1 %v11937_v10  ;;  %3967 = vmatprep.subr.bf16.mxu0 %v11938_v16  ;;  %v11957_v16 = vld [vmem:[#allocation18_spill] sm:$0xff] }
 0x7f3   :  { %4008 = vmatprep.subr.bf16.mxu1 %v11939_v3  ;;  %v11948_v3 = vld [vmem:[#allocation9_spill] sm:$0xff] }
 0x7f5   :  { %3968 = vmatpush1.bf16.msra.mxu0 %v11940_v39  ;;  %v11949_v39 = vld [vmem:[#allocation10_spill] sm:$0xff] }
 0x7f6   :  { %4009 = vmatpush1.bf16.msra.mxu1 %v11941_v57  ;;  %3969 = vmatprep.subr.bf16.mxu0 %v11942_v26  ;;  %v11950_v57 = vld [vmem:[#allocation11_spill] sm:$0xff]  ;;  %v11951_v26 = vld [vmem:[#allocation12_spill] sm:$0xff] }
 0x7f7   :  { %4010 = vmatprep.subr.bf16.mxu1 %v11943_v47  ;;  %v11952_v47 = vld [vmem:[#allocation13_spill] sm:$0xff] }
 0x7f9   :  { %3970 = vmatpush1.bf16.msra.mxu0 %v11944_v28  ;;  %v11953_v28 = vld [vmem:[#allocation14_spill] sm:$0xff] }
 0x7fa   :  { %4011 = vmatpush1.bf16.msra.mxu1 %v11945_v0  ;;  %4073 = vmatprep.subr.bf16.mxu0 %v11946_v8  ;;  %v11954_v0 = vld [vmem:[#allocation15_spill] sm:$0xff]  ;;  %v11955_v8 = vld [vmem:[#allocation16_spill] sm:$0xff] }
 0x7fb   :  { %4114 = vmatprep.subr.bf16.mxu1 %v11947_v20  ;;  %v11956_v20 = vld [vmem:[#allocation17_spill] sm:$0xff] }
 0x7fc   :  { %3972 = vmatmul.mubr.bf16.vlgmr.msra.gmra.mrb[68].mxu0 %v9075_v5 }
 0x7fd   :  { %4013 = vmatmul.mubr.bf16.vlgmr.msra.gmra.mrb[68].mxu1 %v9075_v5  ;;  %4074 = vmatpush1.bf16.msra.mxu0 %v11948_v3  ;;  %v11958_v5 = vld [vmem:[#allocation19_spill] sm:$0xff]  ;;  %v11959_v3 = vld [vmem:[#allocation20_spill] sm:$0xff] }
 0x7fe   :  { %4115 = vmatpush1.bf16.msra.mxu1 %v11949_v39  ;;  %4075 = vmatprep.subr.bf16.mxu0 %v11950_v57  ;;  %v11960_v39 = vld [vmem:[#allocation21_spill] sm:$0xff]  ;;  %v11961_v57 = vld [vmem:[#allocation22_spill] sm:$0xff] }
 0x7ff   :  { %4116 = vmatprep.subr.bf16.mxu1 %v11951_v26  ;;  %v11962_v26 = vld [vmem:[#allocation23_spill] sm:$0xff] }
 0x801   :  { %4076 = vmatpush1.bf16.msra.mxu0 %v11952_v47  ;;  %v11963_v47 = vld [vmem:[#allocation24_spill] sm:$0xff] }
 0x802   :  { %4117 = vmatpush1.bf16.msra.mxu1 %v11953_v28  ;;  %4077 = vmatprep.subr.bf16.mxu0 %v11954_v0  ;;  %v11964_v28 = vld [vmem:[#allocation25_spill] sm:$0xff]  ;;  %v11965_v0 = vld [vmem:[#allocation26_spill] sm:$0xff] }
 0x803   :  { %4118 = vmatprep.subr.bf16.mxu1 %v11955_v8  ;;  %v11966_v8 = vld [vmem:[#allocation27_spill] sm:$0xff] }
 0x805   :  { %4078 = vmatpush1.bf16.msra.mxu0 %v11956_v20  ;;  %v11967_v20 = vld [vmem:[#allocation28_spill] sm:$0xff] }
 0x806   :  { %4119 = vmatpush1.bf16.msra.mxu1 %v11957_v16  ;;  %4079 = vmatprep.subr.bf16.mxu0 %v11958_v5  ;;  %v11968_v16 = vld [vmem:[#allocation29_spill] sm:$0xff]  ;;  %v11969_v5 = vld [vmem:[#allocation30_spill] sm:$0xff] }
 0x807   :  { %4120 = vmatprep.subr.bf16.mxu1 %v11959_v3  ;;  %v11970_v3 = vld [vmem:[#allocation31_spill] sm:$0xff] }
 0x809   :  { %4080 = vmatpush1.bf16.msra.mxu0 %v11960_v39  ;;  %v11971_v39 = vld [vmem:[#allocation32_spill] sm:$0xff] }
 0x80a   :  { %4121 = vmatpush1.bf16.msra.mxu1 %v11961_v57  ;;  %4081 = vmatprep.subr.bf16.mxu0 %v11962_v26  ;;  %v11972_v57 = vld [vmem:[#allocation33_spill] sm:$0xff]  ;;  %v11973_v26 = vld [vmem:[#allocation34_spill] sm:$0xff] }
 0x80b   :  { %4122 = vmatprep.subr.bf16.mxu1 %v11963_v47  ;;  %v11974_v47 = vld [vmem:[#allocation35_spill] sm:$0xff] }
 0x80d   :  { %4082 = vmatpush1.bf16.msra.mxu0 %v11964_v28  ;;  %v11975_v28 = vld [vmem:[#allocation36_spill] sm:$0xff] }
 0x80e   :  { %4123 = vmatpush1.bf16.msra.mxu1 %v11965_v0  ;;  %4083 = vmatprep.subr.bf16.mxu0 %v11966_v8  ;;  %v11976_v0 = vld [vmem:[#allocation37_spill] sm:$0xff]  ;;  %v11977_v8 = vld [vmem:[#allocation38_spill] sm:$0xff] }
 0x80f   :  { %4124 = vmatprep.subr.bf16.mxu1 %v11967_v20  ;;  %v11978_v20 = vld [vmem:[#allocation39_spill] sm:$0xff] }
 0x811   :  { %4084 = vmatpush1.bf16.msra.mxu0 %v11968_v16  ;;  %v11979_v16 = vld [vmem:[#allocation40_spill] sm:$0xff] }
 0x812   :  { %4125 = vmatpush1.bf16.msra.mxu1 %v11969_v5  ;;  %4085 = vmatprep.subr.bf16.mxu0 %v11970_v3  ;;  %v11980_v5 = vld [vmem:[#allocation41_spill] sm:$0xff]  ;;  %v11981_v3 = vld [vmem:[#allocation42_spill] sm:$0xff] }
 0x813   :  { %4126 = vmatprep.subr.bf16.mxu1 %v11971_v39  ;;  %v11982_v39 = vld [vmem:[#allocation43_spill] sm:$0xff] }
 0x815   :  { %4086 = vmatpush1.bf16.msra.mxu0 %v11972_v57  ;;  %v11983_v57 = vld [vmem:[#allocation44_spill] sm:$0xff] }
 0x816   :  { %4127 = vmatpush1.bf16.msra.mxu1 %v11973_v26  ;;  %4087 = vmatprep.subr.bf16.mxu0 %v11974_v47  ;;  %v11984_v26 = vld [vmem:[#allocation45_spill] sm:$0xff]  ;;  %v11985_v47 = vld [vmem:[#allocation46_spill] sm:$0xff] }
 0x817   :  { %4128 = vmatprep.subr.bf16.mxu1 %v11975_v28  ;;  %v11986_v28 = vld [vmem:[#allocation47_spill] sm:$0xff] }
 0x819   :  { %4088 = vmatpush1.bf16.msra.mxu0 %v11976_v0  ;;  %v11987_v0 = vld [vmem:[#allocation48_spill] sm:$0xff] }
 0x81a   :  { %4129 = vmatpush1.bf16.msra.mxu1 %v11977_v8  ;;  %4089 = vmatprep.subr.bf16.mxu0 %v11978_v20  ;;  %v11988_v8 = vld [vmem:[#allocation49_spill] sm:$0xff]  ;;  %v11989_v20 = vld [vmem:[#allocation50_spill] sm:$0xff] }
 0x81b   :  { %4130 = vmatprep.subr.bf16.mxu1 %v11979_v16  ;;  %v11990_v16 = vld [vmem:[#allocation51_spill] sm:$0xff] }
 0x81d   :  { %4090 = vmatpush1.bf16.msra.mxu0 %v11980_v5  ;;  %v11991_v5 = vld [vmem:[#allocation52_spill] sm:$0xff] }
 0x81e   :  { %4131 = vmatpush1.bf16.msra.mxu1 %v11981_v3  ;;  %4091 = vmatprep.subr.bf16.mxu0 %v11982_v39  ;;  %v11992_v3 = vld [vmem:[#allocation53_spill] sm:$0xff]  ;;  %v11993_v39 = vld [vmem:[#allocation54_spill] sm:$0xff] }
 0x81f   :  { %4132 = vmatprep.subr.bf16.mxu1 %v11983_v57  ;;  %v11994_v57 = vld [vmem:[#allocation55_spill] sm:$0xff] }
 0x821   :  { %4092 = vmatpush1.bf16.msra.mxu0 %v11984_v26  ;;  %v11995_v26 = vld [vmem:[#allocation56_spill] sm:$0xff] }
 0x822   :  { %4133 = vmatpush1.bf16.msra.mxu1 %v11985_v47  ;;  %4093 = vmatprep.subr.bf16.mxu0 %v11986_v28  ;;  %v11996_v47 = vld [vmem:[#allocation57_spill] sm:$0xff]  ;;  %v11997_v28 = vld [vmem:[#allocation58_spill] sm:$0xff] }
 0x823   :  { %4134 = vmatprep.subr.bf16.mxu1 %v11987_v0  ;;  %v11998_v0 = vld [vmem:[#allocation59_spill] sm:$0xff] }
 0x825   :  { %4094 = vmatpush1.bf16.msra.mxu0 %v11988_v8  ;;  %v11999_v8 = vld [vmem:[#allocation60_spill] sm:$0xff] }
 0x826   :  { %4135 = vmatpush1.bf16.msra.mxu1 %v11989_v20  ;;  %4095 = vmatprep.subr.bf16.mxu0 %v11990_v16  ;;  %v12000_v20 = vld [vmem:[#allocation61_spill] sm:$0xff]  ;;  %v12001_v16 = vld [vmem:[#allocation62_spill] sm:$0xff] }
 0x827   :  { %4136 = vmatprep.subr.bf16.mxu1 %v11991_v5  ;;  %v12002_v5 = vld [vmem:[#allocation63_spill] sm:$0xff] }
 0x829   :  { %4096 = vmatpush1.bf16.msra.mxu0 %v11992_v3  ;;  %v12003_v3 = vld [vmem:[#allocation64_spill] sm:$0xff] }
 0x82a   :  { %4137 = vmatpush1.bf16.msra.mxu1 %v11993_v39  ;;  %4097 = vmatprep.subr.bf16.mxu0 %v11994_v57  ;;  %v12004_v39 = vld [vmem:[#allocation65_spill] sm:$0xff]  ;;  %v12005_v57 = vld [vmem:[#allocation66_spill] sm:$0xff] }
 0x82b   :  { %4138 = vmatprep.subr.bf16.mxu1 %v11995_v26  ;;  %v12006_v26 = vld [vmem:[#allocation67_spill] sm:$0xff] }
 0x82d   :  { %4098 = vmatpush1.bf16.msra.mxu0 %v11996_v47  ;;  %v12007_v47 = vld [vmem:[#allocation68_spill] sm:$0xff] }
 0x82e   :  { %4139 = vmatpush1.bf16.msra.mxu1 %v11997_v28  ;;  %4099 = vmatprep.subr.bf16.mxu0 %v11998_v0  ;;  %v12008_v28 = vld [vmem:[#allocation69_spill] sm:$0xff]  ;;  %v12009_v0 = vld [vmem:[#allocation70_spill] sm:$0xff] }
 0x82f   :  { %4140 = vmatprep.subr.bf16.mxu1 %v11999_v8  ;;  %v12010_v8 = vld [vmem:[#allocation71_spill] sm:$0xff] }
 0x831   :  { %4100 = vmatpush1.bf16.msra.mxu0 %v12000_v20  ;;  %v12011_v20 = vld [vmem:[#allocation72_spill] sm:$0xff] }
 0x832   :  { %4141 = vmatpush1.bf16.msra.mxu1 %v12001_v16  ;;  %4101 = vmatprep.subr.bf16.mxu0 %v12002_v5  ;;  %v12012_v5 = vld [vmem:[#allocation227_spill] sm:$0xff] }
 0x833   :  { %4142 = vmatprep.subr.bf16.mxu1 %v12003_v3 }
 0x835   :  { %4102 = vmatpush1.bf16.msra.mxu0 %v12004_v39  ;;  %v12013_v39 = vld [vmem:[#allocation229_spill] sm:$0xff] }
 0x836   :  { %4143 = vmatpush1.bf16.msra.mxu1 %v12005_v57  ;;  %4103 = vmatprep.subr.bf16.mxu0 %v12006_v26  ;;  %v12014_v57 = vld [vmem:[#allocation230_spill] sm:$0xff] }
 0x837   :  { %4144 = vmatprep.subr.bf16.mxu1 %v12007_v47  ;;  %v12015_v47 = vld [vmem:[#allocation232_spill] sm:$0xff] }
 0x839   :  { %4104 = vmatpush1.bf16.msra.mxu0 %v12008_v28 }
 0x83a   :  { %4145 = vmatpush1.bf16.msra.mxu1 %v12009_v0  ;;  %4155 = vmatprep.subr.bf16.mxu0 %v12010_v8  ;;  %v12016_v8 = vld [vmem:[#allocation292_spill] sm:$0xff] }
 0x83b   :  { %4196 = vmatprep.subr.bf16.mxu1 %v12011_v20 }
 0x88f   :  { %v3891_v16 = vpop.f32.mrb[64].mxu0 }
 0x890   :  { %v4030_v10 = vadd.f32 %v3891_v16, %v12012_v5  ;;  %v3932_v3 = vpop.f32.mrb[64].mxu1  ;;  %v3893_v12 = vpop.f32.mrb[65].mxu0 }
 0x891   :  { %v4032_v23 = vadd.f32 %v3932_v3, %v12013_v39  ;;  %v4031_v29 = vadd.f32 %v3893_v12, %v12014_v57  ;;  %v3934_v26 = vpop.f32.mrb[65].mxu1  ;;  %v3895_v2 = vpop.f32.mrb[66].mxu0  ;;  %v12018_v39 = vld [vmem:[#allocation295_spill] sm:$0xff] }
 0x892   :  { %v4033_v31 = vadd.f32 %v3934_v26, %v12015_v47  ;;  %v3936_v28 = vpop.f32.mrb[66].mxu1  ;;  %v3896_v62 = vpop.f32.mrb[67].mxu0  ;;  %v12019_v47 = vld [vmem:[#allocation296_spill] sm:$0xff] }
 0x893   :  { %v3937_v0 = vpop.f32.mrb[67].mxu1  ;;  %6033 = vtanh.f32 %v4032_v23 }
 0x894   :  { %6035 = vtanh.f32 %v4030_v10 }
 0x895   :  { %6037 = vtanh.f32 %v4033_v31 }
 0x896   :  { %6039 = vtanh.f32 %v4031_v29 }
 0x89d   :  { %v6034_v42 = vpop.eup %6033 }
 0x89e   :  { %v6036_v10 = vpop.eup %6035  ;;  %v4050_v29 = vmul.f32 0.5, %v6034_v42 }
 0x89f   :  { %v6038_v26 = vpop.eup %6037 }
 0x8a0   :  { %v4051_v62 = vmul.f32 0.5, %v6038_v26  ;;  %v4052_v60 = vadd.f32 0.5, %v4050_v29 }
 0x8cf   :  { %v3973_v20 = vpop.f32.mrb[68].mxu0 }
 0x8d0   :  { %v4034_v16 = vadd.f32 %v3973_v20, %v12016_v8  ;;  %v4014_v5 = vpop.f32.mrb[68].mxu1  ;;  %v3975_v61 = vpop.f32.mrb[69].mxu0  ;;  %v4046_v20 = vmul.f32 0.5, %v6036_v10 }
 0x8d1   :  { %v4036_v3 = vadd.f32 %v4014_v5, %v12017_v21  ;;  %v4035_v57 = vadd.f32 %v3975_v61, %v12018_v39  ;;  %v4016_v12 = vpop.f32.mrb[69].mxu1  ;;  %v3977_v2 = vpop.f32.mrb[70].mxu0  ;;  %v4053_v5 = vadd.f32 0.5, %v4051_v62 }
 0x8d2   :  { %6041 = vtanh.f32 %v4034_v16  ;;  %v4037_v28 = vadd.f32 %v4016_v12, %v12019_v47  ;;  %v4018_v0 = vpop.f32.mrb[70].mxu1  ;;  %v3978_v23 = vpop.f32.mrb[71].mxu0  ;;  %v4048_v61 = vadd.f32 0.5, %v4046_v20  ;;  %v4058_v16 = vmul.f32 %v4052_v60, %v9066_v44 }
 0x8d3   :  { %v4019_v31 = vpop.f32.mrb[71].mxu1  ;;  %6043 = vtanh.f32 %v4035_v57  ;;  %v6040_v8 = vpop.eup %6039  ;;  %v4059_v0 = vmul.f32 %v4053_v5, %v9069_v36 }
 0x8d4   :  { %v4047_v21 = vmul.f32 0.5, %v6040_v8  ;;  %6045 = vtanh.f32 %v4036_v3 }
 0x8d5   :  { %6047 = vtanh.f32 %v4037_v28 }
 0x8d6   :  { %v4049_v12 = vadd.f32 0.5, %v4047_v21 }
 0x8dc   :  { %v6042_v39 = vpop.eup %6041 }
 0x8dd   :  { %v4060_v2 = vmul.f32 %v6042_v39, %v4048_v61  ;;  %v6044_v47 = vpop.eup %6043 }
 0x8de   :  { %v4061_v42 = vmul.f32 %v6044_v47, %v4049_v12  ;;  %v6046_v10 = vpop.eup %6045  ;;  %v12020_v12 = vld [vmem:[#allocation109_spill] sm:$0xff]  ;;  %v12022_v47 = vld [vmem:[#allocation111_spill] sm:$0xff] }
 0x8df   :  { %v9360_v23 = vadd.f32 %v4060_v2, %v4058_v16  ;;  %v6048_v3 = vpop.eup %6047  ;;  %v4054_v28 = vmul.f32 0.5, %v6046_v10  ;;  %v12021_v2 = vld [vmem:[#allocation110_spill] sm:$0xff] }
 0x8e0   :  { %v9363_v57 = vadd.f32 %v4061_v42, %v4059_v0  ;;  %v4055_v31 = vmul.f32 0.5, %v6048_v3  ;;  %v12023_v0 = vld [vmem:[#allocation112_spill] sm:$0xff]  ;;  %v12024_v42 = vld [vmem:[#allocation113_spill] sm:$0xff]  ;;  %v12025_v10 = vld [vmem:[#allocation114_spill] sm:$0xff] }
 0x8e1   :  { %6049 = vtanh.f32 %v9360_v23  ;;  %v4056_v26 = vadd.f32 0.5, %v4054_v28  ;;  %v12026_v3 = vld [vmem:[#allocation115_spill] sm:$0xff]  ;;  %v12027_v28 = vld [vmem:[#allocation116_spill] sm:$0xff] }
 0x8e2   :  { %6051 = vtanh.f32 %v9363_v57  ;;  %v4057_v29 = vadd.f32 0.5, %v4055_v31  ;;  %v12028_v31 = vld [vmem:[#allocation117_spill] sm:$0xff] }
 0x8eb   :  { %v6050_v60 = vpop.eup %6049 }
 0x8ec   :  { %v4066_v44 = vmul.f32 %v6050_v60, %v4056_v26  ;;  %v6052_v8 = vpop.eup %6051  ;;  %v12029_v26 = vld [vmem:[#allocation118_spill] sm:$0xff]  ;;  %v12030_v60 = vld [vmem:[#allocation119_spill] sm:$0xff] }
 0x8ed   :  { %v4067_v20 = vmul.f32 %v6052_v8, %v4057_v29  ;;  %v12032_v29 = vld [vmem:[#allocation121_spill] sm:$0xff]  ;;  %v12033_v8 = vld [vmem:[#allocation122_spill] sm:$0xff] }
 0x8ee   :  { %v5239_v36 = vmax.f32 %v4066_v44, 0.0  ;;  %v9369_v5 = vpack.c.bf16 %v4066_v44, %v4066_v44  ;;  %v12031_v44 = vld [vmem:[#allocation120_spill] sm:$0xff] }
 0x8ef   :  { %v9366_v62 = vpack.c.bf16 %v4067_v20, %v4067_v20  ;;  %v5240_v21 = vmax.f32 %v4067_v20, 0.0  ;;  %v12034_v20 = vld [vmem:[#allocation123_spill] sm:$0xff] }
 0x8f0   :  { %v5267_v61 = vmul.f32 %v8184_v56, %v5239_v36  ;;  %v12035_v36 = vld [vmem:[#allocation124_spill] sm:$0xff] }
 0x8f1   :  { %4105 = vmatprep.mubr.bf16.mxu0 %v9366_v62  ;;  %4146 = vmatprep.mubr.bf16.mxu1 %v9366_v62  ;;  %v5268_v39 = vmul.f32 %v8188_v24, %v5240_v21  ;;  %v12036_v21 = vld [vmem:[#allocation125_spill] sm:$0xff] }
 0x8f2   :  { %4106 = vmatmul.mubr.bf16.vlgmr.msra.gmra.mrb[72].mxu0 %v9369_v5  ;;  %4147 = vmatmul.mubr.bf16.vlgmr.msra.gmra.mrb[72].mxu1 %v9369_v5 }
 0x8f3   :  { %4156 = vmatpush1.bf16.msra.mxu0 %v11116_v55  ;;  %4197 = vmatpush1.bf16.msra.mxu1 %v11117_v17  ;;  %v5287_v16 = vadd.f32 %v5268_v39, %v5267_v61  ;;  %v12037_v61 = vld [vmem:[#allocation126_spill] sm:$0xff]  ;;  %v12038_v39 = vld [vmem:[#allocation127_spill] sm:$0xff] }
 0x8f4   :  { %4187 = vmatprep.mubr.bf16.mxu0 %v9366_v62  ;;  %4228 = vmatprep.mubr.bf16.mxu1 %v9366_v62 }
 0x8f5   :  { %5288 = vadd.xlane.f32.xlu0 %v5287_v16  ;;  %4157 = vmatprep.subr.bf16.mxu0 %v11118_v34  ;;  %v12039_v16 = vld [vmem:[#allocation128_spill] sm:$0xff] }
 0x8f6   :  { %4198 = vmatprep.subr.bf16.mxu1 %v11119_v33 }
 0x8f7   :  { %4158 = vmatpush1.bf16.msra.mxu0 %v11120_v41  ;;  %4199 = vmatpush1.bf16.msra.mxu1 %v11121_v14 }
 0x8f8   :  { %4159 = vmatprep.subr.bf16.mxu0 %v11122_v22  ;;  %4200 = vmatprep.subr.bf16.mxu1 %v11123_v40 }
 0x8fb   :  { %4160 = vmatpush1.bf16.msra.mxu0 %v11124_v9  ;;  %4201 = vmatpush1.bf16.msra.mxu1 %v11342_v52 }
 0x8fc   :  { %4161 = vmatprep.subr.bf16.mxu0 %v11343_v43  ;;  %4202 = vmatprep.subr.bf16.mxu1 %v11344_v53 }
 0x8ff   :  { %4162 = vmatpush1.bf16.msra.mxu0 %v11345_v54  ;;  %4203 = vmatpush1.bf16.msra.mxu1 %v11346_v30 }
 0x900   :  { %4163 = vmatprep.subr.bf16.mxu0 %v11347_v51  ;;  %4204 = vmatprep.subr.bf16.mxu1 %v11348_v6 }
 0x903   :  { %4164 = vmatpush1.bf16.msra.mxu0 %v11349_v37  ;;  %4205 = vmatpush1.bf16.msra.mxu1 %v11350_v38 }
 0x904   :  { %4165 = vmatprep.subr.bf16.mxu0 %v11568_v19  ;;  %4206 = vmatprep.subr.bf16.mxu1 %v11569_v58 }
 0x907   :  { %4166 = vmatpush1.bf16.msra.mxu0 %v11570_v1  ;;  %4207 = vmatpush1.bf16.msra.mxu1 %v11571_v11 }
 0x908   :  { %4167 = vmatprep.subr.bf16.mxu0 %v11572_v7  ;;  %4208 = vmatprep.subr.bf16.mxu1 %v11573_v50 }
 0x90b   :  { %4168 = vmatpush1.bf16.msra.mxu0 %v11574_v27  ;;  %4209 = vmatpush1.bf16.msra.mxu1 %v11575_v18 }
 0x90c   :  { %4169 = vmatprep.subr.bf16.mxu0 %v11576_v32  ;;  %4210 = vmatprep.subr.bf16.mxu1 %v11794_v4 }
 0x90f   :  { %4170 = vmatpush1.bf16.msra.mxu0 %v11795_v13  ;;  %4211 = vmatpush1.bf16.msra.mxu1 %v11796_v63 }
 0x910   :  { %4171 = vmatprep.subr.bf16.mxu0 %v11797_v25  ;;  %4212 = vmatprep.subr.bf16.mxu1 %v11798_v45 }
 0x913   :  { %4172 = vmatpush1.bf16.msra.mxu0 %v11799_v48  ;;  %4213 = vmatpush1.bf16.msra.mxu1 %v11800_v15 }
 0x914   :  { %4173 = vmatprep.subr.bf16.mxu0 %v11801_v49  ;;  %4214 = vmatprep.subr.bf16.mxu1 %v11802_v59 }
 0x917   :  { %4174 = vmatpush1.bf16.msra.mxu0 %v12020_v12  ;;  %4215 = vmatpush1.bf16.msra.mxu1 %v12021_v2 }
 0x918   :  { %4175 = vmatprep.subr.bf16.mxu0 %v12022_v47  ;;  %4216 = vmatprep.subr.bf16.mxu1 %v12023_v0 }
 0x91b   :  { %4176 = vmatpush1.bf16.msra.mxu0 %v12024_v42  ;;  %4217 = vmatpush1.bf16.msra.mxu1 %v12025_v10  ;;  %v12243_v42 = vld [vmem:[#allocation301_spill] sm:$0xff] }
 0x91c   :  { %4177 = vmatprep.subr.bf16.mxu0 %v12026_v3  ;;  %4218 = vmatprep.subr.bf16.mxu1 %v12027_v28 }
 0x91f   :  { %4178 = vmatpush1.bf16.msra.mxu0 %v12028_v31  ;;  %4219 = vmatpush1.bf16.msra.mxu1 %v12029_v26  ;;  %v12040_v26 = vld [vmem:[#allocation129_spill] sm:$0xff] }
 0x920   :  { %4179 = vmatprep.subr.bf16.mxu0 %v12030_v60  ;;  %4220 = vmatprep.subr.bf16.mxu1 %v12031_v44  ;;  %v12041_v60 = vld [vmem:[#allocation130_spill] sm:$0xff]  ;;  %v12042_v44 = vld [vmem:[#allocation131_spill] sm:$0xff] }
 0x923   :  { %4180 = vmatpush1.bf16.msra.mxu0 %v12032_v29  ;;  %4221 = vmatpush1.bf16.msra.mxu1 %v12033_v8  ;;  %v12043_v29 = vld [vmem:[#allocation132_spill] sm:$0xff]  ;;  %v12044_v8 = vld [vmem:[#allocation133_spill] sm:$0xff] }
 0x924   :  { %4181 = vmatprep.subr.bf16.mxu0 %v12034_v20  ;;  %4222 = vmatprep.subr.bf16.mxu1 %v12035_v36  ;;  %v12045_v20 = vld [vmem:[#allocation134_spill] sm:$0xff]  ;;  %v12046_v36 = vld [vmem:[#allocation135_spill] sm:$0xff] }
 0x927   :  { %4182 = vmatpush1.bf16.msra.mxu0 %v12036_v21  ;;  %4223 = vmatpush1.bf16.msra.mxu1 %v12037_v61  ;;  %v12047_v21 = vld [vmem:[#allocation136_spill] sm:$0xff]  ;;  %v12060_v61 = vld [vmem:[#allocation149_spill] sm:$0xff] }
 0x928   :  { %4183 = vmatprep.subr.bf16.mxu0 %v12038_v39  ;;  %4224 = vmatprep.subr.bf16.mxu1 %v12039_v16  ;;  %v12048_v16 = vld [vmem:[#allocation137_spill] sm:$0xff]  ;;  %v12058_v39 = vld [vmem:[#allocation147_spill] sm:$0xff] }
 0x92b   :  { %4184 = vmatpush1.bf16.msra.mxu0 %v12040_v26  ;;  %4225 = vmatpush1.bf16.msra.mxu1 %v12041_v60  ;;  %v12049_v60 = vld [vmem:[#allocation138_spill] sm:$0xff]  ;;  %v12056_v26 = vld [vmem:[#allocation145_spill] sm:$0xff] }
 0x92c   :  { %4185 = vmatprep.subr.bf16.mxu0 %v12042_v44  ;;  %4226 = vmatprep.subr.bf16.mxu1 %v12043_v29  ;;  %v12050_v29 = vld [vmem:[#allocation139_spill] sm:$0xff]  ;;  %v12055_v44 = vld [vmem:[#allocation144_spill] sm:$0xff] }
 0x92f   :  { %4186 = vmatpush1.bf16.msra.mxu0 %v12044_v8  ;;  %4227 = vmatpush1.bf16.msra.mxu1 %v12045_v20  ;;  %v12051_v8 = vld [vmem:[#allocation140_spill] sm:$0xff]  ;;  %v12052_v20 = vld [vmem:[#allocation141_spill] sm:$0xff] }
 0x930   :  { %4237 = vmatprep.subr.bf16.mxu0 %v12046_v36  ;;  %4278 = vmatprep.subr.bf16.mxu1 %v12047_v21  ;;  %v12053_v36 = vld [vmem:[#allocation142_spill] sm:$0xff]  ;;  %v12054_v21 = vld [vmem:[#allocation143_spill] sm:$0xff] }
 0x932   :  { %4188 = vmatmul.mubr.bf16.vlgmr.msra.gmra.mrb[76].mxu0 %v9369_v5  ;;  %4229 = vmatmul.mubr.bf16.vlgmr.msra.gmra.mrb[76].mxu1 %v9369_v5 }
 0x933   :  { %4238 = vmatpush1.bf16.msra.mxu0 %v12048_v16  ;;  %4269 = vmatprep.mubr.bf16.mxu0 %v9366_v62  ;;  %v12057_v16 = vld [vmem:[#allocation146_spill] sm:$0xff] }
 0x934   :  { %4279 = vmatpush1.bf16.msra.mxu1 %v12049_v60  ;;  %4310 = vmatprep.mubr.bf16.mxu1 %v9366_v62  ;;  %v12059_v60 = vld [vmem:[#allocation148_spill] sm:$0xff] }
 0x935   :  { %4239 = vmatprep.subr.bf16.mxu0 %v12050_v29  ;;  %4280 = vmatprep.subr.bf16.mxu1 %v12051_v8  ;;  %v12061_v29 = vld [vmem:[#allocation150_spill] sm:$0xff]  ;;  %v12062_v8 = vld [vmem:[#allocation151_spill] sm:$0xff] }
 0x937   :  { %4240 = vmatpush1.bf16.msra.mxu0 %v12052_v20  ;;  %v12063_v20 = vld [vmem:[#allocation152_spill] sm:$0xff] }
 0x938   :  { %4281 = vmatpush1.bf16.msra.mxu1 %v12053_v36  ;;  %4241 = vmatprep.subr.bf16.mxu0 %v12054_v21  ;;  %v12064_v36 = vld [vmem:[#allocation153_spill] sm:$0xff]  ;;  %v12065_v21 = vld [vmem:[#allocation154_spill] sm:$0xff] }
 0x939   :  { %4282 = vmatprep.subr.bf16.mxu1 %v12055_v44  ;;  %v12066_v44 = vld [vmem:[#allocation155_spill] sm:$0xff] }
 0x93b   :  { %4242 = vmatpush1.bf16.msra.mxu0 %v12056_v26  ;;  %v12067_v26 = vld [vmem:[#allocation156_spill] sm:$0xff] }
 0x93c   :  { %4283 = vmatpush1.bf16.msra.mxu1 %v12057_v16  ;;  %4243 = vmatprep.subr.bf16.mxu0 %v12058_v39  ;;  %v12068_v39 = vld [vmem:[#allocation158_spill] sm:$0xff] }
 0x93d   :  { %4284 = vmatprep.subr.bf16.mxu1 %v12059_v60  ;;  %v12069_v60 = vld [vmem:[#allocation159_spill] sm:$0xff] }
 0x93f   :  { %4244 = vmatpush1.bf16.msra.mxu0 %v12060_v61  ;;  %v12070_v61 = vld [vmem:[#allocation160_spill] sm:$0xff] }
 0x940   :  { %4285 = vmatpush1.bf16.msra.mxu1 %v12061_v29  ;;  %4245 = vmatprep.subr.bf16.mxu0 %v12062_v8  ;;  %v12071_v29 = vld [vmem:[#allocation161_spill] sm:$0xff]  ;;  %v12072_v8 = vld [vmem:[#allocation162_spill] sm:$0xff] }
 0x941   :  { %4286 = vmatprep.subr.bf16.mxu1 %v12063_v20  ;;  %v12073_v20 = vld [vmem:[#allocation163_spill] sm:$0xff] }
 0x943   :  { %4246 = vmatpush1.bf16.msra.mxu0 %v12064_v36  ;;  %v12074_v36 = vld [vmem:[#allocation164_spill] sm:$0xff] }
 0x944   :  { %4287 = vmatpush1.bf16.msra.mxu1 %v12065_v21  ;;  %4247 = vmatprep.subr.bf16.mxu0 %v12066_v44  ;;  %v12075_v21 = vld [vmem:[#allocation165_spill] sm:$0xff]  ;;  %v12076_v44 = vld [vmem:[#allocation166_spill] sm:$0xff] }
 0x945   :  { %4288 = vmatprep.subr.bf16.mxu1 %v12067_v26  ;;  %v12077_v26 = vld [vmem:[#allocation167_spill] sm:$0xff] }
 0x947   :  { %4248 = vmatpush1.bf16.msra.mxu0 %v11851_v35 }
 0x948   :  { %4289 = vmatpush1.bf16.msra.mxu1 %v12068_v39  ;;  %4249 = vmatprep.subr.bf16.mxu0 %v12069_v60  ;;  %v12078_v39 = vld [vmem:[#allocation169_spill] sm:$0xff]  ;;  %v12079_v60 = vld [vmem:[#allocation170_spill] sm:$0xff] }
 0x949   :  { %4290 = vmatprep.subr.bf16.mxu1 %v12070_v61  ;;  %v12080_v61 = vld [vmem:[#allocation171_spill] sm:$0xff] }
 0x94b   :  { %4250 = vmatpush1.bf16.msra.mxu0 %v12071_v29  ;;  %v12081_v29 = vld [vmem:[#allocation172_spill] sm:$0xff] }
 0x94c   :  { %4291 = vmatpush1.bf16.msra.mxu1 %v12072_v8  ;;  %4251 = vmatprep.subr.bf16.mxu0 %v12073_v20  ;;  %v12082_v8 = vld [vmem:[#allocation173_spill] sm:$0xff]  ;;  %v12083_v20 = vld [vmem:[#allocation174_spill] sm:$0xff] }
 0x94d   :  { %4292 = vmatprep.subr.bf16.mxu1 %v12074_v36  ;;  %v12084_v36 = vld [vmem:[#allocation175_spill] sm:$0xff] }
 0x94f   :  { %4252 = vmatpush1.bf16.msra.mxu0 %v12075_v21  ;;  %v12085_v21 = vld [vmem:[#allocation176_spill] sm:$0xff] }
 0x950   :  { %4293 = vmatpush1.bf16.msra.mxu1 %v12076_v44  ;;  %4253 = vmatprep.subr.bf16.mxu0 %v12077_v26  ;;  %v12086_v44 = vld [vmem:[#allocation177_spill] sm:$0xff]  ;;  %v12087_v26 = vld [vmem:[#allocation178_spill] sm:$0xff] }
 0x951   :  { %4294 = vmatprep.subr.bf16.mxu1 %v11645_v46  ;;  %v12088_v46 = vld [vmem:[#allocation179_spill] sm:$0xff] }
 0x953   :  { %4254 = vmatpush1.bf16.msra.mxu0 %v12078_v39  ;;  %v12089_v39 = vld [vmem:[#allocation180_spill] sm:$0xff] }
 0x954   :  { %4295 = vmatpush1.bf16.msra.mxu1 %v12079_v60  ;;  %4255 = vmatprep.subr.bf16.mxu0 %v12080_v61  ;;  %v12090_v60 = vld [vmem:[#allocation181_spill] sm:$0xff]  ;;  %v12091_v61 = vld [vmem:[#allocation182_spill] sm:$0xff] }
 0x955   :  { %4296 = vmatprep.subr.bf16.mxu1 %v12081_v29  ;;  %v12092_v29 = vld [vmem:[#allocation183_spill] sm:$0xff] }
 0x957   :  { %4256 = vmatpush1.bf16.msra.mxu0 %v12082_v8  ;;  %v12093_v8 = vld [vmem:[#allocation184_spill] sm:$0xff] }
 0x958   :  { %4297 = vmatpush1.bf16.msra.mxu1 %v12083_v20  ;;  %4257 = vmatprep.subr.bf16.mxu0 %v12084_v36  ;;  %v12094_v20 = vld [vmem:[#allocation185_spill] sm:$0xff]  ;;  %v12095_v36 = vld [vmem:[#allocation186_spill] sm:$0xff] }
 0x959   :  { %4298 = vmatprep.subr.bf16.mxu1 %v12085_v21  ;;  %v12096_v21 = vld [vmem:[#allocation188_spill] sm:$0xff] }
 0x95b   :  { %4258 = vmatpush1.bf16.msra.mxu0 %v12086_v44  ;;  %v12097_v44 = vld [vmem:[#allocation189_spill] sm:$0xff] }
 0x95c   :  { %4299 = vmatpush1.bf16.msra.mxu1 %v12087_v26  ;;  %4259 = vmatprep.subr.bf16.mxu0 %v12088_v46  ;;  %v12098_v26 = vld [vmem:[#allocation190_spill] sm:$0xff]  ;;  %v12099_v46 = vld [vmem:[#allocation191_spill] sm:$0xff] }
 0x95d   :  { %4300 = vmatprep.subr.bf16.mxu1 %v12089_v39  ;;  %v12100_v39 = vld [vmem:[#allocation192_spill] sm:$0xff] }
 0x95f   :  { %4260 = vmatpush1.bf16.msra.mxu0 %v12090_v60  ;;  %v12101_v60 = vld [vmem:[#allocation193_spill] sm:$0xff] }
 0x960   :  { %4301 = vmatpush1.bf16.msra.mxu1 %v12091_v61  ;;  %4261 = vmatprep.subr.bf16.mxu0 %v12092_v29  ;;  %v12102_v61 = vld [vmem:[#allocation198_spill] sm:$0xff]  ;;  %v12103_v29 = vld [vmem:[#allocation199_spill] sm:$0xff] }
 0x961   :  { %4302 = vmatprep.subr.bf16.mxu1 %v12093_v8  ;;  %v12104_v8 = vld [vmem:[#allocation200_spill] sm:$0xff] }
 0x963   :  { %4262 = vmatpush1.bf16.msra.mxu0 %v12094_v20  ;;  %v12105_v20 = vld [vmem:[#allocation201_spill] sm:$0xff] }
 0x964   :  { %4303 = vmatpush1.bf16.msra.mxu1 %v12095_v36  ;;  %4263 = vmatprep.subr.bf16.mxu0 %v12096_v21  ;;  %v12106_v36 = vld [vmem:[#allocation204_spill] sm:$0xff]  ;;  %v12107_v21 = vld [vmem:[#allocation207_spill] sm:$0xff] }
 0x965   :  { %4304 = vmatprep.subr.bf16.mxu1 %v12097_v44  ;;  %v12108_v44 = vld [vmem:[#allocation209_spill] sm:$0xff] }
 0x967   :  { %4264 = vmatpush1.bf16.msra.mxu0 %v12098_v26  ;;  %v12109_v26 = vld [vmem:[#allocation210_spill] sm:$0xff] }
 0x968   :  { %4305 = vmatpush1.bf16.msra.mxu1 %v12099_v46  ;;  %4265 = vmatprep.subr.bf16.mxu0 %v12100_v39  ;;  %v12120_v39 = vld [vmem:[#allocation233_spill] sm:$0xff] }
 0x969   :  { %4306 = vmatprep.subr.bf16.mxu1 %v12101_v60  ;;  %v12110_v60 = vld [vmem:[#allocation212_spill] sm:$0xff] }
 0x96b   :  { %4266 = vmatpush1.bf16.msra.mxu0 %v12102_v61  ;;  %v12118_v61 = vld [vmem:[#allocation228_spill] sm:$0xff] }
 0x96c   :  { %4307 = vmatpush1.bf16.msra.mxu1 %v12103_v29  ;;  %4267 = vmatprep.subr.bf16.mxu0 %v12104_v8  ;;  %v12111_v29 = vld [vmem:[#allocation215_spill] sm:$0xff]  ;;  %v12117_v8 = vld [vmem:[#allocation226_spill] sm:$0xff] }
 0x96d   :  { %4308 = vmatprep.subr.bf16.mxu1 %v12105_v20  ;;  %v12112_v20 = vld [vmem:[#allocation217_spill] sm:$0xff] }
 0x96f   :  { %4268 = vmatpush1.bf16.msra.mxu0 %v12106_v36  ;;  %v12113_v36 = vld [vmem:[#allocation218_spill] sm:$0xff] }
 0x970   :  { %4309 = vmatpush1.bf16.msra.mxu1 %v12107_v21  ;;  %4319 = vmatprep.subr.bf16.mxu0 %v12108_v44  ;;  %v12114_v21 = vld [vmem:[#allocation220_spill] sm:$0xff]  ;;  %v12115_v44 = vld [vmem:[#allocation223_spill] sm:$0xff] }
 0x971   :  { %4360 = vmatprep.subr.bf16.mxu1 %v12109_v26  ;;  %v12116_v26 = vld [vmem:[#allocation225_spill] sm:$0xff] }
 0x972   :  { %4270 = vmatmul.mubr.bf16.vlgmr.msra.gmra.mrb[72].mxu0 %v9369_v5 }
 0x973   :  { %4311 = vmatmul.mubr.bf16.vlgmr.msra.gmra.mrb[72].mxu1 %v9369_v5  ;;  %4320 = vmatpush1.bf16.msra.mxu0 %v12110_v60  ;;  %v12119_v60 = vld [vmem:[#allocation231_spill] sm:$0xff] }
 0x974   :  { %4351 = vmatprep.mubr.bf16.mxu0 %v9366_v62  ;;  %4361 = vmatpush1.bf16.msra.mxu1 %v12111_v29  ;;  %v12121_v29 = vld [vmem:[#allocation234_spill] sm:$0xff] }
 0x975   :  { %4392 = vmatprep.mubr.bf16.mxu1 %v9366_v62  ;;  %4321 = vmatprep.subr.bf16.mxu0 %v12112_v20  ;;  %v12122_v62 = vld [vmem:[#allocation236_spill] sm:$0xff]  ;;  %v12123_v20 = vld [vmem:[#allocation239_spill] sm:$0xff] }
 0x976   :  { %4362 = vmatprep.subr.bf16.mxu1 %v12113_v36  ;;  %v12124_v36 = vld [vmem:[#allocation241_spill] sm:$0xff] }
 0x977   :  { %4322 = vmatpush1.bf16.msra.mxu0 %v12114_v21  ;;  %v12125_v21 = vld [vmem:[#allocation242_spill] sm:$0xff] }
 0x978   :  { %4363 = vmatpush1.bf16.msra.mxu1 %v12115_v44  ;;  %4323 = vmatprep.subr.bf16.mxu0 %v12116_v26  ;;  %v12126_v44 = vld [vmem:[#allocation244_spill] sm:$0xff]  ;;  %v12127_v26 = vld [vmem:[#allocation247_spill] sm:$0xff] }
 0x979   :  { %4364 = vmatprep.subr.bf16.mxu1 %v12117_v8  ;;  %v12128_v8 = vld [vmem:[#allocation249_spill] sm:$0xff] }
 0x97b   :  { %4324 = vmatpush1.bf16.msra.mxu0 %v12118_v61  ;;  %v12129_v61 = vld [vmem:[#allocation250_spill] sm:$0xff] }
 0x97c   :  { %4365 = vmatpush1.bf16.msra.mxu1 %v12119_v60  ;;  %4325 = vmatprep.subr.bf16.mxu0 %v12120_v39  ;;  %v12130_v60 = vld [vmem:[#allocation252_spill] sm:$0xff]  ;;  %v12131_v39 = vld [vmem:[#allocation255_spill] sm:$0xff] }
 0x97d   :  { %4366 = vmatprep.subr.bf16.mxu1 %v12121_v29  ;;  %v12132_v29 = vld [vmem:[#allocation257_spill] sm:$0xff] }
 0x97f   :  { %4326 = vmatpush1.bf16.msra.mxu0 %v12122_v62  ;;  %v12133_v62 = vld [vmem:[#allocation258_spill] sm:$0xff] }
 0x980   :  { %4367 = vmatpush1.bf16.msra.mxu1 %v12123_v20  ;;  %4327 = vmatprep.subr.bf16.mxu0 %v12124_v36  ;;  %v12134_v20 = vld [vmem:[#allocation263_spill] sm:$0xff]  ;;  %v12135_v36 = vld [vmem:[#allocation264_spill] sm:$0xff] }
 0x981   :  { %4368 = vmatprep.subr.bf16.mxu1 %v12125_v21  ;;  %v12136_v21 = vld [vmem:[#allocation265_spill] sm:$0xff] }
 0x983   :  { %4328 = vmatpush1.bf16.msra.mxu0 %v12126_v44  ;;  %v12137_v44 = vld [vmem:[#allocation266_spill] sm:$0xff] }
 0x984   :  { %4369 = vmatpush1.bf16.msra.mxu1 %v12127_v26  ;;  %4329 = vmatprep.subr.bf16.mxu0 %v12128_v8  ;;  %v12138_v26 = vld [vmem:[#allocation267_spill] sm:$0xff]  ;;  %v12139_v8 = vld [vmem:[#allocation270_spill] sm:$0xff] }
 0x985   :  { %4370 = vmatprep.subr.bf16.mxu1 %v12129_v61  ;;  %v12140_v61 = vld [vmem:[#allocation273_spill] sm:$0xff] }
 0x987   :  { %4330 = vmatpush1.bf16.msra.mxu0 %v12130_v60  ;;  %v12141_v60 = vld [vmem:[#allocation274_spill] sm:$0xff] }
 0x988   :  { %4371 = vmatpush1.bf16.msra.mxu1 %v12131_v39  ;;  %4331 = vmatprep.subr.bf16.mxu0 %v12132_v29  ;;  %v12142_v39 = vld [vmem:[#allocation275_spill] sm:$0xff]  ;;  %v12143_v29 = vld [vmem:[#allocation278_spill] sm:$0xff] }
 0x989   :  { %4372 = vmatprep.subr.bf16.mxu1 %v12133_v62  ;;  %v12144_v62 = vld [vmem:[#allocation281_spill] sm:$0xff] }
 0x98b   :  { %4332 = vmatpush1.bf16.msra.mxu0 %v12134_v20  ;;  %v12145_v20 = vld [vmem:[#allocation282_spill] sm:$0xff] }
 0x98c   :  { %4373 = vmatpush1.bf16.msra.mxu1 %v12135_v36  ;;  %4333 = vmatprep.subr.bf16.mxu0 %v12136_v21  ;;  %v12146_v36 = vld [vmem:[#allocation283_spill] sm:$0xff]  ;;  %v12147_v21 = vld [vmem:[#allocation286_spill] sm:$0xff] }
 0x98d   :  { %4374 = vmatprep.subr.bf16.mxu1 %v12137_v44  ;;  %v12148_v44 = vld [vmem:[#allocation289_spill] sm:$0xff] }
 0x98f   :  { %4334 = vmatpush1.bf16.msra.mxu0 %v12138_v26  ;;  %v12149_v26 = vld [vmem:[#allocation290_spill] sm:$0xff] }
 0x990   :  { %4375 = vmatpush1.bf16.msra.mxu1 %v12139_v8  ;;  %4335 = vmatprep.subr.bf16.mxu0 %v12140_v61  ;;  %v12150_v8 = vld [vmem:[#allocation291_spill] sm:$0xff]  ;;  %v12151_v61 = vld [vmem:[#allocation294_spill] sm:$0xff] }
 0x991   :  { %4376 = vmatprep.subr.bf16.mxu1 %v12141_v60  ;;  %v12152_v60 = vld [vmem:[#allocation297_spill] sm:$0xff] }
 0x993   :  { %4336 = vmatpush1.bf16.msra.mxu0 %v12142_v39  ;;  %v12153_v39 = vld [vmem:[#allocation298_spill] sm:$0xff] }
 0x994   :  { %4377 = vmatpush1.bf16.msra.mxu1 %v12143_v29  ;;  %4337 = vmatprep.subr.bf16.mxu0 %v12144_v62  ;;  %v12154_v29 = vld [vmem:[#allocation299_spill] sm:$0xff]  ;;  %v12155_v62 = vld [vmem:[#allocation302_spill] sm:$0xff] }
 0x995   :  { %4378 = vmatprep.subr.bf16.mxu1 %v12145_v20  ;;  %v12156_v20 = vld [vmem:[#allocation305_spill] sm:$0xff] }
 0x997   :  { %4338 = vmatpush1.bf16.msra.mxu0 %v12146_v36  ;;  %v12157_v36 = vld [vmem:[#allocation306_spill] sm:$0xff] }
 0x998   :  { %4379 = vmatpush1.bf16.msra.mxu1 %v12147_v21  ;;  %4339 = vmatprep.subr.bf16.mxu0 %v12148_v44  ;;  %v12158_v21 = vld [vmem:[#allocation307_spill] sm:$0xff]  ;;  %v12159_v44 = vld [vmem:[#allocation310_spill] sm:$0xff] }
 0x999   :  { %4380 = vmatprep.subr.bf16.mxu1 %v12149_v26  ;;  %v12160_v26 = vld [vmem:[#allocation313_spill] sm:$0xff] }
 0x99b   :  { %4340 = vmatpush1.bf16.msra.mxu0 %v12150_v8  ;;  %v12161_v8 = vld [vmem:[#allocation314_spill] sm:$0xff] }
 0x99c   :  { %4381 = vmatpush1.bf16.msra.mxu1 %v12151_v61  ;;  %4341 = vmatprep.subr.bf16.mxu0 %v12152_v60  ;;  %v12162_v61 = vld [vmem:[#allocation315_spill] sm:$0xff]  ;;  %v12163_v60 = vld [vmem:[#allocation318_spill] sm:$0xff] }
 0x99d   :  { %4382 = vmatprep.subr.bf16.mxu1 %v12153_v39  ;;  %v12164_v39 = vld [vmem:[#allocation321_spill] sm:$0xff] }
 0x99f   :  { %4342 = vmatpush1.bf16.msra.mxu0 %v12154_v29  ;;  %v12165_v29 = vld [vmem:[#allocation322_spill] sm:$0xff] }
 0x9a0   :  { %4383 = vmatpush1.bf16.msra.mxu1 %v12155_v62  ;;  %4343 = vmatprep.subr.bf16.mxu0 %v12156_v20  ;;  %v12166_v62 = vld [vmem:[#allocation323_spill] sm:$0xff]  ;;  %v12167_v20 = vld [vmem:[#allocation324_spill] sm:$0xff] }
 0x9a1   :  { %4384 = vmatprep.subr.bf16.mxu1 %v12157_v36  ;;  %v12168_v36 = vld [vmem:[#allocation325_spill] sm:$0xff] }
 0x9a3   :  { %4344 = vmatpush1.bf16.msra.mxu0 %v12158_v21  ;;  %v12169_v21 = vld [vmem:[#allocation326_spill] sm:$0xff] }
 0x9a4   :  { %4385 = vmatpush1.bf16.msra.mxu1 %v12159_v44  ;;  %4345 = vmatprep.subr.bf16.mxu0 %v12160_v26  ;;  %v12170_v44 = vld [vmem:[#allocation327_spill] sm:$0xff]  ;;  %v12171_v26 = vld [vmem:[#allocation328_spill] sm:$0xff] }
 0x9a5   :  { %4386 = vmatprep.subr.bf16.mxu1 %v12161_v8  ;;  %v12172_v8 = vld [vmem:[#allocation7_spill] sm:$0xff] }
 0x9a7   :  { %4346 = vmatpush1.bf16.msra.mxu0 %v12162_v61  ;;  %v12173_v61 = vld [vmem:[#allocation8_spill] sm:$0xff] }
 0x9a8   :  { %4387 = vmatpush1.bf16.msra.mxu1 %v12163_v60  ;;  %4347 = vmatprep.subr.bf16.mxu0 %v12164_v39  ;;  %v12183_v39 = vld [vmem:[#allocation18_spill] sm:$0xff] }
 0x9a9   :  { %4388 = vmatprep.subr.bf16.mxu1 %v12165_v29  ;;  %v12174_v29 = vld [vmem:[#allocation9_spill] sm:$0xff] }
 0x9ab   :  { %4348 = vmatpush1.bf16.msra.mxu0 %v12166_v62  ;;  %v12175_v62 = vld [vmem:[#allocation10_spill] sm:$0xff] }
 0x9ac   :  { %4389 = vmatpush1.bf16.msra.mxu1 %v12167_v20  ;;  %4349 = vmatprep.subr.bf16.mxu0 %v12168_v36  ;;  %v12176_v20 = vld [vmem:[#allocation11_spill] sm:$0xff]  ;;  %v12177_v36 = vld [vmem:[#allocation12_spill] sm:$0xff] }
 0x9ad   :  { %4390 = vmatprep.subr.bf16.mxu1 %v12169_v21  ;;  %v12178_v21 = vld [vmem:[#allocation13_spill] sm:$0xff] }
 0x9af   :  { %4350 = vmatpush1.bf16.msra.mxu0 %v12170_v44  ;;  %v12179_v44 = vld [vmem:[#allocation14_spill] sm:$0xff] }
 0x9b0   :  { %4391 = vmatpush1.bf16.msra.mxu1 %v12171_v26  ;;  %4453 = vmatprep.subr.bf16.mxu0 %v12172_v8  ;;  %v12180_v26 = vld [vmem:[#allocation15_spill] sm:$0xff]  ;;  %v12181_v8 = vld [vmem:[#allocation16_spill] sm:$0xff] }
 0x9b1   :  { %4494 = vmatprep.subr.bf16.mxu1 %v12173_v61  ;;  %v12182_v61 = vld [vmem:[#allocation17_spill] sm:$0xff] }
 0x9b2   :  { %4352 = vmatmul.mubr.bf16.vlgmr.msra.gmra.mrb[76].mxu0 %v9369_v5 }
 0x9b3   :  { %4393 = vmatmul.mubr.bf16.vlgmr.msra.gmra.mrb[76].mxu1 %v9369_v5  ;;  %4454 = vmatpush1.bf16.msra.mxu0 %v12174_v29  ;;  %v12184_v5 = vld [vmem:[#allocation19_spill] sm:$0xff]  ;;  %v12185_v29 = vld [vmem:[#allocation20_spill] sm:$0xff] }
 0x9b4   :  { %4495 = vmatpush1.bf16.msra.mxu1 %v12175_v62  ;;  %4455 = vmatprep.subr.bf16.mxu0 %v12176_v20  ;;  %v12186_v62 = vld [vmem:[#allocation21_spill] sm:$0xff]  ;;  %v12187_v20 = vld [vmem:[#allocation22_spill] sm:$0xff] }
 0x9b5   :  { %4496 = vmatprep.subr.bf16.mxu1 %v12177_v36  ;;  %v12188_v36 = vld [vmem:[#allocation23_spill] sm:$0xff] }
 0x9b7   :  { %4456 = vmatpush1.bf16.msra.mxu0 %v12178_v21  ;;  %v12189_v21 = vld [vmem:[#allocation24_spill] sm:$0xff] }
 0x9b8   :  { %4497 = vmatpush1.bf16.msra.mxu1 %v12179_v44  ;;  %4457 = vmatprep.subr.bf16.mxu0 %v12180_v26  ;;  %v12190_v44 = vld [vmem:[#allocation25_spill] sm:$0xff]  ;;  %v12191_v26 = vld [vmem:[#allocation26_spill] sm:$0xff] }
 0x9b9   :  { %4498 = vmatprep.subr.bf16.mxu1 %v12181_v8  ;;  %v12192_v8 = vld [vmem:[#allocation27_spill] sm:$0xff] }
 0x9bb   :  { %4458 = vmatpush1.bf16.msra.mxu0 %v12182_v61  ;;  %v12193_v61 = vld [vmem:[#allocation28_spill] sm:$0xff] }
 0x9bc   :  { %4499 = vmatpush1.bf16.msra.mxu1 %v12183_v39  ;;  %4459 = vmatprep.subr.bf16.mxu0 %v12184_v5  ;;  %v12194_v39 = vld [vmem:[#allocation29_spill] sm:$0xff]  ;;  %v12195_v5 = vld [vmem:[#allocation30_spill] sm:$0xff] }
 0x9bd   :  { %4500 = vmatprep.subr.bf16.mxu1 %v12185_v29  ;;  %v12196_v29 = vld [vmem:[#allocation31_spill] sm:$0xff] }
 0x9bf   :  { %4460 = vmatpush1.bf16.msra.mxu0 %v12186_v62  ;;  %v12197_v62 = vld [vmem:[#allocation32_spill] sm:$0xff] }
 0x9c0   :  { %4501 = vmatpush1.bf16.msra.mxu1 %v12187_v20  ;;  %4461 = vmatprep.subr.bf16.mxu0 %v12188_v36  ;;  %v12198_v20 = vld [vmem:[#allocation33_spill] sm:$0xff]  ;;  %v12199_v36 = vld [vmem:[#allocation34_spill] sm:$0xff] }
 0x9c1   :  { %4502 = vmatprep.subr.bf16.mxu1 %v12189_v21  ;;  %v12200_v21 = vld [vmem:[#allocation35_spill] sm:$0xff] }
 0x9c3   :  { %4462 = vmatpush1.bf16.msra.mxu0 %v12190_v44  ;;  %v12201_v44 = vld [vmem:[#allocation36_spill] sm:$0xff] }
 0x9c4   :  { %4503 = vmatpush1.bf16.msra.mxu1 %v12191_v26  ;;  %4463 = vmatprep.subr.bf16.mxu0 %v12192_v8  ;;  %v12202_v26 = vld [vmem:[#allocation37_spill] sm:$0xff]  ;;  %v12203_v8 = vld [vmem:[#allocation38_spill] sm:$0xff] }
 0x9c5   :  { %4504 = vmatprep.subr.bf16.mxu1 %v12193_v61  ;;  %v12204_v61 = vld [vmem:[#allocation39_spill] sm:$0xff] }
 0x9c7   :  { %4464 = vmatpush1.bf16.msra.mxu0 %v12194_v39  ;;  %v12205_v39 = vld [vmem:[#allocation40_spill] sm:$0xff] }
 0x9c8   :  { %4505 = vmatpush1.bf16.msra.mxu1 %v12195_v5  ;;  %4465 = vmatprep.subr.bf16.mxu0 %v12196_v29  ;;  %v12206_v5 = vld [vmem:[#allocation41_spill] sm:$0xff]  ;;  %v12207_v29 = vld [vmem:[#allocation42_spill] sm:$0xff] }
 0x9c9   :  { %4506 = vmatprep.subr.bf16.mxu1 %v12197_v62  ;;  %v12208_v62 = vld [vmem:[#allocation43_spill] sm:$0xff] }
 0x9cb   :  { %4466 = vmatpush1.bf16.msra.mxu0 %v12198_v20  ;;  %v12209_v20 = vld [vmem:[#allocation44_spill] sm:$0xff] }
 0x9cc   :  { %4507 = vmatpush1.bf16.msra.mxu1 %v12199_v36  ;;  %4467 = vmatprep.subr.bf16.mxu0 %v12200_v21  ;;  %v12210_v36 = vld [vmem:[#allocation45_spill] sm:$0xff]  ;;  %v12211_v21 = vld [vmem:[#allocation46_spill] sm:$0xff] }
 0x9cd   :  { %4508 = vmatprep.subr.bf16.mxu1 %v12201_v44  ;;  %v12212_v44 = vld [vmem:[#allocation47_spill] sm:$0xff] }
 0x9cf   :  { %4468 = vmatpush1.bf16.msra.mxu0 %v12202_v26  ;;  %v12213_v26 = vld [vmem:[#allocation48_spill] sm:$0xff] }
 0x9d0   :  { %4509 = vmatpush1.bf16.msra.mxu1 %v12203_v8  ;;  %4469 = vmatprep.subr.bf16.mxu0 %v12204_v61  ;;  %v12214_v8 = vld [vmem:[#allocation49_spill] sm:$0xff]  ;;  %v12215_v61 = vld [vmem:[#allocation50_spill] sm:$0xff] }
 0x9d1   :  { %4510 = vmatprep.subr.bf16.mxu1 %v12205_v39  ;;  %v12216_v39 = vld [vmem:[#allocation51_spill] sm:$0xff] }
 0x9d3   :  { %4470 = vmatpush1.bf16.msra.mxu0 %v12206_v5  ;;  %v12217_v5 = vld [vmem:[#allocation52_spill] sm:$0xff] }
 0x9d4   :  { %4511 = vmatpush1.bf16.msra.mxu1 %v12207_v29  ;;  %4471 = vmatprep.subr.bf16.mxu0 %v12208_v62  ;;  %v12218_v29 = vld [vmem:[#allocation53_spill] sm:$0xff]  ;;  %v12219_v62 = vld [vmem:[#allocation54_spill] sm:$0xff] }
 0x9d5   :  { %4512 = vmatprep.subr.bf16.mxu1 %v12209_v20  ;;  %v12220_v20 = vld [vmem:[#allocation55_spill] sm:$0xff] }
 0x9d7   :  { %4472 = vmatpush1.bf16.msra.mxu0 %v12210_v36  ;;  %v12221_v36 = vld [vmem:[#allocation56_spill] sm:$0xff] }
 0x9d8   :  { %4513 = vmatpush1.bf16.msra.mxu1 %v12211_v21  ;;  %4473 = vmatprep.subr.bf16.mxu0 %v12212_v44  ;;  %v12222_v21 = vld [vmem:[#allocation57_spill] sm:$0xff]  ;;  %v12223_v44 = vld [vmem:[#allocation58_spill] sm:$0xff] }
 0x9d9   :  { %4514 = vmatprep.subr.bf16.mxu1 %v12213_v26  ;;  %v12224_v26 = vld [vmem:[#allocation59_spill] sm:$0xff] }
 0x9db   :  { %4474 = vmatpush1.bf16.msra.mxu0 %v12214_v8  ;;  %v12225_v8 = vld [vmem:[#allocation60_spill] sm:$0xff] }
 0x9dc   :  { %4515 = vmatpush1.bf16.msra.mxu1 %v12215_v61  ;;  %4475 = vmatprep.subr.bf16.mxu0 %v12216_v39  ;;  %v12226_v61 = vld [vmem:[#allocation61_spill] sm:$0xff]  ;;  %v12227_v39 = vld [vmem:[#allocation62_spill] sm:$0xff] }
 0x9dd   :  { %4516 = vmatprep.subr.bf16.mxu1 %v12217_v5  ;;  %v12228_v5 = vld [vmem:[#allocation63_spill] sm:$0xff] }
 0x9df   :  { %4476 = vmatpush1.bf16.msra.mxu0 %v12218_v29  ;;  %v12229_v29 = vld [vmem:[#allocation64_spill] sm:$0xff] }
 0x9e0   :  { %4517 = vmatpush1.bf16.msra.mxu1 %v12219_v62  ;;  %4477 = vmatprep.subr.bf16.mxu0 %v12220_v20  ;;  %v12230_v62 = vld [vmem:[#allocation65_spill] sm:$0xff]  ;;  %v12231_v20 = vld [vmem:[#allocation66_spill] sm:$0xff] }
 0x9e1   :  { %4518 = vmatprep.subr.bf16.mxu1 %v12221_v36  ;;  %v12232_v36 = vld [vmem:[#allocation67_spill] sm:$0xff] }
 0x9e3   :  { %4478 = vmatpush1.bf16.msra.mxu0 %v12222_v21  ;;  %v12233_v21 = vld [vmem:[#allocation68_spill] sm:$0xff] }
 0x9e4   :  { %4519 = vmatpush1.bf16.msra.mxu1 %v12223_v44  ;;  %4479 = vmatprep.subr.bf16.mxu0 %v12224_v26  ;;  %v12234_v44 = vld [vmem:[#allocation69_spill] sm:$0xff]  ;;  %v12235_v26 = vld [vmem:[#allocation70_spill] sm:$0xff] }
 0x9e5   :  { %4520 = vmatprep.subr.bf16.mxu1 %v12225_v8  ;;  %v12236_v8 = vld [vmem:[#allocation71_spill] sm:$0xff] }
 0x9e7   :  { %4480 = vmatpush1.bf16.msra.mxu0 %v12226_v61  ;;  %v12237_v61 = vld [vmem:[#allocation72_spill] sm:$0xff] }
 0x9e8   :  { %4521 = vmatpush1.bf16.msra.mxu1 %v12227_v39  ;;  %4481 = vmatprep.subr.bf16.mxu0 %v12228_v5  ;;  %v12238_v5 = vld [vmem:[#allocation235_spill] sm:$0xff] }
 0x9e9   :  { %4522 = vmatprep.subr.bf16.mxu1 %v12229_v29 }
 0x9eb   :  { %4482 = vmatpush1.bf16.msra.mxu0 %v12230_v62  ;;  %v12239_v62 = vld [vmem:[#allocation237_spill] sm:$0xff] }
 0x9ec   :  { %4523 = vmatpush1.bf16.msra.mxu1 %v12231_v20  ;;  %4483 = vmatprep.subr.bf16.mxu0 %v12232_v36  ;;  %v12240_v20 = vld [vmem:[#allocation238_spill] sm:$0xff] }
 0x9ed   :  { %4524 = vmatprep.subr.bf16.mxu1 %v12233_v21  ;;  %v12241_v21 = vld [vmem:[#allocation240_spill] sm:$0xff] }
 0x9ef   :  { %4484 = vmatpush1.bf16.msra.mxu0 %v12234_v44 }
 0x9f0   :  { %4525 = vmatpush1.bf16.msra.mxu1 %v12235_v26  ;;  %4535 = vmatprep.subr.bf16.mxu0 %v12236_v8  ;;  %v12242_v8 = vld [vmem:[#allocation300_spill] sm:$0xff] }
 0x9f1   :  { %4576 = vmatprep.subr.bf16.mxu1 %v12237_v61 }
 0xa45   :  { %v4271_v39 = vpop.f32.mrb[72].mxu0 }
 0xa46   :  { %v4410_v60 = vadd.f32 %v4271_v39, %v12238_v5  ;;  %v4312_v29 = vpop.f32.mrb[72].mxu1  ;;  %v4273_v46 = vpop.f32.mrb[73].mxu0 }
 0xa47   :  { %v4412_v35 = vadd.f32 %v4312_v29, %v12239_v62  ;;  %v4411_v16 = vadd.f32 %v4273_v46, %v12240_v20  ;;  %v4314_v36 = vpop.f32.mrb[73].mxu1  ;;  %v4275_v31 = vpop.f32.mrb[74].mxu0  ;;  %v12244_v62 = vld [vmem:[#allocation303_spill] sm:$0xff] }
 0xa48   :  { %v4413_v28 = vadd.f32 %v4314_v36, %v12241_v21  ;;  %v4316_v44 = vpop.f32.mrb[74].mxu1  ;;  %v4276_v3 = vpop.f32.mrb[75].mxu0 }
 0xa49   :  { %v4317_v26 = vpop.f32.mrb[75].mxu1  ;;  %6053 = vtanh.f32 %v4412_v35  ;;  %v12245_v44 = vld [vmem:[#allocation304_spill] sm:$0xff] }
 0xa4a   :  { %6055 = vtanh.f32 %v4410_v60 }
 0xa4b   :  { %6057 = vtanh.f32 %v4413_v28 }
 0xa4c   :  { %6059 = vtanh.f32 %v4411_v16 }
 0xa53   :  { %v6054_v0 = vpop.eup %6053 }
 0xa54   :  { %v6056_v60 = vpop.eup %6055  ;;  %v4430_v21 = vmul.f32 0.5, %v6054_v0 }
 0xa55   :  { %v6058_v36 = vpop.eup %6057 }
 0xa56   :  { %v4431_v16 = vmul.f32 0.5, %v6058_v36  ;;  %v4432_v47 = vadd.f32 0.5, %v4430_v21 }
 0xa85   :  { %v4353_v61 = vpop.f32.mrb[76].mxu0 }
 0xa86   :  { %v4414_v39 = vadd.f32 %v4353_v61, %v12242_v8  ;;  %v4394_v5 = vpop.f32.mrb[76].mxu1  ;;  %v4355_v10 = vpop.f32.mrb[77].mxu0  ;;  %v4426_v61 = vmul.f32 0.5, %v6056_v60 }
 0xa87   :  { %v4416_v29 = vadd.f32 %v4394_v5, %v12243_v42  ;;  %v4415_v46 = vadd.f32 %v4355_v10, %v12244_v62  ;;  %v4396_v20 = vpop.f32.mrb[77].mxu1  ;;  %v4357_v31 = vpop.f32.mrb[78].mxu0  ;;  %v4433_v5 = vadd.f32 0.5, %v4431_v16 }
 0xa88   :  { %6061 = vtanh.f32 %v4414_v39  ;;  %v4417_v3 = vadd.f32 %v4396_v20, %v12245_v44  ;;  %v4398_v26 = vpop.f32.mrb[78].mxu1  ;;  %v4358_v35 = vpop.f32.mrb[79].mxu0  ;;  %v4428_v10 = vadd.f32 0.5, %v4426_v61  ;;  %v4438_v39 = vmul.f32 %v4432_v47, %v9360_v23 }
 0xa89   :  { %v4399_v28 = vpop.f32.mrb[79].mxu1  ;;  %6063 = vtanh.f32 %v4415_v46  ;;  %v6060_v8 = vpop.eup %6059  ;;  %v4439_v26 = vmul.f32 %v4433_v5, %v9363_v57 }
 0xa8a   :  { %v4427_v42 = vmul.f32 0.5, %v6060_v8  ;;  %6065 = vtanh.f32 %v4416_v29 }
 0xa8b   :  { %6067 = vtanh.f32 %v4417_v3 }
 0xa8c   :  { %v4429_v20 = vadd.f32 0.5, %v4427_v42 }
 0xa92   :  { %v6062_v62 = vpop.eup %6061 }
 0xa93   :  { %v4440_v31 = vmul.f32 %v6062_v62, %v4428_v10  ;;  %v6064_v44 = vpop.eup %6063 }
 0xa94   :  { %v4441_v0 = vmul.f32 %v6064_v44, %v4429_v20  ;;  %v6066_v60 = vpop.eup %6065  ;;  %v12246_v20 = vld [vmem:[#allocation111_spill] sm:$0xff]  ;;  %v12248_v44 = vld [vmem:[#allocation113_spill] sm:$0xff] }
 0xa95   :  { %v9654_v35 = vadd.f32 %v4440_v31, %v4438_v39  ;;  %v6068_v29 = vpop.eup %6067  ;;  %v4434_v3 = vmul.f32 0.5, %v6066_v60  ;;  %v12247_v31 = vld [vmem:[#allocation112_spill] sm:$0xff] }
 0xa96   :  { %v9657_v46 = vadd.f32 %v4441_v0, %v4439_v26  ;;  %v4435_v28 = vmul.f32 0.5, %v6068_v29  ;;  %v12249_v26 = vld [vmem:[#allocation114_spill] sm:$0xff]  ;;  %v12250_v0 = vld [vmem:[#allocation115_spill] sm:$0xff]  ;;  %v12251_v60 = vld [vmem:[#allocation116_spill] sm:$0xff] }
 0xa97   :  { %6069 = vtanh.f32 %v9654_v35  ;;  %v4436_v36 = vadd.f32 0.5, %v4434_v3  ;;  %v12252_v29 = vld [vmem:[#allocation117_spill] sm:$0xff]  ;;  %v12253_v3 = vld [vmem:[#allocation118_spill] sm:$0xff] }
 0xa98   :  { %6071 = vtanh.f32 %v9657_v46  ;;  %v4437_v21 = vadd.f32 0.5, %v4435_v28  ;;  %v12254_v28 = vld [vmem:[#allocation119_spill] sm:$0xff] }
 0xaa1   :  { %v6070_v23 = vpop.eup %6069 }
 0xaa2   :  { %v4446_v47 = vmul.f32 %v6070_v23, %v4436_v36  ;;  %v6072_v8 = vpop.eup %6071  ;;  %v12255_v36 = vld [vmem:[#allocation120_spill] sm:$0xff]  ;;  %v12256_v23 = vld [vmem:[#allocation121_spill] sm:$0xff] }
 0xaa3   :  { %v4447_v61 = vmul.f32 %v6072_v8, %v4437_v21  ;;  %v12258_v21 = vld [vmem:[#allocation123_spill] sm:$0xff]  ;;  %v12259_v8 = vld [vmem:[#allocation124_spill] sm:$0xff] }
 0xaa4   :  { %v5241_v57 = vmax.f32 %v4446_v47, 0.0  ;;  %v9663_v5 = vpack.c.bf16 %v4446_v47, %v4446_v47  ;;  %v12257_v47 = vld [vmem:[#allocation122_spill] sm:$0xff] }
 0xaa5   :  { %v9660_v16 = vpack.c.bf16 %v4447_v61, %v4447_v61  ;;  %v5242_v42 = vmax.f32 %v4447_v61, 0.0  ;;  %v12260_v61 = vld [vmem:[#allocation125_spill] sm:$0xff] }
 0xaa6   :  { %v5269_v10 = vmul.f32 %v8184_v56, %v5241_v57  ;;  %v12261_v57 = vld [vmem:[#allocation126_spill] sm:$0xff] }
 0xaa7   :  { %4485 = vmatprep.mubr.bf16.mxu0 %v9660_v16  ;;  %4526 = vmatprep.mubr.bf16.mxu1 %v9660_v16  ;;  %v5270_v62 = vmul.f32 %v8188_v24, %v5242_v42  ;;  %v12262_v42 = vld [vmem:[#allocation127_spill] sm:$0xff] }
 0xaa8   :  { %4486 = vmatmul.mubr.bf16.vlgmr.msra.gmra.mrb[80].mxu0 %v9663_v5  ;;  %4527 = vmatmul.mubr.bf16.vlgmr.msra.gmra.mrb[80].mxu1 %v9663_v5 }
 0xaa9   :  { %4536 = vmatpush1.bf16.msra.mxu0 %v11116_v55  ;;  %4577 = vmatpush1.bf16.msra.mxu1 %v11117_v17  ;;  %v5290_v39 = vadd.f32 %v5270_v62, %v5269_v10  ;;  %v12263_v10 = vld [vmem:[#allocation128_spill] sm:$0xff]  ;;  %v12264_v62 = vld [vmem:[#allocation129_spill] sm:$0xff] }
 0xaaa   :  { %4567 = vmatprep.mubr.bf16.mxu0 %v9660_v16  ;;  %4608 = vmatprep.mubr.bf16.mxu1 %v9660_v16 }
 0xaab   :  { %5291 = vadd.xlane.f32.xlu1 %v5290_v39  ;;  %4537 = vmatprep.subr.bf16.mxu0 %v11118_v34  ;;  %v12265_v39 = vld [vmem:[#allocation130_spill] sm:$0xff] }
 0xaac   :  { %4578 = vmatprep.subr.bf16.mxu1 %v11119_v33 }
 0xaad   :  { %4538 = vmatpush1.bf16.msra.mxu0 %v11120_v41  ;;  %4579 = vmatpush1.bf16.msra.mxu1 %v11121_v14 }
 0xaae   :  { %4539 = vmatprep.subr.bf16.mxu0 %v11122_v22  ;;  %4580 = vmatprep.subr.bf16.mxu1 %v11123_v40 }
 0xab1   :  { %4540 = vmatpush1.bf16.msra.mxu0 %v11124_v9  ;;  %4581 = vmatpush1.bf16.msra.mxu1 %v11342_v52 }
 0xab2   :  { %4541 = vmatprep.subr.bf16.mxu0 %v11343_v43  ;;  %4582 = vmatprep.subr.bf16.mxu1 %v11344_v53 }
 0xab5   :  { %4542 = vmatpush1.bf16.msra.mxu0 %v11345_v54  ;;  %4583 = vmatpush1.bf16.msra.mxu1 %v11346_v30 }
 0xab6   :  { %4543 = vmatprep.subr.bf16.mxu0 %v11347_v51  ;;  %4584 = vmatprep.subr.bf16.mxu1 %v11348_v6 }
 0xab9   :  { %4544 = vmatpush1.bf16.msra.mxu0 %v11349_v37  ;;  %4585 = vmatpush1.bf16.msra.mxu1 %v11350_v38 }
 0xaba   :  { %4545 = vmatprep.subr.bf16.mxu0 %v11568_v19  ;;  %4586 = vmatprep.subr.bf16.mxu1 %v11569_v58 }
 0xabd   :  { %4546 = vmatpush1.bf16.msra.mxu0 %v11570_v1  ;;  %4587 = vmatpush1.bf16.msra.mxu1 %v11571_v11 }
 0xabe   :  { %4547 = vmatprep.subr.bf16.mxu0 %v11572_v7  ;;  %4588 = vmatprep.subr.bf16.mxu1 %v11573_v50 }
 0xac1   :  { %4548 = vmatpush1.bf16.msra.mxu0 %v11574_v27  ;;  %4589 = vmatpush1.bf16.msra.mxu1 %v11575_v18 }
 0xac2   :  { %4549 = vmatprep.subr.bf16.mxu0 %v11576_v32  ;;  %4590 = vmatprep.subr.bf16.mxu1 %v11794_v4 }
 0xac5   :  { %4550 = vmatpush1.bf16.msra.mxu0 %v11795_v13  ;;  %4591 = vmatpush1.bf16.msra.mxu1 %v11796_v63 }
 0xac6   :  { %4551 = vmatprep.subr.bf16.mxu0 %v11797_v25  ;;  %4592 = vmatprep.subr.bf16.mxu1 %v11798_v45 }
 0xac9   :  { %4552 = vmatpush1.bf16.msra.mxu0 %v11799_v48  ;;  %4593 = vmatpush1.bf16.msra.mxu1 %v11800_v15 }
 0xaca   :  { %4553 = vmatprep.subr.bf16.mxu0 %v11801_v49  ;;  %4594 = vmatprep.subr.bf16.mxu1 %v11802_v59 }
 0xacd   :  { %4554 = vmatpush1.bf16.msra.mxu0 %v12020_v12  ;;  %4595 = vmatpush1.bf16.msra.mxu1 %v12021_v2 }
 0xace   :  { %4555 = vmatprep.subr.bf16.mxu0 %v12246_v20  ;;  %4596 = vmatprep.subr.bf16.mxu1 %v12247_v31 }
 0xad1   :  { %4556 = vmatpush1.bf16.msra.mxu0 %v12248_v44  ;;  %4597 = vmatpush1.bf16.msra.mxu1 %v12249_v26  ;;  %v12469_v44 = vld [vmem:[#allocation309_spill] sm:$0xff] }
 0xad2   :  { %4557 = vmatprep.subr.bf16.mxu0 %v12250_v0  ;;  %4598 = vmatprep.subr.bf16.mxu1 %v12251_v60 }
 0xad5   :  { %4558 = vmatpush1.bf16.msra.mxu0 %v12252_v29  ;;  %4599 = vmatpush1.bf16.msra.mxu1 %v12253_v3 }
 0xad6   :  { %4559 = vmatprep.subr.bf16.mxu0 %v12254_v28  ;;  %4600 = vmatprep.subr.bf16.mxu1 %v12255_v36  ;;  %v12266_v36 = vld [vmem:[#allocation131_spill] sm:$0xff] }
 0xad9   :  { %4560 = vmatpush1.bf16.msra.mxu0 %v12256_v23  ;;  %4601 = vmatpush1.bf16.msra.mxu1 %v12257_v47  ;;  %v12267_v23 = vld [vmem:[#allocation132_spill] sm:$0xff]  ;;  %v12268_v47 = vld [vmem:[#allocation133_spill] sm:$0xff] }
 0xada   :  { %4561 = vmatprep.subr.bf16.mxu0 %v12258_v21  ;;  %4602 = vmatprep.subr.bf16.mxu1 %v12259_v8  ;;  %v12269_v21 = vld [vmem:[#allocation134_spill] sm:$0xff]  ;;  %v12270_v8 = vld [vmem:[#allocation135_spill] sm:$0xff] }
 0xadd   :  { %4562 = vmatpush1.bf16.msra.mxu0 %v12260_v61  ;;  %4603 = vmatpush1.bf16.msra.mxu1 %v12261_v57  ;;  %v12271_v61 = vld [vmem:[#allocation136_spill] sm:$0xff]  ;;  %v12284_v57 = vld [vmem:[#allocation149_spill] sm:$0xff] }
 0xade   :  { %4563 = vmatprep.subr.bf16.mxu0 %v12262_v42  ;;  %4604 = vmatprep.subr.bf16.mxu1 %v12263_v10  ;;  %v12272_v10 = vld [vmem:[#allocation137_spill] sm:$0xff]  ;;  %v12282_v42 = vld [vmem:[#allocation147_spill] sm:$0xff] }
 0xae1   :  { %4564 = vmatpush1.bf16.msra.mxu0 %v12264_v62  ;;  %4605 = vmatpush1.bf16.msra.mxu1 %v12265_v39  ;;  %v12273_v39 = vld [vmem:[#allocation138_spill] sm:$0xff]  ;;  %v12280_v62 = vld [vmem:[#allocation145_spill] sm:$0xff] }
 0xae2   :  { %4565 = vmatprep.subr.bf16.mxu0 %v12266_v36  ;;  %4606 = vmatprep.subr.bf16.mxu1 %v12267_v23  ;;  %v12274_v23 = vld [vmem:[#allocation139_spill] sm:$0xff]  ;;  %v12279_v36 = vld [vmem:[#allocation144_spill] sm:$0xff] }
 0xae5   :  { %4566 = vmatpush1.bf16.msra.mxu0 %v12268_v47  ;;  %4607 = vmatpush1.bf16.msra.mxu1 %v12269_v21  ;;  %v12275_v47 = vld [vmem:[#allocation140_spill] sm:$0xff]  ;;  %v12276_v21 = vld [vmem:[#allocation141_spill] sm:$0xff] }
 0xae6   :  { %4617 = vmatprep.subr.bf16.mxu0 %v12270_v8  ;;  %4658 = vmatprep.subr.bf16.mxu1 %v12271_v61  ;;  %v12277_v8 = vld [vmem:[#allocation142_spill] sm:$0xff]  ;;  %v12278_v61 = vld [vmem:[#allocation143_spill] sm:$0xff] }
 0xae8   :  { %4568 = vmatmul.mubr.bf16.vlgmr.msra.gmra.mrb[84].mxu0 %v9663_v5  ;;  %4609 = vmatmul.mubr.bf16.vlgmr.msra.gmra.mrb[84].mxu1 %v9663_v5 }
 0xae9   :  { %4618 = vmatpush1.bf16.msra.mxu0 %v12272_v10  ;;  %4649 = vmatprep.mubr.bf16.mxu0 %v9660_v16  ;;  %v12281_v10 = vld [vmem:[#allocation146_spill] sm:$0xff] }
 0xaea   :  { %4659 = vmatpush1.bf16.msra.mxu1 %v12273_v39  ;;  %4690 = vmatprep.mubr.bf16.mxu1 %v9660_v16  ;;  %v12283_v39 = vld [vmem:[#allocation148_spill] sm:$0xff] }
 0xaeb   :  { %4619 = vmatprep.subr.bf16.mxu0 %v12274_v23  ;;  %4660 = vmatprep.subr.bf16.mxu1 %v12275_v47  ;;  %v12285_v23 = vld [vmem:[#allocation150_spill] sm:$0xff]  ;;  %v12286_v47 = vld [vmem:[#allocation151_spill] sm:$0xff] }
 0xaed   :  { %4620 = vmatpush1.bf16.msra.mxu0 %v12276_v21  ;;  %v12287_v21 = vld [vmem:[#allocation152_spill] sm:$0xff] }
 0xaee   :  { %4661 = vmatpush1.bf16.msra.mxu1 %v12277_v8  ;;  %4621 = vmatprep.subr.bf16.mxu0 %v12278_v61  ;;  %v12288_v8 = vld [vmem:[#allocation153_spill] sm:$0xff]  ;;  %v12289_v61 = vld [vmem:[#allocation154_spill] sm:$0xff] }
 0xaef   :  { %4662 = vmatprep.subr.bf16.mxu1 %v12279_v36  ;;  %v12290_v36 = vld [vmem:[#allocation155_spill] sm:$0xff] }
 0xaf1   :  { %4622 = vmatpush1.bf16.msra.mxu0 %v12280_v62  ;;  %v12291_v62 = vld [vmem:[#allocation156_spill] sm:$0xff] }
 0xaf2   :  { %4663 = vmatpush1.bf16.msra.mxu1 %v12281_v10  ;;  %4623 = vmatprep.subr.bf16.mxu0 %v12282_v42  ;;  %v12292_v10 = vld [vmem:[#allocation157_spill] sm:$0xff]  ;;  %v12293_v42 = vld [vmem:[#allocation158_spill] sm:$0xff] }
 0xaf3   :  { %4664 = vmatprep.subr.bf16.mxu1 %v12283_v39  ;;  %v12294_v39 = vld [vmem:[#allocation159_spill] sm:$0xff] }
 0xaf5   :  { %4624 = vmatpush1.bf16.msra.mxu0 %v12284_v57  ;;  %v12295_v57 = vld [vmem:[#allocation160_spill] sm:$0xff] }
 0xaf6   :  { %4665 = vmatpush1.bf16.msra.mxu1 %v12285_v23  ;;  %4625 = vmatprep.subr.bf16.mxu0 %v12286_v47  ;;  %v12296_v23 = vld [vmem:[#allocation161_spill] sm:$0xff]  ;;  %v12297_v47 = vld [vmem:[#allocation162_spill] sm:$0xff] }
 0xaf7   :  { %4666 = vmatprep.subr.bf16.mxu1 %v12287_v21  ;;  %v12298_v21 = vld [vmem:[#allocation163_spill] sm:$0xff] }
 0xaf9   :  { %4626 = vmatpush1.bf16.msra.mxu0 %v12288_v8  ;;  %v12299_v8 = vld [vmem:[#allocation164_spill] sm:$0xff] }
 0xafa   :  { %4667 = vmatpush1.bf16.msra.mxu1 %v12289_v61  ;;  %4627 = vmatprep.subr.bf16.mxu0 %v12290_v36  ;;  %v12300_v61 = vld [vmem:[#allocation165_spill] sm:$0xff]  ;;  %v12301_v36 = vld [vmem:[#allocation166_spill] sm:$0xff] }
 0xafb   :  { %4668 = vmatprep.subr.bf16.mxu1 %v12291_v62  ;;  %v12302_v62 = vld [vmem:[#allocation167_spill] sm:$0xff] }
 0xafd   :  { %4628 = vmatpush1.bf16.msra.mxu0 %v12292_v10  ;;  %v12303_v10 = vld [vmem:[#allocation168_spill] sm:$0xff] }
 0xafe   :  { %4669 = vmatpush1.bf16.msra.mxu1 %v12293_v42  ;;  %4629 = vmatprep.subr.bf16.mxu0 %v12294_v39  ;;  %v12304_v42 = vld [vmem:[#allocation169_spill] sm:$0xff]  ;;  %v12305_v39 = vld [vmem:[#allocation170_spill] sm:$0xff] }
 0xaff   :  { %4670 = vmatprep.subr.bf16.mxu1 %v12295_v57  ;;  %v12306_v57 = vld [vmem:[#allocation171_spill] sm:$0xff] }
 0xb01   :  { %4630 = vmatpush1.bf16.msra.mxu0 %v12296_v23  ;;  %v12307_v23 = vld [vmem:[#allocation172_spill] sm:$0xff] }
 0xb02   :  { %4671 = vmatpush1.bf16.msra.mxu1 %v12297_v47  ;;  %4631 = vmatprep.subr.bf16.mxu0 %v12298_v21  ;;  %v12308_v47 = vld [vmem:[#allocation173_spill] sm:$0xff]  ;;  %v12309_v21 = vld [vmem:[#allocation174_spill] sm:$0xff] }
 0xb03   :  { %4672 = vmatprep.subr.bf16.mxu1 %v12299_v8  ;;  %v12310_v8 = vld [vmem:[#allocation175_spill] sm:$0xff] }
 0xb05   :  { %4632 = vmatpush1.bf16.msra.mxu0 %v12300_v61  ;;  %v12311_v61 = vld [vmem:[#allocation176_spill] sm:$0xff] }
 0xb06   :  { %4673 = vmatpush1.bf16.msra.mxu1 %v12301_v36  ;;  %4633 = vmatprep.subr.bf16.mxu0 %v12302_v62  ;;  %v12312_v36 = vld [vmem:[#allocation177_spill] sm:$0xff]  ;;  %v12313_v62 = vld [vmem:[#allocation178_spill] sm:$0xff] }
 0xb07   :  { %4674 = vmatprep.subr.bf16.mxu1 %v12303_v10  ;;  %v12314_v10 = vld [vmem:[#allocation179_spill] sm:$0xff] }
 0xb09   :  { %4634 = vmatpush1.bf16.msra.mxu0 %v12304_v42  ;;  %v12315_v42 = vld [vmem:[#allocation180_spill] sm:$0xff] }
 0xb0a   :  { %4675 = vmatpush1.bf16.msra.mxu1 %v12305_v39  ;;  %4635 = vmatprep.subr.bf16.mxu0 %v12306_v57  ;;  %v12316_v39 = vld [vmem:[#allocation181_spill] sm:$0xff]  ;;  %v12317_v57 = vld [vmem:[#allocation182_spill] sm:$0xff] }
 0xb0b   :  { %4676 = vmatprep.subr.bf16.mxu1 %v12307_v23  ;;  %v12318_v23 = vld [vmem:[#allocation183_spill] sm:$0xff] }
 0xb0d   :  { %4636 = vmatpush1.bf16.msra.mxu0 %v12308_v47  ;;  %v12319_v47 = vld [vmem:[#allocation184_spill] sm:$0xff] }
 0xb0e   :  { %4677 = vmatpush1.bf16.msra.mxu1 %v12309_v21  ;;  %4637 = vmatprep.subr.bf16.mxu0 %v12310_v8  ;;  %v12320_v21 = vld [vmem:[#allocation185_spill] sm:$0xff]  ;;  %v12321_v8 = vld [vmem:[#allocation186_spill] sm:$0xff] }
 0xb0f   :  { %4678 = vmatprep.subr.bf16.mxu1 %v12311_v61  ;;  %v12322_v61 = vld [vmem:[#allocation188_spill] sm:$0xff] }
 0xb11   :  { %4638 = vmatpush1.bf16.msra.mxu0 %v12312_v36  ;;  %v12323_v36 = vld [vmem:[#allocation189_spill] sm:$0xff] }
 0xb12   :  { %4679 = vmatpush1.bf16.msra.mxu1 %v12313_v62  ;;  %4639 = vmatprep.subr.bf16.mxu0 %v12314_v10  ;;  %v12324_v62 = vld [vmem:[#allocation190_spill] sm:$0xff]  ;;  %v12325_v10 = vld [vmem:[#allocation191_spill] sm:$0xff] }
 0xb13   :  { %4680 = vmatprep.subr.bf16.mxu1 %v12315_v42  ;;  %v12326_v42 = vld [vmem:[#allocation192_spill] sm:$0xff] }
 0xb15   :  { %4640 = vmatpush1.bf16.msra.mxu0 %v12316_v39  ;;  %v12327_v39 = vld [vmem:[#allocation193_spill] sm:$0xff] }
 0xb16   :  { %4681 = vmatpush1.bf16.msra.mxu1 %v12317_v57  ;;  %4641 = vmatprep.subr.bf16.mxu0 %v12318_v23  ;;  %v12328_v57 = vld [vmem:[#allocation198_spill] sm:$0xff]  ;;  %v12329_v23 = vld [vmem:[#allocation199_spill] sm:$0xff] }
 0xb17   :  { %4682 = vmatprep.subr.bf16.mxu1 %v12319_v47  ;;  %v12330_v47 = vld [vmem:[#allocation200_spill] sm:$0xff] }
 0xb19   :  { %4642 = vmatpush1.bf16.msra.mxu0 %v12320_v21  ;;  %v12331_v21 = vld [vmem:[#allocation201_spill] sm:$0xff] }
 0xb1a   :  { %4683 = vmatpush1.bf16.msra.mxu1 %v12321_v8  ;;  %4643 = vmatprep.subr.bf16.mxu0 %v12322_v61  ;;  %v12332_v8 = vld [vmem:[#allocation204_spill] sm:$0xff]  ;;  %v12333_v61 = vld [vmem:[#allocation207_spill] sm:$0xff] }
 0xb1b   :  { %4684 = vmatprep.subr.bf16.mxu1 %v12323_v36  ;;  %v12334_v36 = vld [vmem:[#allocation209_spill] sm:$0xff] }
 0xb1d   :  { %4644 = vmatpush1.bf16.msra.mxu0 %v12324_v62  ;;  %v12335_v62 = vld [vmem:[#allocation210_spill] sm:$0xff] }
 0xb1e   :  { %4685 = vmatpush1.bf16.msra.mxu1 %v12325_v10  ;;  %4645 = vmatprep.subr.bf16.mxu0 %v12326_v42  ;;  %v12346_v42 = vld [vmem:[#allocation233_spill] sm:$0xff] }
 0xb1f   :  { %4686 = vmatprep.subr.bf16.mxu1 %v12327_v39  ;;  %v12336_v39 = vld [vmem:[#allocation212_spill] sm:$0xff] }
 0xb21   :  { %4646 = vmatpush1.bf16.msra.mxu0 %v12328_v57  ;;  %v12344_v57 = vld [vmem:[#allocation228_spill] sm:$0xff] }
 0xb22   :  { %4687 = vmatpush1.bf16.msra.mxu1 %v12329_v23  ;;  %4647 = vmatprep.subr.bf16.mxu0 %v12330_v47  ;;  %v12337_v23 = vld [vmem:[#allocation215_spill] sm:$0xff]  ;;  %v12343_v47 = vld [vmem:[#allocation226_spill] sm:$0xff] }
 0xb23   :  { %4688 = vmatprep.subr.bf16.mxu1 %v12331_v21  ;;  %v12338_v21 = vld [vmem:[#allocation217_spill] sm:$0xff] }
 0xb25   :  { %4648 = vmatpush1.bf16.msra.mxu0 %v12332_v8  ;;  %v12339_v8 = vld [vmem:[#allocation218_spill] sm:$0xff] }
 0xb26   :  { %4689 = vmatpush1.bf16.msra.mxu1 %v12333_v61  ;;  %4699 = vmatprep.subr.bf16.mxu0 %v12334_v36  ;;  %v12340_v61 = vld [vmem:[#allocation220_spill] sm:$0xff]  ;;  %v12341_v36 = vld [vmem:[#allocation223_spill] sm:$0xff] }
 0xb27   :  { %4740 = vmatprep.subr.bf16.mxu1 %v12335_v62  ;;  %v12342_v62 = vld [vmem:[#allocation225_spill] sm:$0xff] }
 0xb28   :  { %4650 = vmatmul.mubr.bf16.vlgmr.msra.gmra.mrb[80].mxu0 %v9663_v5 }
 0xb29   :  { %4691 = vmatmul.mubr.bf16.vlgmr.msra.gmra.mrb[80].mxu1 %v9663_v5  ;;  %4700 = vmatpush1.bf16.msra.mxu0 %v12336_v39  ;;  %v12345_v39 = vld [vmem:[#allocation231_spill] sm:$0xff] }
 0xb2a   :  { %4731 = vmatprep.mubr.bf16.mxu0 %v9660_v16  ;;  %4741 = vmatpush1.bf16.msra.mxu1 %v12337_v23  ;;  %v12347_v23 = vld [vmem:[#allocation234_spill] sm:$0xff] }
 0xb2b   :  { %4772 = vmatprep.mubr.bf16.mxu1 %v9660_v16  ;;  %4701 = vmatprep.subr.bf16.mxu0 %v12338_v21  ;;  %v12348_v16 = vld [vmem:[#allocation236_spill] sm:$0xff]  ;;  %v12349_v21 = vld [vmem:[#allocation239_spill] sm:$0xff] }
 0xb2c   :  { %4742 = vmatprep.subr.bf16.mxu1 %v12339_v8  ;;  %v12350_v8 = vld [vmem:[#allocation241_spill] sm:$0xff] }
 0xb2d   :  { %4702 = vmatpush1.bf16.msra.mxu0 %v12340_v61  ;;  %v12351_v61 = vld [vmem:[#allocation242_spill] sm:$0xff] }
 0xb2e   :  { %4743 = vmatpush1.bf16.msra.mxu1 %v12341_v36  ;;  %4703 = vmatprep.subr.bf16.mxu0 %v12342_v62  ;;  %v12352_v36 = vld [vmem:[#allocation244_spill] sm:$0xff]  ;;  %v12353_v62 = vld [vmem:[#allocation247_spill] sm:$0xff] }
 0xb2f   :  { %4744 = vmatprep.subr.bf16.mxu1 %v12343_v47  ;;  %v12354_v47 = vld [vmem:[#allocation249_spill] sm:$0xff] }
 0xb31   :  { %4704 = vmatpush1.bf16.msra.mxu0 %v12344_v57  ;;  %v12355_v57 = vld [vmem:[#allocation250_spill] sm:$0xff] }
 0xb32   :  { %4745 = vmatpush1.bf16.msra.mxu1 %v12345_v39  ;;  %4705 = vmatprep.subr.bf16.mxu0 %v12346_v42  ;;  %v12356_v39 = vld [vmem:[#allocation252_spill] sm:$0xff]  ;;  %v12357_v42 = vld [vmem:[#allocation255_spill] sm:$0xff] }
 0xb33   :  { %4746 = vmatprep.subr.bf16.mxu1 %v12347_v23  ;;  %v12358_v23 = vld [vmem:[#allocation257_spill] sm:$0xff] }
 0xb35   :  { %4706 = vmatpush1.bf16.msra.mxu0 %v12348_v16  ;;  %v12359_v16 = vld [vmem:[#allocation258_spill] sm:$0xff] }
 0xb36   :  { %4747 = vmatpush1.bf16.msra.mxu1 %v12349_v21  ;;  %4707 = vmatprep.subr.bf16.mxu0 %v12350_v8  ;;  %v12360_v21 = vld [vmem:[#allocation263_spill] sm:$0xff]  ;;  %v12361_v8 = vld [vmem:[#allocation264_spill] sm:$0xff] }
 0xb37   :  { %4748 = vmatprep.subr.bf16.mxu1 %v12351_v61  ;;  %v12362_v61 = vld [vmem:[#allocation265_spill] sm:$0xff] }
 0xb39   :  { %4708 = vmatpush1.bf16.msra.mxu0 %v12352_v36  ;;  %v12363_v36 = vld [vmem:[#allocation266_spill] sm:$0xff] }
 0xb3a   :  { %4749 = vmatpush1.bf16.msra.mxu1 %v12353_v62  ;;  %4709 = vmatprep.subr.bf16.mxu0 %v12354_v47  ;;  %v12364_v62 = vld [vmem:[#allocation267_spill] sm:$0xff]  ;;  %v12365_v47 = vld [vmem:[#allocation270_spill] sm:$0xff] }
 0xb3b   :  { %4750 = vmatprep.subr.bf16.mxu1 %v12355_v57  ;;  %v12366_v57 = vld [vmem:[#allocation273_spill] sm:$0xff] }
 0xb3d   :  { %4710 = vmatpush1.bf16.msra.mxu0 %v12356_v39  ;;  %v12367_v39 = vld [vmem:[#allocation274_spill] sm:$0xff] }
 0xb3e   :  { %4751 = vmatpush1.bf16.msra.mxu1 %v12357_v42  ;;  %4711 = vmatprep.subr.bf16.mxu0 %v12358_v23  ;;  %v12368_v42 = vld [vmem:[#allocation275_spill] sm:$0xff]  ;;  %v12369_v23 = vld [vmem:[#allocation278_spill] sm:$0xff] }
 0xb3f   :  { %4752 = vmatprep.subr.bf16.mxu1 %v12359_v16  ;;  %v12370_v16 = vld [vmem:[#allocation281_spill] sm:$0xff] }
 0xb41   :  { %4712 = vmatpush1.bf16.msra.mxu0 %v12360_v21  ;;  %v12371_v21 = vld [vmem:[#allocation282_spill] sm:$0xff] }
 0xb42   :  { %4753 = vmatpush1.bf16.msra.mxu1 %v12361_v8  ;;  %4713 = vmatprep.subr.bf16.mxu0 %v12362_v61  ;;  %v12372_v8 = vld [vmem:[#allocation283_spill] sm:$0xff]  ;;  %v12373_v61 = vld [vmem:[#allocation286_spill] sm:$0xff] }
 0xb43   :  { %4754 = vmatprep.subr.bf16.mxu1 %v12363_v36  ;;  %v12374_v36 = vld [vmem:[#allocation289_spill] sm:$0xff] }
 0xb45   :  { %4714 = vmatpush1.bf16.msra.mxu0 %v12364_v62  ;;  %v12375_v62 = vld [vmem:[#allocation290_spill] sm:$0xff] }
 0xb46   :  { %4755 = vmatpush1.bf16.msra.mxu1 %v12365_v47  ;;  %4715 = vmatprep.subr.bf16.mxu0 %v12366_v57  ;;  %v12376_v47 = vld [vmem:[#allocation291_spill] sm:$0xff]  ;;  %v12377_v57 = vld [vmem:[#allocation294_spill] sm:$0xff] }
 0xb47   :  { %4756 = vmatprep.subr.bf16.mxu1 %v12367_v39  ;;  %v12378_v39 = vld [vmem:[#allocation297_spill] sm:$0xff] }
 0xb49   :  { %4716 = vmatpush1.bf16.msra.mxu0 %v12368_v42  ;;  %v12379_v42 = vld [vmem:[#allocation298_spill] sm:$0xff] }
 0xb4a   :  { %4757 = vmatpush1.bf16.msra.mxu1 %v12369_v23  ;;  %4717 = vmatprep.subr.bf16.mxu0 %v12370_v16  ;;  %v12380_v23 = vld [vmem:[#allocation299_spill] sm:$0xff]  ;;  %v12381_v16 = vld [vmem:[#allocation302_spill] sm:$0xff] }
 0xb4b   :  { %4758 = vmatprep.subr.bf16.mxu1 %v12371_v21  ;;  %v12382_v21 = vld [vmem:[#allocation305_spill] sm:$0xff] }
 0xb4d   :  { %4718 = vmatpush1.bf16.msra.mxu0 %v12372_v8  ;;  %v12383_v8 = vld [vmem:[#allocation306_spill] sm:$0xff] }
 0xb4e   :  { %4759 = vmatpush1.bf16.msra.mxu1 %v12373_v61  ;;  %4719 = vmatprep.subr.bf16.mxu0 %v12374_v36  ;;  %v12384_v61 = vld [vmem:[#allocation307_spill] sm:$0xff]  ;;  %v12385_v36 = vld [vmem:[#allocation310_spill] sm:$0xff] }
 0xb4f   :  { %4760 = vmatprep.subr.bf16.mxu1 %v12375_v62  ;;  %v12386_v62 = vld [vmem:[#allocation313_spill] sm:$0xff] }
 0xb51   :  { %4720 = vmatpush1.bf16.msra.mxu0 %v12376_v47  ;;  %v12387_v47 = vld [vmem:[#allocation314_spill] sm:$0xff] }
 0xb52   :  { %4761 = vmatpush1.bf16.msra.mxu1 %v12377_v57  ;;  %4721 = vmatprep.subr.bf16.mxu0 %v12378_v39  ;;  %v12388_v57 = vld [vmem:[#allocation315_spill] sm:$0xff]  ;;  %v12389_v39 = vld [vmem:[#allocation318_spill] sm:$0xff] }
 0xb53   :  { %4762 = vmatprep.subr.bf16.mxu1 %v12379_v42  ;;  %v12390_v42 = vld [vmem:[#allocation321_spill] sm:$0xff] }
 0xb55   :  { %4722 = vmatpush1.bf16.msra.mxu0 %v12380_v23  ;;  %v12391_v23 = vld [vmem:[#allocation322_spill] sm:$0xff] }
 0xb56   :  { %4763 = vmatpush1.bf16.msra.mxu1 %v12381_v16  ;;  %4723 = vmatprep.subr.bf16.mxu0 %v12382_v21  ;;  %v12392_v16 = vld [vmem:[#allocation323_spill] sm:$0xff]  ;;  %v12393_v21 = vld [vmem:[#allocation324_spill] sm:$0xff] }
 0xb57   :  { %4764 = vmatprep.subr.bf16.mxu1 %v12383_v8  ;;  %v12394_v8 = vld [vmem:[#allocation325_spill] sm:$0xff] }
 0xb59   :  { %4724 = vmatpush1.bf16.msra.mxu0 %v12384_v61  ;;  %v12395_v61 = vld [vmem:[#allocation326_spill] sm:$0xff] }
 0xb5a   :  { %4765 = vmatpush1.bf16.msra.mxu1 %v12385_v36  ;;  %4725 = vmatprep.subr.bf16.mxu0 %v12386_v62  ;;  %v12396_v36 = vld [vmem:[#allocation327_spill] sm:$0xff]  ;;  %v12397_v62 = vld [vmem:[#allocation328_spill] sm:$0xff] }
 0xb5b   :  { %4766 = vmatprep.subr.bf16.mxu1 %v12387_v47  ;;  %v12398_v47 = vld [vmem:[#allocation7_spill] sm:$0xff] }
 0xb5d   :  { %4726 = vmatpush1.bf16.msra.mxu0 %v12388_v57  ;;  %v12399_v57 = vld [vmem:[#allocation8_spill] sm:$0xff] }
 0xb5e   :  { %4767 = vmatpush1.bf16.msra.mxu1 %v12389_v39  ;;  %4727 = vmatprep.subr.bf16.mxu0 %v12390_v42  ;;  %v12409_v42 = vld [vmem:[#allocation18_spill] sm:$0xff] }
 0xb5f   :  { %4768 = vmatprep.subr.bf16.mxu1 %v12391_v23  ;;  %v12400_v23 = vld [vmem:[#allocation9_spill] sm:$0xff] }
 0xb61   :  { %4728 = vmatpush1.bf16.msra.mxu0 %v12392_v16  ;;  %v12401_v16 = vld [vmem:[#allocation10_spill] sm:$0xff] }
 0xb62   :  { %4769 = vmatpush1.bf16.msra.mxu1 %v12393_v21  ;;  %4729 = vmatprep.subr.bf16.mxu0 %v12394_v8  ;;  %v12402_v21 = vld [vmem:[#allocation11_spill] sm:$0xff]  ;;  %v12403_v8 = vld [vmem:[#allocation12_spill] sm:$0xff] }
 0xb63   :  { %4770 = vmatprep.subr.bf16.mxu1 %v12395_v61  ;;  %v12404_v61 = vld [vmem:[#allocation13_spill] sm:$0xff] }
 0xb65   :  { %4730 = vmatpush1.bf16.msra.mxu0 %v12396_v36  ;;  %v12405_v36 = vld [vmem:[#allocation14_spill] sm:$0xff] }
 0xb66   :  { %4771 = vmatpush1.bf16.msra.mxu1 %v12397_v62  ;;  %4833 = vmatprep.subr.bf16.mxu0 %v12398_v47  ;;  %v12406_v62 = vld [vmem:[#allocation15_spill] sm:$0xff]  ;;  %v12407_v47 = vld [vmem:[#allocation16_spill] sm:$0xff] }
 0xb67   :  { %4874 = vmatprep.subr.bf16.mxu1 %v12399_v57  ;;  %v12408_v57 = vld [vmem:[#allocation17_spill] sm:$0xff] }
 0xb68   :  { %4732 = vmatmul.mubr.bf16.vlgmr.msra.gmra.mrb[84].mxu0 %v9663_v5 }
 0xb69   :  { %4773 = vmatmul.mubr.bf16.vlgmr.msra.gmra.mrb[84].mxu1 %v9663_v5  ;;  %4834 = vmatpush1.bf16.msra.mxu0 %v12400_v23  ;;  %v12410_v5 = vld [vmem:[#allocation19_spill] sm:$0xff]  ;;  %v12411_v23 = vld [vmem:[#allocation20_spill] sm:$0xff] }
 0xb6a   :  { %4875 = vmatpush1.bf16.msra.mxu1 %v12401_v16  ;;  %4835 = vmatprep.subr.bf16.mxu0 %v12402_v21  ;;  %v12412_v16 = vld [vmem:[#allocation21_spill] sm:$0xff]  ;;  %v12413_v21 = vld [vmem:[#allocation22_spill] sm:$0xff] }
 0xb6b   :  { %4876 = vmatprep.subr.bf16.mxu1 %v12403_v8  ;;  %v12414_v8 = vld [vmem:[#allocation23_spill] sm:$0xff] }
 0xb6d   :  { %4836 = vmatpush1.bf16.msra.mxu0 %v12404_v61  ;;  %v12415_v61 = vld [vmem:[#allocation24_spill] sm:$0xff] }
 0xb6e   :  { %4877 = vmatpush1.bf16.msra.mxu1 %v12405_v36  ;;  %4837 = vmatprep.subr.bf16.mxu0 %v12406_v62  ;;  %v12416_v36 = vld [vmem:[#allocation25_spill] sm:$0xff]  ;;  %v12417_v62 = vld [vmem:[#allocation26_spill] sm:$0xff] }
 0xb6f   :  { %4878 = vmatprep.subr.bf16.mxu1 %v12407_v47  ;;  %v12418_v47 = vld [vmem:[#allocation27_spill] sm:$0xff] }
 0xb71   :  { %4838 = vmatpush1.bf16.msra.mxu0 %v12408_v57  ;;  %v12419_v57 = vld [vmem:[#allocation28_spill] sm:$0xff] }
 0xb72   :  { %4879 = vmatpush1.bf16.msra.mxu1 %v12409_v42  ;;  %4839 = vmatprep.subr.bf16.mxu0 %v12410_v5  ;;  %v12420_v42 = vld [vmem:[#allocation29_spill] sm:$0xff]  ;;  %v12421_v5 = vld [vmem:[#allocation30_spill] sm:$0xff] }
 0xb73   :  { %4880 = vmatprep.subr.bf16.mxu1 %v12411_v23  ;;  %v12422_v23 = vld [vmem:[#allocation31_spill] sm:$0xff] }
 0xb75   :  { %4840 = vmatpush1.bf16.msra.mxu0 %v12412_v16  ;;  %v12423_v16 = vld [vmem:[#allocation32_spill] sm:$0xff] }
 0xb76   :  { %4881 = vmatpush1.bf16.msra.mxu1 %v12413_v21  ;;  %4841 = vmatprep.subr.bf16.mxu0 %v12414_v8  ;;  %v12424_v21 = vld [vmem:[#allocation33_spill] sm:$0xff]  ;;  %v12425_v8 = vld [vmem:[#allocation34_spill] sm:$0xff] }
 0xb77   :  { %4882 = vmatprep.subr.bf16.mxu1 %v12415_v61  ;;  %v12426_v61 = vld [vmem:[#allocation35_spill] sm:$0xff] }
 0xb79   :  { %4842 = vmatpush1.bf16.msra.mxu0 %v12416_v36  ;;  %v12427_v36 = vld [vmem:[#allocation36_spill] sm:$0xff] }
 0xb7a   :  { %4883 = vmatpush1.bf16.msra.mxu1 %v12417_v62  ;;  %4843 = vmatprep.subr.bf16.mxu0 %v12418_v47  ;;  %v12428_v62 = vld [vmem:[#allocation37_spill] sm:$0xff]  ;;  %v12429_v47 = vld [vmem:[#allocation38_spill] sm:$0xff] }
 0xb7b   :  { %4884 = vmatprep.subr.bf16.mxu1 %v12419_v57  ;;  %v12430_v57 = vld [vmem:[#allocation39_spill] sm:$0xff] }
 0xb7d   :  { %4844 = vmatpush1.bf16.msra.mxu0 %v12420_v42  ;;  %v12431_v42 = vld [vmem:[#allocation40_spill] sm:$0xff] }
 0xb7e   :  { %4885 = vmatpush1.bf16.msra.mxu1 %v12421_v5  ;;  %4845 = vmatprep.subr.bf16.mxu0 %v12422_v23  ;;  %v12432_v5 = vld [vmem:[#allocation41_spill] sm:$0xff]  ;;  %v12433_v23 = vld [vmem:[#allocation42_spill] sm:$0xff] }
 0xb7f   :  { %4886 = vmatprep.subr.bf16.mxu1 %v12423_v16  ;;  %v12434_v16 = vld [vmem:[#allocation43_spill] sm:$0xff] }
 0xb81   :  { %4846 = vmatpush1.bf16.msra.mxu0 %v12424_v21  ;;  %v12435_v21 = vld [vmem:[#allocation44_spill] sm:$0xff] }
 0xb82   :  { %4887 = vmatpush1.bf16.msra.mxu1 %v12425_v8  ;;  %4847 = vmatprep.subr.bf16.mxu0 %v12426_v61  ;;  %v12436_v8 = vld [vmem:[#allocation45_spill] sm:$0xff]  ;;  %v12437_v61 = vld [vmem:[#allocation46_spill] sm:$0xff] }
 0xb83   :  { %4888 = vmatprep.subr.bf16.mxu1 %v12427_v36  ;;  %v12438_v36 = vld [vmem:[#allocation47_spill] sm:$0xff] }
 0xb85   :  { %4848 = vmatpush1.bf16.msra.mxu0 %v12428_v62  ;;  %v12439_v62 = vld [vmem:[#allocation48_spill] sm:$0xff] }
 0xb86   :  { %4889 = vmatpush1.bf16.msra.mxu1 %v12429_v47  ;;  %4849 = vmatprep.subr.bf16.mxu0 %v12430_v57  ;;  %v12440_v47 = vld [vmem:[#allocation49_spill] sm:$0xff]  ;;  %v12441_v57 = vld [vmem:[#allocation50_spill] sm:$0xff] }
 0xb87   :  { %4890 = vmatprep.subr.bf16.mxu1 %v12431_v42  ;;  %v12442_v42 = vld [vmem:[#allocation51_spill] sm:$0xff] }
 0xb89   :  { %4850 = vmatpush1.bf16.msra.mxu0 %v12432_v5  ;;  %v12443_v5 = vld [vmem:[#allocation52_spill] sm:$0xff] }
 0xb8a   :  { %4891 = vmatpush1.bf16.msra.mxu1 %v12433_v23  ;;  %4851 = vmatprep.subr.bf16.mxu0 %v12434_v16  ;;  %v12444_v23 = vld [vmem:[#allocation53_spill] sm:$0xff]  ;;  %v12445_v16 = vld [vmem:[#allocation54_spill] sm:$0xff] }
 0xb8b   :  { %4892 = vmatprep.subr.bf16.mxu1 %v12435_v21  ;;  %v12446_v21 = vld [vmem:[#allocation55_spill] sm:$0xff] }
 0xb8d   :  { %4852 = vmatpush1.bf16.msra.mxu0 %v12436_v8  ;;  %v12447_v8 = vld [vmem:[#allocation56_spill] sm:$0xff] }
 0xb8e   :  { %4893 = vmatpush1.bf16.msra.mxu1 %v12437_v61  ;;  %4853 = vmatprep.subr.bf16.mxu0 %v12438_v36  ;;  %v12448_v61 = vld [vmem:[#allocation57_spill] sm:$0xff]  ;;  %v12449_v36 = vld [vmem:[#allocation58_spill] sm:$0xff] }
 0xb8f   :  { %4894 = vmatprep.subr.bf16.mxu1 %v12439_v62  ;;  %v12450_v62 = vld [vmem:[#allocation59_spill] sm:$0xff] }
 0xb91   :  { %4854 = vmatpush1.bf16.msra.mxu0 %v12440_v47  ;;  %v12451_v47 = vld [vmem:[#allocation60_spill] sm:$0xff] }
 0xb92   :  { %4895 = vmatpush1.bf16.msra.mxu1 %v12441_v57  ;;  %4855 = vmatprep.subr.bf16.mxu0 %v12442_v42  ;;  %v12452_v57 = vld [vmem:[#allocation61_spill] sm:$0xff]  ;;  %v12453_v42 = vld [vmem:[#allocation62_spill] sm:$0xff] }
 0xb93   :  { %4896 = vmatprep.subr.bf16.mxu1 %v12443_v5  ;;  %v12454_v5 = vld [vmem:[#allocation63_spill] sm:$0xff] }
 0xb95   :  { %4856 = vmatpush1.bf16.msra.mxu0 %v12444_v23  ;;  %v12455_v23 = vld [vmem:[#allocation64_spill] sm:$0xff] }
 0xb96   :  { %4897 = vmatpush1.bf16.msra.mxu1 %v12445_v16  ;;  %4857 = vmatprep.subr.bf16.mxu0 %v12446_v21  ;;  %v12456_v16 = vld [vmem:[#allocation65_spill] sm:$0xff]  ;;  %v12457_v21 = vld [vmem:[#allocation66_spill] sm:$0xff] }
 0xb97   :  { %4898 = vmatprep.subr.bf16.mxu1 %v12447_v8  ;;  %v12458_v8 = vld [vmem:[#allocation67_spill] sm:$0xff] }
 0xb99   :  { %4858 = vmatpush1.bf16.msra.mxu0 %v12448_v61  ;;  %v12459_v61 = vld [vmem:[#allocation68_spill] sm:$0xff] }
 0xb9a   :  { %4899 = vmatpush1.bf16.msra.mxu1 %v12449_v36  ;;  %4859 = vmatprep.subr.bf16.mxu0 %v12450_v62  ;;  %v12460_v36 = vld [vmem:[#allocation69_spill] sm:$0xff]  ;;  %v12461_v62 = vld [vmem:[#allocation70_spill] sm:$0xff] }
 0xb9b   :  { %4900 = vmatprep.subr.bf16.mxu1 %v12451_v47  ;;  %v12462_v47 = vld [vmem:[#allocation71_spill] sm:$0xff] }
 0xb9d   :  { %4860 = vmatpush1.bf16.msra.mxu0 %v12452_v57  ;;  %v12463_v57 = vld [vmem:[#allocation72_spill] sm:$0xff] }
 0xb9e   :  { %4901 = vmatpush1.bf16.msra.mxu1 %v12453_v42  ;;  %4861 = vmatprep.subr.bf16.mxu0 %v12454_v5  ;;  %v12464_v5 = vld [vmem:[#allocation243_spill] sm:$0xff] }
 0xb9f   :  { %4902 = vmatprep.subr.bf16.mxu1 %v12455_v23 }
 0xba1   :  { %4862 = vmatpush1.bf16.msra.mxu0 %v12456_v16  ;;  %v12465_v16 = vld [vmem:[#allocation245_spill] sm:$0xff] }
 0xba2   :  { %4903 = vmatpush1.bf16.msra.mxu1 %v12457_v21  ;;  %4863 = vmatprep.subr.bf16.mxu0 %v12458_v8  ;;  %v12466_v21 = vld [vmem:[#allocation246_spill] sm:$0xff] }
 0xba3   :  { %4904 = vmatprep.subr.bf16.mxu1 %v12459_v61  ;;  %v12467_v61 = vld [vmem:[#allocation248_spill] sm:$0xff] }
 0xba5   :  { %4864 = vmatpush1.bf16.msra.mxu0 %v12460_v36 }
 0xba6   :  { %4905 = vmatpush1.bf16.msra.mxu1 %v12461_v62  ;;  %4915 = vmatprep.subr.bf16.mxu0 %v12462_v47 }
 0xba7   :  { %4956 = vmatprep.subr.bf16.mxu1 %v12463_v57  ;;  %v12468_v57 = vld [vmem:[#allocation308_spill] sm:$0xff] }
 0xbfb   :  { %v4651_v42 = vpop.f32.mrb[80].mxu0 }
 0xbfc   :  { %v4790_v39 = vadd.f32 %v4651_v42, %v12464_v5  ;;  %v4692_v23 = vpop.f32.mrb[80].mxu1  ;;  %v4653_v10 = vpop.f32.mrb[81].mxu0 }
 0xbfd   :  { %v4792_v28 = vadd.f32 %v4692_v23, %v12465_v16  ;;  %v4791_v3 = vadd.f32 %v4653_v10, %v12466_v21  ;;  %v4694_v8 = vpop.f32.mrb[81].mxu1  ;;  %v4655_v29 = vpop.f32.mrb[82].mxu0  ;;  %v12470_v16 = vld [vmem:[#allocation311_spill] sm:$0xff] }
 0xbfe   :  { %v4793_v60 = vadd.f32 %v4694_v8, %v12467_v61  ;;  %v4696_v36 = vpop.f32.mrb[82].mxu1  ;;  %v4656_v0 = vpop.f32.mrb[83].mxu0  ;;  %v12471_v8 = vld [vmem:[#allocation312_spill] sm:$0xff] }
 0xbff   :  { %v4697_v62 = vpop.f32.mrb[83].mxu1  ;;  %6073 = vtanh.f32 %v4792_v28 }
 0xc00   :  { %6075 = vtanh.f32 %v4790_v39 }
 0xc01   :  { %6077 = vtanh.f32 %v4793_v60 }
 0xc02   :  { %6079 = vtanh.f32 %v4791_v3 }
 0xc09   :  { %v6074_v31 = vpop.eup %6073 }
 0xc0a   :  { %v6076_v39 = vpop.eup %6075  ;;  %v4810_v36 = vmul.f32 0.5, %v6074_v31 }
 0xc0b   :  { %v6078_v3 = vpop.eup %6077 }
 0xc0c   :  { %v6080_v62 = vpop.eup %6079  ;;  %v4812_v20 = vadd.f32 0.5, %v4810_v36 }
 0xc3b   :  { %v4733_v47 = vpop.f32.mrb[84].mxu0 }
 0xc3c   :  { %v4794_v42 = vadd.f32 %v4733_v47, %v12468_v57  ;;  %v4774_v5 = vpop.f32.mrb[84].mxu1  ;;  %v4735_v26 = vpop.f32.mrb[85].mxu0  ;;  %v4806_v47 = vmul.f32 0.5, %v6076_v39  ;;  %v4811_v57 = vmul.f32 0.5, %v6078_v3 }
 0xc3d   :  { %v4796_v23 = vadd.f32 %v4774_v5, %v12469_v44  ;;  %v4795_v10 = vadd.f32 %v4735_v26, %v12470_v16  ;;  %v4776_v21 = vpop.f32.mrb[85].mxu1  ;;  %v4737_v29 = vpop.f32.mrb[86].mxu0  ;;  %v4807_v44 = vmul.f32 0.5, %v6080_v62 }
 0xc3e   :  { %6081 = vtanh.f32 %v4794_v42  ;;  %v4797_v0 = vadd.f32 %v4776_v21, %v12471_v8  ;;  %v4778_v61 = vpop.f32.mrb[86].mxu1  ;;  %v4738_v28 = vpop.f32.mrb[87].mxu0  ;;  %v4808_v26 = vadd.f32 0.5, %v4806_v47  ;;  %v4813_v5 = vadd.f32 0.5, %v4811_v57 }
 0xc3f   :  { %v4779_v60 = vpop.f32.mrb[87].mxu1  ;;  %6083 = vtanh.f32 %v4795_v10  ;;  %v4818_v42 = vmul.f32 %v4812_v20, %v9654_v35  ;;  %v4809_v21 = vadd.f32 0.5, %v4807_v44 }
 0xc40   :  { %6085 = vtanh.f32 %v4796_v23  ;;  %v4819_v61 = vmul.f32 %v4813_v5, %v9657_v46 }
 0xc41   :  { %6087 = vtanh.f32 %v4797_v0 }
 0xc48   :  { %v6082_v16 = vpop.eup %6081 }
 0xc49   :  { %v4820_v29 = vmul.f32 %v6082_v16, %v4808_v26  ;;  %v6084_v8 = vpop.eup %6083 }
 0xc4a   :  { %v4821_v31 = vmul.f32 %v6084_v8, %v4809_v21  ;;  %v6086_v39 = vpop.eup %6085  ;;  %v12510_v21 = vld [vmem:[#allocation149_spill] sm:$0xff]  ;;  %v12512_v8 = vld [vmem:[#allocation151_spill] sm:$0xff] }
 0xc4b   :  { %v9948_v28 = vadd.f32 %v4820_v29, %v4818_v42  ;;  %v6088_v23 = vpop.eup %6087  ;;  %v4814_v0 = vmul.f32 0.5, %v6086_v39  ;;  %v12511_v29 = vld [vmem:[#allocation150_spill] sm:$0xff] }
 0xc4c   :  { %v9951_v10 = vadd.f32 %v4821_v31, %v4819_v61  ;;  %v4815_v60 = vmul.f32 0.5, %v6088_v23  ;;  %v12513_v61 = vld [vmem:[#allocation152_spill] sm:$0xff]  ;;  %v12514_v31 = vld [vmem:[#allocation153_spill] sm:$0xff]  ;;  %v12515_v39 = vld [vmem:[#allocation154_spill] sm:$0xff] }
 0xc4d   :  { %6089 = vtanh.f32 %v9948_v28  ;;  %v4816_v3 = vadd.f32 0.5, %v4814_v0  ;;  %v12516_v23 = vld [vmem:[#allocation155_spill] sm:$0xff]  ;;  %v12517_v0 = vld [vmem:[#allocation156_spill] sm:$0xff] }
 0xc4e   :  { %6091 = vtanh.f32 %v9951_v10  ;;  %v4817_v36 = vadd.f32 0.5, %v4815_v60  ;;  %v12518_v60 = vld [vmem:[#allocation157_spill] sm:$0xff] }
 0xc57   :  { %v6090_v35 = vpop.eup %6089 }
 0xc58   :  { %v4826_v20 = vmul.f32 %v6090_v35, %v4816_v3  ;;  %v6092_v62 = vpop.eup %6091  ;;  %v12519_v3 = vld [vmem:[#allocation158_spill] sm:$0xff]  ;;  %v12520_v35 = vld [vmem:[#allocation159_spill] sm:$0xff] }
 0xc59   :  { %v4827_v47 = vmul.f32 %v6092_v62, %v4817_v36  ;;  %v12522_v36 = vld [vmem:[#allocation161_spill] sm:$0xff]  ;;  %v12523_v62 = vld [vmem:[#allocation162_spill] sm:$0xff] }
 0xc5a   :  { %v5243_v46 = vmax.f32 %v4826_v20, 0.0  ;;  %v9957_v5 = vpack.c.bf16 %v4826_v20, %v4826_v20  ;;  %v12521_v20 = vld [vmem:[#allocation160_spill] sm:$0xff] }
 0xc5b   :  { %v9954_v57 = vpack.c.bf16 %v4827_v47, %v4827_v47  ;;  %v5244_v44 = vmax.f32 %v4827_v47, 0.0  ;;  %v12524_v47 = vld [vmem:[#allocation163_spill] sm:$0xff] }
 0xc5c   :  { %v5271_v26 = vmul.f32 %v8184_v56, %v5243_v46  ;;  %v12525_v46 = vld [vmem:[#allocation164_spill] sm:$0xff] }
 0xc5d   :  { %4865 = vmatprep.mubr.bf16.mxu0 %v9954_v57  ;;  %4906 = vmatprep.mubr.bf16.mxu1 %v9954_v57  ;;  %v5272_v16 = vmul.f32 %v8188_v24, %v5244_v44  ;;  %v12526_v44 = vld [vmem:[#allocation165_spill] sm:$0xff] }
 0xc5e   :  { %4866 = vmatmul.mubr.bf16.vlgmr.msra.gmra.mrb[88].mxu0 %v9957_v5  ;;  %4907 = vmatmul.mubr.bf16.vlgmr.msra.gmra.mrb[88].mxu1 %v9957_v5 }
 0xc5f   :  { %4916 = vmatpush1.bf16.msra.mxu0 %v11116_v55  ;;  %4957 = vmatpush1.bf16.msra.mxu1 %v11117_v17  ;;  %v5293_v42 = vadd.f32 %v5272_v16, %v5271_v26  ;;  %v12472_v55 = vld [vmem:[#allocation111_spill] sm:$0xff]  ;;  %v12473_v17 = vld [vmem:[#allocation112_spill] sm:$0xff]  ;;  %v12527_v26 = vld [vmem:[#allocation166_spill] sm:$0xff] }
 0xc60   :  { %4947 = vmatprep.mubr.bf16.mxu0 %v9954_v57  ;;  %4988 = vmatprep.mubr.bf16.mxu1 %v9954_v57  ;;  %v12528_v16 = vld [vmem:[#allocation167_spill] sm:$0xff] }
 0xc61   :  { %5294 = vadd.xlane.f32.xlu0 %v5293_v42  ;;  %4917 = vmatprep.subr.bf16.mxu0 %v11118_v34  ;;  %v12474_v34 = vld [vmem:[#allocation113_spill] sm:$0xff]  ;;  %v12529_v42 = vld [vmem:[#allocation168_spill] sm:$0xff] }
 0xc62   :  { %4958 = vmatprep.subr.bf16.mxu1 %v11119_v33  ;;  %v12475_v33 = vld [vmem:[#allocation114_spill] sm:$0xff] }
 0xc63   :  { %4918 = vmatpush1.bf16.msra.mxu0 %v11120_v41  ;;  %4959 = vmatpush1.bf16.msra.mxu1 %v11121_v14  ;;  %v12476_v41 = vld [vmem:[#allocation115_spill] sm:$0xff]  ;;  %v12477_v14 = vld [vmem:[#allocation116_spill] sm:$0xff] }
 0xc64   :  { %4919 = vmatprep.subr.bf16.mxu0 %v11122_v22  ;;  %4960 = vmatprep.subr.bf16.mxu1 %v11123_v40  ;;  %v12478_v22 = vld [vmem:[#allocation117_spill] sm:$0xff]  ;;  %v12479_v40 = vld [vmem:[#allocation118_spill] sm:$0xff] }
 0xc67   :  { %4920 = vmatpush1.bf16.msra.mxu0 %v11124_v9  ;;  %4961 = vmatpush1.bf16.msra.mxu1 %v11342_v52  ;;  %v12480_v9 = vld [vmem:[#allocation119_spill] sm:$0xff]  ;;  %v12481_v52 = vld [vmem:[#allocation120_spill] sm:$0xff] }
 0xc68   :  { %4921 = vmatprep.subr.bf16.mxu0 %v11343_v43  ;;  %4962 = vmatprep.subr.bf16.mxu1 %v11344_v53  ;;  %v12482_v43 = vld [vmem:[#allocation121_spill] sm:$0xff]  ;;  %v12483_v53 = vld [vmem:[#allocation122_spill] sm:$0xff] }
 0xc6b   :  { %4922 = vmatpush1.bf16.msra.mxu0 %v11345_v54  ;;  %4963 = vmatpush1.bf16.msra.mxu1 %v11346_v30  ;;  %v12484_v54 = vld [vmem:[#allocation123_spill] sm:$0xff]  ;;  %v12485_v30 = vld [vmem:[#allocation124_spill] sm:$0xff] }
 0xc6c   :  { %4923 = vmatprep.subr.bf16.mxu0 %v11347_v51  ;;  %4964 = vmatprep.subr.bf16.mxu1 %v11348_v6  ;;  %v12486_v51 = vld [vmem:[#allocation125_spill] sm:$0xff]  ;;  %v12487_v6 = vld [vmem:[#allocation126_spill] sm:$0xff] }
 0xc6f   :  { %4924 = vmatpush1.bf16.msra.mxu0 %v11349_v37  ;;  %4965 = vmatpush1.bf16.msra.mxu1 %v11350_v38  ;;  %v12488_v37 = vld [vmem:[#allocation127_spill] sm:$0xff]  ;;  %v12489_v38 = vld [vmem:[#allocation128_spill] sm:$0xff] }
 0xc70   :  { %4925 = vmatprep.subr.bf16.mxu0 %v11568_v19  ;;  %4966 = vmatprep.subr.bf16.mxu1 %v11569_v58  ;;  %v12490_v19 = vld [vmem:[#allocation129_spill] sm:$0xff]  ;;  %v12491_v58 = vld [vmem:[#allocation130_spill] sm:$0xff] }
 0xc73   :  { %4926 = vmatpush1.bf16.msra.mxu0 %v11570_v1  ;;  %4967 = vmatpush1.bf16.msra.mxu1 %v11571_v11  ;;  %v12492_v1 = vld [vmem:[#allocation131_spill] sm:$0xff]  ;;  %v12493_v11 = vld [vmem:[#allocation132_spill] sm:$0xff] }
 0xc74   :  { %4927 = vmatprep.subr.bf16.mxu0 %v11572_v7  ;;  %4968 = vmatprep.subr.bf16.mxu1 %v11573_v50  ;;  %v12494_v7 = vld [vmem:[#allocation133_spill] sm:$0xff]  ;;  %v12495_v50 = vld [vmem:[#allocation134_spill] sm:$0xff] }
 0xc77   :  { %4928 = vmatpush1.bf16.msra.mxu0 %v11574_v27  ;;  %4969 = vmatpush1.bf16.msra.mxu1 %v11575_v18  ;;  %v12496_v27 = vld [vmem:[#allocation135_spill] sm:$0xff]  ;;  %v12497_v18 = vld [vmem:[#allocation136_spill] sm:$0xff] }
 0xc78   :  { %4929 = vmatprep.subr.bf16.mxu0 %v11576_v32  ;;  %4970 = vmatprep.subr.bf16.mxu1 %v11794_v4  ;;  %v12498_v32 = vld [vmem:[#allocation137_spill] sm:$0xff]  ;;  %v12499_v4 = vld [vmem:[#allocation138_spill] sm:$0xff] }
 0xc7b   :  { %4930 = vmatpush1.bf16.msra.mxu0 %v11795_v13  ;;  %4971 = vmatpush1.bf16.msra.mxu1 %v11796_v63  ;;  %v12500_v13 = vld [vmem:[#allocation139_spill] sm:$0xff]  ;;  %v12501_v63 = vld [vmem:[#allocation140_spill] sm:$0xff] }
 0xc7c   :  { %4931 = vmatprep.subr.bf16.mxu0 %v11797_v25  ;;  %4972 = vmatprep.subr.bf16.mxu1 %v11798_v45  ;;  %v12502_v25 = vld [vmem:[#allocation141_spill] sm:$0xff]  ;;  %v12503_v45 = vld [vmem:[#allocation142_spill] sm:$0xff] }
 0xc7f   :  { %4932 = vmatpush1.bf16.msra.mxu0 %v11799_v48  ;;  %4973 = vmatpush1.bf16.msra.mxu1 %v11800_v15  ;;  %v12504_v48 = vld [vmem:[#allocation143_spill] sm:$0xff]  ;;  %v12505_v15 = vld [vmem:[#allocation144_spill] sm:$0xff] }
 0xc80   :  { %4933 = vmatprep.subr.bf16.mxu0 %v11801_v49  ;;  %4974 = vmatprep.subr.bf16.mxu1 %v11802_v59  ;;  %v12506_v49 = vld [vmem:[#allocation145_spill] sm:$0xff]  ;;  %v12507_v59 = vld [vmem:[#allocation146_spill] sm:$0xff] }
 0xc83   :  { %4934 = vmatpush1.bf16.msra.mxu0 %v12020_v12  ;;  %4975 = vmatpush1.bf16.msra.mxu1 %v12021_v2  ;;  %v12508_v12 = vld [vmem:[#allocation147_spill] sm:$0xff]  ;;  %v12509_v2 = vld [vmem:[#allocation148_spill] sm:$0xff] }
 0xc84   :  { %4935 = vmatprep.subr.bf16.mxu0 %v12472_v55  ;;  %4976 = vmatprep.subr.bf16.mxu1 %v12473_v17  ;;  %v12530_v55 = vld [vmem:[#allocation169_spill] sm:$0xff]  ;;  %v12531_v17 = vld [vmem:[#allocation170_spill] sm:$0xff] }
 0xc87   :  { %4936 = vmatpush1.bf16.msra.mxu0 %v12474_v34  ;;  %4977 = vmatpush1.bf16.msra.mxu1 %v12475_v33  ;;  %v12532_v34 = vld [vmem:[#allocation171_spill] sm:$0xff]  ;;  %v12533_v33 = vld [vmem:[#allocation172_spill] sm:$0xff] }
 0xc88   :  { %4937 = vmatprep.subr.bf16.mxu0 %v12476_v41  ;;  %4978 = vmatprep.subr.bf16.mxu1 %v12477_v14  ;;  %v12534_v41 = vld [vmem:[#allocation173_spill] sm:$0xff]  ;;  %v12535_v14 = vld [vmem:[#allocation174_spill] sm:$0xff] }
 0xc8b   :  { %4938 = vmatpush1.bf16.msra.mxu0 %v12478_v22  ;;  %4979 = vmatpush1.bf16.msra.mxu1 %v12479_v40  ;;  %v12536_v22 = vld [vmem:[#allocation175_spill] sm:$0xff]  ;;  %v12537_v40 = vld [vmem:[#allocation176_spill] sm:$0xff] }
 0xc8c   :  { %4939 = vmatprep.subr.bf16.mxu0 %v12480_v9  ;;  %4980 = vmatprep.subr.bf16.mxu1 %v12481_v52  ;;  %v12538_v9 = vld [vmem:[#allocation177_spill] sm:$0xff]  ;;  %v12539_v52 = vld [vmem:[#allocation178_spill] sm:$0xff] }
 0xc8f   :  { %4940 = vmatpush1.bf16.msra.mxu0 %v12482_v43  ;;  %4981 = vmatpush1.bf16.msra.mxu1 %v12483_v53  ;;  %v12540_v43 = vld [vmem:[#allocation179_spill] sm:$0xff]  ;;  %v12541_v53 = vld [vmem:[#allocation180_spill] sm:$0xff] }
 0xc90   :  { %4941 = vmatprep.subr.bf16.mxu0 %v12484_v54  ;;  %4982 = vmatprep.subr.bf16.mxu1 %v12485_v30  ;;  %v12542_v54 = vld [vmem:[#allocation181_spill] sm:$0xff]  ;;  %v12543_v30 = vld [vmem:[#allocation182_spill] sm:$0xff] }
 0xc93   :  { %4942 = vmatpush1.bf16.msra.mxu0 %v12486_v51  ;;  %4983 = vmatpush1.bf16.msra.mxu1 %v12487_v6  ;;  %v12544_v51 = vld [vmem:[#allocation183_spill] sm:$0xff]  ;;  %v12545_v6 = vld [vmem:[#allocation184_spill] sm:$0xff] }
 0xc94   :  { %4943 = vmatprep.subr.bf16.mxu0 %v12488_v37  ;;  %4984 = vmatprep.subr.bf16.mxu1 %v12489_v38  ;;  %v12546_v37 = vld [vmem:[#allocation185_spill] sm:$0xff]  ;;  %v12547_v38 = vld [vmem:[#allocation186_spill] sm:$0xff] }
 0xc97   :  { %4944 = vmatpush1.bf16.msra.mxu0 %v12490_v19  ;;  %4985 = vmatpush1.bf16.msra.mxu1 %v12491_v58  ;;  %v12548_v19 = vld [vmem:[#allocation188_spill] sm:$0xff]  ;;  %v12549_v58 = vld [vmem:[#allocation189_spill] sm:$0xff] }
 0xc98   :  { %4945 = vmatprep.subr.bf16.mxu0 %v12492_v1  ;;  %4986 = vmatprep.subr.bf16.mxu1 %v12493_v11  ;;  %v12550_v1 = vld [vmem:[#allocation190_spill] sm:$0xff]  ;;  %v12551_v11 = vld [vmem:[#allocation191_spill] sm:$0xff] }
 0xc9b   :  { %4946 = vmatpush1.bf16.msra.mxu0 %v12494_v7  ;;  %4987 = vmatpush1.bf16.msra.mxu1 %v12495_v50  ;;  %v12552_v7 = vld [vmem:[#allocation192_spill] sm:$0xff]  ;;  %v12553_v50 = vld [vmem:[#allocation193_spill] sm:$0xff] }
 0xc9c   :  { %4997 = vmatprep.subr.bf16.mxu0 %v12496_v27  ;;  %5038 = vmatprep.subr.bf16.mxu1 %v12497_v18  ;;  %v12554_v27 = vld [vmem:[#allocation198_spill] sm:$0xff]  ;;  %v12555_v18 = vld [vmem:[#allocation199_spill] sm:$0xff] }
 0xc9e   :  { %4948 = vmatmul.mubr.bf16.vlgmr.msra.gmra.mrb[92].mxu0 %v9957_v5  ;;  %4989 = vmatmul.mubr.bf16.vlgmr.msra.gmra.mrb[92].mxu1 %v9957_v5 }
 0xc9f   :  { %4998 = vmatpush1.bf16.msra.mxu0 %v12498_v32  ;;  %5029 = vmatprep.mubr.bf16.mxu0 %v9954_v57  ;;  %v12556_v32 = vld [vmem:[#allocation200_spill] sm:$0xff] }
 0xca0   :  { %5039 = vmatpush1.bf16.msra.mxu1 %v12499_v4  ;;  %5070 = vmatprep.mubr.bf16.mxu1 %v9954_v57  ;;  %v12557_v4 = vld [vmem:[#allocation201_spill] sm:$0xff] }
 0xca1   :  { %4999 = vmatprep.subr.bf16.mxu0 %v12500_v13  ;;  %5040 = vmatprep.subr.bf16.mxu1 %v12501_v63  ;;  %v12558_v13 = vld [vmem:[#allocation204_spill] sm:$0xff]  ;;  %v12559_v63 = vld [vmem:[#allocation207_spill] sm:$0xff] }
 0xca3   :  { %5000 = vmatpush1.bf16.msra.mxu0 %v12502_v25  ;;  %v12560_v25 = vld [vmem:[#allocation209_spill] sm:$0xff] }
 0xca4   :  { %5041 = vmatpush1.bf16.msra.mxu1 %v12503_v45  ;;  %5001 = vmatprep.subr.bf16.mxu0 %v12504_v48  ;;  %v12561_v45 = vld [vmem:[#allocation210_spill] sm:$0xff]  ;;  %v12562_v48 = vld [vmem:[#allocation212_spill] sm:$0xff] }
 0xca5   :  { %5042 = vmatprep.subr.bf16.mxu1 %v12505_v15  ;;  %v12563_v15 = vld [vmem:[#allocation215_spill] sm:$0xff] }
 0xca7   :  { %5002 = vmatpush1.bf16.msra.mxu0 %v12506_v49  ;;  %v12564_v49 = vld [vmem:[#allocation217_spill] sm:$0xff] }
 0xca8   :  { %5043 = vmatpush1.bf16.msra.mxu1 %v12507_v59  ;;  %5003 = vmatprep.subr.bf16.mxu0 %v12508_v12  ;;  %v12565_v59 = vld [vmem:[#allocation218_spill] sm:$0xff]  ;;  %v12566_v12 = vld [vmem:[#allocation220_spill] sm:$0xff] }
 0xca9   :  { %5044 = vmatprep.subr.bf16.mxu1 %v12509_v2  ;;  %v12567_v2 = vld [vmem:[#allocation223_spill] sm:$0xff] }
 0xcab   :  { %5004 = vmatpush1.bf16.msra.mxu0 %v12510_v21  ;;  %v12568_v21 = vld [vmem:[#allocation225_spill] sm:$0xff] }
 0xcac   :  { %5045 = vmatpush1.bf16.msra.mxu1 %v12511_v29  ;;  %5005 = vmatprep.subr.bf16.mxu0 %v12512_v8  ;;  %v12569_v29 = vld [vmem:[#allocation226_spill] sm:$0xff]  ;;  %v12570_v8 = vld [vmem:[#allocation228_spill] sm:$0xff] }
 0xcad   :  { %5046 = vmatprep.subr.bf16.mxu1 %v12513_v61  ;;  %v12571_v61 = vld [vmem:[#allocation231_spill] sm:$0xff] }
 0xcaf   :  { %5006 = vmatpush1.bf16.msra.mxu0 %v12514_v31  ;;  %v12572_v31 = vld [vmem:[#allocation233_spill] sm:$0xff] }
 0xcb0   :  { %5047 = vmatpush1.bf16.msra.mxu1 %v12515_v39  ;;  %5007 = vmatprep.subr.bf16.mxu0 %v12516_v23  ;;  %v12573_v39 = vld [vmem:[#allocation234_spill] sm:$0xff]  ;;  %v12575_v23 = vld [vmem:[#allocation239_spill] sm:$0xff] }
 0xcb1   :  { %5048 = vmatprep.subr.bf16.mxu1 %v12517_v0  ;;  %v12576_v0 = vld [vmem:[#allocation241_spill] sm:$0xff] }
 0xcb3   :  { %5008 = vmatpush1.bf16.msra.mxu0 %v12518_v60  ;;  %v12577_v60 = vld [vmem:[#allocation242_spill] sm:$0xff] }
 0xcb4   :  { %5049 = vmatpush1.bf16.msra.mxu1 %v12519_v3  ;;  %5009 = vmatprep.subr.bf16.mxu0 %v12520_v35  ;;  %v12578_v3 = vld [vmem:[#allocation244_spill] sm:$0xff]  ;;  %v12579_v35 = vld [vmem:[#allocation247_spill] sm:$0xff] }
 0xcb5   :  { %5050 = vmatprep.subr.bf16.mxu1 %v12521_v20  ;;  %v12580_v20 = vld [vmem:[#allocation249_spill] sm:$0xff] }
 0xcb7   :  { %5010 = vmatpush1.bf16.msra.mxu0 %v12522_v36  ;;  %v12581_v36 = vld [vmem:[#allocation250_spill] sm:$0xff] }
 0xcb8   :  { %5051 = vmatpush1.bf16.msra.mxu1 %v12523_v62  ;;  %5011 = vmatprep.subr.bf16.mxu0 %v12524_v47  ;;  %v12582_v62 = vld [vmem:[#allocation252_spill] sm:$0xff]  ;;  %v12583_v47 = vld [vmem:[#allocation255_spill] sm:$0xff] }
 0xcb9   :  { %5052 = vmatprep.subr.bf16.mxu1 %v12525_v46  ;;  %v12584_v46 = vld [vmem:[#allocation257_spill] sm:$0xff] }
 0xcbb   :  { %5012 = vmatpush1.bf16.msra.mxu0 %v12526_v44  ;;  %v12585_v44 = vld [vmem:[#allocation258_spill] sm:$0xff] }
 0xcbc   :  { %5053 = vmatpush1.bf16.msra.mxu1 %v12527_v26  ;;  %5013 = vmatprep.subr.bf16.mxu0 %v12528_v16  ;;  %v12586_v26 = vld [vmem:[#allocation263_spill] sm:$0xff]  ;;  %v12587_v16 = vld [vmem:[#allocation264_spill] sm:$0xff] }
 0xcbd   :  { %5054 = vmatprep.subr.bf16.mxu1 %v12529_v42  ;;  %v12588_v42 = vld [vmem:[#allocation265_spill] sm:$0xff] }
 0xcbf   :  { %5014 = vmatpush1.bf16.msra.mxu0 %v12530_v55  ;;  %v12589_v55 = vld [vmem:[#allocation266_spill] sm:$0xff] }
 0xcc0   :  { %5055 = vmatpush1.bf16.msra.mxu1 %v12531_v17  ;;  %5015 = vmatprep.subr.bf16.mxu0 %v12532_v34  ;;  %v12590_v17 = vld [vmem:[#allocation267_spill] sm:$0xff]  ;;  %v12591_v34 = vld [vmem:[#allocation270_spill] sm:$0xff] }
 0xcc1   :  { %5056 = vmatprep.subr.bf16.mxu1 %v12533_v33  ;;  %v12592_v33 = vld [vmem:[#allocation273_spill] sm:$0xff] }
 0xcc3   :  { %5016 = vmatpush1.bf16.msra.mxu0 %v12534_v41  ;;  %v12593_v41 = vld [vmem:[#allocation274_spill] sm:$0xff] }
 0xcc4   :  { %5057 = vmatpush1.bf16.msra.mxu1 %v12535_v14  ;;  %5017 = vmatprep.subr.bf16.mxu0 %v12536_v22  ;;  %v12594_v14 = vld [vmem:[#allocation275_spill] sm:$0xff]  ;;  %v12595_v22 = vld [vmem:[#allocation278_spill] sm:$0xff] }
 0xcc5   :  { %5058 = vmatprep.subr.bf16.mxu1 %v12537_v40  ;;  %v12596_v40 = vld [vmem:[#allocation281_spill] sm:$0xff] }
 0xcc7   :  { %5018 = vmatpush1.bf16.msra.mxu0 %v12538_v9  ;;  %v12597_v9 = vld [vmem:[#allocation282_spill] sm:$0xff] }
 0xcc8   :  { %5059 = vmatpush1.bf16.msra.mxu1 %v12539_v52  ;;  %5019 = vmatprep.subr.bf16.mxu0 %v12540_v43  ;;  %v12598_v52 = vld [vmem:[#allocation283_spill] sm:$0xff]  ;;  %v12599_v43 = vld [vmem:[#allocation286_spill] sm:$0xff] }
 0xcc9   :  { %5060 = vmatprep.subr.bf16.mxu1 %v12541_v53  ;;  %v12600_v53 = vld [vmem:[#allocation289_spill] sm:$0xff] }
 0xccb   :  { %5020 = vmatpush1.bf16.msra.mxu0 %v12542_v54  ;;  %v12601_v54 = vld [vmem:[#allocation290_spill] sm:$0xff] }
 0xccc   :  { %5061 = vmatpush1.bf16.msra.mxu1 %v12543_v30  ;;  %5021 = vmatprep.subr.bf16.mxu0 %v12544_v51  ;;  %v12602_v30 = vld [vmem:[#allocation291_spill] sm:$0xff]  ;;  %v12603_v51 = vld [vmem:[#allocation294_spill] sm:$0xff] }
 0xccd   :  { %5062 = vmatprep.subr.bf16.mxu1 %v12545_v6  ;;  %v12604_v6 = vld [vmem:[#allocation297_spill] sm:$0xff] }
 0xccf   :  { %5022 = vmatpush1.bf16.msra.mxu0 %v12546_v37  ;;  %v12605_v37 = vld [vmem:[#allocation298_spill] sm:$0xff] }
 0xcd0   :  { %5063 = vmatpush1.bf16.msra.mxu1 %v12547_v38  ;;  %5023 = vmatprep.subr.bf16.mxu0 %v12548_v19  ;;  %v12606_v38 = vld [vmem:[#allocation299_spill] sm:$0xff]  ;;  %v12607_v19 = vld [vmem:[#allocation302_spill] sm:$0xff] }
 0xcd1   :  { %5064 = vmatprep.subr.bf16.mxu1 %v12549_v58  ;;  %v12608_v58 = vld [vmem:[#allocation305_spill] sm:$0xff] }
 0xcd3   :  { %5024 = vmatpush1.bf16.msra.mxu0 %v12550_v1  ;;  %v12609_v1 = vld [vmem:[#allocation306_spill] sm:$0xff] }
 0xcd4   :  { %5065 = vmatpush1.bf16.msra.mxu1 %v12551_v11  ;;  %5025 = vmatprep.subr.bf16.mxu0 %v12552_v7  ;;  %v12610_v11 = vld [vmem:[#allocation307_spill] sm:$0xff]  ;;  %v12611_v7 = vld [vmem:[#allocation310_spill] sm:$0xff] }
 0xcd5   :  { %5066 = vmatprep.subr.bf16.mxu1 %v12553_v50  ;;  %v12612_v50 = vld [vmem:[#allocation313_spill] sm:$0xff] }
 0xcd7   :  { %5026 = vmatpush1.bf16.msra.mxu0 %v12554_v27  ;;  %v12613_v27 = vld [vmem:[#allocation314_spill] sm:$0xff] }
 0xcd8   :  { %5067 = vmatpush1.bf16.msra.mxu1 %v12555_v18  ;;  %5027 = vmatprep.subr.bf16.mxu0 %v12556_v32  ;;  %v12614_v18 = vld [vmem:[#allocation315_spill] sm:$0xff]  ;;  %v12615_v32 = vld [vmem:[#allocation318_spill] sm:$0xff] }
 0xcd9   :  { %5068 = vmatprep.subr.bf16.mxu1 %v12557_v4  ;;  %v12616_v4 = vld [vmem:[#allocation321_spill] sm:$0xff] }
 0xcdb   :  { %5028 = vmatpush1.bf16.msra.mxu0 %v12558_v13  ;;  %v12617_v13 = vld [vmem:[#allocation322_spill] sm:$0xff] }
 0xcdc   :  { %5069 = vmatpush1.bf16.msra.mxu1 %v12559_v63  ;;  %5079 = vmatprep.subr.bf16.mxu0 %v12560_v25  ;;  %v12618_v63 = vld [vmem:[#allocation323_spill] sm:$0xff]  ;;  %v12619_v25 = vld [vmem:[#allocation324_spill] sm:$0xff] }
 0xcdd   :  { %5120 = vmatprep.subr.bf16.mxu1 %v12561_v45  ;;  %v12620_v45 = vld [vmem:[#allocation325_spill] sm:$0xff] }
 0xcde   :  { %5030 = vmatmul.mubr.bf16.vlgmr.msra.gmra.mrb[88].mxu0 %v9957_v5 }
 0xcdf   :  { %5071 = vmatmul.mubr.bf16.vlgmr.msra.gmra.mrb[88].mxu1 %v9957_v5  ;;  %5080 = vmatpush1.bf16.msra.mxu0 %v12562_v48  ;;  %v12621_v48 = vld [vmem:[#allocation326_spill] sm:$0xff] }
 0xce0   :  { %5111 = vmatprep.mubr.bf16.mxu0 %v9954_v57  ;;  %5121 = vmatpush1.bf16.msra.mxu1 %v12563_v15  ;;  %v12622_v15 = vld [vmem:[#allocation327_spill] sm:$0xff] }
 0xce1   :  { %5152 = vmatprep.mubr.bf16.mxu1 %v9954_v57  ;;  %5081 = vmatprep.subr.bf16.mxu0 %v12564_v49  ;;  %v12574_v57 = vld [vmem:[#allocation236_spill] sm:$0xff] }
 0xce2   :  { %5122 = vmatprep.subr.bf16.mxu1 %v12565_v59  ;;  %v12623_v49 = vld [vmem:[#allocation328_spill] sm:$0xff] }
 0xce3   :  { %5082 = vmatpush1.bf16.msra.mxu0 %v12566_v12  ;;  %v12624_v12 = vld [vmem:[#allocation251_spill] sm:$0xff] }
 0xce4   :  { %5123 = vmatpush1.bf16.msra.mxu1 %v12567_v2  ;;  %5083 = vmatprep.subr.bf16.mxu0 %v12568_v21 }
 0xce5   :  { %5124 = vmatprep.subr.bf16.mxu1 %v12569_v29 }
 0xce7   :  { %5084 = vmatpush1.bf16.msra.mxu0 %v12570_v8  ;;  %v12625_v8 = vld [vmem:[#allocation253_spill] sm:$0xff] }
 0xce8   :  { %5125 = vmatpush1.bf16.msra.mxu1 %v12571_v61  ;;  %5085 = vmatprep.subr.bf16.mxu0 %v12572_v31  ;;  %v12626_v31 = vld [vmem:[#allocation254_spill] sm:$0xff] }
 0xce9   :  { %5126 = vmatprep.subr.bf16.mxu1 %v12573_v39 }
 0xceb   :  { %5086 = vmatpush1.bf16.msra.mxu0 %v12574_v57 }
 0xcec   :  { %5127 = vmatpush1.bf16.msra.mxu1 %v12575_v23  ;;  %5087 = vmatprep.subr.bf16.mxu0 %v12576_v0  ;;  %v12627_v0 = vld [vmem:[#allocation256_spill] sm:$0xff] }
 0xced   :  { %5128 = vmatprep.subr.bf16.mxu1 %v12577_v60 }
 0xcef   :  { %5088 = vmatpush1.bf16.msra.mxu0 %v12578_v3 }
 0xcf0   :  { %5129 = vmatpush1.bf16.msra.mxu1 %v12579_v35  ;;  %5089 = vmatprep.subr.bf16.mxu0 %v12580_v20 }
 0xcf1   :  { %5130 = vmatprep.subr.bf16.mxu1 %v12581_v36  ;;  %v12628_v36 = vld [vmem:[#allocation316_spill] sm:$0xff] }
 0xcf3   :  { %5090 = vmatpush1.bf16.msra.mxu0 %v12582_v62 }
 0xcf4   :  { %5131 = vmatpush1.bf16.msra.mxu1 %v12583_v47  ;;  %5091 = vmatprep.subr.bf16.mxu0 %v12584_v46 }
 0xcf5   :  { %5132 = vmatprep.subr.bf16.mxu1 %v12585_v44  ;;  %v12629_v44 = vld [vmem:[#allocation317_spill] sm:$0xff] }
 0xcf7   :  { %5092 = vmatpush1.bf16.msra.mxu0 %v12586_v26 }
 0xcf8   :  { %5133 = vmatpush1.bf16.msra.mxu1 %v12587_v16  ;;  %5093 = vmatprep.subr.bf16.mxu0 %v12588_v42  ;;  %v12630_v16 = vld [vmem:[#allocation319_spill] sm:$0xff] }
 0xcf9   :  { %5134 = vmatprep.subr.bf16.mxu1 %v12589_v55 }
 0xcfb   :  { %5094 = vmatpush1.bf16.msra.mxu0 %v12590_v17 }
 0xcfc   :  { %5135 = vmatpush1.bf16.msra.mxu1 %v12591_v34  ;;  %5095 = vmatprep.subr.bf16.mxu0 %v12592_v33  ;;  %v12631_v33 = vld [vmem:[#allocation320_spill] sm:$0xff] }
 0xcfd   :  { %5136 = vmatprep.subr.bf16.mxu1 %v12593_v41 }
 0xcff   :  { %5096 = vmatpush1.bf16.msra.mxu0 %v12594_v14 }
 0xd00   :  { %5137 = vmatpush1.bf16.msra.mxu1 %v12595_v22  ;;  %5097 = vmatprep.subr.bf16.mxu0 %v12596_v40 }
 0xd01   :  { %5138 = vmatprep.subr.bf16.mxu1 %v12597_v9 }
 0xd03   :  { %5098 = vmatpush1.bf16.msra.mxu0 %v12598_v52 }
 0xd04   :  { %5139 = vmatpush1.bf16.msra.mxu1 %v12599_v43  ;;  %5099 = vmatprep.subr.bf16.mxu0 %v12600_v53 }
 0xd05   :  { %5140 = vmatprep.subr.bf16.mxu1 %v12601_v54 }
 0xd07   :  { %5100 = vmatpush1.bf16.msra.mxu0 %v12602_v30 }
 0xd08   :  { %5141 = vmatpush1.bf16.msra.mxu1 %v12603_v51  ;;  %5101 = vmatprep.subr.bf16.mxu0 %v12604_v6 }
 0xd09   :  { %5142 = vmatprep.subr.bf16.mxu1 %v12605_v37 }
 0xd0b   :  { %5102 = vmatpush1.bf16.msra.mxu0 %v12606_v38 }
 0xd0c   :  { %5143 = vmatpush1.bf16.msra.mxu1 %v12607_v19  ;;  %5103 = vmatprep.subr.bf16.mxu0 %v12608_v58 }
 0xd0d   :  { %5144 = vmatprep.subr.bf16.mxu1 %v12609_v1 }
 0xd0f   :  { %5104 = vmatpush1.bf16.msra.mxu0 %v12610_v11 }
 0xd10   :  { %5145 = vmatpush1.bf16.msra.mxu1 %v12611_v7  ;;  %5105 = vmatprep.subr.bf16.mxu0 %v12612_v50 }
 0xd11   :  { %5146 = vmatprep.subr.bf16.mxu1 %v12613_v27 }
 0xd13   :  { %5106 = vmatpush1.bf16.msra.mxu0 %v12614_v18 }
 0xd14   :  { %5147 = vmatpush1.bf16.msra.mxu1 %v12615_v32  ;;  %5107 = vmatprep.subr.bf16.mxu0 %v12616_v4 }
 0xd15   :  { %5148 = vmatprep.subr.bf16.mxu1 %v12617_v13 }
 0xd17   :  { %5108 = vmatpush1.bf16.msra.mxu0 %v12618_v63 }
 0xd18   :  { %5149 = vmatpush1.bf16.msra.mxu1 %v12619_v25  ;;  %5109 = vmatprep.subr.bf16.mxu0 %v12620_v45 }
 0xd19   :  { %5150 = vmatprep.subr.bf16.mxu1 %v12621_v48 }
 0xd1b   :  { %5110 = vmatpush1.bf16.msra.mxu0 %v12622_v15 }
 0xd1c   :  { %5151 = vmatpush1.bf16.msra.mxu1 %v12623_v49 }
 0xd1e   :  { %5112 = vmatmul.mubr.bf16.vlgmr.msra.gmra.mrb[92].mxu0 %v9957_v5 }
 0xd1f   :  { %5153 = vmatmul.mubr.bf16.vlgmr.msra.gmra.mrb[92].mxu1 %v9957_v5 }
 0xdb1   :  { %v5031_v59 = vpop.f32.mrb[88].mxu0 }
 0xdb2   :  { %v5170_v2 = vadd.f32 %v5031_v59, %v12624_v12  ;;  %v5072_v21 = vpop.f32.mrb[88].mxu1  ;;  %v5033_v29 = vpop.f32.mrb[89].mxu0 }
 0xdb3   :  { %v5172_v61 = vadd.f32 %v5072_v21, %v12625_v8  ;;  %v5171_v39 = vadd.f32 %v5033_v29, %v12626_v31  ;;  %v5074_v57 = vpop.f32.mrb[89].mxu1  ;;  %v5035_v23 = vpop.f32.mrb[90].mxu0  ;;  %v11_v8 = vstv %s10192_s5 }
 0xdb4   :  { %v5173_v60 = vadd.f32 %v5074_v57, %v12627_v0  ;;  %v5076_v3 = vpop.f32.mrb[90].mxu1  ;;  %v5036_v35 = vpop.f32.mrb[91].mxu0  ;;  %12 = vst [vmem:[#allocation6] sm:$0x1] %v11_v8  ;;  %v12632_v23 = vlaneseq }
 0xdb5   :  { %v5077_v20 = vpop.f32.mrb[91].mxu1  ;;  %6093 = vtanh.f32 %v5172_v61  ;;  %v6115_v61 = vmov 0   ;;  %v5283_v57 = vpop.xlane.xlu1 %5282 }
 0xdb6   :  { %6095 = vtanh.f32 %v5170_v2  ;;  %5952 = vset.pattern.permute.xlu0 %v6115_v61  ;;  %v5308_v0 = vand.u32 127, %v12632_v23 }
 0xdb7   :  { %6097 = vtanh.f32 %v5173_v60 }
 0xdb8   :  { %6099 = vtanh.f32 %v5171_v39  ;;  %v5277_v39 = vpop.xlane.xlu0 %5276 }
 0xdb9   :  { %v5286_v3 = vpop.xlane.xlu1 %5285 }
 0xdbb   :  { %v5820_v31 = vld [vmem:[#allocation6] ss:$0 sm:$0xff] }
 0xdbc   :  { %5395 = vperm.xlu0 %5952, %v5820_v31   ;;  %v5280_v60 = vpop.xlane.xlu0 %5279 }
 0xdbf   :  { %v6094_v34 = vpop.eup %6093 }
 0xdc0   :  { %v6096_v40 = vpop.eup %6095  ;;  %v5190_v43 = vmul.f32 0.5, %v6094_v34 }
 0xdc1   :  { %v6098_v52 = vpop.eup %6097  ;;  %v5186_v54 = vmul.f32 0.5, %v6096_v40 }
 0xdc2   :  { %v6100_v53 = vpop.eup %6099  ;;  %v5191_v30 = vmul.f32 0.5, %v6098_v52  ;;  %v5192_v51 = vadd.f32 0.5, %v5190_v43 }
 0xdc3   :  { %v5187_v6 = vmul.f32 0.5, %v6100_v53  ;;  %v5188_v37 = vadd.f32 0.5, %v5186_v54 }
 0xdc4   :  { %v5193_v38 = vadd.f32 0.5, %v5191_v30  ;;  %v5198_v58 = vmul.f32 %v5192_v51, %v9948_v28 }
 0xdc5   :  { %v5189_v1 = vadd.f32 0.5, %v5187_v6 }
 0xdc6   :  { %v5199_v50 = vmul.f32 %v5193_v38, %v9951_v10 }
 0xdf1   :  { %v5113_v5 = vpop.f32.mrb[92].mxu0 }
 0xdf2   :  { %v5174_v62 = vadd.f32 %v5113_v5, %v12628_v36  ;;  %v5154_v47 = vpop.f32.mrb[92].mxu1  ;;  %v5115_v46 = vpop.f32.mrb[93].mxu0 }
 0xdf3   :  { %v5176_v26 = vadd.f32 %v5154_v47, %v12629_v44  ;;  %v5175_v42 = vadd.f32 %v5115_v46, %v12630_v16  ;;  %v5156_v55 = vpop.f32.mrb[93].mxu1  ;;  %v5117_v17 = vpop.f32.mrb[94].mxu0 }
 0xdf4   :  { %6101 = vtanh.f32 %v5174_v62  ;;  %v5177_v41 = vadd.f32 %v5156_v55, %v12631_v33  ;;  %v5158_v14 = vpop.f32.mrb[94].mxu1  ;;  %v5118_v22 = vpop.f32.mrb[95].mxu0 }
 0xdf5   :  { %v5159_v9 = vpop.f32.mrb[95].mxu1  ;;  %6103 = vtanh.f32 %v5175_v42  ;;  %v5292_v36 = vpop.xlane.xlu1 %5291 }
 0xdf6   :  { %6105 = vtanh.f32 %v5176_v26 }
 0xdf7   :  { %6107 = vtanh.f32 %v5177_v41 }
 0xdfe   :  { %v6102_v19 = vpop.eup %6101 }
 0xdff   :  { %v5200_v11 = vmul.f32 %v6102_v19, %v5188_v37  ;;  %v6104_v7 = vpop.eup %6103 }
 0xe00   :  { %v5201_v18 = vmul.f32 %v6104_v7, %v5189_v1  ;;  %v6106_v4 = vpop.eup %6105 }
 0xe01   :  { %v5202_v27 = vadd.f32 %v5200_v11, %v5198_v58  ;;  %v6108_v13 = vpop.eup %6107  ;;  %v5194_v63 = vmul.f32 0.5, %v6106_v4 }
 0xe02   :  { %v5203_v32 = vadd.f32 %v5201_v18, %v5199_v50  ;;  %v5195_v25 = vmul.f32 0.5, %v6108_v13 }
 0xe03   :  { %6109 = vtanh.f32 %v5202_v27  ;;  %v5196_v45 = vadd.f32 0.5, %v5194_v63 }
 0xe04   :  { %6111 = vtanh.f32 %v5203_v32  ;;  %v5197_v15 = vadd.f32 0.5, %v5195_v25 }
 0xe0d   :  { %v6110_v48 = vpop.eup %6109 }
 0xe0e   :  { %v5206_v49 = vmul.f32 %v6110_v48, %v5196_v45  ;;  %v6112_v59 = vpop.eup %6111 }
 0xe0f   :  { %v5207_v28 = vmul.f32 %v6112_v59, %v5197_v15 }
 0xe10   :  { %v5245_v12 = vmax.f32 %v5206_v49, 0.0 }
 0xe11   :  { %v5246_v2 = vmax.f32 %v5207_v28, 0.0 }
 0xe12   :  { %v5273_v21 = vmul.f32 %v8184_v56, %v5245_v12  ;;  %v12633_v56 = vld [vmem:[#allocation187_spill] sm:$0xff] }
 0xe13   :  { %v5274_v10 = vmul.f32 %v8188_v24, %v5246_v2  ;;  %v5311_v35 = vsub.s32 %v5308_v0, %v12633_v56  ;;  %v5289_v24 = vpop.xlane.xlu0 %5288 }
 0xe15   :  { %v5296_v29 = vadd.f32 %v5274_v10, %v5273_v21  ;;  %v5316_v20 = vrot.slane %v5280_v60, %v5311_v35  ;;  %v5320_v5 = vrot.slane %v5283_v57, %v5311_v35  ;;  %v5312_v62 = vrot.slane %v5277_v39, %v5311_v35 }
 0xe16   :  { %v5324_v47 = vrot.slane %v5286_v3, %v5311_v35  ;;  %v5328_v44 = vrot.slane %v5289_v24, %v5311_v35  ;;  %v5332_v16 = vrot.slane %v5292_v36, %v5311_v35 }
 0xe17   :  { %5297 = vadd.xlane.f32.xlu1 %v5296_v29  ;;  %v5295_v46 = vpop.xlane.xlu0 %5294  ;;  %v5342_v26 = vsel %vm5341_vm1, %v5316_v20, %v5312_v62 }
 0xe18   :  { %v5344_v42 = vsel %vm5343_vm2, %v5320_v5, %v5342_v26  ;;  %v5336_v55 = vrot.slane %v5295_v46, %v5311_v35 }
 0xe19   :  { %v5346_v17 = vsel %vm5345_vm3, %v5324_v47, %v5344_v42 }
 0xe1a   :  { %v5348_v34 = vsel %vm5347_vm4, %v5328_v44, %v5346_v17 }
 0xe1b   :  { %v5350_v14 = vsel %vm5349_vm5, %v5332_v16, %v5348_v34 }
 0xe1c   :  { %v5352_v22 = vsel %vm5351_vm6, %v5336_v55, %v5350_v14 }
 0xe3b   :  { %v5396_v9 = vpop.permute.xlu0 %5395 }
 0xea4   :  { %v5298_v33 = vpop.xlane.xlu1 %5297 }
 0xea5   :  { %v5340_v41 = vrot.slane %v5298_v33, %v5311_v35 }
 0xea7   :  { %v5354_v40 = vsel %vm5353_vm7, %v5340_v41, %v5352_v22 }
 0xea8   :  { %5356 = vxpose.xlu1.b32.start.end [1/1] (short) (narrow) %v5354_v40, 8 }
 0xf28   :  { %v5372_v52 = vpop.trf.xlu1 }
 0xf29   :  { %v5398_v43 = vadd.f32 %v5396_v9, %v5372_v52 }
 0xf2b   :  { %5399 = vst.msk [vmem:[%s10193_s6] sm:$0xff] %vm91_vm0, %v5398_v43 }

</bundles_post_ra>
